<compile_context>
chip_gen: v5e
topology: v5e:2x2
jax: 0.10.0
libtpu: 0.0.40
codegen_flags: <defaults>
</compile_context>

<pallas_src>
import jax
import jax.numpy as jnp
import numpy as np
from jax.experimental import pallas as pl
from jax.experimental.pallas import tpu as pltpu

BN_EPS = 1e-5


# ---------------------------------------------------------------------------
# Fused kernel (per batch element)
# ---------------------------------------------------------------------------
def _make_fused_kernel(H, W, stride, Ho, Wo, has_proj):
    s = stride
    strided = s > 1
    Wp = W + 2                  # padded image width
    HWp = H * Wp                # rows of the flattened working domain
    P = (H + 3) * Wp            # flat padded-image buffer rows (incl. slack)
    OFF = Wp + 1                # flat offset of padded pixel (1, 1)

    def kernel(x_ref, s1_ref, b1_ref, w1_ref, alpha_ref,
               w2_ref, s2_ref, b2_ref, fc1_ref, fc2_ref, *rest):
        i = 0
        if strided:
            xsc_ref = rest[i]; i += 1
        if has_proj:
            wsc_ref, ssc_ref, bsc_ref = rest[i:i + 3]; i += 3
        out_ref = rest[i]; i += 1
        pad1_ref, pad2_ref = rest[i], rest[i + 1]; i += 2
        if strided:
            r2s_ref, r2sub_ref = rest[i], rest[i + 1]

        Cin = x_ref.shape[-1]
        cdt = pad1_ref.dtype                      # bf16 MXU / scratch dtype

        # Flat row m of the working domain is pixel (m // Wp, m % Wp);
        # columns >= W are padding garbage and are masked where it matters.
        col_ok = (jax.lax.broadcasted_iota(jnp.int32, (HWp, 1), 0) % Wp) < W

        # ---- BN1 (eval-mode, folded) -> zero-padded flattened image -------
        xa = x_ref[0]                                       # (HWp, Cin) f32
        bn1 = jnp.where(col_ok, xa * s1_ref[...] + b1_ref[...], 0.0)

        def fill_pad(pad_ref, interior, C):
            # Interior store covers padded rows 1..H; the two small uncovered
            # halo chunks are re-zeroed every step so the kernel stays correct
            # when the "parallel" batch axis is sharded across TensorCores.
            pad_ref[0:OFF, :] = jnp.zeros((OFF, C), cdt)
            pad_ref[OFF + HWp:P, :] = jnp.zeros((P - OFF - HWp, C), cdt)
            pad_ref[OFF:OFF + HWp, :] = interior

        fill_pad(pad1_ref, bn1.astype(cdt), Cin)

        # ---- 3x3 conv as 9 CONTIGUOUS shifted windows (no per-tap copies,
        # no per-tap casts, accumulator initialized with the k=0 dot). ------
        # TODO(synk): for Cin < 128 build an im2col LHS (K=9*Cin) to fill the
        # 256-wide MXU K dim on v6e/v7x.
        def conv3x3(pad_ref, w_ref):
            acc = None
            for k in range(9):
                dy, dx = divmod(k, 3)
                o = dy * Wp + dx
                tap = pad_ref[o:o + HWp, :]                 # contiguous bf16
                d = jnp.dot(tap, w_ref[k], preferred_element_type=jnp.float32)
                acc = d if acc is None else acc + d
            return acc                                      # (HWp, depth) f32

        acc1 = conv3x3(pad1_ref, w1_ref)

        # ---- PReLU ----------------------------------------------------------
        r1 = jnp.where(acc1 > 0, acc1, acc1 * alpha_ref[...])

        # ---- conv2 (computed at stride 1 with contiguous taps) --------------
        fill_pad(pad2_ref, jnp.where(col_ok, r1, 0.0).astype(cdt), r1.shape[-1])
        acc2 = conv3x3(pad2_ref, w2_ref)

        # ---- stride-s subsampling (downsampling blocks only) ----------------
        if strided:
            # TODO(synk): parity-deinterleave pad2 to avoid the s^2 extra MXU
            # flops of computing conv2 at stride 1 before subsampling.
            r2s_ref[...] = acc2
            for io in range(Ho):
                r2sub_ref[io * Wo:(io + 1) * Wo, :] = (
                    r2s_ref[pl.ds(io * s * Wp, Wo, stride=s), :])
            y = r2sub_ref[...]                              # (Ho*Wo, depth)
            valid = None
            inv_n = 1.0 / float(Ho * Wo)
        else:
            y = acc2                                        # (HWp, depth)
            valid = col_ok
            inv_n = 1.0 / float(H * W)

        # ---- BN2 (folded) ----------------------------------------------------
        r2 = y * s2_ref[...] + b2_ref[...]

        # ---- SE: avgpool -> fc1 -> ReLU -> fc2 -> sigmoid -> scale -----------
        r2m = r2 if valid is None else jnp.where(valid, r2, 0.0)
        pooled = jnp.sum(r2m, axis=0, keepdims=True) * inv_n     # (1, depth)
        h = jnp.maximum(
            jnp.dot(pooled.astype(cdt), fc1_ref[...],
                    preferred_element_type=jnp.float32), 0.0)
        z = jnp.dot(h.astype(cdt), fc2_ref[...],
                    preferred_element_type=jnp.float32)
        gate = 1.0 / (1.0 + jnp.exp(-z))                    # exact sigmoid
        res = r2 * gate

        # ---- shortcut ---------------------------------------------------------
        xs = xsc_ref[0] if strided else xa                  # (rows, Cin) f32
        if has_proj:
            sc = (jnp.dot(xs.astype(cdt), wsc_ref[...],
                          preferred_element_type=jnp.float32)
                  * ssc_ref[...] + bsc_ref[...])
        else:
            sc = xs        # in_channel == depth: MaxPool2d(1, s) == identity

        out_ref[0] = (res + sc).astype(out_ref.dtype)

    return kernel


# ---------------------------------------------------------------------------
# Wrapper
# ---------------------------------------------------------------------------
def bottleneck_ir_se_forward(x_nchw, p, stride):
    # TODO(synk): keep activations NHWC (and bf16, esp. on v5e) across stacked
    # blocks and transpose only at model entry/exit.
    x = jnp.transpose(x_nchw, (0, 2, 3, 1)).astype(jnp.float32)   # NHWC
    N, H, W, Cin = x.shape
    depth = p["w1"].shape[-1]
    cmid = p["fc1"].shape[-1]
    s = stride
    Ho = (H - 1) // s + 1
    Wo = (W - 1) // s + 1
    Wp = W + 2
    HWp = H * Wp
    P = (H + 3) * Wp
    strided = s > 1
    has_proj = "wsc" in p

    # Width-pad with 2 zero columns and flatten (H, W+2) -> H*(W+2) so every
    # 3x3 tap is a contiguous window inside the kernel.
    x_flat = jnp.pad(x, ((0, 0), (0, 0), (0, 2), (0, 0))).reshape(N, HWp, Cin)

    in_specs = [
        pl.BlockSpec((1, HWp, Cin), lambda b: (b, 0, 0)),         # x (flat)
        pl.BlockSpec((1, Cin), lambda b: (0, 0)),                 # bn1 scale
        pl.BlockSpec((1, Cin), lambda b: (0, 0)),                 # bn1 bias
        pl.BlockSpec((9, Cin, depth), lambda b: (0, 0, 0)),       # w1 (bf16)
        pl.BlockSpec((1, depth), lambda b: (0, 0)),               # PReLU alpha
        pl.BlockSpec((9, depth, depth), lambda b: (0, 0, 0)),     # w2 (bf16)
        pl.BlockSpec((1, depth), lambda b: (0, 0)),               # bn2 scale
        pl.BlockSpec((1, depth), lambda b: (0, 0)),               # bn2 bias
        pl.BlockSpec((depth, cmid), lambda b: (0, 0)),            # SE fc1
        pl.BlockSpec((cmid, depth), lambda b: (0, 0)),            # SE fc2
    ]
    args = [x_flat, p["bn1_scale"], p["bn1_bias"], p["w1"], p["alpha"],
            p["w2"], p["bn2_scale"], p["bn2_bias"], p["fc1"], p["fc2"]]

    if strided:
        # Shortcut input pre-subsampled in the wrapper (removes the mixed
        # int + strided-ds ref read that broke the previous version).
        x_sc = x[:, ::s, ::s, :].reshape(N, Ho * Wo, Cin)
        in_specs.append(pl.BlockSpec((1, Ho * Wo, Cin), lambda b: (b, 0, 0)))
        args.append(x_sc)
    if has_proj:
        in_specs += [
            pl.BlockSpec((Cin, depth), lambda b: (0, 0)),         # wsc (bf16)
            pl.BlockSpec((1, depth), lambda b: (0, 0)),           # bnsc scale
            pl.BlockSpec((1, depth), lambda b: (0, 0)),           # bnsc bias
        ]
        args += [p["wsc"], p["bnsc_scale"], p["bnsc_bias"]]

    out_rows = Ho * Wo if strided else HWp

    scratch = [
        pltpu.VMEM((P, Cin), jnp.bfloat16),        # zero-padded BN(x), flat
        pltpu.VMEM((P, depth), jnp.bfloat16),      # zero-padded r1, flat
    ]
    if strided:
        scratch += [
            pltpu.VMEM((HWp, depth), jnp.float32),      # full-res conv2 out
            pltpu.VMEM((Ho * Wo, depth), jnp.float32),  # strided subsample
        ]

    kernel = _make_fused_kernel(H, W, s, Ho, Wo, has_proj)

    # TODO(synk): at production sizes (112x112 / 56x56 stages) add a row-tile
    # grid axis with a 1-row halo, set vmem_limit_bytes per generation, mark
    # grid-invariant weight specs with pipeline_mode=pl.Buffered(1), and fold
    # a small batch tile into the block for the 14x14/7x7 stages.
    out = pl.pallas_call(
        kernel,
        out_shape=jax.ShapeDtypeStruct((N, out_rows, depth), jnp.float32),
        grid_spec=pltpu.PrefetchScalarGridSpec(
            num_scalar_prefetch=0,
            grid=(N,),                                    # independent batch
            in_specs=in_specs,
            out_specs=pl.BlockSpec((1, out_rows, depth), lambda b: (b, 0, 0)),
            scratch_shapes=scratch,
        ),
        compiler_params=pltpu.CompilerParams(
            dimension_semantics=("parallel",)),
    )(*args)

    if strided:
        out_nhwc = out.reshape(N, Ho, Wo, depth)
    else:
        out_nhwc = out.reshape(N, H, Wp, depth)[:, :, :W, :]
    return jnp.transpose(out_nhwc, (0, 3, 1, 2))                  # NCHW


# ---------------------------------------------------------------------------
# Deterministic synthetic parameters (PyTorch shapes -> kernel-ready layouts)
# ---------------------------------------------------------------------------
def make_params(key, in_channel, depth, reduction=16):
    cmid = depth // reduction
    ks = jax.random.split(key, 9)

    def nrm(k, shape, scale=0.1):
        return scale * jax.random.normal(k, shape, jnp.float32)

    w1_pt = nrm(ks[0], (depth, in_channel, 3, 3))                 # Conv2d OIHW
    w2_pt = nrm(ks[1], (depth, depth, 3, 3))
    alpha = 0.25 + nrm(ks[2], (depth,))                           # PReLU
    fc1_pt = nrm(ks[3], (cmid, depth), 0.2)                       # SE fc1
    fc2_pt = nrm(ks[4], (depth, cmid), 0.2)                       # SE fc2
    wsc_pt = nrm(ks[5], (depth, in_channel))                      # shortcut 1x1

    def bn(k, c):
        k1, k2, k3, k4 = jax.random.split(k, 4)
        gamma = 1.0 + nrm(k1, (c,))
        beta = nrm(k2, (c,))
        mean = nrm(k3, (c,))
        var = jax.random.uniform(k4, (c,), jnp.float32, 0.5, 1.5)
        return gamma, beta, mean, var

    bn1, bn2, bnsc = bn(ks[6], in_channel), bn(ks[7], depth), bn(ks[8], depth)

    def fold(gamma, beta, mean, var):
        scale = gamma * jax.lax.rsqrt(var + BN_EPS)
        return scale, beta - mean * scale

    s1, b1 = fold(*bn1)
    s2, b2 = fold(*bn2)

    bf16 = jnp.bfloat16
    p = dict(
        bn1_scale=s1.reshape(1, in_channel),
        bn1_bias=b1.reshape(1, in_channel),
        w1=jnp.transpose(w1_pt, (2, 3, 1, 0)).reshape(9, in_channel, depth).astype(bf16),
        alpha=alpha.reshape(1, depth),
        w2=jnp.transpose(w2_pt, (2, 3, 1, 0)).reshape(9, depth, depth).astype(bf16),
        bn2_scale=s2.reshape(1, depth),
        bn2_bias=b2.reshape(1, depth),
        fc1=fc1_pt.T.astype(bf16),
        fc2=fc2_pt.T.astype(bf16),
    )
    if in_channel != depth:                 # projection shortcut params only
        ssc, bsc = fold(*bnsc)
        p.update(wsc=wsc_pt.T.astype(bf16),
                 bnsc_scale=ssc.reshape(1, depth),
                 bnsc_bias=bsc.reshape(1, depth))

    pt = dict(w1=w1_pt, w2=w2_pt, alpha=alpha, fc1=fc1_pt, fc2=fc2_pt,
              wsc=wsc_pt, bn1=bn1, bn2=bn2, bnsc=bnsc)
    return p, pt


# ---------------------------------------------------------------------------
# Pure-JAX reference (mirrors the PyTorch forward, eval-mode BN, f32)
# ---------------------------------------------------------------------------
def reference_forward(x, pt, in_channel, depth, stride):
    def bn_apply(y, bnp):
        g, b, m, v = bnp
        inv = jax.lax.rsqrt(v + BN_EPS)
        return ((y - m[None, :, None, None]) * (g * inv)[None, :, None, None]
                + b[None, :, None, None])

    def conv(y, w, s, pad):
        return jax.lax.conv_general_dilated(
            y, w, (s, s), ((pad, pad), (pad, pad)),
            dimension_numbers=("NCHW", "OIHW", "NCHW"))

    r = bn_apply(x, pt["bn1"])
    r = conv(r, pt["w1"], 1, 1)
    a = pt["alpha"][None, :, None, None]
    r = jnp.where(r > 0, r, a * r)                               # PReLU
    r = conv(r, pt["w2"], stride, 1)
    r = bn_apply(r, pt["bn2"])
    pooled = jnp.mean(r, axis=(2, 3), keepdims=True)             # SE
    h = jnp.maximum(conv(pooled, pt["fc1"][:, :, None, None], 1, 0), 0.0)
    g = jax.nn.sigmoid(conv(h, pt["fc2"][:, :, None, None], 1, 0))
    r = r * g
    if in_channel == depth:
        sc = x[:, :, ::stride, ::stride]
    else:
        sc = bn_apply(conv(x, pt["wsc"][:, :, None, None], stride, 0), pt["bnsc"])
    return r + sc


if __name__ == "__main__":
    def run_case(in_channel, depth, stride, N=2, H=16, W=16):
        key = jax.random.PRNGKey(0)
        kx, kp = jax.random.split(key)
        x = jax.random.normal(kx, (N, in_channel, H, W), jnp.float32)
        params, pt_params = make_params(kp, in_channel, depth)
        out = jax.block_until_ready(bottleneck_ir_se_forward(x, params, stride))
        ref = reference_forward(x, pt_params, in_channel, depth, stride)
        # bf16 MXU operands / bf16 padded scratch (f32 accumulation) ->
        # loosened tolerance; this is intentional.
        np.testing.assert_allclose(np.asarray(out), np.asarray(ref),
                                   rtol=3e-2, atol=5e-2)

    run_case(16, 32, 2)   # projection shortcut (1x1 conv + BN), strided conv
    run_case(32, 32, 1)   # identity shortcut (MaxPool2d(1,1)), stride 1
    print("KERNEL_OK")
</pallas_src>

<mosaic_0001>
module attributes {stable_mosaic.version = 11 : i64} {
  func.func @kernel(%arg0: i32, %arg1: memref<1x288x16xf32, #tpu.memory_space<vmem>>, %arg2: memref<1x16xf32, #tpu.memory_space<vmem>>, %arg3: memref<1x16xf32, #tpu.memory_space<vmem>>, %arg4: memref<9x16x32xbf16, #tpu.memory_space<vmem>>, %arg5: memref<1x32xf32, #tpu.memory_space<vmem>>, %arg6: memref<9x32x32xbf16, #tpu.memory_space<vmem>>, %arg7: memref<1x32xf32, #tpu.memory_space<vmem>>, %arg8: memref<1x32xf32, #tpu.memory_space<vmem>>, %arg9: memref<32x2xbf16, #tpu.memory_space<vmem>>, %arg10: memref<2x32xbf16, #tpu.memory_space<vmem>>, %arg11: memref<1x64x16xf32, #tpu.memory_space<vmem>>, %arg12: memref<16x32xbf16, #tpu.memory_space<vmem>>, %arg13: memref<1x32xf32, #tpu.memory_space<vmem>>, %arg14: memref<1x32xf32, #tpu.memory_space<vmem>>, %arg15: memref<1x64x32xf32, #tpu.memory_space<vmem>>, %arg16: memref<342x16xbf16, #tpu.memory_space<vmem>>, %arg17: memref<342x32xbf16, #tpu.memory_space<vmem>>, %arg18: memref<288x32xf32, #tpu.memory_space<vmem>>, %arg19: memref<64x32xf32, #tpu.memory_space<vmem>>) attributes {dimension_semantics = [#tpu.dimension_semantics<parallel>], iteration_bounds = array<i64: 2>, scalar_prefetch = 0 : i64, scratch_operands = 4 : i64, tpu.core_type = #tpu.core_type<tc>, window_params = [{transform_indices = @transform_0, window_bounds = array<i64: 1, 288, 16>}, {pipeline_mode = #tpu.pipeline_mode<synchronous>, transform_indices = @transform_1, window_bounds = array<i64: 1, 16>}, {pipeline_mode = #tpu.pipeline_mode<synchronous>, transform_indices = @transform_2, window_bounds = array<i64: 1, 16>}, {pipeline_mode = #tpu.pipeline_mode<synchronous>, transform_indices = @transform_3, window_bounds = array<i64: 9, 16, 32>}, {pipeline_mode = #tpu.pipeline_mode<synchronous>, transform_indices = @transform_4, window_bounds = array<i64: 1, 32>}, {pipeline_mode = #tpu.pipeline_mode<synchronous>, transform_indices = @transform_5, window_bounds = array<i64: 9, 32, 32>}, {pipeline_mode = #tpu.pipeline_mode<synchronous>, transform_indices = @transform_6, window_bounds = array<i64: 1, 32>}, {pipeline_mode = #tpu.pipeline_mode<synchronous>, transform_indices = @transform_7, window_bounds = array<i64: 1, 32>}, {pipeline_mode = #tpu.pipeline_mode<synchronous>, transform_indices = @transform_8, window_bounds = array<i64: 32, 2>}, {pipeline_mode = #tpu.pipeline_mode<synchronous>, transform_indices = @transform_9, window_bounds = array<i64: 2, 32>}, {transform_indices = @transform_10, window_bounds = array<i64: 1, 64, 16>}, {pipeline_mode = #tpu.pipeline_mode<synchronous>, transform_indices = @transform_11, window_bounds = array<i64: 16, 32>}, {pipeline_mode = #tpu.pipeline_mode<synchronous>, transform_indices = @transform_12, window_bounds = array<i64: 1, 32>}, {pipeline_mode = #tpu.pipeline_mode<synchronous>, transform_indices = @transform_13, window_bounds = array<i64: 1, 32>}, {transform_indices = @transform_14, window_bounds = array<i64: 1, 64, 32>}]} {
    %0 = tpu.iota {dimensions = array<i32: 0>} : vector<288x1xi32>
    %c18_i32 = arith.constant 18 : i32
    %c0_i32 = arith.constant 0 : i32
    %1 = arith.cmpi eq, %c18_i32, %c0_i32 : i32
    %c1_i32 = arith.constant 1 : i32
    %2 = arith.select %1, %c1_i32, %c18_i32 : i32
    %3 = vector.broadcast %2 : i32 to vector<288x1xi32>
    %4 = arith.remsi %0, %3 : vector<288x1xi32>
    %c0_i32_0 = arith.constant 0 : i32
    %5 = vector.broadcast %c0_i32_0 : i32 to vector<288x1xi32>
    %6 = arith.cmpi ne, %4, %5 : vector<288x1xi32>
    %c0_i32_1 = arith.constant 0 : i32
    %7 = vector.broadcast %c0_i32_1 : i32 to vector<288x1xi32>
    %8 = arith.cmpi slt, %4, %7 : vector<288x1xi32>
    %c0_i32_2 = arith.constant 0 : i32
    %9 = arith.cmpi slt, %2, %c0_i32_2 : i32
    %10 = vector.broadcast %9 : i1 to vector<288x1xi1>
    %11 = vector.broadcast %10 : vector<288x1xi1> to vector<288x1xi1>
    %12 = arith.xori %8, %11 : vector<288x1xi1>
    %13 = arith.andi %12, %6 : vector<288x1xi1>
    %14 = vector.broadcast %2 : i32 to vector<288x1xi32>
    %15 = arith.addi %4, %14 : vector<288x1xi32>
    %16 = arith.select %13, %15, %4 : vector<288x1xi1>, vector<288x1xi32>
    %c16_i32 = arith.constant 16 : i32
    %17 = vector.broadcast %c16_i32 : i32 to vector<288x1xi32>
    %18 = arith.cmpi slt, %16, %17 : vector<288x1xi32>
    %c0 = arith.constant 0 : index
    %c0_3 = arith.constant 0 : index
    %c0_4 = arith.constant 0 : index
    %19 = vector.load %arg1[%c0, %c0_3, %c0_4] : memref<1x288x16xf32, #tpu.memory_space<vmem>>, vector<1x288x16xf32>
    %20 = vector.shape_cast %19 : vector<1x288x16xf32> to vector<288x16xf32>
    %c0_5 = arith.constant 0 : index
    %c0_6 = arith.constant 0 : index
    %21 = vector.load %arg2[%c0_5, %c0_6] : memref<1x16xf32, #tpu.memory_space<vmem>>, vector<1x16xf32>
    %22 = vector.broadcast %21 : vector<1x16xf32> to vector<288x16xf32>
    %23 = arith.mulf %20, %22 : vector<288x16xf32>
    %c0_7 = arith.constant 0 : index
    %c0_8 = arith.constant 0 : index
    %24 = vector.load %arg3[%c0_7, %c0_8] : memref<1x16xf32, #tpu.memory_space<vmem>>, vector<1x16xf32>
    %25 = vector.broadcast %24 : vector<1x16xf32> to vector<288x16xf32>
    %26 = arith.addf %23, %25 : vector<288x16xf32>
    %cst = arith.constant 0.000000e+00 : f32
    %27 = vector.shape_cast %18 : vector<288x1xi1> to vector<288x1xi1>
    %28 = vector.broadcast %27 : vector<288x1xi1> to vector<288x16xi1>
    %29 = vector.broadcast %cst : f32 to vector<288x16xf32>
    %30 = arith.select %28, %26, %29 : vector<288x16xi1>, vector<288x16xf32>
    %31 = arith.truncf %30 : vector<288x16xf32> to vector<288x16xbf16>
    %cst_9 = arith.constant 0.000000e+00 : bf16
    %32 = vector.broadcast %cst_9 : bf16 to vector<19x16xbf16>
    %c0_10 = arith.constant 0 : index
    %c0_11 = arith.constant 0 : index
    %33 = vector.load %arg16[%c0_10, %c0_11] : memref<342x16xbf16, #tpu.memory_space<vmem>>, vector<19x16xbf16>
    tpu.vector_store %arg16[%c0_10, %c0_11], %32 {strides = array<i32>} : memref<342x16xbf16, #tpu.memory_space<vmem>>, vector<19x16xbf16>,
    %cst_12 = arith.constant 0.000000e+00 : bf16
    %34 = vector.broadcast %cst_12 : bf16 to vector<35x16xbf16>
    %c307 = arith.constant 307 : index
    %c0_13 = arith.constant 0 : index
    %35 = vector.load %arg16[%c307, %c0_13] : memref<342x16xbf16, #tpu.memory_space<vmem>>, vector<35x16xbf16>
    tpu.vector_store %arg16[%c307, %c0_13], %34 {strides = array<i32>} : memref<342x16xbf16, #tpu.memory_space<vmem>>, vector<35x16xbf16>,
    %c19 = arith.constant 19 : index
    %c0_14 = arith.constant 0 : index
    %36 = vector.load %arg16[%c19, %c0_14] : memref<342x16xbf16, #tpu.memory_space<vmem>>, vector<288x16xbf16>
    tpu.vector_store %arg16[%c19, %c0_14], %31 {strides = array<i32>} : memref<342x16xbf16, #tpu.memory_space<vmem>>, vector<288x16xbf16>,
    %c0_15 = arith.constant 0 : index
    %c0_16 = arith.constant 0 : index
    %37 = vector.load %arg16[%c0_15, %c0_16] : memref<342x16xbf16, #tpu.memory_space<vmem>>, vector<288x16xbf16>
    %c0_17 = arith.constant 0 : index
    %c0_18 = arith.constant 0 : index
    %c0_19 = arith.constant 0 : index
    %38 = vector.load %arg4[%c0_17, %c0_18, %c0_19] : memref<9x16x32xbf16, #tpu.memory_space<vmem>>, vector<1x16x32xbf16>
    %39 = vector.shape_cast %38 : vector<1x16x32xbf16> to vector<16x32xbf16>
    %cst_20 = arith.constant dense<0.000000e+00> : vector<288x32xf32>
    %40 = tpu.matmul %37, %39, %cst_20 {dimension_numbers = #tpu.dot_dimension_numbers<[1], [0], [0], [1], [0, 0, 1, 1], [], []>} : vector<288x16xbf16>, vector<16x32xbf16>, vector<288x32xf32> -> vector<288x32xf32>
    %c1 = arith.constant 1 : index
    %c0_21 = arith.constant 0 : index
    %41 = vector.load %arg16[%c1, %c0_21] : memref<342x16xbf16, #tpu.memory_space<vmem>>, vector<288x16xbf16>
    %c1_22 = arith.constant 1 : index
    %c0_23 = arith.constant 0 : index
    %c0_24 = arith.constant 0 : index
    %42 = vector.load %arg4[%c1_22, %c0_23, %c0_24] : memref<9x16x32xbf16, #tpu.memory_space<vmem>>, vector<1x16x32xbf16>
    %43 = vector.shape_cast %42 : vector<1x16x32xbf16> to vector<16x32xbf16>
    %cst_25 = arith.constant dense<0.000000e+00> : vector<288x32xf32>
    %44 = tpu.matmul %41, %43, %cst_25 {dimension_numbers = #tpu.dot_dimension_numbers<[1], [0], [0], [1], [0, 0, 1, 1], [], []>} : vector<288x16xbf16>, vector<16x32xbf16>, vector<288x32xf32> -> vector<288x32xf32>
    %45 = arith.addf %40, %44 : vector<288x32xf32>
    %c2 = arith.constant 2 : index
    %c0_26 = arith.constant 0 : index
    %46 = vector.load %arg16[%c2, %c0_26] : memref<342x16xbf16, #tpu.memory_space<vmem>>, vector<288x16xbf16>
    %c2_27 = arith.constant 2 : index
    %c0_28 = arith.constant 0 : index
    %c0_29 = arith.constant 0 : index
    %47 = vector.load %arg4[%c2_27, %c0_28, %c0_29] : memref<9x16x32xbf16, #tpu.memory_space<vmem>>, vector<1x16x32xbf16>
    %48 = vector.shape_cast %47 : vector<1x16x32xbf16> to vector<16x32xbf16>
    %cst_30 = arith.constant dense<0.000000e+00> : vector<288x32xf32>
    %49 = tpu.matmul %46, %48, %cst_30 {dimension_numbers = #tpu.dot_dimension_numbers<[1], [0], [0], [1], [0, 0, 1, 1], [], []>} : vector<288x16xbf16>, vector<16x32xbf16>, vector<288x32xf32> -> vector<288x32xf32>
    %50 = arith.addf %45, %49 : vector<288x32xf32>
    %c18 = arith.constant 18 : index
    %c0_31 = arith.constant 0 : index
    %51 = vector.load %arg16[%c18, %c0_31] : memref<342x16xbf16, #tpu.memory_space<vmem>>, vector<288x16xbf16>
    %c3 = arith.constant 3 : index
    %c0_32 = arith.constant 0 : index
    %c0_33 = arith.constant 0 : index
    %52 = vector.load %arg4[%c3, %c0_32, %c0_33] : memref<9x16x32xbf16, #tpu.memory_space<vmem>>, vector<1x16x32xbf16>
    %53 = vector.shape_cast %52 : vector<1x16x32xbf16> to vector<16x32xbf16>
    %cst_34 = arith.constant dense<0.000000e+00> : vector<288x32xf32>
    %54 = tpu.matmul %51, %53, %cst_34 {dimension_numbers = #tpu.dot_dimension_numbers<[1], [0], [0], [1], [0, 0, 1, 1], [], []>} : vector<288x16xbf16>, vector<16x32xbf16>, vector<288x32xf32> -> vector<288x32xf32>
    %55 = arith.addf %50, %54 : vector<288x32xf32>
    %c19_35 = arith.constant 19 : index
    %c0_36 = arith.constant 0 : index
    %56 = vector.load %arg16[%c19_35, %c0_36] : memref<342x16xbf16, #tpu.memory_space<vmem>>, vector<288x16xbf16>
    %c4 = arith.constant 4 : index
    %c0_37 = arith.constant 0 : index
    %c0_38 = arith.constant 0 : index
    %57 = vector.load %arg4[%c4, %c0_37, %c0_38] : memref<9x16x32xbf16, #tpu.memory_space<vmem>>, vector<1x16x32xbf16>
    %58 = vector.shape_cast %57 : vector<1x16x32xbf16> to vector<16x32xbf16>
    %cst_39 = arith.constant dense<0.000000e+00> : vector<288x32xf32>
    %59 = tpu.matmul %56, %58, %cst_39 {dimension_numbers = #tpu.dot_dimension_numbers<[1], [0], [0], [1], [0, 0, 1, 1], [], []>} : vector<288x16xbf16>, vector<16x32xbf16>, vector<288x32xf32> -> vector<288x32xf32>
    %60 = arith.addf %55, %59 : vector<288x32xf32>
    %c20 = arith.constant 20 : index
    %c0_40 = arith.constant 0 : index
    %61 = vector.load %arg16[%c20, %c0_40] : memref<342x16xbf16, #tpu.memory_space<vmem>>, vector<288x16xbf16>
    %c5 = arith.constant 5 : index
    %c0_41 = arith.constant 0 : index
    %c0_42 = arith.constant 0 : index
    %62 = vector.load %arg4[%c5, %c0_41, %c0_42] : memref<9x16x32xbf16, #tpu.memory_space<vmem>>, vector<1x16x32xbf16>
    %63 = vector.shape_cast %62 : vector<1x16x32xbf16> to vector<16x32xbf16>
    %cst_43 = arith.constant dense<0.000000e+00> : vector<288x32xf32>
    %64 = tpu.matmul %61, %63, %cst_43 {dimension_numbers = #tpu.dot_dimension_numbers<[1], [0], [0], [1], [0, 0, 1, 1], [], []>} : vector<288x16xbf16>, vector<16x32xbf16>, vector<288x32xf32> -> vector<288x32xf32>
    %65 = arith.addf %60, %64 : vector<288x32xf32>
    %c36 = arith.constant 36 : index
    %c0_44 = arith.constant 0 : index
    %66 = vector.load %arg16[%c36, %c0_44] : memref<342x16xbf16, #tpu.memory_space<vmem>>, vector<288x16xbf16>
    %c6 = arith.constant 6 : index
    %c0_45 = arith.constant 0 : index
    %c0_46 = arith.constant 0 : index
    %67 = vector.load %arg4[%c6, %c0_45, %c0_46] : memref<9x16x32xbf16, #tpu.memory_space<vmem>>, vector<1x16x32xbf16>
    %68 = vector.shape_cast %67 : vector<1x16x32xbf16> to vector<16x32xbf16>
    %cst_47 = arith.constant dense<0.000000e+00> : vector<288x32xf32>
    %69 = tpu.matmul %66, %68, %cst_47 {dimension_numbers = #tpu.dot_dimension_numbers<[1], [0], [0], [1], [0, 0, 1, 1], [], []>} : vector<288x16xbf16>, vector<16x32xbf16>, vector<288x32xf32> -> vector<288x32xf32>
    %70 = arith.addf %65, %69 : vector<288x32xf32>
    %c37 = arith.constant 37 : index
    %c0_48 = arith.constant 0 : index
    %71 = vector.load %arg16[%c37, %c0_48] : memref<342x16xbf16, #tpu.memory_space<vmem>>, vector<288x16xbf16>
    %c7 = arith.constant 7 : index
    %c0_49 = arith.constant 0 : index
    %c0_50 = arith.constant 0 : index
    %72 = vector.load %arg4[%c7, %c0_49, %c0_50] : memref<9x16x32xbf16, #tpu.memory_space<vmem>>, vector<1x16x32xbf16>
    %73 = vector.shape_cast %72 : vector<1x16x32xbf16> to vector<16x32xbf16>
    %cst_51 = arith.constant dense<0.000000e+00> : vector<288x32xf32>
    %74 = tpu.matmul %71, %73, %cst_51 {dimension_numbers = #tpu.dot_dimension_numbers<[1], [0], [0], [1], [0, 0, 1, 1], [], []>} : vector<288x16xbf16>, vector<16x32xbf16>, vector<288x32xf32> -> vector<288x32xf32>
    %75 = arith.addf %70, %74 : vector<288x32xf32>
    %c38 = arith.constant 38 : index
    %c0_52 = arith.constant 0 : index
    %76 = vector.load %arg16[%c38, %c0_52] : memref<342x16xbf16, #tpu.memory_space<vmem>>, vector<288x16xbf16>
    %c8 = arith.constant 8 : index
    %c0_53 = arith.constant 0 : index
    %c0_54 = arith.constant 0 : index
    %77 = vector.load %arg4[%c8, %c0_53, %c0_54] : memref<9x16x32xbf16, #tpu.memory_space<vmem>>, vector<1x16x32xbf16>
    %78 = vector.shape_cast %77 : vector<1x16x32xbf16> to vector<16x32xbf16>
    %cst_55 = arith.constant dense<0.000000e+00> : vector<288x32xf32>
    %79 = tpu.matmul %76, %78, %cst_55 {dimension_numbers = #tpu.dot_dimension_numbers<[1], [0], [0], [1], [0, 0, 1, 1], [], []>} : vector<288x16xbf16>, vector<16x32xbf16>, vector<288x32xf32> -> vector<288x32xf32>
    %80 = arith.addf %75, %79 : vector<288x32xf32>
    %cst_56 = arith.constant 0.000000e+00 : f32
    %81 = vector.broadcast %cst_56 : f32 to vector<288x32xf32>
    %82 = arith.cmpf ogt, %80, %81 : vector<288x32xf32>
    %c0_57 = arith.constant 0 : index
    %c0_58 = arith.constant 0 : index
    %83 = vector.load %arg5[%c0_57, %c0_58] : memref<1x32xf32, #tpu.memory_space<vmem>>, vector<1x32xf32>
    %84 = vector.broadcast %83 : vector<1x32xf32> to vector<288x32xf32>
    %85 = arith.mulf %80, %84 : vector<288x32xf32>
    %86 = arith.select %82, %80, %85 : vector<288x32xi1>, vector<288x32xf32>
    %cst_59 = arith.constant 0.000000e+00 : f32
    %87 = vector.shape_cast %18 : vector<288x1xi1> to vector<288x1xi1>
    %88 = vector.broadcast %87 : vector<288x1xi1> to vector<288x32xi1>
    %89 = vector.broadcast %cst_59 : f32 to vector<288x32xf32>
    %90 = arith.select %88, %86, %89 : vector<288x32xi1>, vector<288x32xf32>
    %91 = arith.truncf %90 : vector<288x32xf32> to vector<288x32xbf16>
    %cst_60 = arith.constant 0.000000e+00 : bf16
    %92 = vector.broadcast %cst_60 : bf16 to vector<19x32xbf16>
    %c0_61 = arith.constant 0 : index
    %c0_62 = arith.constant 0 : index
    %93 = vector.load %arg17[%c0_61, %c0_62] : memref<342x32xbf16, #tpu.memory_space<vmem>>, vector<19x32xbf16>
    tpu.vector_store %arg17[%c0_61, %c0_62], %92 {strides = array<i32>} : memref<342x32xbf16, #tpu.memory_space<vmem>>, vector<19x32xbf16>,
    %cst_63 = arith.constant 0.000000e+00 : bf16
    %94 = vector.broadcast %cst_63 : bf16 to vector<35x32xbf16>
    %c307_64 = arith.constant 307 : index
    %c0_65 = arith.constant 0 : index
    %95 = vector.load %arg17[%c307_64, %c0_65] : memref<342x32xbf16, #tpu.memory_space<vmem>>, vector<35x32xbf16>
    tpu.vector_store %arg17[%c307_64, %c0_65], %94 {strides = array<i32>} : memref<342x32xbf16, #tpu.memory_space<vmem>>, vector<35x32xbf16>,
    %c19_66 = arith.constant 19 : index
    %c0_67 = arith.constant 0 : index
    %96 = vector.load %arg17[%c19_66, %c0_67] : memref<342x32xbf16, #tpu.memory_space<vmem>>, vector<288x32xbf16>
    tpu.vector_store %arg17[%c19_66, %c0_67], %91 {strides = array<i32>} : memref<342x32xbf16, #tpu.memory_space<vmem>>, vector<288x32xbf16>,
    %c0_68 = arith.constant 0 : index
    %c0_69 = arith.constant 0 : index
    %97 = vector.load %arg17[%c0_68, %c0_69] : memref<342x32xbf16, #tpu.memory_space<vmem>>, vector<288x32xbf16>
    %c0_70 = arith.constant 0 : index
    %c0_71 = arith.constant 0 : index
    %c0_72 = arith.constant 0 : index
    %98 = vector.load %arg6[%c0_70, %c0_71, %c0_72] : memref<9x32x32xbf16, #tpu.memory_space<vmem>>, vector<1x32x32xbf16>
    %99 = vector.shape_cast %98 : vector<1x32x32xbf16> to vector<32x32xbf16>
    %cst_73 = arith.constant dense<0.000000e+00> : vector<288x32xf32>
    %100 = tpu.matmul %97, %99, %cst_73 {dimension_numbers = #tpu.dot_dimension_numbers<[1], [0], [0], [1], [0, 0, 1, 1], [], []>} : vector<288x32xbf16>, vector<32x32xbf16>, vector<288x32xf32> -> vector<288x32xf32>
    %c1_74 = arith.constant 1 : index
    %c0_75 = arith.constant 0 : index
    %101 = vector.load %arg17[%c1_74, %c0_75] : memref<342x32xbf16, #tpu.memory_space<vmem>>, vector<288x32xbf16>
    %c1_76 = arith.constant 1 : index
    %c0_77 = arith.constant 0 : index
    %c0_78 = arith.constant 0 : index
    %102 = vector.load %arg6[%c1_76, %c0_77, %c0_78] : memref<9x32x32xbf16, #tpu.memory_space<vmem>>, vector<1x32x32xbf16>
    %103 = vector.shape_cast %102 : vector<1x32x32xbf16> to vector<32x32xbf16>
    %cst_79 = arith.constant dense<0.000000e+00> : vector<288x32xf32>
    %104 = tpu.matmul %101, %103, %cst_79 {dimension_numbers = #tpu.dot_dimension_numbers<[1], [0], [0], [1], [0, 0, 1, 1], [], []>} : vector<288x32xbf16>, vector<32x32xbf16>, vector<288x32xf32> -> vector<288x32xf32>
    %105 = arith.addf %100, %104 : vector<288x32xf32>
    %c2_80 = arith.constant 2 : index
    %c0_81 = arith.constant 0 : index
    %106 = vector.load %arg17[%c2_80, %c0_81] : memref<342x32xbf16, #tpu.memory_space<vmem>>, vector<288x32xbf16>
    %c2_82 = arith.constant 2 : index
    %c0_83 = arith.constant 0 : index
    %c0_84 = arith.constant 0 : index
    %107 = vector.load %arg6[%c2_82, %c0_83, %c0_84] : memref<9x32x32xbf16, #tpu.memory_space<vmem>>, vector<1x32x32xbf16>
    %108 = vector.shape_cast %107 : vector<1x32x32xbf16> to vector<32x32xbf16>
    %cst_85 = arith.constant dense<0.000000e+00> : vector<288x32xf32>
    %109 = tpu.matmul %106, %108, %cst_85 {dimension_numbers = #tpu.dot_dimension_numbers<[1], [0], [0], [1], [0, 0, 1, 1], [], []>} : vector<288x32xbf16>, vector<32x32xbf16>, vector<288x32xf32> -> vector<288x32xf32>
    %110 = arith.addf %105, %109 : vector<288x32xf32>
    %c18_86 = arith.constant 18 : index
    %c0_87 = arith.constant 0 : index
    %111 = vector.load %arg17[%c18_86, %c0_87] : memref<342x32xbf16, #tpu.memory_space<vmem>>, vector<288x32xbf16>
    %c3_88 = arith.constant 3 : index
    %c0_89 = arith.constant 0 : index
    %c0_90 = arith.constant 0 : index
    %112 = vector.load %arg6[%c3_88, %c0_89, %c0_90] : memref<9x32x32xbf16, #tpu.memory_space<vmem>>, vector<1x32x32xbf16>
    %113 = vector.shape_cast %112 : vector<1x32x32xbf16> to vector<32x32xbf16>
    %cst_91 = arith.constant dense<0.000000e+00> : vector<288x32xf32>
    %114 = tpu.matmul %111, %113, %cst_91 {dimension_numbers = #tpu.dot_dimension_numbers<[1], [0], [0], [1], [0, 0, 1, 1], [], []>} : vector<288x32xbf16>, vector<32x32xbf16>, vector<288x32xf32> -> vector<288x32xf32>
    %115 = arith.addf %110, %114 : vector<288x32xf32>
    %c19_92 = arith.constant 19 : index
    %c0_93 = arith.constant 0 : index
    %116 = vector.load %arg17[%c19_92, %c0_93] : memref<342x32xbf16, #tpu.memory_space<vmem>>, vector<288x32xbf16>
    %c4_94 = arith.constant 4 : index
    %c0_95 = arith.constant 0 : index
    %c0_96 = arith.constant 0 : index
    %117 = vector.load %arg6[%c4_94, %c0_95, %c0_96] : memref<9x32x32xbf16, #tpu.memory_space<vmem>>, vector<1x32x32xbf16>
    %118 = vector.shape_cast %117 : vector<1x32x32xbf16> to vector<32x32xbf16>
    %cst_97 = arith.constant dense<0.000000e+00> : vector<288x32xf32>
    %119 = tpu.matmul %116, %118, %cst_97 {dimension_numbers = #tpu.dot_dimension_numbers<[1], [0], [0], [1], [0, 0, 1, 1], [], []>} : vector<288x32xbf16>, vector<32x32xbf16>, vector<288x32xf32> -> vector<288x32xf32>
    %120 = arith.addf %115, %119 : vector<288x32xf32>
    %c20_98 = arith.constant 20 : index
    %c0_99 = arith.constant 0 : index
    %121 = vector.load %arg17[%c20_98, %c0_99] : memref<342x32xbf16, #tpu.memory_space<vmem>>, vector<288x32xbf16>
    %c5_100 = arith.constant 5 : index
    %c0_101 = arith.constant 0 : index
    %c0_102 = arith.constant 0 : index
    %122 = vector.load %arg6[%c5_100, %c0_101, %c0_102] : memref<9x32x32xbf16, #tpu.memory_space<vmem>>, vector<1x32x32xbf16>
    %123 = vector.shape_cast %122 : vector<1x32x32xbf16> to vector<32x32xbf16>
    %cst_103 = arith.constant dense<0.000000e+00> : vector<288x32xf32>
    %124 = tpu.matmul %121, %123, %cst_103 {dimension_numbers = #tpu.dot_dimension_numbers<[1], [0], [0], [1], [0, 0, 1, 1], [], []>} : vector<288x32xbf16>, vector<32x32xbf16>, vector<288x32xf32> -> vector<288x32xf32>
    %125 = arith.addf %120, %124 : vector<288x32xf32>
    %c36_104 = arith.constant 36 : index
    %c0_105 = arith.constant 0 : index
    %126 = vector.load %arg17[%c36_104, %c0_105] : memref<342x32xbf16, #tpu.memory_space<vmem>>, vector<288x32xbf16>
    %c6_106 = arith.constant 6 : index
    %c0_107 = arith.constant 0 : index
    %c0_108 = arith.constant 0 : index
    %127 = vector.load %arg6[%c6_106, %c0_107, %c0_108] : memref<9x32x32xbf16, #tpu.memory_space<vmem>>, vector<1x32x32xbf16>
    %128 = vector.shape_cast %127 : vector<1x32x32xbf16> to vector<32x32xbf16>
    %cst_109 = arith.constant dense<0.000000e+00> : vector<288x32xf32>
    %129 = tpu.matmul %126, %128, %cst_109 {dimension_numbers = #tpu.dot_dimension_numbers<[1], [0], [0], [1], [0, 0, 1, 1], [], []>} : vector<288x32xbf16>, vector<32x32xbf16>, vector<288x32xf32> -> vector<288x32xf32>
    %130 = arith.addf %125, %129 : vector<288x32xf32>
    %c37_110 = arith.constant 37 : index
    %c0_111 = arith.constant 0 : index
    %131 = vector.load %arg17[%c37_110, %c0_111] : memref<342x32xbf16, #tpu.memory_space<vmem>>, vector<288x32xbf16>
    %c7_112 = arith.constant 7 : index
    %c0_113 = arith.constant 0 : index
    %c0_114 = arith.constant 0 : index
    %132 = vector.load %arg6[%c7_112, %c0_113, %c0_114] : memref<9x32x32xbf16, #tpu.memory_space<vmem>>, vector<1x32x32xbf16>
    %133 = vector.shape_cast %132 : vector<1x32x32xbf16> to vector<32x32xbf16>
    %cst_115 = arith.constant dense<0.000000e+00> : vector<288x32xf32>
    %134 = tpu.matmul %131, %133, %cst_115 {dimension_numbers = #tpu.dot_dimension_numbers<[1], [0], [0], [1], [0, 0, 1, 1], [], []>} : vector<288x32xbf16>, vector<32x32xbf16>, vector<288x32xf32> -> vector<288x32xf32>
    %135 = arith.addf %130, %134 : vector<288x32xf32>
    %c38_116 = arith.constant 38 : index
    %c0_117 = arith.constant 0 : index
    %136 = vector.load %arg17[%c38_116, %c0_117] : memref<342x32xbf16, #tpu.memory_space<vmem>>, vector<288x32xbf16>
    %c8_118 = arith.constant 8 : index
    %c0_119 = arith.constant 0 : index
    %c0_120 = arith.constant 0 : index
    %137 = vector.load %arg6[%c8_118, %c0_119, %c0_120] : memref<9x32x32xbf16, #tpu.memory_space<vmem>>, vector<1x32x32xbf16>
    %138 = vector.shape_cast %137 : vector<1x32x32xbf16> to vector<32x32xbf16>
    %cst_121 = arith.constant dense<0.000000e+00> : vector<288x32xf32>
    %139 = tpu.matmul %136, %138, %cst_121 {dimension_numbers = #tpu.dot_dimension_numbers<[1], [0], [0], [1], [0, 0, 1, 1], [], []>} : vector<288x32xbf16>, vector<32x32xbf16>, vector<288x32xf32> -> vector<288x32xf32>
    %140 = arith.addf %135, %139 : vector<288x32xf32>
    %c0_122 = arith.constant 0 : index
    %c0_123 = arith.constant 0 : index
    %141 = vector.load %arg18[%c0_122, %c0_123] : memref<288x32xf32, #tpu.memory_space<vmem>>, vector<288x32xf32>
    tpu.vector_store %arg18[%c0_122, %c0_123], %140 {strides = array<i32>} : memref<288x32xf32, #tpu.memory_space<vmem>>, vector<288x32xf32>,
    %c0_124 = arith.constant 0 : index
    %c0_125 = arith.constant 0 : index
    %142 = tpu.strided_load %arg18[%c0_124, %c0_125] {strides = array<i32: 2, 1>} : memref<288x32xf32, #tpu.memory_space<vmem>>, vector<8x32xf32>
    %c0_126 = arith.constant 0 : index
    %c0_127 = arith.constant 0 : index
    %143 = vector.load %arg19[%c0_126, %c0_127] : memref<64x32xf32, #tpu.memory_space<vmem>>, vector<8x32xf32>
    tpu.vector_store %arg19[%c0_126, %c0_127], %142 {strides = array<i32>} : memref<64x32xf32, #tpu.memory_space<vmem>>, vector<8x32xf32>,
    %c36_128 = arith.constant 36 : index
    %c0_129 = arith.constant 0 : index
    %144 = tpu.strided_load %arg18[%c36_128, %c0_129] {strides = array<i32: 2, 1>} : memref<288x32xf32, #tpu.memory_space<vmem>>, vector<8x32xf32>
    %c8_130 = arith.constant 8 : index
    %c0_131 = arith.constant 0 : index
    %145 = vector.load %arg19[%c8_130, %c0_131] : memref<64x32xf32, #tpu.memory_space<vmem>>, vector<8x32xf32>
    tpu.vector_store %arg19[%c8_130, %c0_131], %144 {strides = array<i32>} : memref<64x32xf32, #tpu.memory_space<vmem>>, vector<8x32xf32>,
    %c72 = arith.constant 72 : index
    %c0_132 = arith.constant 0 : index
    %146 = tpu.strided_load %arg18[%c72, %c0_132] {strides = array<i32: 2, 1>} : memref<288x32xf32, #tpu.memory_space<vmem>>, vector<8x32xf32>
    %c16 = arith.constant 16 : index
    %c0_133 = arith.constant 0 : index
    %147 = vector.load %arg19[%c16, %c0_133] : memref<64x32xf32, #tpu.memory_space<vmem>>, vector<8x32xf32>
    tpu.vector_store %arg19[%c16, %c0_133], %146 {strides = array<i32>} : memref<64x32xf32, #tpu.memory_space<vmem>>, vector<8x32xf32>,
    %c108 = arith.constant 108 : index
    %c0_134 = arith.constant 0 : index
    %148 = tpu.strided_load %arg18[%c108, %c0_134] {strides = array<i32: 2, 1>} : memref<288x32xf32, #tpu.memory_space<vmem>>, vector<8x32xf32>
    %c24 = arith.constant 24 : index
    %c0_135 = arith.constant 0 : index
    %149 = vector.load %arg19[%c24, %c0_135] : memref<64x32xf32, #tpu.memory_space<vmem>>, vector<8x32xf32>
    tpu.vector_store %arg19[%c24, %c0_135], %148 {strides = array<i32>} : memref<64x32xf32, #tpu.memory_space<vmem>>, vector<8x32xf32>,
    %c144 = arith.constant 144 : index
    %c0_136 = arith.constant 0 : index
    %150 = tpu.strided_load %arg18[%c144, %c0_136] {strides = array<i32: 2, 1>} : memref<288x32xf32, #tpu.memory_space<vmem>>, vector<8x32xf32>
    %c32 = arith.constant 32 : index
    %c0_137 = arith.constant 0 : index
    %151 = vector.load %arg19[%c32, %c0_137] : memref<64x32xf32, #tpu.memory_space<vmem>>, vector<8x32xf32>
    tpu.vector_store %arg19[%c32, %c0_137], %150 {strides = array<i32>} : memref<64x32xf32, #tpu.memory_space<vmem>>, vector<8x32xf32>,
    %c180 = arith.constant 180 : index
    %c0_138 = arith.constant 0 : index
    %152 = tpu.strided_load %arg18[%c180, %c0_138] {strides = array<i32: 2, 1>} : memref<288x32xf32, #tpu.memory_space<vmem>>, vector<8x32xf32>
    %c40 = arith.constant 40 : index
    %c0_139 = arith.constant 0 : index
    %153 = vector.load %arg19[%c40, %c0_139] : memref<64x32xf32, #tpu.memory_space<vmem>>, vector<8x32xf32>
    tpu.vector_store %arg19[%c40, %c0_139], %152 {strides = array<i32>} : memref<64x32xf32, #tpu.memory_space<vmem>>, vector<8x32xf32>,
    %c216 = arith.constant 216 : index
    %c0_140 = arith.constant 0 : index
    %154 = tpu.strided_load %arg18[%c216, %c0_140] {strides = array<i32: 2, 1>} : memref<288x32xf32, #tpu.memory_space<vmem>>, vector<8x32xf32>
    %c48 = arith.constant 48 : index
    %c0_141 = arith.constant 0 : index
    %155 = vector.load %arg19[%c48, %c0_141] : memref<64x32xf32, #tpu.memory_space<vmem>>, vector<8x32xf32>
    tpu.vector_store %arg19[%c48, %c0_141], %154 {strides = array<i32>} : memref<64x32xf32, #tpu.memory_space<vmem>>, vector<8x32xf32>,
    %c252 = arith.constant 252 : index
    %c0_142 = arith.constant 0 : index
    %156 = tpu.strided_load %arg18[%c252, %c0_142] {strides = array<i32: 2, 1>} : memref<288x32xf32, #tpu.memory_space<vmem>>, vector<8x32xf32>
    %c56 = arith.constant 56 : index
    %c0_143 = arith.constant 0 : index
    %157 = vector.load %arg19[%c56, %c0_143] : memref<64x32xf32, #tpu.memory_space<vmem>>, vector<8x32xf32>
    tpu.vector_store %arg19[%c56, %c0_143], %156 {strides = array<i32>} : memref<64x32xf32, #tpu.memory_space<vmem>>, vector<8x32xf32>,
    %c0_144 = arith.constant 0 : index
    %c0_145 = arith.constant 0 : index
    %158 = vector.load %arg19[%c0_144, %c0_145] : memref<64x32xf32, #tpu.memory_space<vmem>>, vector<64x32xf32>
    %c0_146 = arith.constant 0 : index
    %c0_147 = arith.constant 0 : index
    %159 = vector.load %arg7[%c0_146, %c0_147] : memref<1x32xf32, #tpu.memory_space<vmem>>, vector<1x32xf32>
    %160 = vector.broadcast %159 : vector<1x32xf32> to vector<64x32xf32>
    %161 = arith.mulf %158, %160 : vector<64x32xf32>
    %c0_148 = arith.constant 0 : index
    %c0_149 = arith.constant 0 : index
    %162 = vector.load %arg8[%c0_148, %c0_149] : memref<1x32xf32, #tpu.memory_space<vmem>>, vector<1x32xf32>
    %163 = vector.broadcast %162 : vector<1x32xf32> to vector<64x32xf32>
    %164 = arith.addf %161, %163 : vector<64x32xf32>
    %cst_150 = arith.constant dense<0.000000e+00> : vector<32xf32>
    %165 = vector.multi_reduction <add>, %164, %cst_150 [0] : vector<64x32xf32> to vector<32xf32>
    %166 = vector.shape_cast %165 : vector<32xf32> to vector<1x32xf32>
    %cst_151 = arith.constant 1.562500e-02 : f32
    %167 = vector.broadcast %cst_151 : f32 to vector<1x32xf32>
    %168 = arith.mulf %166, %167 : vector<1x32xf32>
    %169 = arith.truncf %168 : vector<1x32xf32> to vector<1x32xbf16>
    %c0_152 = arith.constant 0 : index
    %c0_153 = arith.constant 0 : index
    %170 = vector.load %arg9[%c0_152, %c0_153] : memref<32x2xbf16, #tpu.memory_space<vmem>>, vector<32x2xbf16>
    %cst_154 = arith.constant dense<0.000000e+00> : vector<1x2xf32>
    %171 = tpu.matmul %169, %170, %cst_154 {dimension_numbers = #tpu.dot_dimension_numbers<[1], [0], [0], [1], [0, 0, 1, 1], [], []>} : vector<1x32xbf16>, vector<32x2xbf16>, vector<1x2xf32> -> vector<1x2xf32>
    %cst_155 = arith.constant 0.000000e+00 : f32
    %172 = vector.broadcast %cst_155 : f32 to vector<1x2xf32>
    %173 = arith.maximumf %171, %172 : vector<1x2xf32>
    %174 = arith.truncf %173 : vector<1x2xf32> to vector<1x2xbf16>
    %c0_156 = arith.constant 0 : index
    %c0_157 = arith.constant 0 : index
    %175 = vector.load %arg10[%c0_156, %c0_157] : memref<2x32xbf16, #tpu.memory_space<vmem>>, vector<2x32xbf16>
    %cst_158 = arith.constant dense<0.000000e+00> : vector<1x32xf32>
    %176 = tpu.matmul %174, %175, %cst_158 {dimension_numbers = #tpu.dot_dimension_numbers<[1], [0], [0], [1], [0, 0, 1, 1], [], []>} : vector<1x2xbf16>, vector<2x32xbf16>, vector<1x32xf32> -> vector<1x32xf32>
    %cst_159 = arith.constant 0.000000e+00 : f32
    %177 = vector.broadcast %cst_159 : f32 to vector<1x32xf32>
    %178 = arith.subf %177, %176 : vector<1x32xf32>
    %179 = math.exp %178 : vector<1x32xf32>
    %cst_160 = arith.constant 1.000000e+00 : f32
    %180 = vector.broadcast %cst_160 : f32 to vector<1x32xf32>
    %181 = arith.addf %180, %179 : vector<1x32xf32>
    %cst_161 = arith.constant 1.000000e+00 : f32
    %182 = vector.broadcast %cst_161 : f32 to vector<1x32xf32>
    %183 = arith.divf %182, %181 : vector<1x32xf32>
    %184 = vector.broadcast %183 : vector<1x32xf32> to vector<64x32xf32>
    %185 = arith.mulf %164, %184 : vector<64x32xf32>
    %c0_162 = arith.constant 0 : index
    %c0_163 = arith.constant 0 : index
    %c0_164 = arith.constant 0 : index
    %186 = vector.load %arg11[%c0_162, %c0_163, %c0_164] : memref<1x64x16xf32, #tpu.memory_space<vmem>>, vector<1x64x16xf32>
    %187 = vector.shape_cast %186 : vector<1x64x16xf32> to vector<64x16xf32>
    %188 = arith.truncf %187 : vector<64x16xf32> to vector<64x16xbf16>
    %c0_165 = arith.constant 0 : index
    %c0_166 = arith.constant 0 : index
    %189 = vector.load %arg12[%c0_165, %c0_166] : memref<16x32xbf16, #tpu.memory_space<vmem>>, vector<16x32xbf16>
    %cst_167 = arith.constant dense<0.000000e+00> : vector<64x32xf32>
    %190 = tpu.matmul %188, %189, %cst_167 {dimension_numbers = #tpu.dot_dimension_numbers<[1], [0], [0], [1], [0, 0, 1, 1], [], []>} : vector<64x16xbf16>, vector<16x32xbf16>, vector<64x32xf32> -> vector<64x32xf32>
    %c0_168 = arith.constant 0 : index
    %c0_169 = arith.constant 0 : index
    %191 = vector.load %arg13[%c0_168, %c0_169] : memref<1x32xf32, #tpu.memory_space<vmem>>, vector<1x32xf32>
    %192 = vector.broadcast %191 : vector<1x32xf32> to vector<64x32xf32>
    %193 = arith.mulf %190, %192 : vector<64x32xf32>
    %c0_170 = arith.constant 0 : index
    %c0_171 = arith.constant 0 : index
    %194 = vector.load %arg14[%c0_170, %c0_171] : memref<1x32xf32, #tpu.memory_space<vmem>>, vector<1x32xf32>
    %195 = vector.broadcast %194 : vector<1x32xf32> to vector<64x32xf32>
    %196 = arith.addf %193, %195 : vector<64x32xf32>
    %197 = arith.addf %185, %196 : vector<64x32xf32>
    %c0_172 = arith.constant 0 : index
    %c0_173 = arith.constant 0 : index
    %c0_174 = arith.constant 0 : index
    %198 = vector.load %arg15[%c0_172, %c0_173, %c0_174] : memref<1x64x32xf32, #tpu.memory_space<vmem>>, vector<1x64x32xf32>
    %199 = vector.shape_cast %198 : vector<1x64x32xf32> to vector<64x32xf32>
    %200 = vector.shape_cast %197 : vector<64x32xf32> to vector<1x64x32xf32>
    tpu.vector_store %arg15[%c0_172, %c0_173, %c0_174], %200 {strides = array<i32>} : memref<1x64x32xf32, #tpu.memory_space<vmem>>, vector<1x64x32xf32>,
    return
  }
  func.func @transform_0(%arg0: i32) -> (i32, i32, i32) {
    %c0_i32 = arith.constant 0 : i32
    %c0_i32_0 = arith.constant 0 : i32
    %c0_i32_1 = arith.constant 0 : i32
    return %arg0, %c0_i32, %c0_i32_0 : i32, i32, i32
  }
  func.func @transform_1(%arg0: i32) -> (i32, i32) {
    %c0_i32 = arith.constant 0 : i32
    %c0_i32_0 = arith.constant 0 : i32
    %c0_i32_1 = arith.constant 0 : i32
    return %c0_i32, %c0_i32_0 : i32, i32
  }
  func.func @transform_2(%arg0: i32) -> (i32, i32) {
    %c0_i32 = arith.constant 0 : i32
    %c0_i32_0 = arith.constant 0 : i32
    %c0_i32_1 = arith.constant 0 : i32
    return %c0_i32, %c0_i32_0 : i32, i32
  }
  func.func @transform_3(%arg0: i32) -> (i32, i32, i32) {
    %c0_i32 = arith.constant 0 : i32
    %c0_i32_0 = arith.constant 0 : i32
    %c0_i32_1 = arith.constant 0 : i32
    %c0_i32_2 = arith.constant 0 : i32
    return %c0_i32, %c0_i32_0, %c0_i32_1 : i32, i32, i32
  }
  func.func @transform_4(%arg0: i32) -> (i32, i32) {
    %c0_i32 = arith.constant 0 : i32
    %c0_i32_0 = arith.constant 0 : i32
    %c0_i32_1 = arith.constant 0 : i32
    return %c0_i32, %c0_i32_0 : i32, i32
  }
  func.func @transform_5(%arg0: i32) -> (i32, i32, i32) {
    %c0_i32 = arith.constant 0 : i32
    %c0_i32_0 = arith.constant 0 : i32
    %c0_i32_1 = arith.constant 0 : i32
    %c0_i32_2 = arith.constant 0 : i32
    return %c0_i32, %c0_i32_0, %c0_i32_1 : i32, i32, i32
  }
  func.func @transform_6(%arg0: i32) -> (i32, i32) {
    %c0_i32 = arith.constant 0 : i32
    %c0_i32_0 = arith.constant 0 : i32
    %c0_i32_1 = arith.constant 0 : i32
    return %c0_i32, %c0_i32_0 : i32, i32
  }
  func.func @transform_7(%arg0: i32) -> (i32, i32) {
    %c0_i32 = arith.constant 0 : i32
    %c0_i32_0 = arith.constant 0 : i32
    %c0_i32_1 = arith.constant 0 : i32
    return %c0_i32, %c0_i32_0 : i32, i32
  }
  func.func @transform_8(%arg0: i32) -> (i32, i32) {
    %c0_i32 = arith.constant 0 : i32
    %c0_i32_0 = arith.constant 0 : i32
    %c0_i32_1 = arith.constant 0 : i32
    return %c0_i32, %c0_i32_0 : i32, i32
  }
  func.func @transform_9(%arg0: i32) -> (i32, i32) {
    %c0_i32 = arith.constant 0 : i32
    %c0_i32_0 = arith.constant 0 : i32
    %c0_i32_1 = arith.constant 0 : i32
    return %c0_i32, %c0_i32_0 : i32, i32
  }
  func.func @transform_10(%arg0: i32) -> (i32, i32, i32) {
    %c0_i32 = arith.constant 0 : i32
    %c0_i32_0 = arith.constant 0 : i32
    %c0_i32_1 = arith.constant 0 : i32
    return %arg0, %c0_i32, %c0_i32_0 : i32, i32, i32
  }
  func.func @transform_11(%arg0: i32) -> (i32, i32) {
    %c0_i32 = arith.constant 0 : i32
    %c0_i32_0 = arith.constant 0 : i32
    %c0_i32_1 = arith.constant 0 : i32
    return %c0_i32, %c0_i32_0 : i32, i32
  }
  func.func @transform_12(%arg0: i32) -> (i32, i32) {
    %c0_i32 = arith.constant 0 : i32
    %c0_i32_0 = arith.constant 0 : i32
    %c0_i32_1 = arith.constant 0 : i32
    return %c0_i32, %c0_i32_0 : i32, i32
  }
  func.func @transform_13(%arg0: i32) -> (i32, i32) {
    %c0_i32 = arith.constant 0 : i32
    %c0_i32_0 = arith.constant 0 : i32
    %c0_i32_1 = arith.constant 0 : i32
    return %c0_i32, %c0_i32_0 : i32, i32
  }
  func.func @transform_14(%arg0: i32) -> (i32, i32, i32) {
    %c0_i32 = arith.constant 0 : i32
    %c0_i32_0 = arith.constant 0 : i32
    %c0_i32_1 = arith.constant 0 : i32
    return %arg0, %c0_i32, %c0_i32_0 : i32, i32, i32
  }
}

</mosaic_0001>

<bundles_post_ra>
// kernel: tpu_custom_call.1
= control target key start
LH: loop header
LB: loop body
LE: loop exit
PB: predicated region body
PF: predicated region fallthrough
CT: control target
= control target key end

     0   :  { %s10349_s29 = smov 0   ;;  %s14940_s0 = inlined_call_operand.vmem [shape: f32[2,288,16], index: 0, kind: input, shape index: {}]   ;;  %s14941_s1 = inlined_call_operand.vmem [shape: f32[1,16], index: 1, kind: input, shape index: {}]   ;;  %s14942_s2 = inlined_call_operand.vmem [shape: f32[1,16], index: 2, kind: input, shape index: {}]   ;;  %s14943_s3 = inlined_call_operand.vmem [shape: bf16[9,16,32], index: 3, kind: input, shape index: {}]   ;;  %s14944_s4 = inlined_call_operand.vmem [shape: f32[1,32], index: 4, kind: input, shape index: {}]   ;;  %s14945_s5 = inlined_call_operand.vmem [shape: bf16[9,32,32], index: 5, kind: input, shape index: {}]   ;;  %s14946_s6 = inlined_call_operand.vmem [shape: f32[1,32], index: 6, kind: input, shape index: {}]   ;;  %s14947_s7 = inlined_call_operand.vmem [shape: f32[1,32], index: 7, kind: input, shape index: {}]   ;;  %s14948_s8 = inlined_call_operand.vmem [shape: bf16[32,2], index: 8, kind: input, shape index: {}]   ;;  %s14949_s9 = inlined_call_operand.vmem [shape: bf16[2,32], index: 9, kind: input, shape index: {}]   ;;  %s14950_s10 = inlined_call_operand.vmem [shape: f32[2,64,16], index: 10, kind: input, shape index: {}]   ;;  %s14951_s11 = inlined_call_operand.vmem [shape: bf16[16,32], index: 11, kind: input, shape index: {}]   ;;  %s14952_s12 = inlined_call_operand.vmem [shape: f32[1,32], index: 12, kind: input, shape index: {}]   ;;  %s14953_s13 = inlined_call_operand.vmem [shape: f32[1,32], index: 13, kind: input, shape index: {}]   ;;  %s14954_s14 = inlined_call_operand.vmem [shape: f32[2,64,32], index: 14, kind: output, shape index: {}]  }
   0x1 LB: > { %s9138_s30 = sadd.s32 4294967295, %s10271_s29   ;;  %p9142_p0 = scmp.ge.s32.totalorder %s10271_s29, 1  ;;  %s10271_s29 = sphi %s10349_s29, %s24_s29  }
   0x2   : > { %p422_p1 = scmp.lt.s32.totalorder %s10271_s29, 3 }
   0x4   : > { %p423_p2 = pnand %p9142_p0, %p422_p1 }
   0x6   : > { %426 = sbr.rel (%p423_p2) target bundleno = 2246 (0x8c6), region = 76 }
   0xb   : > { %v10075_v0 = vld [vmem:[%s14943_s3] sm:$0xff]  ;;  %v10076_v1 = vld [vmem:[%s14943_s3 + $0x8] sm:$0xff]  ;;  %p473_p3 = scmp.lt.s32.totalorder %s9138_s30, 1  ;;  %v489_v2 = vlaneseq  ;;  %vm14957_vm0 = vcmask 125952   ;;  %v14979_v19 = vmov 0   ;;  %vm14959_vm13 = vcmask 130048  }
   0xc   : > { %10205 = vmatpush.bf16.msra.mxu2 %v10075_v0  ;;  %2857 = vmatpush.bf16.msra.mxu0 %v10076_v1  ;;  %2047 = vst.msk [vmem:[#allocation2] sm:$0xf] %vm14957_vm0, %v14979_v19  ;;  %v10413_v51 = vld [vmem:[%s14941_s1] ss:$0 sm:$0xff] }
   0xd   : > { %s15895_s30 = smov (!%p473_p3, %s9138_s30), 1  ;;  %v10365_v3 = vshrl.u32 %v489_v2, 7  ;;  %2998 = vmatpush.bf16.msra.mxu1 %v10075_v0  ;;  %10204 = vmatpush.bf16.msra.mxu3 %v10076_v1  ;;  %2048 = vst.msk [vmem:[#allocation2 + $0x4] sm:$0xf] %vm14957_vm0, %v14979_v19  ;;  %v10422_v62 = vld [vmem:[%s14942_s2] ss:$0 sm:$0xff] }
   0xe   : > { %s10207_s19 = smul.u32 288, %s15895_s30  ;;  %2061 = vst.msk [vmem:[#allocation2 + $0x9c] sm:$0xf] %vm14957_vm0, %v14979_v19  ;;  %s10056_s25 = sshll.u32 %s15895_s30, 6 }
   0xf   : > { %v10368_v4 = vadd.s32 152, %v10365_v3  ;;  %v10371_v5 = vadd.s32 160, %v10365_v3  ;;  %v10374_v6 = vadd.s32 168, %v10365_v3  ;;  %v10377_v7 = vadd.s32 8, %v10365_v3  ;;  %2062 = vst.msk [vmem:[#allocation2 + $0xa0] sm:$0xf] %vm14957_vm0, %v14979_v19  ;;  %s482_s28 = scalar_lea.vmem %s14950_s10, %s10056_s25  ;;  %s487_s20 = scalar_lea.vmem %s14954_s14, %s10056_s25 }
  0x10   : > { %v529_v13 = vand.u32 65535, %v10365_v3  ;;  %v530_v14 = vshrl.u32 %v10365_v3, 16  ;;  %s10402_s22 = scalar_lea.vmem %s14940_s0, %s10207_s19  ;;  %v10426_v2 = vadd.s32 176, %v10365_v3 }
  0x11   : > { %10206 = vmatpush.bf16.msrb.mxu3 %v10075_v0  ;;  %v1080_v8 = vand.u32 65535, %v10368_v4  ;;  %v1081_v9 = vshrl.u32 %v10368_v4, 16  ;;  %v1109_v10 = vand.u32 65535, %v10371_v5  ;;  %v1110_v11 = vshrl.u32 %v10371_v5, 16  ;;  %v1805_v44 = vld [vmem:[%s10402_s22 + $0x98] sm:$0xff]  ;;  %v1806_v45 = vld [vmem:[%s10402_s22 + $0xa0] sm:$0xff] }
  0x12   : > { %v1138_v12 = vand.u32 65535, %v10374_v6  ;;  %v1139_v18 = vshrl.u32 %v10374_v6, 16  ;;  %v1807_v50 = vld [vmem:[%s10402_s22 + $0xa8] sm:$0xff]  ;;  %v1845_v57 = vmul.f32 %v10413_v51, %v1805_v44  ;;  %v1846_v58 = vmul.f32 %v10413_v51, %v1806_v45 }
  0x13   : > { %v1083_v15 = vmul.u32 14564, %v1080_v8  ;;  %v1084_v16 = vmul.u32 58254, %v1080_v8  ;;  %v1085_v17 = vmul.u32 14564, %v1081_v9  ;;  %v1086_v20 = vmul.u32 58254, %v1081_v9 }
  0x14   : > { %v1112_v21 = vmul.u32 14564, %v1109_v10  ;;  %v1113_v22 = vmul.u32 58254, %v1109_v10  ;;  %v1114_v23 = vmul.u32 14564, %v1110_v11  ;;  %v1115_v27 = vmul.u32 58254, %v1110_v11 }
  0x15   : > { %v1087_v24 = vshll.u32 %v1084_v16, 16  ;;  %v1088_v25 = vshrl.u32 %v1084_v16, 16  ;;  %v1089_v26 = vshll.u32 %v1085_v17, 16  ;;  %v1090_v28 = vshrl.u32 %v1085_v17, 16 }
  0x16   : > { %v1116_v29 = vshll.u32 %v1113_v22, 16  ;;  %v1117_v30 = vshrl.u32 %v1113_v22, 16  ;;  %v1118_v31 = vshll.u32 %v1114_v23, 16  ;;  %v1141_v33 = vmul.u32 14564, %v1138_v12 }
  0x17   : > { %vm1091_vm1 = vc.u32 %v1083_v15, %v1087_v24  ;;  %v1093_v32 = vadd.s32 %v1087_v24, %v1083_v15  ;;  %v1142_v34 = vmul.u32 58254, %v1138_v12  ;;  %v1143_v37 = vmul.u32 14564, %v1139_v18 }
  0x18   : > { %v1092_v35 = vsel %vm1091_vm1, 1, %v14979_v19  ;;  %vm1120_vm2 = vc.u32 %v1112_v21, %v1116_v29  ;;  %v1122_v36 = vadd.s32 %v1116_v29, %v1112_v21  ;;  %v1144_v40 = vmul.u32 58254, %v1139_v18 }
  0x19   : > { %v1094_v38 = vadd.s32 %v1092_v35, %v1086_v20  ;;  %vm1095_vm3 = vc.u32 %v1093_v32, %v1089_v26  ;;  %v1121_v39 = vsel %vm1120_vm2, 1, %v14979_v19  ;;  %v1145_v43 = vshll.u32 %v1142_v34, 16 }
  0x1a   : > { %v1096_v41 = vsel %vm1095_vm3, 1, %v14979_v19  ;;  %v1123_v42 = vadd.s32 %v1121_v39, %v1115_v27  ;;  %vm1124_vm4 = vc.u32 %v1122_v36, %v1118_v31  ;;  %v1119_v47 = vshrl.u32 %v1114_v23, 16 }
  0x1b   : > { %v1098_v46 = vadd.s32 %v1096_v41, %v1094_v38  ;;  %v1125_v48 = vsel %vm1124_vm4, 1, %v14979_v19  ;;  %v1147_v49 = vshll.u32 %v1143_v37, 16  ;;  %v1146_v53 = vshrl.u32 %v1142_v34, 16 }
  0x1c   : > { %v1127_v52 = vadd.s32 %v1125_v48, %v1123_v42  ;;  %vm1149_vm5 = vc.u32 %v1141_v33, %v1145_v43  ;;  %v1151_v54 = vadd.s32 %v1145_v43, %v1141_v33  ;;  %v1847_v61 = vmul.f32 %v10413_v51, %v1807_v50 }
  0x1d   : > { %v1099_v55 = vadd.s32 %v1098_v46, %v1088_v25  ;;  %v1150_v56 = vsel %vm1149_vm5, 1, %v14979_v19  ;;  %v1148_v0 = vshrl.u32 %v1143_v37, 16  ;;  %v1885_v10 = vadd.f32 %v10422_v62, %v1845_v57 }
  0x1e   : > { %v1128_v59 = vadd.s32 %v1127_v52, %v1117_v30  ;;  %v1152_v60 = vadd.s32 %v1150_v56, %v1144_v40  ;;  %vm1153_vm6 = vc.u32 %v1151_v54, %v1147_v49  ;;  %v1886_v11 = vadd.f32 %v10422_v62, %v1846_v58 }
  0x1f   : > { %v1100_v63 = vadd.s32 %v1099_v55, %v1090_v28  ;;  %v1154_v1 = vsel %vm1153_vm6, 1, %v14979_v19  ;;  %v10431_v15 = vadd.f32 %v10422_v62, %v1847_v61  ;;  %v532_v16 = vmul.u32 14564, %v529_v13 }
  0x20   : > { %v1129_v8 = vadd.s32 %v1128_v59, %v1119_v47  ;;  %v1156_v9 = vadd.s32 %v1154_v1, %v1152_v60  ;;  %v533_v17 = vmul.u32 58254, %v529_v13  ;;  %v10439_v21 = vmul.u32 14564, %v530_v14 }
  0x21   : > { %v1101_v12 = vshrl.u32 %v1100_v63, 4  ;;  %v535_v22 = vmul.u32 58254, %v530_v14  ;;  %v558_v26 = vand.u32 65535, %v10377_v7  ;;  %v559_v32 = vshrl.u32 %v10377_v7, 16 }
  0x22   : > { %v1130_v18 = vshrl.u32 %v1129_v8, 4  ;;  %v1157_v20 = vadd.s32 %v1156_v9, %v1146_v53  ;;  %v536_v24 = vshll.u32 %v533_v17, 16  ;;  %v537_v25 = vshrl.u32 %v533_v17, 16  ;;  %v10479_v9 = vld [vmem:[#allocation2] sm:$0xff]  }
  0x23   : > { %v1102_v23 = vmul.u32 18, %v1101_v12  ;;  %v538_v29 = vshll.u32 %v10439_v21, 16  ;;  %v539_v13 = vshrl.u32 %v10439_v21, 16  ;;  %v561_v35 = vmul.u32 14564, %v558_v26  ;;  %v1786_v17 = vld [vmem:[%s10402_s22] sm:$0xff]  ;;  %9244 = vmatmul.msk.bf16.vlgmr.msra.gmra.mxu1 %vm14959_vm13, %v10479_v9 }
  0x24   : > { %v1131_v27 = vmul.u32 18, %v1130_v18  ;;  %v1158_v28 = vadd.s32 %v1157_v20, %v1148_v0  ;;  %vm540_vm7 = vc.u32 %v532_v16, %v536_v24  ;;  %v542_v31 = vadd.s32 %v536_v24, %v532_v16 }
  0x25   : > { %v1103_v30 = vsub.s32 %v10368_v4, %v1102_v23  ;;  %v541_v34 = vsel %vm540_vm7, 1, %v14979_v19  ;;  %v10450_v40 = vmul.u32 58254, %v558_v26  ;;  %v15091_v43 = vmov 0  ;;  %v1787_v26 = vld [vmem:[%s10402_s22 + $0x8] sm:$0xff] }
  0x26   : > { %v1132_v33 = vsub.s32 %v10371_v5, %v1131_v27  ;;  %v1159_v14 = vshrl.u32 %v1158_v28, 4  ;;  %v543_v37 = vadd.s32 %v541_v34, %v535_v22  ;;  %vm544_vm15 = vc.u32 %v542_v31, %v538_v29 }
  0x27   : > { %vm1589_vm8 = vcmp.ne.s32.totalorder %v1103_v30, 0  ;;  %vm1625_vm9 = vcmp.lt.s32.totalorder %v1103_v30, 0  ;;  %v1697_v36 = vadd.s32 18, %v1103_v30  ;;  %v10452_v5 = vmul.u32 14564, %v559_v32 }
  0x28   : > { %v1160_v38 = vmul.u32 18, %v1159_v14  ;;  %vm1590_vm10 = vcmp.ne.s32.totalorder %v1132_v33, 0  ;;  %vm1626_vm11 = vcmp.lt.s32.totalorder %v1132_v33, 0  ;;  %vm1661_vm12 = vmand %vm1625_vm9, %vm1589_vm8  ;;  %v1698_v39 = vadd.s32 18, %v1132_v33 }
  0x29   : > { %vm1662_vm14 = vmand %vm1626_vm11, %vm1590_vm10  ;;  %v1733_v4 = vsel %vm1661_vm12, %v1697_v36, %v1103_v30  ;;  %v545_v44 = vsel %vm544_vm15, 1, %v14979_v19  ;;  %v15094_v45 = vmov 0  ;;  %vm2066_vm3 = vsmask.f32 5392 }
  0x2a   : > { %v1161_v41 = vsub.s32 %v10374_v6, %v1160_v38  ;;  %v1734_v42 = vsel %vm1662_vm14, %v1698_v39, %v1132_v33  ;;  %vm10455_vm1 = vcmp.lt.s32.totalorder %v1733_v4, 16  ;;  %v547_v47 = vadd.s32 %v545_v44, %v543_v37  ;;  %v2052_v37 = vld [vmem:[#allocation2 + $0x8] sm:$0x3] }
  0x2b   : > { %v15092_v43 = vsel %vm10455_vm1, 4294967295, %v15091_v43  ;;  %vm10460_vm2 = vcmp.lt.s32.totalorder %v1734_v42, 16  ;;  %v1993_v46 = vsel %vm10455_vm1, %v1885_v10, 0.0  ;;  %v564_v48 = vmul.u32 58254, %v559_v32 }
  0x2c   : > { %15093 = vst [vmem:[#allocation6_spill] sm:$0xff] %v15092_v43  ;;  %v15095_v45 = vsel %vm10460_vm2, 4294967295, %v15094_v45  ;;  %vm1591_vm4 = vcmp.ne.s32.totalorder %v1161_v41, 0  ;;  %vm1627_vm5 = vcmp.lt.s32.totalorder %v1161_v41, 0  ;;  %v1699_v6 = vadd.s32 18, %v1161_v41 }
  0x2d   : > { %15096 = vst [vmem:[#allocation7_spill] sm:$0xff] %v15095_v45  ;;  %v1994_v49 = vsel %vm10460_vm2, %v1886_v11, 0.0  ;;  %vm1663_vm6 = vmand %vm1627_vm5, %vm1591_vm4  ;;  %v2029_v50 = vpack.c.bf16 %v1993_v46, %v1993_v46  ;;  %vm14956_vm7 = vsmask.f32 1280  ;;  %v548_v53 = vadd.s32 %v547_v47, %v537_v25 }
  0x2e   : > { %v2030_v52 = vpack.c.bf16 %v1994_v49, %v1994_v49  ;;  %v565_v54 = vshll.u32 %v10450_v40, 16  ;;  %v1735_v55 = vsel %vm1663_vm6, %v1699_v6, %v1161_v41  ;;  %v566_v56 = vshrl.u32 %v10450_v40, 16  ;;  %vm10493_vm11 = vmor %vm14956_vm7, %vm2066_vm3  ;;  %v1808_v49 = vld [vmem:[%s10402_s22 + $0xb0] sm:$0xff] }
  0x2f   : > { %v567_v57 = vshll.u32 %v10452_v5, 16  ;;  %v568_v58 = vshrl.u32 %v10452_v5, 16  ;;  %vm10472_vm8 = vcmp.lt.s32.totalorder %v1735_v55, 16  ;;  %v15097_v59 = vmov 0 }
  0x30   : > { %v15098_v59 = vsel %vm10472_vm8, 4294967295, %v15097_v59  ;;  %v2258_v60 = vshrl.u32 %v2029_v50, 16  ;;  %v2261_v61 = vshll.u32 %v2029_v50, 16  ;;  %v2268_v63 = vshrl.u32 %v2030_v52, 16 }
  0x31   : > { %15099 = vst [vmem:[#allocation8_spill] sm:$0xff] %v15098_v59  ;;  %v1995_v0 = vsel %vm10472_vm8, %v10431_v15, 0.0  ;;  %v2271_v1 = vshll.u32 %v2030_v52, 16  ;;  %v549_v8 = vadd.s32 %v548_v53, %v539_v13  ;;  %vm569_vm9 = vc.u32 %v561_v35, %v565_v54 }
  0x32   : > { %v2031_v10 = vpack.c.bf16 %v1995_v0, %v1995_v0  ;;  %v2260_v11 = vrot.slane %v2258_v60, 6  ;;  %v2263_v12 = vrot.slane %v2261_v61, 7  ;;  %v2270_v16 = vrot.slane %v2268_v63, 6 }
  0x33   : > { %v2273_v18 = vrot.slane %v2271_v1, 7  ;;  %v550_v20 = vshrl.u32 %v549_v8, 4  ;;  %v570_v21 = vsel %vm569_vm9, 1, %v14979_v19  ;;  %v571_v22 = vadd.s32 %v565_v54, %v561_v35  ;;  %v10096_v1 = vld [vmem:[%s14943_s3 + $0x20] sm:$0xff] }
  0x34   : > { %v10485_v15 = vor.u32 %v2263_v12, %v2260_v11  ;;  %v2278_v23 = vshrl.u32 %v2031_v10, 16  ;;  %v2281_v24 = vshll.u32 %v2031_v10, 16  ;;  %v572_v25 = vadd.s32 %v570_v21, %v564_v48  ;;  %3940 = vmatpush.bf16.msrb.mxu0 %v10096_v1 }
  0x35   : > { %v2274_v27 = vor.u32 %v2273_v18, %v2270_v16  ;;  %v551_v28 = vmul.u32 18, %v550_v20  ;;  %vm573_vm10 = vc.u32 %v571_v22, %v567_v57  ;;  %v1826_v29 = vmul.f32 %v10413_v51, %v1786_v17 }
  0x36   : > { %v2266_v13 = vrot.slane %v10485_v15, 4  ;;  %v2280_v30 = vrot.slane %v2278_v23, 6  ;;  %v2283_v31 = vrot.slane %v2281_v24, 7  ;;  %v574_v32 = vsel %vm573_vm10, 1, %v14979_v19 }
  0x37   : > { %v2276_v14 = vrot.slane %v2274_v27, 4  ;;  %v552_v34 = vsub.s32 %v10365_v3, %v551_v28  ;;  %v576_v35 = vadd.s32 %v574_v32, %v572_v25  ;;  %v1827_v36 = vmul.f32 %v10413_v51, %v1787_v26 }
  0x38   : > { %v2275_v38 = vsel %vm10493_vm11, %v2266_v13, %v2274_v27  ;;  %v10501_v39 = vor.u32 %v2283_v31, %v2280_v30  ;;  %v1866_v4 = vadd.f32 %v10422_v62, %v1826_v29  ;;  %vm2049_vm12 = vcmask 123904  }
  0x39   : > { %2486 = vst.msk [vmem:[#allocation2 + $0x58] sm:$0xf] %vm14957_vm0, %v2275_v38  ;;  %v577_v40 = vadd.s32 %v576_v35, %v566_v56  ;;  %vm1570_vm14 = vcmp.ne.s32.totalorder %v552_v34, 0  ;;  %vm1606_vm15 = vcmp.lt.s32.totalorder %v552_v34, 0  ;;  %v1678_v5 = vadd.s32 18, %v552_v34  ;;  %vm10506_vm3 = vmand %vm2049_vm12, %vm14956_vm7 }
  0x3a   : > { %v2285_v42 = vsel %vm10493_vm11, %v2276_v14, %v10501_v39  ;;  %vm1642_vm4 = vmand %vm1606_vm15, %vm1570_vm14  ;;  %v2053_v44 = vsel %vm10506_vm3, 0, %v2052_v37  ;;  %v2286_v46 = vrot.slane %v10501_v39, 4  ;;  %v10518_v6 = vadd.s32 184, %v10365_v3 }
  0x3b   : > { %2487 = vst.msk [vmem:[#allocation2 + $0x5c] sm:$0xf] %vm14957_vm0, %v2285_v42  ;;  %v578_v47 = vadd.s32 %v577_v40, %v568_v58  ;;  %v1714_v48 = vsel %vm1642_vm4, %v1678_v5, %v552_v34  ;;  %v15104_v50 = vmov 0  ;;  %v1867_v52 = vadd.f32 %v10422_v62, %v1827_v36 }
  0x3c   : > { %vm10521_vm5 = vcmp.lt.s32.totalorder %v1714_v48, 16  ;;  %2054 = vst [vmem:[#allocation2 + $0x8] sm:$0x3] %v2053_v44  ;;  %vm2055_vm6 = vcmask 125953   ;;  %vm14955_vm9 = vsmask.f32 7942  ;;  %v10533_v61 = vmul.f32 %v10413_v51, %v1808_v49 }
  0x3d   : > { %v15105_v50 = vsel %vm10521_vm5, 4294967295, %v15104_v50  ;;  %v579_v53 = vshrl.u32 %v578_v47, 4  ;;  %v1974_v54 = vsel %vm10521_vm5, %v1866_v4, 0.0  ;;  %v2644_v55 = vshll.u32 %v10479_v9, 16  ;;  %vm10547_vm14 = vmand %vm2055_vm6, %vm14955_vm9 }
  0x3e   : > { %15106 = vst [vmem:[#allocation9_spill] sm:$0xff] %v15105_v50  ;;  %v1167_v56 = vand.u32 65535, %v10426_v2  ;;  %v2010_v57 = vpack.c.bf16 %v1974_v54, %v1974_v54  ;;  %v2642_v58 = vshrl.u32 %v10479_v9, 16  ;;  %v1168_v60 = vshrl.u32 %v10426_v2, 16 }
  0x3f   : > { %v580_v63 = vmul.u32 18, %v579_v53  ;;  %v2646_v0 = vrot.slane %v2644_v55, 1  ;;  %v1196_v17 = vand.u32 65535, %v10518_v6  ;;  %v1197_v21 = vshrl.u32 %v10518_v6, 16  ;;  %v1809_v53 = vld [vmem:[%s10402_s22 + $0xb8] sm:$0xff] }
  0x40   : > { %v1170_v8 = vmul.u32 14564, %v1167_v56  ;;  %v1171_v10 = vmul.u32 58254, %v1167_v56  ;;  %v2069_v11 = vshrl.u32 %v2010_v57, 16  ;;  %v2072_v12 = vshll.u32 %v2010_v57, 16 }
  0x41   : > { %v1172_v16 = vmul.u32 14564, %v1168_v60  ;;  %v581_v9 = vsub.s32 %v10377_v7, %v580_v63  ;;  %v1173_v18 = vmul.u32 58254, %v1168_v60  ;;  %v10543_v25 = vor.u32 %v2646_v0, %v2642_v58 }
  0x42   : > { %v1174_v20 = vshll.u32 %v1171_v10, 16  ;;  %v10541_v22 = vld [vmem:[#allocation2 + $0x58] sm:$0xff]  ;;  %v2071_v23 = vrot.slane %v2069_v11, 6  ;;  %v2074_v24 = vrot.slane %v2072_v12, 7  ;;  %v1199_v31 = vmul.u32 14564, %v1196_v17 }
  0x43   : > { %v1176_v26 = vshll.u32 %v1172_v16, 16  ;;  %vm1571_vm10 = vcmp.ne.s32.totalorder %v581_v9, 0  ;;  %vm1607_vm12 = vcmp.lt.s32.totalorder %v581_v9, 0  ;;  %v1679_v27 = vadd.s32 18, %v581_v9  ;;  %v2464_v7 = vld [vmem:[#allocation2 + $0x8] sm:$0xe]  ;;  %9255 = vmatmul.msk.bf16.vlgmr.msra.gmra.mxu2 %vm14959_vm13, %v10541_v22 }
  0x44   : > { %vm1178_vm15 = vc.u32 %v1170_v8, %v1174_v20  ;;  %vm1643_vm4 = vmand %vm1607_vm12, %vm1571_vm10  ;;  %v2075_v29 = vor.u32 %v2074_v24, %v2071_v23  ;;  %v1180_v30 = vadd.s32 %v1174_v20, %v1170_v8  ;;  %v1200_v34 = vmul.u32 58254, %v1196_v17 }
  0x45   : > { %v1179_v13 = vsel %vm1178_vm15, 1, %v14979_v19  ;;  %v1715_v32 = vsel %vm1643_vm4, %v1679_v27, %v581_v9  ;;  %v1201_v35 = vmul.u32 14564, %v1197_v21  ;;  %v15109_v36 = vmov 0 }
  0x46   : > { %v1181_v14 = vadd.s32 %v1179_v13, %v1173_v18  ;;  %vm10554_vm6 = vcmp.lt.s32.totalorder %v1715_v32, 16  ;;  %v2465_v37 = vsel %vm10547_vm14, %v2075_v29, %v2464_v7  ;;  %v1175_v38 = vshrl.u32 %v1171_v10, 16 }
  0x47   : > { %v15110_v36 = vsel %vm10554_vm6, 4294967295, %v15109_v36  ;;  %vm1182_vm9 = vc.u32 %v1180_v30, %v1176_v26  ;;  %v1975_v4 = vsel %vm10554_vm6, %v1867_v52, 0.0  ;;  %2466 = vst [vmem:[#allocation2 + $0x8] sm:$0xe] %v2465_v37  ;;  %v1202_v5 = vmul.u32 58254, %v1197_v21 }
  0x48   : > { %15111 = vst [vmem:[#allocation10_spill] sm:$0xff] %v15110_v36  ;;  %v1183_v40 = vsel %vm1182_vm9, 1, %v14979_v19  ;;  %v1203_v42 = vshll.u32 %v1200_v34, 16  ;;  %v2011_v44 = vpack.c.bf16 %v1975_v4, %v1975_v4  ;;  %v1177_v47 = vshrl.u32 %v1172_v16, 16 }
  0x49   : > { %v1185_v48 = vadd.s32 %v1183_v40, %v1181_v14  ;;  %v1205_v49 = vshll.u32 %v1201_v35, 16  ;;  %v2076_v54 = vrot.slane %v2075_v29, 4  ;;  %v1204_v55 = vshrl.u32 %v1200_v34, 16  ;;  %v1788_v29 = vld [vmem:[%s10402_s22 + $0x10] sm:$0xff] }
  0x4a   : > { %vm1207_vm10 = vc.u32 %v1199_v31, %v1203_v42  ;;  %v1209_v56 = vadd.s32 %v1203_v42, %v1199_v31  ;;  %v2078_v57 = vshrl.u32 %v2011_v44, 16  ;;  %v2081_v58 = vshll.u32 %v2011_v44, 16 }
  0x4b   : > { %v1186_v60 = vadd.s32 %v1185_v48, %v1175_v38  ;;  %v1208_v63 = vsel %vm1207_vm10, 1, %v14979_v19  ;;  %v1206_v52 = vshrl.u32 %v1201_v35, 16  ;;  %v1849_v1 = vmul.f32 %v10413_v51, %v1809_v53 }
  0x4c   : > { %v1210_v0 = vadd.s32 %v1208_v63, %v1202_v5  ;;  %vm1211_vm12 = vc.u32 %v1209_v56, %v1205_v49  ;;  %v2080_v8 = vrot.slane %v2078_v57, 6  ;;  %v2083_v10 = vrot.slane %v2081_v58, 7 }
  0x4d   : > { %v1187_v11 = vadd.s32 %v1186_v60, %v1177_v47  ;;  %v1212_v12 = vsel %vm1211_vm12, 1, %v14979_v19  ;;  %v1888_v17 = vadd.f32 %v10422_v62, %v10533_v61  ;;  %v10570_v9 = vadd.s32 16, %v10365_v3 }
  0x4e   : > { %v1214_v16 = vadd.s32 %v1212_v12, %v1210_v0  ;;  %v10573_v18 = vadd.s32 24, %v10365_v3  ;;  %v10575_v20 = vor.u32 %v2083_v10, %v2080_v8  ;;  %v2729_v23 = vshll.u32 %v10541_v22, 16 }
  0x4f   : > { %v1188_v21 = vshrl.u32 %v1187_v11, 4  ;;  %v2733_v24 = vshrl.u32 %v10541_v22, 16  ;;  %v10580_v27 = vadd.f32 %v10422_v62, %v1849_v1  ;;  %v587_v7 = vand.u32 65535, %v10570_v9 }
  0x50   : > { %v1215_v26 = vadd.s32 %v1214_v16, %v1204_v55  ;;  %v588_v61 = vshrl.u32 %v10570_v9, 16  ;;  %v2085_v13 = vsel %vm10493_vm11, %v2076_v54, %v10575_v20  ;;  %v10588_v31 = vrot.slane %v2729_v23, 1 }
  0x51   : > { %v1189_v30 = vmul.u32 18, %v1188_v21  ;;  %v616_v32 = vand.u32 65535, %v10573_v18  ;;  %2467 = vst.msk [vmem:[#allocation2 + $0xc] sm:$0xf] %vm14957_vm0, %v2085_v13  ;;  %v590_v14 = vmul.u32 14564, %v587_v7  ;;  %v591_v34 = vmul.u32 58254, %v587_v7 }
  0x52   : > { %v1216_v22 = vadd.s32 %v1215_v26, %v1206_v52  ;;  %v592_v35 = vmul.u32 14564, %v588_v61  ;;  %v10594_v38 = vor.u32 %v2733_v24, %v10588_v31  ;;  %v617_v4 = vshrl.u32 %v10573_v18, 16 }
  0x53   : > { %v1190_v37 = vsub.s32 %v10426_v2, %v1189_v30  ;;  %v10598_v40 = vmul.f32 %v10413_v51, %v1788_v29  ;;  %vm14958_vm9 = vsmask.f32 7424  ;;  %v593_v42 = vmul.u32 58254, %v588_v61 }
  0x54   : > { %v1217_v5 = vshrl.u32 %v1216_v22, 4  ;;  %v594_v44 = vshll.u32 %v591_v34, 16  ;;  %v596_v47 = vshll.u32 %v592_v35, 16  ;;  %v619_v49 = vmul.u32 14564, %v616_v32 }
  0x55   : > { %vm1592_vm15 = vcmp.ne.s32.totalorder %v1190_v37, 0  ;;  %vm1628_vm4 = vcmp.lt.s32.totalorder %v1190_v37, 0  ;;  %v1700_v48 = vadd.s32 18, %v1190_v37  ;;  %v620_v54 = vmul.u32 58254, %v616_v32  ;;  %v1789_v32 = vld [vmem:[%s10402_s22 + $0x18] sm:$0xff] }
  0x56   : > { %v1218_v53 = vmul.u32 18, %v1217_v5  ;;  %vm1664_vm10 = vmand %vm1628_vm4, %vm1592_vm15  ;;  %vm598_vm12 = vc.u32 %v590_v14, %v594_v44  ;;  %v600_v2 = vadd.s32 %v594_v44, %v590_v14  ;;  %v595_v56 = vshrl.u32 %v591_v34, 16 }
  0x57   : > { %v1736_v55 = vsel %vm1664_vm10, %v1700_v48, %v1190_v37  ;;  %v599_v57 = vsel %vm598_vm12, 1, %v14979_v19  ;;  %v10601_v58 = vmul.u32 14564, %v617_v4  ;;  %v15112_v63 = vmov 0 }
  0x58   : > { %v1219_v60 = vsub.s32 %v10518_v6, %v1218_v53  ;;  %vm10604_vm7 = vcmp.lt.s32.totalorder %v1736_v55, 16  ;;  %v601_v52 = vadd.s32 %v599_v57, %v593_v42  ;;  %vm602_vm0 = vc.u32 %v600_v2, %v596_v47  ;;  %v10608_v0 = vld [vmem:[#allocation2 + $0x8] sm:$0xff] }
  0x59   : > { %v15113_v63 = vsel %vm10604_vm7, 4294967295, %v15112_v63  ;;  %v1996_v1 = vsel %vm10604_vm7, %v1888_v17, 0.0  ;;  %v597_v8 = vshrl.u32 %v592_v35, 16  ;;  %v603_v10 = vsel %vm602_vm0, 1, %v14979_v19  ;;  %9245 = vmatmul.msk.bf16.gmra.mxu1 %vm14959_vm13, %v10608_v0 }
  0x5a   : > { %15114 = vst [vmem:[#allocation11_spill] sm:$0xff] %v15113_v63  ;;  %v623_v11 = vshll.u32 %v620_v54, 16  ;;  %vm1593_vm15 = vcmp.ne.s32.totalorder %v1219_v60, 0  ;;  %vm1629_vm4 = vcmp.lt.s32.totalorder %v1219_v60, 0  ;;  %v1701_v12 = vadd.s32 18, %v1219_v60 }
  0x5b   : > { %v2032_v6 = vpack.c.bf16 %v1996_v1, %v1996_v1  ;;  %v2649_v16 = vshll.u32 %v10608_v0, 16  ;;  %vm1665_vm10 = vmand %vm1629_vm4, %vm1593_vm15  ;;  %v605_v21 = vadd.s32 %v603_v10, %v601_v52  ;;  %v622_v23 = vmul.u32 58254, %v617_v4 }
  0x5c   : > { %v625_v24 = vshll.u32 %v10601_v58, 16  ;;  %v1737_v17 = vsel %vm1665_vm10, %v1701_v12, %v1219_v60  ;;  %vm627_vm0 = vc.u32 %v619_v49, %v623_v11  ;;  %v15115_v29 = vmov 0 }
  0x5d   : > { %v2288_v26 = vshrl.u32 %v2032_v6, 16  ;;  %v2291_v7 = vshll.u32 %v2032_v6, 16  ;;  %v2651_v61 = vrot.slane %v2649_v16, 1  ;;  %vm10617_vm12 = vcmp.lt.s32.totalorder %v1737_v17, 16 }
  0x5e   : > { %v15116_v29 = vsel %vm10617_vm12, 4294967295, %v15115_v29  ;;  %v606_v13 = vadd.s32 %v605_v21, %v595_v56  ;;  %v628_v30 = vsel %vm627_vm0, 1, %v14979_v19  ;;  %v1997_v22 = vsel %vm10617_vm12, %v10580_v27, 0.0 }
  0x5f   : > { %15117 = vst [vmem:[#allocation12_spill] sm:$0xff] %v15116_v29  ;;  %v2290_v14 = vrot.slane %v2288_v26, 6  ;;  %v2293_v34 = vrot.slane %v2291_v7, 7  ;;  %v629_v35 = vadd.s32 %v623_v11, %v619_v49  ;;  %v2652_v37 = vsel %vm14958_vm9, %v10543_v25, %v2651_v61 }
  0x60   : > { %v2033_v4 = vpack.c.bf16 %v1997_v22, %v1997_v22  ;;  %v607_v5 = vadd.s32 %v606_v13, %v597_v8  ;;  %v630_v42 = vadd.s32 %v628_v30, %v622_v23  ;;  %9222 = vmatmul.msk.bf16.vlgmr.msra.gmra.mxu0 %vm14959_vm13, %v2652_v37  ;;  %v624_v47 = vshrl.u32 %v620_v54, 16  ;;  %v1810_v54 = vld [vmem:[%s10402_s22 + $0xc0] sm:$0xff] }
  0x61   : > { %v2294_v44 = vor.u32 %v2293_v34, %v2290_v14  ;;  %vm631_vm15 = vc.u32 %v629_v35, %v625_v24  ;;  %v1829_v48 = vmul.f32 %v10413_v51, %v1789_v32  ;;  %v626_v49 = vshrl.u32 %v10601_v58, 16  ;;  %v1811_v24 = vld [vmem:[%s10402_s22 + $0xc8] sm:$0xff] }
  0x62   : > { %v2298_v53 = vshrl.u32 %v2033_v4, 16  ;;  %v2301_v2 = vshll.u32 %v2033_v4, 16  ;;  %v608_v27 = vshrl.u32 %v607_v5, 4  ;;  %v632_v55 = vsel %vm631_vm15, 1, %v14979_v19 }
  0x63   : > { %v2295_v25 = vsel %vm10493_vm11, %v2286_v46, %v2294_v44  ;;  %v634_v56 = vadd.s32 %v632_v55, %v630_v42  ;;  %v1868_v57 = vadd.f32 %v10422_v62, %v10598_v40  ;;  %v2296_v60 = vrot.slane %v2294_v44, 4 }
  0x64   : > { %v2300_v52 = vrot.slane %v2298_v53, 6  ;;  %v2303_v1 = vrot.slane %v2301_v2, 7  ;;  %vm15118_vm4 = vcmask 125952   ;;  %v609_v8 = vmul.u32 18, %v608_v27 }
  0x65   : > { %2488 = vst.msk [vmem:[#allocation2 + $0x60] sm:$0xf] %vm15118_vm4, %v2295_v25  ;;  %v635_v10 = vadd.s32 %v634_v56, %v624_v47  ;;  %v1869_v39 = vadd.f32 %v10422_v62, %v1829_v48  ;;  %v2086_v11 = vrot.slane %v10575_v20, 4  ;;  %v10643_v46 = vadd.s32 192, %v10365_v3  ;;  %vm15119_vm15 = vmmov %vm15118_vm4 }
  0x66   : > { %v10645_v58 = vor.u32 %v2303_v1, %v2300_v52  ;;  %v610_v40 = vsub.s32 %v10570_v9, %v609_v8  ;;  %v2653_v12 = vshrl.u32 %v10608_v0, 16  ;;  %v10650_v6 = vadd.s32 200, %v10365_v3 }
  0x67   : > { %v636_v16 = vadd.s32 %v635_v10, %v626_v49  ;;  %v1225_v21 = vand.u32 65535, %v10643_v46  ;;  %v1226_v23 = vshrl.u32 %v10643_v46, 16  ;;  %v10656_v17 = vmul.f32 %v10413_v51, %v1810_v54 }
  0x68   : > { %v2305_v26 = vsel %vm10493_vm11, %v2296_v60, %v10645_v58  ;;  %vm1572_vm10 = vcmp.ne.s32.totalorder %v610_v40, 0  ;;  %vm1608_vm0 = vcmp.lt.s32.totalorder %v610_v40, 0  ;;  %v1680_v9 = vadd.s32 18, %v610_v40 }
  0x69   : > { %2489 = vst.msk [vmem:[#allocation2 + $0x64] sm:$0xf] %vm15119_vm15, %v2305_v26  ;;  %v637_v0 = vshrl.u32 %v636_v16, 4  ;;  %vm1644_vm4 = vmand %vm1608_vm0, %vm1572_vm10  ;;  %v1228_v7 = vmul.u32 14564, %v1225_v21  ;;  %v1229_v13 = vmul.u32 58254, %v1225_v21  ;;  %v1230_v30 = vmul.u32 14564, %v1226_v23 }
  0x6a   : > { %v1716_v32 = vsel %vm1644_vm4, %v1680_v9, %v610_v40  ;;  %v1254_v22 = vand.u32 65535, %v10650_v6  ;;  %v1255_v14 = vshrl.u32 %v10650_v6, 16  ;;  %v10665_v34 = vmul.f32 %v10413_v51, %v1811_v24 }
  0x6b   : > { %v638_v35 = vmul.u32 18, %v637_v0  ;;  %vm10667_vm9 = vcmp.lt.s32.totalorder %v1716_v32, 16  ;;  %v15120_v37 = vmov 0  ;;  %v10671_v4 = vor.u32 %v2653_v12, %v2651_v61 }
  0x6c   : > { %v15121_v37 = vsel %vm10667_vm9, 4294967295, %v15120_v37  ;;  %v1232_v5 = vshll.u32 %v1229_v13, 16  ;;  %v1976_v42 = vsel %vm10667_vm9, %v1868_v57, 0.0  ;;  %v1231_v44 = vmul.u32 58254, %v1226_v23 }
  0x6d   : > { %15122 = vst [vmem:[#allocation13_spill] sm:$0xff] %v15121_v37  ;;  %v1233_v47 = vshrl.u32 %v1229_v13, 16  ;;  %v1234_v48 = vshll.u32 %v1230_v30, 16  ;;  %v639_v53 = vsub.s32 %v10573_v18, %v638_v35  ;;  %v2012_v2 = vpack.c.bf16 %v1976_v42, %v1976_v42 }
  0x6e   : > { %vm1236_vm10 = vc.u32 %v1228_v7, %v1232_v5  ;;  %v1238_v27 = vadd.s32 %v1232_v5, %v1228_v7  ;;  %v1257_v25 = vmul.u32 14564, %v1254_v22  ;;  %v1258_v49 = vmul.u32 58254, %v1254_v22 }
  0x6f   : > { %v1237_v55 = vsel %vm1236_vm10, 1, %v14979_v19  ;;  %v10677_v56 = vmul.u32 14564, %v1255_v14  ;;  %vm1573_vm0 = vcmp.ne.s32.totalorder %v639_v53, 0  ;;  %vm1609_vm15 = vcmp.lt.s32.totalorder %v639_v53, 0 }
  0x70   : > { %v1681_v61 = vadd.s32 18, %v639_v53  ;;  %v2088_v54 = vshrl.u32 %v2012_v2, 16  ;;  %v10679_v60 = vld [vmem:[#allocation2 + $0x60] sm:$0xff]  ;;  %vm1645_vm4 = vmand %vm1609_vm15, %vm1573_vm0  ;;  %v2091_v57 = vshll.u32 %v2012_v2, 16  ;;  %v1239_v52 = vadd.s32 %v1237_v55, %v1231_v44 }
  0x71   : > { %vm1240_vm13 = vc.u32 %v1238_v27, %v1234_v48  ;;  %v1261_v18 = vshll.u32 %v1258_v49, 16  ;;  %v1235_v10 = vshrl.u32 %v1230_v30, 16  ;;  %v2737_v12 = vshll.u32 %v10679_v60, 16 }
  0x72   : > { %v1717_v1 = vsel %vm1645_vm4, %v1681_v61, %v639_v53  ;;  %v2090_v8 = vrot.slane %v2088_v54, 6  ;;  %v1241_v40 = vsel %vm1240_vm13, 1, %v14979_v19  ;;  %vm15123_vm10 = vcmask 130048  }
  0x73   : > { %9256 = vmatmul.msk.bf16.gmra.mxu2 %vm15123_vm10, %v10679_v60  ;;  %vm10685_vm12 = vcmp.lt.s32.totalorder %v1717_v1, 16  ;;  %v15124_v16 = vmov 0  ;;  %v2093_v21 = vrot.slane %v2091_v57, 7  ;;  %v1243_v23 = vadd.s32 %v1241_v40, %v1239_v52  ;;  %vm15128_vm15 = vmmov %vm15123_vm10 }
  0x74   : > { %v15125_v16 = vsel %vm10685_vm12, 4294967295, %v15124_v16  ;;  %v1977_v24 = vsel %vm10685_vm12, %v1869_v39, 0.0  ;;  %v1260_v26 = vmul.u32 58254, %v1255_v14  ;;  %v1263_v9 = vshll.u32 %v10677_v56, 16 }
  0x75   : > { %15126 = vst [vmem:[#allocation14_spill] sm:$0xff] %v15125_v16  ;;  %vm1265_vm0 = vc.u32 %v1257_v25, %v1261_v18  ;;  %v2739_v0 = vrot.slane %v2737_v12, 1  ;;  %v2013_v7 = vpack.c.bf16 %v1977_v24, %v1977_v24  ;;  %v2094_v13 = vor.u32 %v2093_v21, %v2090_v8 }
  0x76   : > { %v1244_v30 = vadd.s32 %v1243_v23, %v1233_v47  ;;  %v1262_v32 = vshrl.u32 %v1258_v49, 16  ;;  %v1264_v22 = vshrl.u32 %v10677_v56, 16  ;;  %v1266_v35 = vsel %vm1265_vm0, 1, %v14979_v19  ;;  %v1790_v49 = vld [vmem:[%s10402_s22 + $0x20] sm:$0xff] }
  0x77   : > { %v1267_v5 = vadd.s32 %v1261_v18, %v1257_v25  ;;  %vm15127_vm13 = vsmask.f32 7424  ;;  %v2095_v39 = vsel %vm10493_vm11, %v2086_v11, %v2094_v13  ;;  %v2098_v14 = vshrl.u32 %v2013_v7, 16 }
  0x78   : > { %v2740_v42 = vsel %vm15127_vm13, %v10594_v38, %v2739_v0  ;;  %v1890_v44 = vadd.f32 %v10422_v62, %v10656_v17  ;;  %v2101_v47 = vshll.u32 %v2013_v7, 16  ;;  %vm15129_vm4 = vcmask 125952  }
  0x79   : > { %9233 = vmatmul.msk.bf16.vlgmr.msra.gmra.mxu3 %vm15128_vm15, %v2740_v42  ;;  %2468 = vst.msk [vmem:[#allocation2 + $0x10] sm:$0xf] %vm15129_vm4, %v2095_v39  ;;  %v1245_v48 = vadd.s32 %v1244_v30, %v1235_v10  ;;  %v1268_v53 = vadd.s32 %v1266_v35, %v1260_v26  ;;  %vm1269_vm10 = vc.u32 %v1267_v5, %v1263_v9  ;;  %v2096_v2 = vrot.slane %v2094_v13, 4  ;;  %vm15130_vm0 = vmmov %vm15129_vm4 }
  0x7a   : > { %v2100_v38 = vrot.slane %v2098_v14, 6  ;;  %v1270_v20 = vsel %vm1269_vm10, 1, %v14979_v19  ;;  %v10706_v27 = vadd.s32 32, %v10365_v3  ;;  %v2103_v11 = vrot.slane %v2101_v47, 7 }
  0x7b   : > { %v1246_v55 = vshrl.u32 %v1245_v48, 4  ;;  %v1272_v25 = vadd.s32 %v1270_v20, %v1268_v53  ;;  %v10709_v17 = vadd.s32 40, %v10365_v3  ;;  %v10714_v56 = vadd.f32 %v10422_v62, %v10665_v34 }
  0x7c   : > { %v2741_v61 = vshrl.u32 %v10679_v60, 16  ;;  %v645_v54 = vand.u32 65535, %v10706_v27  ;;  %v646_v57 = vshrl.u32 %v10706_v27, 16  ;;  %v10719_v52 = vor.u32 %v2103_v11, %v2100_v38 }
  0x7d   : > { %v1247_v18 = vmul.u32 18, %v1246_v55  ;;  %v1273_v1 = vadd.s32 %v1272_v25, %v1262_v32  ;;  %v2306_v8 = vrot.slane %v10645_v58, 4  ;;  %v10723_v21 = vmul.f32 %v10413_v51, %v1790_v49 }
  0x7e   : > { %v648_v10 = vmul.u32 14564, %v645_v54  ;;  %v649_v40 = vmul.u32 58254, %v645_v54  ;;  %v650_v12 = vmul.u32 14564, %v646_v57  ;;  %v2105_v34 = vsel %vm10493_vm11, %v2096_v2, %v10719_v52 }
  0x7f   : > { %v1248_v60 = vsub.s32 %v10643_v46, %v1247_v18  ;;  %v1274_v23 = vadd.s32 %v1273_v1, %v1264_v22  ;;  %v674_v24 = vand.u32 65535, %v10709_v17  ;;  %2469 = vst.msk [vmem:[#allocation2 + $0x14] sm:$0xf] %vm15130_vm0, %v2105_v34  ;;  %v10731_v26 = vor.u32 %v2741_v61, %v2739_v0 }
  0x80   : > { %v651_v9 = vmul.u32 58254, %v646_v57  ;;  %v652_v7 = vshll.u32 %v649_v40, 16  ;;  %v654_v13 = vshll.u32 %v650_v12, 16  ;;  %v653_v35 = vshrl.u32 %v649_v40, 16 }
  0x81   : > { %v1275_v30 = vshrl.u32 %v1274_v23, 4  ;;  %vm1594_vm13 = vcmp.ne.s32.totalorder %v1248_v60, 0  ;;  %vm1630_vm15 = vcmp.lt.s32.totalorder %v1248_v60, 0  ;;  %v1702_v32 = vadd.s32 18, %v1248_v60 }
  0x82   : > { %vm1666_vm4 = vmand %vm1630_vm15, %vm1594_vm13  ;;  %vm656_vm10 = vc.u32 %v648_v10, %v652_v7  ;;  %v658_v5 = vadd.s32 %v652_v7, %v648_v10  ;;  %v675_v46 = vshrl.u32 %v10709_v17, 16  ;;  %v678_v14 = vmul.u32 58254, %v674_v24 }
  0x83   : > { %v1276_v22 = vmul.u32 18, %v1275_v30  ;;  %v1738_v42 = vsel %vm1666_vm4, %v1702_v32, %v1248_v60  ;;  %v657_v39 = vsel %vm656_vm10, 1, %v14979_v19  ;;  %v15131_v0 = vmov 0 }
  0x84   : > { %vm10735_vm0 = vcmp.lt.s32.totalorder %v1738_v42, 16  ;;  %v659_v47 = vadd.s32 %v657_v39, %v651_v9  ;;  %vm660_vm7 = vc.u32 %v658_v5, %v654_v13  ;;  %v10739_v48 = vmul.u32 14564, %v675_v46  ;;  %v1791_v9 = vld [vmem:[%s10402_s22 + $0x28] sm:$0xff] }
  0x85   : > { %v15132_v0 = vsel %vm10735_vm0, 4294967295, %v15131_v0  ;;  %v1277_v53 = vsub.s32 %v10650_v6, %v1276_v22  ;;  %v1998_v2 = vsel %vm10735_vm0, %v1890_v44, 0.0  ;;  %v661_v38 = vsel %vm660_vm7, 1, %v14979_v19 }
  0x86   : > { %15133 = vst [vmem:[#allocation15_spill] sm:$0xff] %v15132_v0  ;;  %v677_v20 = vmul.u32 14564, %v674_v24  ;;  %v2034_v11 = vpack.c.bf16 %v1998_v2, %v1998_v2  ;;  %v655_v55 = vshrl.u32 %v650_v12, 16  ;;  %v663_v25 = vadd.s32 %v661_v38, %v659_v47  ;;  %v10745_v61 = vld [vmem:[#allocation2 + $0x10] sm:$0xff] }
  0x87   : > { %v681_v49 = vshll.u32 %v678_v14, 16  ;;  %vm1595_vm13 = vcmp.ne.s32.totalorder %v1277_v53, 0  ;;  %vm1631_vm15 = vcmp.lt.s32.totalorder %v1277_v53, 0  ;;  %v1703_v54 = vadd.s32 18, %v1277_v53 }
  0x88   : > { %v683_v57 = vshll.u32 %v10739_v48, 16  ;;  %vm1667_vm4 = vmand %vm1631_vm15, %vm1595_vm13  ;;  %v2308_v6 = vshrl.u32 %v2034_v11, 16  ;;  %v2311_v18 = vshll.u32 %v2034_v11, 16  ;;  %v664_v1 = vadd.s32 %v663_v25, %v653_v35 }
  0x89   : > { %v680_v44 = vmul.u32 58254, %v675_v46  ;;  %v2657_v10 = vshll.u32 %v10745_v61, 16  ;;  %v1739_v40 = vsel %vm1667_vm4, %v1703_v54, %v1277_v53  ;;  %vm685_vm7 = vc.u32 %v677_v20, %v681_v49 }
  0x8a   : > { %v687_v12 = vadd.s32 %v681_v49, %v677_v20  ;;  %vm15134_vm10 = vcmask 130048   ;;  %vm10751_vm0 = vcmp.lt.s32.totalorder %v1739_v40, 16  ;;  %v15135_v34 = vmov 0 }
  0x8b   : > { %9246 = vmatmul.msk.bf16.gmra.mxu1 %vm15134_vm10, %v10745_v61  ;;  %v15136_v34 = vsel %vm10751_vm0, 4294967295, %v15135_v34  ;;  %v2310_v60 = vrot.slane %v2308_v6, 6  ;;  %v2313_v23 = vrot.slane %v2311_v18, 7  ;;  %v665_v24 = vadd.s32 %v664_v1, %v655_v55  ;;  %vm15139_vm4 = vmmov %vm15134_vm10  ;;  %v1812_v18 = vld [vmem:[%s10402_s22 + $0xd0] sm:$0xff] }
  0x8c   : > { %15137 = vst [vmem:[#allocation16_spill] sm:$0xff] %v15136_v34  ;;  %v10756_v7 = vrot.slane %v2657_v10, 1  ;;  %v1999_v13 = vsel %vm10751_vm0, %v10714_v56, 0.0  ;;  %v686_v30 = vsel %vm685_vm7, 1, %v14979_v19  ;;  %vm689_vm13 = vc.u32 %v687_v12, %v683_v57 }
  0x8d   : > { %v2035_v32 = vpack.c.bf16 %v1999_v13, %v1999_v13  ;;  %v2314_v35 = vor.u32 %v2313_v23, %v2310_v60  ;;  %v666_v5 = vshrl.u32 %v665_v24, 4  ;;  %v688_v46 = vadd.s32 %v686_v30, %v680_v44  ;;  %v10801_v24 = vld [vmem:[%s14941_s1] ss:$0 sm:$0xff] }
  0x8e   : > { %vm15138_vm15 = vsmask.f32 7424  ;;  %v682_v42 = vshrl.u32 %v678_v14, 16  ;;  %v690_v39 = vsel %vm689_vm13, 1, %v14979_v19  ;;  %v1831_v47 = vmul.f32 %v10413_v51, %v1791_v9 }
  0x8f   : > { %v2660_v22 = vsel %vm15138_vm15, %v10671_v4, %v10756_v7  ;;  %v2315_v56 = vsel %vm10493_vm11, %v2306_v8, %v2314_v35  ;;  %v2318_v53 = vshrl.u32 %v2035_v32, 16  ;;  %v2321_v2 = vshll.u32 %v2035_v32, 16 }
  0x90   : > { %9223 = vmatmul.msk.bf16.gmra.mxu0 %vm15139_vm4, %v2660_v22  ;;  %v684_v38 = vshrl.u32 %v10739_v48, 16  ;;  %v2316_v20 = vrot.slane %v2314_v35, 4  ;;  %vm15140_vm7 = vcmask 125952   ;;  %v667_v4 = vmul.u32 18, %v666_v5 }
  0x91   : > { %2490 = vst.msk [vmem:[#allocation2 + $0x68] sm:$0xf] %vm15140_vm7, %v2315_v56  ;;  %v692_v14 = vadd.s32 %v690_v39, %v688_v46  ;;  %v1870_v51 = vadd.f32 %v10422_v62, %v10723_v21  ;;  %v2320_v11 = vrot.slane %v2318_v53, 6  ;;  %v2323_v55 = vrot.slane %v2321_v2, 7  ;;  %vm15141_vm4 = vmmov %vm15140_vm7 }
  0x92   : > { %v10777_v58 = vadd.f32 %v10422_v62, %v1831_v47  ;;  %v10780_v8 = vadd.s32 208, %v10365_v3  ;;  %v668_v25 = vsub.s32 %v10706_v27, %v667_v4  ;;  %v2106_v49 = vrot.slane %v10719_v52, 4 }
  0x93   : > { %v693_v48 = vadd.s32 %v692_v14, %v682_v42  ;;  %v10785_v54 = vadd.s32 216, %v10365_v3  ;;  %v10787_v57 = vor.u32 %v2323_v55, %v2320_v11  ;;  %v2661_v21 = vshrl.u32 %v10745_v61, 16 }
  0x94   : > { %v1283_v6 = vand.u32 65535, %v10780_v8  ;;  %v1284_v62 = vshrl.u32 %v10780_v8, 16  ;;  %vm1574_vm10 = vcmp.ne.s32.totalorder %v668_v25, 0  ;;  %vm1610_vm13 = vcmp.lt.s32.totalorder %v668_v25, 0 }
  0x95   : > { %v694_v1 = vadd.s32 %v693_v48, %v684_v38  ;;  %v1682_v44 = vadd.s32 18, %v668_v25  ;;  %v2325_v27 = vsel %vm10493_vm11, %v2316_v20, %v10787_v57  ;;  %vm1646_vm15 = vmand %vm1610_vm13, %vm1574_vm10  ;;  %v1312_v23 = vand.u32 65535, %v10785_v54 }
  0x96   : > { %v1286_v10 = vmul.u32 14564, %v1283_v6  ;;  %v1287_v40 = vmul.u32 58254, %v1283_v6  ;;  %v1288_v12 = vmul.u32 14564, %v1284_v62  ;;  %2491 = vst.msk [vmem:[#allocation2 + $0x6c] sm:$0xf] %vm15141_vm4, %v2325_v27  ;;  %v10804_v9 = vmul.f32 %v10801_v24, %v1812_v18 }
  0x97   : > { %v695_v61 = vshrl.u32 %v694_v1, 4  ;;  %v1718_v60 = vsel %vm1646_vm15, %v1682_v44, %v668_v25  ;;  %v15142_v13 = vmov 0  ;;  %v1289_v30 = vmul.u32 58254, %v1284_v62 }
  0x98   : > { %vm10806_vm7 = vcmp.lt.s32.totalorder %v1718_v60, 16  ;;  %v1290_v32 = vshll.u32 %v1287_v40, 16  ;;  %v1292_v35 = vshll.u32 %v1288_v12, 16  ;;  %v1291_v22 = vshrl.u32 %v1287_v40, 16 }
  0x99   : > { %v15143_v13 = vsel %vm10806_vm7, 4294967295, %v15142_v13  ;;  %v696_v5 = vmul.u32 18, %v695_v61  ;;  %v1978_v46 = vsel %vm10806_vm7, %v1870_v51, 0.0  ;;  %v1313_v42 = vshrl.u32 %v10785_v54, 16 }
  0x9a   : > { %15144 = vst [vmem:[#allocation17_spill] sm:$0xff] %v15143_v13  ;;  %v2014_v39 = vpack.c.bf16 %v1978_v46, %v1978_v46  ;;  %vm1294_vm10 = vc.u32 %v1286_v10, %v1290_v32  ;;  %v1296_v47 = vadd.s32 %v1290_v32, %v1286_v10  ;;  %v1315_v56 = vmul.u32 14564, %v1312_v23 }
  0x9b   : > { %v697_v53 = vsub.s32 %v10709_v17, %v696_v5  ;;  %v1295_v2 = vsel %vm1294_vm10, 1, %v14979_v19  ;;  %v1316_v38 = vmul.u32 58254, %v1312_v23  ;;  %v10815_v20 = vmul.u32 14564, %v1313_v42  ;;  %v1813_v23 = vld [vmem:[%s10402_s22 + $0xd8] sm:$0xff] }
  0x9c   : > { %v2108_v4 = vshrl.u32 %v2014_v39, 16  ;;  %v2111_v14 = vshll.u32 %v2014_v39, 16  ;;  %v1297_v11 = vadd.s32 %v1295_v2, %v1289_v30  ;;  %vm1298_vm13 = vc.u32 %v1296_v47, %v1292_v35 }
  0x9d   : > { %vm1575_vm15 = vcmp.ne.s32.totalorder %v697_v53, 0  ;;  %vm1611_vm4 = vcmp.lt.s32.totalorder %v697_v53, 0  ;;  %v1683_v51 = vadd.s32 18, %v697_v53  ;;  %v1299_v55 = vsel %vm1298_vm13, 1, %v14979_v19  ;;  %v10818_v25 = vld [vmem:[#allocation2 + $0x68] sm:$0xff] }
  0x9e   : > { %vm1647_vm0 = vmand %vm1611_vm4, %vm1575_vm15  ;;  %v2110_v48 = vrot.slane %v2108_v4, 6  ;;  %v2113_v17 = vrot.slane %v2111_v14, 7  ;;  %v1293_v6 = vshrl.u32 %v1288_v12, 16  ;;  %v1301_v62 = vadd.s32 %v1299_v55, %v1297_v11  ;;  %v10850_v11 = vld [vmem:[%s14942_s2] ss:$0 sm:$0xff] }
  0x9f   : > { %v1719_v18 = vsel %vm1647_vm0, %v1683_v51, %v697_v53  ;;  %v1318_v1 = vmul.u32 58254, %v1313_v42  ;;  %v1319_v44 = vshll.u32 %v1316_v38, 16  ;;  %v1321_v27 = vshll.u32 %v10815_v20, 16  ;;  %v1792_v51 = vld [vmem:[%s10402_s22 + $0x30] sm:$0xff] }
  0xa0   : > { %v2745_v10 = vshll.u32 %v10818_v25, 16  ;;  %vm15145_vm10 = vcmask 130048   ;;  %vm10824_vm8 = vcmp.lt.s32.totalorder %v1719_v18, 16  ;;  %v15146_v40 = vmov 0 }
  0xa1   : > { %9257 = vmatmul.msk.bf16.gmra.mxu2 %vm15145_vm10, %v10818_v25  ;;  %v15147_v40 = vsel %vm10824_vm8, 4294967295, %v15146_v40  ;;  %v2114_v61 = vor.u32 %v2113_v17, %v2110_v48  ;;  %v1302_v60 = vadd.s32 %v1301_v62, %v1291_v22  ;;  %v1979_v12 = vsel %vm10824_vm8, %v10777_v58, 0.0 }
  0xa2   : > { %15148 = vst [vmem:[#allocation18_spill] sm:$0xff] %v15147_v40  ;;  %v10833_v30 = vor.u32 %v2661_v21, %v10756_v7  ;;  %vm1323_vm0 = vc.u32 %v1315_v56, %v1319_v44  ;;  %v1325_v32 = vadd.s32 %v1319_v44, %v1315_v56  ;;  %v2747_v35 = vrot.slane %v2745_v10, 1 }
  0xa3   : > { %v2015_v5 = vpack.c.bf16 %v1979_v12, %v1979_v12  ;;  %v2115_v46 = vsel %vm10493_vm11, %v2106_v49, %v2114_v61  ;;  %v1320_v42 = vshrl.u32 %v1316_v38, 16  ;;  %vm15149_vm13 = vcmask 125952  }
  0xa4   : > { %2470 = vst.msk [vmem:[#allocation2 + $0x18] sm:$0xf] %vm15149_vm13, %v2115_v46  ;;  %v1303_v22 = vadd.s32 %v1302_v60, %v1293_v6  ;;  %v1324_v39 = vsel %vm1323_vm0, 1, %v14979_v19  ;;  %vm1327_vm15 = vc.u32 %v1325_v32, %v1321_v27  ;;  %v1853_v7 = vmul.f32 %v10801_v24, %v1813_v23  ;;  %v1793_v6 = vld [vmem:[%s10402_s22 + $0x38] sm:$0xff]  ;;  %vm15151_vm0 = vmmov %vm15149_vm13 }
  0xa5   : > { %vm15150_vm4 = vsmask.f32 7424  ;;  %v2118_v21 = vshrl.u32 %v2015_v5, 16  ;;  %v2121_v47 = vshll.u32 %v2015_v5, 16  ;;  %v1326_v56 = vadd.s32 %v1324_v39, %v1318_v1 }
  0xa6   : > { %v2748_v58 = vsel %vm15150_vm4, %v10731_v26, %v2747_v35  ;;  %v2116_v52 = vrot.slane %v2114_v61, 4  ;;  %v1304_v49 = vshrl.u32 %v1303_v22, 4  ;;  %v1322_v53 = vshrl.u32 %v10815_v20, 16 }
  0xa7   : > { %9234 = vmatmul.msk.bf16.gmra.mxu3 %vm15145_vm10, %v2748_v58  ;;  %v1328_v2 = vsel %vm1327_vm15, 1, %v14979_v19  ;;  %v2120_v38 = vrot.slane %v2118_v21, 6  ;;  %v2123_v4 = vrot.slane %v2121_v47, 7  ;;  %v1892_v26 = vadd.f32 %v10850_v11, %v10804_v9 }
  0xa8   : > { %v1330_v14 = vadd.s32 %v1328_v2, %v1326_v56  ;;  %v1305_v55 = vmul.u32 18, %v1304_v49  ;;  %v10856_v48 = vadd.f32 %v10850_v11, %v1853_v7  ;;  %v10859_v20 = vadd.s32 48, %v10365_v3 }
  0xa9   : > { %v10862_v17 = vadd.s32 56, %v10365_v3  ;;  %v10865_v62 = vor.u32 %v2123_v4, %v2120_v38  ;;  %v2326_v1 = vrot.slane %v10787_v57, 4  ;;  %v2749_v44 = vshrl.u32 %v10818_v25, 16 }
  0xaa   : > { %v1331_v18 = vadd.s32 %v1330_v14, %v1320_v42  ;;  %v1306_v9 = vsub.s32 %v10780_v8, %v1305_v55  ;;  %v703_v27 = vand.u32 65535, %v10859_v20  ;;  %v704_v10 = vshrl.u32 %v10859_v20, 16 }
  0xab   : > { %v10873_v61 = vmul.f32 %v10801_v24, %v1792_v51  ;;  %v2125_v60 = vsel %vm10493_vm11, %v2116_v52, %v10865_v62  ;;  %v732_v12 = vand.u32 65535, %v10862_v17  ;;  %v10880_v32 = vmul.f32 %v10801_v24, %v1793_v6 }
  0xac   : > { %v1332_v23 = vadd.s32 %v1331_v18, %v1322_v53  ;;  %2471 = vst.msk [vmem:[#allocation2 + $0x1c] sm:$0xf] %vm15151_vm0, %v2125_v60  ;;  %vm1596_vm13 = vcmp.ne.s32.totalorder %v1306_v9, 0  ;;  %vm1632_vm15 = vcmp.lt.s32.totalorder %v1306_v9, 0  ;;  %v1704_v8 = vadd.s32 18, %v1306_v9 }
  0xad   : > { %v733_v25 = vshrl.u32 %v10862_v17, 16  ;;  %vm1668_vm4 = vmand %vm1632_vm15, %vm1596_vm13  ;;  %v706_v46 = vmul.u32 14564, %v703_v27  ;;  %v707_v42 = vmul.u32 58254, %v703_v27  ;;  %v708_v22 = vmul.u32 14564, %v704_v10 }
  0xae   : > { %v1333_v5 = vshrl.u32 %v1332_v23, 4  ;;  %v1740_v39 = vsel %vm1668_vm4, %v1704_v8, %v1306_v9  ;;  %v10884_v7 = vor.u32 %v2749_v44, %v2747_v35  ;;  %v709_v58 = vmul.u32 58254, %v704_v10 }
  0xaf   : > { %v10886_v21 = vmul.u32 58254, %v732_v12  ;;  %vm10888_vm10 = vcmp.lt.s32.totalorder %v1740_v39, 16  ;;  %v15152_v56 = vmov 0  ;;  %v710_v52 = vshll.u32 %v707_v42, 16 }
  0xb0   : > { %v1334_v47 = vmul.u32 18, %v1333_v5  ;;  %v15153_v56 = vsel %vm10888_vm10, 4294967295, %v15152_v56  ;;  %v735_v49 = vmul.u32 14564, %v732_v12  ;;  %v2000_v53 = vsel %vm10888_vm10, %v1892_v26, 0.0 }
  0xb1   : > { %15154 = vst [vmem:[#allocation19_spill] sm:$0xff] %v15153_v56  ;;  %v711_v2 = vshrl.u32 %v707_v42, 16  ;;  %v712_v38 = vshll.u32 %v708_v22, 16  ;;  %v10894_v4 = vmul.u32 14564, %v733_v25  ;;  %v2036_v14 = vpack.c.bf16 %v2000_v53, %v2000_v53 }
  0xb2   : > { %v1335_v35 = vsub.s32 %v10785_v54, %v1334_v47  ;;  %vm714_vm0 = vc.u32 %v706_v46, %v710_v52  ;;  %v716_v51 = vadd.s32 %v710_v52, %v706_v46  ;;  %v713_v55 = vshrl.u32 %v708_v22, 16 }
  0xb3   : > { %v715_v6 = vsel %vm714_vm0, 1, %v14979_v19  ;;  %v738_v18 = vmul.u32 58254, %v733_v25  ;;  %v739_v44 = vshll.u32 %v10886_v21, 16  ;;  %v10899_v9 = vld [vmem:[#allocation2 + $0x18] sm:$0xff]  ;;  %v2328_v27 = vshrl.u32 %v2036_v14, 16 }
  0xb4   : > { %vm1597_vm13 = vcmp.ne.s32.totalorder %v1335_v35, 0  ;;  %vm1633_vm15 = vcmp.lt.s32.totalorder %v1335_v35, 0  ;;  %v1705_v26 = vadd.s32 18, %v1335_v35  ;;  %v2331_v10 = vshll.u32 %v2036_v14, 16 }
  0xb5   : > { %vm1669_vm4 = vmand %vm1633_vm15, %vm1597_vm13  ;;  %v717_v60 = vadd.s32 %v715_v6, %v709_v58  ;;  %vm718_vm10 = vc.u32 %v716_v51, %v712_v38  ;;  %v741_v54 = vshll.u32 %v10894_v4, 16  ;;  %v2665_v23 = vshll.u32 %v10899_v9, 16 }
  0xb6   : > { %v1741_v12 = vsel %vm1669_vm4, %v1705_v26, %v1335_v35  ;;  %v2330_v8 = vrot.slane %v2328_v27, 6  ;;  %v719_v25 = vsel %vm718_vm10, 1, %v14979_v19  ;;  %vm15155_vm0 = vcmask 130048  }
  0xb7   : > { %9247 = vmatmul.msk.bf16.gmra.mxu1 %vm15155_vm0, %v10899_v9  ;;  %vm10906_vm2 = vcmp.lt.s32.totalorder %v1741_v12, 16  ;;  %v15156_v5 = vmov 0  ;;  %v2333_v46 = vrot.slane %v2331_v10, 7  ;;  %v721_v42 = vadd.s32 %v719_v25, %v717_v60  ;;  %vm15160_vm4 = vmmov %vm15155_vm0 }
  0xb8   : > { %v15157_v5 = vsel %vm10906_vm2, 4294967295, %v15156_v5  ;;  %vm743_vm13 = vc.u32 %v735_v49, %v739_v44  ;;  %v10910_v22 = vrot.slane %v2665_v23, 1  ;;  %v2001_v39 = vsel %vm10906_vm2, %v10856_v48, 0.0 }
  0xb9   : > { %15158 = vst [vmem:[#allocation20_spill] sm:$0xff] %v15157_v5  ;;  %v744_v58 = vsel %vm743_vm13, 1, %v14979_v19  ;;  %v745_v47 = vadd.s32 %v739_v44, %v735_v49  ;;  %v2037_v52 = vpack.c.bf16 %v2001_v39, %v2001_v39  ;;  %v2334_v53 = vor.u32 %v2333_v46, %v2330_v8 }
  0xba   : > { %v722_v38 = vadd.s32 %v721_v42, %v711_v2  ;;  %v746_v35 = vadd.s32 %v744_v58, %v738_v18  ;;  %vm15159_vm10 = vsmask.f32 7424  ;;  %v740_v51 = vshrl.u32 %v10886_v21, 16 }
  0xbb   : > { %v2668_v14 = vsel %vm15159_vm10, %v10833_v30, %v10910_v22  ;;  %v742_v6 = vshrl.u32 %v10894_v4, 16  ;;  %vm747_vm15 = vc.u32 %v745_v47, %v741_v54  ;;  %v2335_v48 = vsel %vm10493_vm11, %v2326_v1, %v2334_v53 }
  0xbc   : > { %9224 = vmatmul.msk.bf16.gmra.mxu0 %vm15160_vm4, %v2668_v14  ;;  %v2338_v49 = vshrl.u32 %v2037_v52, 16  ;;  %v2341_v44 = vshll.u32 %v2037_v52, 16  ;;  %v1872_v2 = vadd.f32 %v10850_v11, %v10873_v61  ;;  %v2336_v18 = vrot.slane %v2334_v53, 4 }
  0xbd   : > { %vm15161_vm0 = vcmask 125952   ;;  %v723_v30 = vadd.s32 %v722_v38, %v713_v55  ;;  %v748_v21 = vsel %vm747_vm15, 1, %v14979_v19  ;;  %v10931_v4 = vadd.s32 224, %v10365_v3 }
  0xbe   : > { %2492 = vst.msk [vmem:[#allocation2 + $0x70] sm:$0xf] %vm15161_vm0, %v2335_v48  ;;  %v2340_v26 = vrot.slane %v2338_v49, 6  ;;  %v2343_v27 = vrot.slane %v2341_v44, 7  ;;  %v750_v57 = vadd.s32 %v748_v21, %v746_v35  ;;  %v10934_v10 = vadd.s32 232, %v10365_v3  ;;  %vm15162_vm13 = vmmov %vm15161_vm0 }
  0xbf   : > { %v724_v1 = vshrl.u32 %v723_v30, 4  ;;  %v10938_v60 = vadd.f32 %v10850_v11, %v10880_v32  ;;  %v1341_v61 = vand.u32 65535, %v10931_v4  ;;  %v1342_v55 = vshrl.u32 %v10931_v4, 16 }
  0xc0   : > { %v10942_v54 = vor.u32 %v2343_v27, %v2340_v26  ;;  %v751_v23 = vadd.s32 %v750_v57, %v740_v51  ;;  %v2126_v12 = vrot.slane %v10865_v62, 4  ;;  %v1370_v8 = vand.u32 65535, %v10934_v10 }
  0xc1   : > { %v725_v25 = vmul.u32 18, %v724_v1  ;;  %v2669_v46 = vshrl.u32 %v10899_v9, 16  ;;  %v1344_v42 = vmul.u32 14564, %v1341_v61  ;;  %v1345_v39 = vmul.u32 58254, %v1341_v61 }
  0xc2   : > { %v2345_v32 = vsel %vm10493_vm11, %v2336_v18, %v10942_v54  ;;  %v752_v58 = vadd.s32 %v751_v23, %v742_v6  ;;  %v1346_v47 = vmul.u32 14564, %v1342_v55  ;;  %v1371_v52 = vshrl.u32 %v10934_v10, 16 }
  0xc3   : > { %2493 = vst.msk [vmem:[#allocation2 + $0x74] sm:$0xf] %vm15162_vm13, %v2345_v32  ;;  %v726_v53 = vsub.s32 %v10859_v20, %v725_v25  ;;  %v1347_v38 = vmul.u32 58254, %v1342_v55  ;;  %v1348_v35 = vshll.u32 %v1345_v39, 16  ;;  %v1349_v14 = vshrl.u32 %v1345_v39, 16 }
  0xc4   : > { %v753_v51 = vshrl.u32 %v752_v58, 4  ;;  %v1350_v48 = vshll.u32 %v1346_v47, 16  ;;  %v1373_v49 = vmul.u32 14564, %v1370_v8  ;;  %v10953_v44 = vmul.u32 58254, %v1370_v8  ;;  %v1814_v8 = vld [vmem:[%s10402_s22 + $0xe0] sm:$0xff] }
  0xc5   : > { %vm1576_vm10 = vcmp.ne.s32.totalorder %v726_v53, 0  ;;  %vm1612_vm15 = vcmp.lt.s32.totalorder %v726_v53, 0  ;;  %v1684_v18 = vadd.s32 18, %v726_v53  ;;  %vm1352_vm4 = vc.u32 %v1344_v42, %v1348_v35 }
  0xc6   : > { %v754_v6 = vmul.u32 18, %v753_v51  ;;  %vm1648_vm0 = vmand %vm1612_vm15, %vm1576_vm10  ;;  %v1353_v30 = vsel %vm1352_vm4, 1, %v14979_v19  ;;  %v1354_v21 = vadd.s32 %v1348_v35, %v1344_v42  ;;  %v10956_v26 = vmul.u32 14564, %v1371_v52 }
  0xc7   : > { %v1720_v20 = vsel %vm1648_vm0, %v1684_v18, %v726_v53  ;;  %v1351_v27 = vshrl.u32 %v1346_v47, 16  ;;  %v1355_v57 = vadd.s32 %v1353_v30, %v1347_v38  ;;  %v1377_v1 = vshll.u32 %v10953_v44, 16  ;;  %v1815_v30 = vld [vmem:[%s10402_s22 + $0xe8] sm:$0xff] }
  0xc8   : > { %v755_v61 = vsub.s32 %v10862_v17, %v754_v6  ;;  %vm10960_vm13 = vcmp.lt.s32.totalorder %v1720_v20, 16  ;;  %v15163_v55 = vmov 0  ;;  %vm1356_vm2 = vc.u32 %v1354_v21, %v1350_v48 }
  0xc9   : > { %v15164_v55 = vsel %vm10960_vm13, 4294967295, %v15163_v55  ;;  %v1376_v23 = vmul.u32 58254, %v1371_v52  ;;  %v1980_v25 = vsel %vm10960_vm13, %v1872_v2, 0.0  ;;  %v1357_v42 = vsel %vm1356_vm2, 1, %v14979_v19 }
  0xca   : > { %15165 = vst [vmem:[#allocation21_spill] sm:$0xff] %v15164_v55  ;;  %v1378_v39 = vshrl.u32 %v10953_v44, 16  ;;  %v1379_v32 = vshll.u32 %v10956_v26, 16  ;;  %v10970_v58 = vld [vmem:[#allocation2 + $0x70] sm:$0xff]  ;;  %vm1577_vm10 = vcmp.ne.s32.totalorder %v755_v61, 0  ;;  %vm1613_vm15 = vcmp.lt.s32.totalorder %v755_v61, 0 }
  0xcb   : > { %v1685_v17 = vadd.s32 18, %v755_v61  ;;  %v2016_v47 = vpack.c.bf16 %v1980_v25, %v1980_v25  ;;  %vm1649_vm4 = vmand %vm1613_vm15, %vm1577_vm10  ;;  %v1359_v53 = vadd.s32 %v1357_v42, %v1355_v57  ;;  %vm1381_vm0 = vc.u32 %v1373_v49, %v1377_v1 }
  0xcc   : > { %v1383_v52 = vadd.s32 %v1377_v1, %v1373_v49  ;;  %v1854_v38 = vmul.f32 %v10801_v24, %v1814_v8  ;;  %v2753_v2 = vshll.u32 %v10970_v58, 16  ;;  %vm15166_vm2 = vcmask 130048  }
  0xcd   : > { %9258 = vmatmul.msk.bf16.gmra.mxu2 %vm15166_vm2, %v10970_v58  ;;  %v1721_v35 = vsel %vm1649_vm4, %v1685_v17, %v755_v61  ;;  %v2128_v51 = vshrl.u32 %v2016_v47, 16  ;;  %v2131_v48 = vshll.u32 %v2016_v47, 16  ;;  %v15167_v44 = vmov 0  ;;  %vm15171_vm4 = vmmov %vm15166_vm2 }
  0xce   : > { %vm10976_vm1 = vcmp.lt.s32.totalorder %v1721_v35, 16  ;;  %v1360_v18 = vadd.s32 %v1359_v53, %v1349_v14  ;;  %v1382_v6 = vsel %vm1381_vm0, 1, %v14979_v19  ;;  %vm1385_vm10 = vc.u32 %v1383_v52, %v1379_v32 }
  0xcf   : > { %v15168_v44 = vsel %vm10976_vm1, 4294967295, %v15167_v44  ;;  %v10982_v49 = vrot.slane %v2753_v2, 1  ;;  %v1981_v21 = vsel %vm10976_vm1, %v10938_v60, 0.0  ;;  %v2130_v20 = vrot.slane %v2128_v51, 6 }
  0xd0   : > { %15169 = vst [vmem:[#allocation22_spill] sm:$0xff] %v15168_v44  ;;  %v2133_v57 = vrot.slane %v2131_v48, 7  ;;  %v2017_v1 = vpack.c.bf16 %v1981_v21, %v1981_v21  ;;  %v1361_v61 = vadd.s32 %v1360_v18, %v1351_v27  ;;  %v1384_v8 = vadd.s32 %v1382_v6, %v1376_v23  ;;  %v1794_v18 = vld [vmem:[%s10402_s22 + $0x40] sm:$0xff] }
  0xd1   : > { %v1386_v25 = vsel %vm1385_vm10, 1, %v14979_v19  ;;  %vm15170_vm15 = vsmask.f32 7424  ;;  %v1380_v32 = vshrl.u32 %v10956_v26, 16  ;;  %v1855_v17 = vmul.f32 %v10801_v24, %v1815_v30 }
  0xd2   : > { %v2756_v14 = vsel %vm15170_vm15, %v10884_v7, %v10982_v49  ;;  %v2134_v42 = vor.u32 %v2133_v57, %v2130_v20  ;;  %v2138_v60 = vshrl.u32 %v2017_v1, 16  ;;  %v2141_v47 = vshll.u32 %v2017_v1, 16  ;;  %v1795_v57 = vld [vmem:[%s10402_s22 + $0x48] sm:$0xff] }
  0xd3   : > { %9235 = vmatmul.msk.bf16.gmra.mxu3 %vm15171_vm4, %v2756_v14  ;;  %v1362_v53 = vshrl.u32 %v1361_v61, 4  ;;  %v1388_v52 = vadd.s32 %v1386_v25, %v1384_v8  ;;  %v11001_v7 = vor.u32 %v2669_v46, %v10910_v22  ;;  %v1894_v26 = vadd.f32 %v10850_v11, %v1854_v38 }
  0xd4   : > { %v2135_v27 = vsel %vm10493_vm11, %v2126_v12, %v2134_v42  ;;  %v2136_v23 = vrot.slane %v2134_v42, 4  ;;  %v2140_v2 = vrot.slane %v2138_v60, 6  ;;  %v2143_v35 = vrot.slane %v2141_v47, 7 }
  0xd5   : > { %vm15172_vm0 = vcmask 125952   ;;  %v1363_v51 = vmul.u32 18, %v1362_v53  ;;  %v1389_v48 = vadd.s32 %v1388_v52, %v1378_v39  ;;  %v1895_v62 = vadd.f32 %v10850_v11, %v1855_v17 }
  0xd6   : > { %2472 = vst.msk [vmem:[#allocation2 + $0x20] sm:$0xf] %vm15172_vm0, %v2135_v27  ;;  %v11009_v6 = vadd.s32 64, %v10365_v3  ;;  %v11012_v9 = vadd.s32 72, %v10365_v3  ;;  %v11014_v22 = vor.u32 %v2143_v35, %v2140_v2  ;;  %v11023_v1 = vmul.f32 %v10801_v24, %v1794_v18  ;;  %vm15173_vm15 = vmmov %vm15172_vm0 }
  0xd7   : > { %v1364_v46 = vsub.s32 %v10931_v4, %v1363_v51  ;;  %v1390_v38 = vadd.s32 %v1389_v48, %v1380_v32  ;;  %v11031_v47 = vmul.f32 %v10801_v24, %v1795_v57  ;;  %v15174_v35 = vmov 0 }
  0xd8   : > { %v761_v39 = vand.u32 65535, %v11009_v6  ;;  %v762_v21 = vshrl.u32 %v11009_v6, 16  ;;  %v790_v20 = vand.u32 65535, %v11012_v9  ;;  %v2145_v61 = vsel %vm10493_vm11, %v2136_v23, %v11014_v22 }
  0xd9   : > { %v1391_v8 = vshrl.u32 %v1390_v38, 4  ;;  %vm1598_vm2 = vcmp.ne.s32.totalorder %v1364_v46, 0  ;;  %vm1634_vm10 = vcmp.lt.s32.totalorder %v1364_v46, 0  ;;  %2473 = vst.msk [vmem:[#allocation2 + $0x24] sm:$0xf] %vm15173_vm15, %v2145_v61  ;;  %v1706_v4 = vadd.s32 18, %v1364_v46 }
  0xda   : > { %vm1670_vm4 = vmand %vm1634_vm10, %vm1598_vm2  ;;  %v764_v25 = vmul.u32 14564, %v761_v39  ;;  %v765_v14 = vmul.u32 58254, %v761_v39  ;;  %v766_v42 = vmul.u32 14564, %v762_v21  ;;  %v767_v17 = vmul.u32 58254, %v762_v21 }
  0xdb   : > { %v1392_v32 = vmul.u32 18, %v1391_v8  ;;  %v791_v60 = vshrl.u32 %v11012_v9, 16  ;;  %v1742_v53 = vsel %vm1670_vm4, %v1706_v4, %v1364_v46  ;;  %v793_v23 = vmul.u32 14564, %v790_v20 }
  0xdc   : > { %v768_v52 = vshll.u32 %v765_v14, 16  ;;  %v770_v27 = vshll.u32 %v766_v42, 16  ;;  %vm11034_vm0 = vcmp.lt.s32.totalorder %v1742_v53, 16  ;;  %v769_v51 = vshrl.u32 %v765_v14, 16 }
  0xdd   : > { %v1393_v2 = vsub.s32 %v10934_v10, %v1392_v32  ;;  %v15175_v35 = vsel %vm11034_vm0, 4294967295, %v15174_v35  ;;  %v794_v48 = vmul.u32 58254, %v790_v20  ;;  %v2002_v18 = vsel %vm11034_vm0, %v1894_v26, 0.0 }
  0xde   : > { %15176 = vst [vmem:[#allocation23_spill] sm:$0xff] %v15175_v35  ;;  %vm772_vm2 = vc.u32 %v764_v25, %v768_v52  ;;  %v774_v38 = vadd.s32 %v768_v52, %v764_v25  ;;  %v11040_v39 = vmul.u32 14564, %v791_v60  ;;  %v2038_v21 = vpack.c.bf16 %v2002_v18, %v2002_v18 }
  0xdf   : > { %vm1599_vm10 = vcmp.ne.s32.totalorder %v1393_v2, 0  ;;  %vm1635_vm15 = vcmp.lt.s32.totalorder %v1393_v2, 0  ;;  %v1707_v46 = vadd.s32 18, %v1393_v2  ;;  %v771_v57 = vshrl.u32 %v766_v42, 16 }
  0xe0   : > { %vm1671_vm4 = vmand %vm1635_vm15, %vm1599_vm10  ;;  %v773_v10 = vsel %vm772_vm2, 1, %v14979_v19  ;;  %vm776_vm1 = vc.u32 %v774_v38, %v770_v27  ;;  %v797_v61 = vshll.u32 %v794_v48, 16  ;;  %v11043_v8 = vld [vmem:[#allocation2 + $0x20] sm:$0xff]  ;;  %v2348_v4 = vshrl.u32 %v2038_v21, 16 }
  0xe1   : > { %v1743_v20 = vsel %vm1671_vm4, %v1707_v46, %v1393_v2  ;;  %v2351_v14 = vshll.u32 %v2038_v21, 16  ;;  %v775_v26 = vadd.s32 %v773_v10, %v767_v17  ;;  %v15177_v25 = vmov 0 }
  0xe2   : > { %vm11045_vm0 = vcmp.lt.s32.totalorder %v1743_v20, 16  ;;  %v777_v32 = vsel %vm776_vm1, 1, %v14979_v19  ;;  %v796_v53 = vmul.u32 58254, %v791_v60  ;;  %v799_v52 = vshll.u32 %v11040_v39, 16 }
  0xe3   : > { %v15178_v25 = vsel %vm11045_vm0, 4294967295, %v15177_v25  ;;  %v2673_v42 = vshll.u32 %v11043_v8, 16  ;;  %v2003_v27 = vsel %vm11045_vm0, %v1895_v62, 0.0  ;;  %v2350_v18 = vrot.slane %v2348_v4, 6 }
  0xe4   : > { %15179 = vst [vmem:[#allocation24_spill] sm:$0xff] %v15178_v25  ;;  %v2353_v38 = vrot.slane %v2351_v14, 7  ;;  %vm15180_vm2 = vcmask 130048   ;;  %v2039_v17 = vpack.c.bf16 %v2003_v27, %v2003_v27  ;;  %v779_v2 = vadd.s32 %v777_v32, %v775_v26 }
  0xe5   : > { %9248 = vmatmul.msk.bf16.gmra.mxu1 %vm15180_vm2, %v11043_v8  ;;  %v798_v46 = vshrl.u32 %v794_v48, 16  ;;  %vm801_vm10 = vc.u32 %v793_v23, %v797_v61  ;;  %v11056_v21 = vrot.slane %v2673_v42, 1  ;;  %v803_v20 = vadd.s32 %v797_v61, %v793_v23  ;;  %vm15183_vm4 = vmmov %vm15180_vm2 }
  0xe6   : > { %v2354_v10 = vor.u32 %v2353_v38, %v2350_v18  ;;  %v802_v60 = vsel %vm801_vm10, 1, %v14979_v19  ;;  %v2358_v30 = vshrl.u32 %v2039_v17, 16  ;;  %v2361_v12 = vshll.u32 %v2039_v17, 16 }
  0xe7   : > { %v780_v35 = vadd.s32 %v779_v2, %v769_v51  ;;  %v804_v25 = vadd.s32 %v802_v60, %v796_v53  ;;  %vm15181_vm1 = vsmask.f32 7424  ;;  %v15182_v4 = vrot.slane %v10942_v54, 4 }
  0xe8   : > { %v2676_v62 = vsel %vm15181_vm1, %v11001_v7, %v11056_v21  ;;  %v2356_v14 = vrot.slane %v2354_v10, 4  ;;  %vm805_vm15 = vc.u32 %v803_v20, %v799_v52  ;;  %v2360_v26 = vrot.slane %v2358_v30, 6  ;;  %v1817_v20 = vld [vmem:[%s10402_s22 + $0xf8] sm:$0xff] }
  0xe9   : > { %v2355_v48 = vsel %vm10493_vm11, %v15182_v4, %v2354_v10  ;;  %9225 = vmatmul.msk.bf16.gmra.mxu0 %vm15183_vm4, %v2676_v62  ;;  %v2363_v23 = vrot.slane %v2361_v12, 7  ;;  %vm15184_vm2 = vcmask 125952   ;;  %v781_v51 = vadd.s32 %v780_v35, %v771_v57  ;;  %v1816_v12 = vld [vmem:[%s10402_s22 + $0xf0] sm:$0xff] }
  0xea   : > { %2494 = vst.msk [vmem:[#allocation2 + $0x78] sm:$0xf] %vm15184_vm2, %v2355_v48  ;;  %v806_v61 = vsel %vm805_vm15, 1, %v14979_v19  ;;  %v800_v32 = vshrl.u32 %v11040_v39, 16  ;;  %v15185_v54 = vshrl.u32 %v10970_v58, 16  ;;  %v11078_v27 = vadd.s32 240, %v10365_v3  ;;  %vm15186_vm10 = vmmov %vm15184_vm2 }
  0xeb   : > { %v808_v7 = vadd.s32 %v806_v61, %v804_v25  ;;  %v11070_v53 = vor.u32 %v2363_v23, %v2360_v26  ;;  %v782_v52 = vshrl.u32 %v781_v51, 4  ;;  %v1874_v35 = vadd.f32 %v10850_v11, %v11023_v1 }
  0xec   : > { %v11075_v42 = vor.u32 %v15185_v54, %v10982_v49  ;;  %v1875_v39 = vadd.f32 %v10850_v11, %v11031_v47  ;;  %v11086_v57 = vadd.s32 248, %v10365_v3  ;;  %v1399_v18 = vand.u32 65535, %v11078_v27 }
  0xed   : > { %v809_v30 = vadd.s32 %v808_v7, %v798_v46  ;;  %v2365_v58 = vsel %vm10493_vm11, %v2356_v14, %v11070_v53  ;;  %v783_v49 = vmul.u32 18, %v782_v52  ;;  %v1400_v17 = vshrl.u32 %v11078_v27, 16 }
  0xee   : > { %2495 = vst.msk [vmem:[#allocation2 + $0x7c] sm:$0xf] %vm15186_vm10, %v2365_v58  ;;  %v11097_v47 = vmul.f32 %v10801_v24, %v1816_v12  ;;  %v1402_v46 = vmul.u32 14564, %v1399_v18  ;;  %v1403_v10 = vmul.u32 58254, %v1399_v18  ;;  %v1428_v60 = vand.u32 65535, %v11086_v57 }
  0xef   : > { %v810_v38 = vadd.s32 %v809_v30, %v800_v32  ;;  %v784_v2 = vsub.s32 %v11009_v6, %v783_v49  ;;  %v1404_v4 = vmul.u32 14564, %v1400_v17  ;;  %v1405_v48 = vmul.u32 58254, %v1400_v17 }
  0xf0   : > { %v1429_v14 = vshrl.u32 %v11086_v57, 16  ;;  %v1406_v23 = vshll.u32 %v1403_v10, 16  ;;  %v1431_v32 = vmul.u32 14564, %v1428_v60  ;;  %v11104_v6 = vmul.f32 %v10801_v24, %v1817_v20 }
  0xf1   : > { %v811_v62 = vshrl.u32 %v810_v38, 4  ;;  %vm1578_vm1 = vcmp.ne.s32.totalorder %v784_v2, 0  ;;  %vm1614_vm15 = vcmp.lt.s32.totalorder %v784_v2, 0  ;;  %v1686_v26 = vadd.s32 18, %v784_v2 }
  0xf2   : > { %vm1650_vm4 = vmand %vm1614_vm15, %vm1578_vm1  ;;  %v1408_v61 = vshll.u32 %v1404_v4, 16  ;;  %vm1410_vm2 = vc.u32 %v1402_v46, %v1406_v23  ;;  %v1412_v54 = vadd.s32 %v1406_v23, %v1402_v46  ;;  %v1432_v52 = vmul.u32 58254, %v1428_v60 }
  0xf3   : > { %v812_v51 = vmul.u32 18, %v811_v62  ;;  %v1722_v7 = vsel %vm1650_vm4, %v1686_v26, %v784_v2  ;;  %v15187_v30 = vmov 0  ;;  %v1407_v58 = vshrl.u32 %v1403_v10, 16 }
  0xf4   : > { %vm11107_vm10 = vcmp.lt.s32.totalorder %v1722_v7, 16  ;;  %v1411_v49 = vsel %vm1410_vm2, 1, %v14979_v19  ;;  %vm1414_vm1 = vc.u32 %v1412_v54, %v1408_v61  ;;  %v1433_v2 = vmul.u32 14564, %v1429_v14 }
  0xf5   : > { %v813_v12 = vsub.s32 %v11012_v9, %v812_v51  ;;  %v15188_v30 = vsel %vm11107_vm10, 4294967295, %v15187_v30  ;;  %v11112_v18 = vld [vmem:[#allocation2 + $0x78] sm:$0xff]  ;;  %v1982_v38 = vsel %vm11107_vm10, %v1874_v35, 0.0  ;;  %v1413_v17 = vadd.s32 %v1411_v49, %v1405_v48 }
  0xf6   : > { %15189 = vst [vmem:[#allocation25_spill] sm:$0xff] %v15188_v30  ;;  %v2018_v60 = vpack.c.bf16 %v1982_v38, %v1982_v38  ;;  %v2761_v9 = vshll.u32 %v11112_v18, 16  ;;  %vm15190_vm0 = vcmask 130048   ;;  %v1409_v10 = vshrl.u32 %v1404_v4, 16 }
  0xf7   : > { %vm1579_vm15 = vcmp.ne.s32.totalorder %v813_v12, 0  ;;  %vm1615_vm4 = vcmp.lt.s32.totalorder %v813_v12, 0  ;;  %v1687_v46 = vadd.s32 18, %v813_v12  ;;  %9259 = vmatmul.msk.bf16.gmra.mxu2 %vm15190_vm0, %v11112_v18  ;;  %v1415_v20 = vsel %vm1414_vm1, 1, %v14979_v19 }
  0xf8   : > { %vm1651_vm13 = vmand %vm1615_vm4, %vm1579_vm15  ;;  %v1435_v62 = vshll.u32 %v1432_v52, 16  ;;  %v2148_v23 = vshrl.u32 %v2018_v60, 16  ;;  %v2151_v35 = vshll.u32 %v2018_v60, 16  ;;  %v1417_v48 = vadd.s32 %v1415_v20, %v1413_v17 }
  0xf9   : > { %v1723_v26 = vsel %vm1651_vm13, %v1687_v46, %v813_v12  ;;  %v11120_v51 = vrot.slane %v2761_v9, 1  ;;  %v15191_v61 = vmov 0  ;;  %v1434_v7 = vmul.u32 58254, %v1429_v14 }
  0xfa   : > { %vm11122_vm2 = vcmp.lt.s32.totalorder %v1723_v26, 16  ;;  %v1437_v54 = vshll.u32 %v1433_v2, 16  ;;  %v2150_v38 = vrot.slane %v2148_v23, 6  ;;  %v2153_v4 = vrot.slane %v2151_v35, 7 }
  0xfb   : > { %v15192_v61 = vsel %vm11122_vm2, 4294967295, %v15191_v61  ;;  %v1983_v49 = vsel %vm11122_vm2, %v1875_v39, 0.0  ;;  %v1418_v1 = vadd.s32 %v1417_v48, %v1407_v58  ;;  %vm15194_vm13 = vsmask.f32 7424 }
  0xfc   : > { %15193 = vst [vmem:[#allocation26_spill] sm:$0xff] %v15192_v61  ;;  %v2764_v12 = vsel %vm15194_vm13, %v11075_v42, %v11120_v51  ;;  %v2019_v46 = vpack.c.bf16 %v1983_v49, %v1983_v49  ;;  %vm1439_vm0 = vc.u32 %v1431_v32, %v1435_v62  ;;  %v1441_v17 = vadd.s32 %v1435_v62, %v1431_v32 }
  0xfd   : > { %vm15195_vm1 = vcmask 130048   ;;  %v2154_v60 = vor.u32 %v2153_v4, %v2150_v38  ;;  %v1419_v9 = vadd.s32 %v1418_v1, %v1409_v10  ;;  %v1436_v20 = vshrl.u32 %v1432_v52, 16 }
  0xfe   : > { %9236 = vmatmul.msk.bf16.gmra.mxu3 %vm15195_vm1, %v2764_v12  ;;  %v1440_v14 = vsel %vm1439_vm0, 1, %v14979_v19  ;;  %v2158_v26 = vshrl.u32 %v2019_v46, 16  ;;  %v2161_v25 = vshll.u32 %v2019_v46, 16  ;;  %vm1443_vm15 = vc.u32 %v1441_v17, %v1437_v54 }
  0xff   : > { %v1442_v39 = vadd.s32 %v1440_v14, %v1434_v7  ;;  %v15196_v58 = vrot.slane %v11014_v22, 4  ;;  %v1420_v42 = vshrl.u32 %v1419_v9, 4  ;;  %v1438_v35 = vshrl.u32 %v1433_v2, 16 }
 0x100   : > { %v1444_v32 = vsel %vm1443_vm15, 1, %v14979_v19  ;;  %v2156_v62 = vrot.slane %v2154_v60, 4  ;;  %v2160_v48 = vrot.slane %v2158_v26, 6  ;;  %v2163_v49 = vrot.slane %v2161_v25, 7 }
 0x101   : > { %v2155_v23 = vsel %vm10493_vm11, %v15196_v58, %v2154_v60  ;;  %vm15197_vm4 = vcmask 125952   ;;  %v1446_v1 = vadd.s32 %v1444_v32, %v1442_v39  ;;  %v15198_v52 = vshrl.u32 %v11043_v8, 16 }
 0x102   : > { %2474 = vst.msk [vmem:[#allocation2 + $0x28] sm:$0xf] %vm15197_vm4, %v2155_v23  ;;  %v1421_v22 = vmul.u32 18, %v1420_v42  ;;  %v11145_v7 = vadd.s32 80, %v10365_v3  ;;  %v11148_v2 = vadd.s32 88, %v10365_v3  ;;  %v11150_v54 = vor.u32 %v2163_v49, %v2160_v48  ;;  %vm15199_vm13 = vmmov %vm15197_vm4  ;;  %v10077_v49 = vld [vmem:[%s14943_s3 + $0x10] sm:$0xff] }
 0x103   : > { %v11142_v10 = vor.u32 %v15198_v52, %v11056_v21  ;;  %v1447_v38 = vadd.s32 %v1446_v1, %v1436_v20  ;;  %v1896_v25 = vadd.f32 %v10850_v11, %v11097_v47  ;;  %v11156_v4 = vadd.f32 %v10850_v11, %v11104_v6  ;;  %v1796_v20 = vld [vmem:[%s10402_s22 + $0x50] sm:$0xff]  ;;  %3202 = vmatpush.bf16.msrb.mxu2 %v10077_v49 }
 0x104   : > { %v1422_v8 = vsub.s32 %v11078_v27, %v1421_v22  ;;  %v2366_v21 = vrot.slane %v11070_v53, 4  ;;  %v819_v12 = vand.u32 65535, %v11145_v7  ;;  %v820_v46 = vshrl.u32 %v11145_v7, 16 }
 0x105   : > { %v2165_v17 = vsel %vm10493_vm11, %v2156_v62, %v11150_v54  ;;  %v1448_v60 = vadd.s32 %v1447_v38, %v1438_v35  ;;  %v848_v47 = vand.u32 65535, %v11148_v2  ;;  %v849_v6 = vshrl.u32 %v11148_v2, 16 }
 0x106   : > { %2475 = vst.msk [vmem:[#allocation2 + $0x2c] sm:$0xf] %vm15199_vm13, %v2165_v17  ;;  %vm1600_vm0 = vcmp.ne.s32.totalorder %v1422_v8, 0  ;;  %vm1636_vm1 = vcmp.lt.s32.totalorder %v1422_v8, 0  ;;  %v1708_v27 = vadd.s32 18, %v1422_v8  ;;  %v822_v26 = vmul.u32 14564, %v819_v12 }
 0x107   : > { %v1449_v14 = vshrl.u32 %v1448_v60, 4  ;;  %vm1672_vm15 = vmand %vm1636_vm1, %vm1600_vm0  ;;  %v823_v39 = vmul.u32 58254, %v819_v12  ;;  %v11170_v58 = vmul.u32 14564, %v820_v46  ;;  %v825_v42 = vmul.u32 58254, %v820_v46 }
 0x108   : > { %v1744_v23 = vsel %vm1672_vm15, %v1708_v27, %v1422_v8  ;;  %v11172_v35 = vmul.u32 58254, %v848_v47  ;;  %v11175_v32 = vmul.f32 %v10801_v24, %v1796_v20  ;;  %v15200_v48 = vmov 0 }
 0x109   : > { %v1450_v62 = vmul.u32 18, %v1449_v14  ;;  %vm11177_vm4 = vcmp.lt.s32.totalorder %v1744_v23, 16  ;;  %v826_v1 = vshll.u32 %v823_v39, 16  ;;  %v851_v52 = vmul.u32 14564, %v848_v47 }
 0x10a   : > { %v15201_v48 = vsel %vm11177_vm4, 4294967295, %v15200_v48  ;;  %v2004_v22 = vsel %vm11177_vm4, %v1896_v25, 0.0  ;;  %v827_v38 = vshrl.u32 %v823_v39, 16  ;;  %v828_v8 = vshll.u32 %v11170_v58, 16 }
 0x10b   : > { %15202 = vst [vmem:[#allocation27_spill] sm:$0xff] %v15201_v48  ;;  %v11187_v12 = vmul.u32 14564, %v849_v6  ;;  %v1451_v24 = vsub.s32 %v11086_v57, %v1450_v62  ;;  %v2040_v46 = vpack.c.bf16 %v2004_v22, %v2004_v22  ;;  %vm830_vm13 = vc.u32 %v822_v26, %v826_v1  ;;  %v1799_v48 = vld [vmem:[%s10402_s22 + $0x68] sm:$0xff] }
 0x10c   : > { %v832_v17 = vadd.s32 %v826_v1, %v822_v26  ;;  %v829_v60 = vshrl.u32 %v11170_v58, 16  ;;  %v831_v20 = vsel %vm830_vm13, 1, %v14979_v19  ;;  %v854_v27 = vmul.u32 58254, %v849_v6 }
 0x10d   : > { %v855_v47 = vshll.u32 %v11172_v35, 16  ;;  %v11193_v14 = vld [vmem:[#allocation2 + $0x28] sm:$0xff]  ;;  %vm1601_vm0 = vcmp.ne.s32.totalorder %v1451_v24, 0  ;;  %vm1637_vm1 = vcmp.lt.s32.totalorder %v1451_v24, 0  ;;  %v1709_v25 = vadd.s32 18, %v1451_v24 }
 0x10e   : > { %v2368_v39 = vshrl.u32 %v2040_v46, 16  ;;  %vm1673_vm15 = vmand %vm1637_vm1, %vm1601_vm0  ;;  %v2371_v57 = vshll.u32 %v2040_v46, 16  ;;  %v833_v23 = vadd.s32 %v831_v20, %v825_v42  ;;  %vm834_vm4 = vc.u32 %v832_v17, %v828_v8  ;;  %v1797_v42 = vld [vmem:[%s10402_s22 + $0x58] sm:$0xff] }
 0x10f   : > { %v857_v26 = vshll.u32 %v11187_v12, 16  ;;  %v2681_v58 = vshll.u32 %v11193_v14, 16  ;;  %v1745_v62 = vsel %vm1673_vm15, %v1709_v25, %v1451_v24  ;;  %v835_v6 = vsel %vm834_vm4, 1, %v14979_v19 }
 0x110   : > { %v2370_v49 = vrot.slane %v2368_v39, 6  ;;  %vm15203_vm13 = vcmask 130048   ;;  %vm11200_vm2 = vcmp.lt.s32.totalorder %v1745_v62, 16  ;;  %v15204_v1 = vmov 0 }
 0x111   : > { %9249 = vmatmul.msk.bf16.gmra.mxu1 %vm15203_vm13, %v11193_v14  ;;  %v15205_v1 = vsel %vm11200_vm2, 4294967295, %v15204_v1  ;;  %v2373_v22 = vrot.slane %v2371_v57, 7  ;;  %v837_v9 = vadd.s32 %v835_v6, %v833_v23  ;;  %vm859_vm0 = vc.u32 %v851_v52, %v855_v47  ;;  %vm15208_vm15 = vmmov %vm15203_vm13 }
 0x112   : > { %15206 = vst [vmem:[#allocation28_spill] sm:$0xff] %v15205_v1  ;;  %v11205_v8 = vrot.slane %v2681_v58, 1  ;;  %v2005_v24 = vsel %vm11200_vm2, %v11156_v4, 0.0  ;;  %v860_v46 = vsel %vm859_vm0, 1, %v14979_v19  ;;  %v861_v17 = vadd.s32 %v855_v47, %v851_v52  ;;  %v11218_v58 = vld [vmem:[%s14941_s1] ss:$0 sm:$0xff] }
 0x113   : > { %v2041_v20 = vpack.c.bf16 %v2005_v24, %v2005_v24  ;;  %v2374_v25 = vor.u32 %v2373_v22, %v2370_v49  ;;  %v838_v39 = vadd.s32 %v837_v9, %v827_v38  ;;  %v862_v62 = vadd.s32 %v860_v46, %v854_v27 }
 0x114   : > { %vm15207_vm4 = vsmask.f32 7424  ;;  %v856_v23 = vshrl.u32 %v11172_v35, 16  ;;  %vm863_vm1 = vc.u32 %v861_v17, %v857_v26  ;;  %v1837_v4 = vmul.f32 %v11218_v58, %v1797_v42 }
 0x115   : > { %v2684_v57 = vsel %vm15207_vm4, %v11142_v10, %v11205_v8  ;;  %v2375_v9 = vsel %vm10493_vm11, %v2366_v21, %v2374_v25  ;;  %v2378_v52 = vshrl.u32 %v2041_v20, 16  ;;  %v2381_v38 = vshll.u32 %v2041_v20, 16 }
 0x116   : > { %9226 = vmatmul.msk.bf16.gmra.mxu0 %vm15208_vm15, %v2684_v57  ;;  %v858_v10 = vshrl.u32 %v11187_v12, 16  ;;  %v2376_v35 = vrot.slane %v2374_v25, 4  ;;  %vm15209_vm13 = vcmask 125952   ;;  %v839_v27 = vadd.s32 %v838_v39, %v829_v60 }
 0x117   : > { %2496 = vst.msk [vmem:[#allocation2 + $0x80] sm:$0xf] %vm15209_vm13, %v2375_v9  ;;  %v864_v47 = vsel %vm863_vm1, 1, %v14979_v19  ;;  %v11230_v26 = vadd.s32 256, %v10365_v3  ;;  %v2380_v49 = vrot.slane %v2378_v52, 6  ;;  %v2383_v6 = vrot.slane %v2381_v38, 7  ;;  %vm15211_vm0 = vmmov %vm15209_vm13 }
 0x118   : > { %v866_v22 = vadd.s32 %v864_v47, %v862_v62  ;;  %v11233_v53 = vadd.s32 264, %v10365_v3  ;;  %v15210_v21 = vshrl.u32 %v11112_v18, 16  ;;  %v840_v12 = vshrl.u32 %v839_v27, 4 }
 0x119   : > { %v1457_v24 = vand.u32 65535, %v11230_v26  ;;  %v1458_v60 = vshrl.u32 %v11230_v26, 16  ;;  %v11242_v46 = vor.u32 %v2383_v6, %v2380_v49  ;;  %v1876_v20 = vadd.f32 %v10850_v11, %v11175_v32 }
 0x11a   : > { %v11238_v42 = vor.u32 %v15210_v21, %v11120_v51  ;;  %v867_v17 = vadd.s32 %v866_v22, %v856_v23  ;;  %v1486_v25 = vand.u32 65535, %v11233_v53  ;;  %v841_v39 = vmul.u32 18, %v840_v12 }
 0x11b   : > { %v1877_v62 = vadd.f32 %v10850_v11, %v1837_v4  ;;  %v1460_v57 = vmul.u32 14564, %v1457_v24  ;;  %v1461_v18 = vmul.u32 58254, %v1457_v24  ;;  %v2385_v51 = vsel %vm10493_vm11, %v2376_v35, %v11242_v46 }
 0x11c   : > { %v868_v9 = vadd.s32 %v867_v17, %v858_v10  ;;  %v1462_v52 = vmul.u32 14564, %v1458_v60  ;;  %v1487_v38 = vshrl.u32 %v11233_v53, 16  ;;  %2497 = vst.msk [vmem:[#allocation2 + $0x84] sm:$0xf] %vm15211_vm0, %v2385_v51  ;;  %v842_v23 = vsub.s32 %v11145_v7, %v841_v39 }
 0x11d   : > { %v2166_v32 = vrot.slane %v11150_v54, 4  ;;  %v1463_v27 = vmul.u32 58254, %v1458_v60  ;;  %v1464_v47 = vshll.u32 %v1461_v18, 16  ;;  %v1465_v11 = vshrl.u32 %v1461_v18, 16 }
 0x11e   : > { %v869_v49 = vshrl.u32 %v868_v9, 4  ;;  %v1466_v4 = vshll.u32 %v1462_v52, 16  ;;  %v11255_v6 = vmul.u32 58254, %v1486_v25  ;;  %vm1580_vm4 = vcmp.ne.s32.totalorder %v842_v23, 0 }
 0x11f   : > { %vm1616_vm1 = vcmp.lt.s32.totalorder %v842_v23, 0  ;;  %v1688_v35 = vadd.s32 18, %v842_v23  ;;  %vm1468_vm15 = vc.u32 %v1460_v57, %v1464_v47  ;;  %v1470_v21 = vadd.s32 %v1464_v47, %v1460_v57 }
 0x120   : > { %v870_v10 = vmul.u32 18, %v869_v49  ;;  %vm1652_vm13 = vmand %vm1616_vm1, %vm1580_vm4  ;;  %v1469_v22 = vsel %vm1468_vm15, 1, %v14979_v19  ;;  %v11258_v12 = vmul.u32 14564, %v1487_v38  ;;  %v1489_v60 = vmul.u32 14564, %v1486_v25 }
 0x121   : > { %v1724_v7 = vsel %vm1652_vm13, %v1688_v35, %v842_v23  ;;  %v1471_v24 = vadd.s32 %v1469_v22, %v1463_v27  ;;  %v1493_v17 = vshll.u32 %v11255_v6, 16  ;;  %v15212_v18 = vmov 0 }
 0x122   : > { %v871_v39 = vsub.s32 %v11148_v2, %v870_v10  ;;  %vm11262_vm0 = vcmp.lt.s32.totalorder %v1724_v7, 16  ;;  %v1467_v51 = vshrl.u32 %v1462_v52, 16  ;;  %vm1472_vm2 = vc.u32 %v1470_v21, %v1466_v4 }
 0x123   : > { %v15213_v18 = vsel %vm11262_vm0, 4294967295, %v15212_v18  ;;  %v1984_v9 = vsel %vm11262_vm0, %v1876_v20, 0.0  ;;  %v1473_v57 = vsel %vm1472_vm2, 1, %v14979_v19  ;;  %v1492_v47 = vmul.u32 58254, %v1487_v38  ;;  %v11270_v27 = vld [vmem:[#allocation2 + $0x80] sm:$0xff] }
 0x124   : > { %15214 = vst [vmem:[#allocation29_spill] sm:$0xff] %v15213_v18  ;;  %v1495_v23 = vshll.u32 %v11258_v12, 16  ;;  %vm1581_vm4 = vcmp.ne.s32.totalorder %v871_v39, 0  ;;  %vm1617_vm1 = vcmp.lt.s32.totalorder %v871_v39, 0  ;;  %v1689_v25 = vadd.s32 18, %v871_v39 }
 0x125   : > { %v2020_v2 = vpack.c.bf16 %v1984_v9, %v1984_v9  ;;  %vm1653_vm15 = vmand %vm1617_vm1, %vm1581_vm4  ;;  %v1475_v49 = vadd.s32 %v1473_v57, %v1471_v24  ;;  %v1494_v52 = vshrl.u32 %v11255_v6, 16  ;;  %vm1497_vm13 = vc.u32 %v1489_v60, %v1493_v17  ;;  %v1818_v24 = vld [vmem:[%s10402_s22 + $0x100] sm:$0xff] }
 0x126   : > { %v1499_v4 = vadd.s32 %v1493_v17, %v1489_v60  ;;  %v2769_v20 = vshll.u32 %v11270_v27, 16  ;;  %vm15215_vm2 = vcmask 130048   ;;  %v1725_v38 = vsel %vm1653_vm15, %v1689_v25, %v871_v39 }
 0x127   : > { %9260 = vmatmul.msk.bf16.gmra.mxu2 %vm15215_vm2, %v11270_v27  ;;  %v2168_v35 = vshrl.u32 %v2020_v2, 16  ;;  %v2171_v10 = vshll.u32 %v2020_v2, 16  ;;  %vm11276_vm0 = vcmp.lt.s32.totalorder %v1725_v38, 16  ;;  %v15216_v22 = vmov 0  ;;  %vm15220_vm15 = vmmov %vm15215_vm2 }
 0x128   : > { %v15217_v22 = vsel %vm11276_vm0, 4294967295, %v15216_v22  ;;  %v1476_v21 = vadd.s32 %v1475_v49, %v1465_v11  ;;  %v1498_v7 = vsel %vm1497_vm13, 1, %v14979_v19  ;;  %vm1501_vm4 = vc.u32 %v1499_v4, %v1495_v23 }
 0x129   : > { %15218 = vst [vmem:[#allocation30_spill] sm:$0xff] %v15217_v22  ;;  %v11282_v6 = vrot.slane %v2769_v20, 1  ;;  %v1985_v60 = vsel %vm11276_vm0, %v1877_v62, 0.0  ;;  %v2170_v17 = vrot.slane %v2168_v35, 6  ;;  %v2173_v9 = vrot.slane %v2171_v10, 7  ;;  %v1819_v10 = vld [vmem:[%s10402_s22 + $0x108] sm:$0xff] }
 0x12a   : > { %v2021_v39 = vpack.c.bf16 %v1985_v60, %v1985_v60  ;;  %v1477_v57 = vadd.s32 %v1476_v21, %v1467_v51  ;;  %v1500_v25 = vadd.s32 %v1498_v7, %v1492_v47  ;;  %v1502_v2 = vsel %vm1501_vm4, 1, %v14979_v19 }
 0x12b   : > { %vm15219_vm1 = vsmask.f32 7424  ;;  %v2174_v49 = vor.u32 %v2173_v9, %v2170_v17  ;;  %v1496_v23 = vshrl.u32 %v11258_v12, 16  ;;  %v1858_v4 = vmul.f32 %v11218_v58, %v1818_v24  ;;  %v11304_v17 = vld [vmem:[%s14942_s2] ss:$0 sm:$0xff] }
 0x12c   : > { %v2772_v11 = vsel %vm15219_vm1, %v11238_v42, %v11282_v6  ;;  %v2178_v62 = vshrl.u32 %v2021_v39, 16  ;;  %v2181_v20 = vshll.u32 %v2021_v39, 16  ;;  %v1478_v38 = vshrl.u32 %v1477_v57, 4 }
 0x12d   : > { %9237 = vmatmul.msk.bf16.gmra.mxu3 %vm15220_vm15, %v2772_v11  ;;  %v1504_v35 = vadd.s32 %v1502_v2, %v1500_v25  ;;  %v2175_v51 = vsel %vm10493_vm11, %v2166_v32, %v2174_v49  ;;  %v2176_v47 = vrot.slane %v2174_v49, 4  ;;  %v2685_v42 = vshrl.u32 %v11193_v14, 16 }
 0x12e   : > { %v2180_v21 = vrot.slane %v2178_v62, 6  ;;  %v2183_v7 = vrot.slane %v2181_v20, 7  ;;  %vm15221_vm13 = vcmask 125952   ;;  %v1479_v12 = vmul.u32 18, %v1478_v38 }
 0x12f   : > { %2476 = vst.msk [vmem:[#allocation2 + $0x30] sm:$0xf] %vm15221_vm13, %v2175_v51  ;;  %v1505_v24 = vadd.s32 %v1504_v35, %v1494_v52  ;;  %v1859_v60 = vmul.f32 %v11218_v58, %v1819_v10  ;;  %v1898_v54 = vadd.f32 %v11304_v17, %v1858_v4  ;;  %v11308_v32 = vadd.s32 96, %v10365_v3  ;;  %vm15222_vm1 = vmmov %vm15221_vm13 }
 0x130   : > { %v11311_v14 = vadd.s32 104, %v10365_v3  ;;  %v11313_v9 = vor.u32 %v2183_v7, %v2180_v21  ;;  %v1480_v39 = vsub.s32 %v11230_v26, %v1479_v12  ;;  %v11321_v49 = vadd.s32 272, %v10365_v3  ;;  %v10198_v21 = vld [vmem:[#allocation2] sm:$0xf0]  ;;  %v10199_v7 = vld [vmem:[#allocation2] sm:$0xe] }
 0x131   : > { %v1506_v52 = vadd.s32 %v1505_v24, %v1496_v23  ;;  %v877_v2 = vand.u32 65535, %v11308_v32  ;;  %v878_v11 = vshrl.u32 %v11308_v32, 16  ;;  %v2687_v10 = vor.u32 %v2685_v42, %v11205_v8 }
 0x132   : > { %v2185_v4 = vsel %vm10493_vm11, %v2176_v47, %v11313_v9  ;;  %vm1602_vm2 = vcmp.ne.s32.totalorder %v1480_v39, 0  ;;  %vm1638_vm4 = vcmp.lt.s32.totalorder %v1480_v39, 0  ;;  %v1710_v23 = vadd.s32 18, %v1480_v39 }
 0x133   : > { %v1507_v62 = vshrl.u32 %v1506_v52, 4  ;;  %2477 = vst.msk [vmem:[#allocation2 + $0x34] sm:$0xf] %vm15222_vm1, %v2185_v4  ;;  %vm11327_vm15 = vmand %vm1638_vm4, %vm1602_vm2  ;;  %v11331_v20 = vmul.u32 58254, %v877_v2  ;;  %v11333_v38 = vmul.u32 14564, %v878_v11  ;;  %v906_v35 = vand.u32 65535, %v11311_v14 }
 0x134   : > { %v1899_v47 = vadd.f32 %v11304_v17, %v1859_v60  ;;  %v880_v12 = vmul.u32 14564, %v877_v2  ;;  %v1746_v24 = vsel %vm11327_vm15, %v1710_v23, %v1480_v39  ;;  %v10200_v52 = vor.u32 %v10199_v7, %v10198_v21  ;;  %v11340_v4 = vld [vmem:[#allocation2 + $0x8] sm:$0xff] }
 0x135   : > { %v1508_v51 = vmul.u32 18, %v1507_v62  ;;  %vm14991_vm13 = vcmask 1046528   ;;  %v14984_v25 = vrot.slane %v11340_v4, 1  ;;  %vm11344_vm2 = vcmp.lt.s32.totalorder %v1746_v24, 16 }
 0x136   : > { %v15225_v19 = vmov 0  ;;  %v883_v8 = vmul.u32 58254, %v878_v11  ;;  %v884_v42 = vshll.u32 %v11331_v20, 16  ;;  %v2006_v60 = vsel %vm11344_vm2, %v1898_v54, 0.0 }
 0x137   : > { %v1509_v57 = vsub.s32 %v11233_v53, %v1508_v51  ;;  %v15226_v19 = vsel %vm11344_vm2, 4294967295, %v15225_v19  ;;  %v3098_v2 = vrot.slane %v10200_v52, 1  ;;  %v885_v39 = vshrl.u32 %v11331_v20, 16 }
 0x138   : > { %15227 = vst [vmem:[#allocation31_spill] sm:$0xff] %v15226_v19  ;;  %v886_v62 = vshll.u32 %v11333_v38, 16  ;;  %v2042_v23 = vpack.c.bf16 %v2006_v60, %v2006_v60  ;;  %vm888_vm0 = vc.u32 %v880_v12, %v884_v42  ;;  %v890_v11 = vadd.s32 %v884_v42, %v880_v12 }
 0x139   : > { %vm1603_vm4 = vcmp.ne.s32.totalorder %v1509_v57, 0  ;;  %vm1639_vm1 = vcmp.lt.s32.totalorder %v1509_v57, 0  ;;  %v1711_v26 = vadd.s32 18, %v1509_v57  ;;  %v3100_v53 = vsel %vm14991_vm13, %v3098_v2, %v14984_v25 }
 0x13a   : > { %vm1675_vm15 = vmand %vm1639_vm1, %vm1603_vm4  ;;  %v907_v51 = vshrl.u32 %v11311_v14, 16  ;;  %v11357_v54 = vld [vmem:[#allocation2 + $0x30] sm:$0xff]  ;;  %v2388_v20 = vshrl.u32 %v2042_v23, 16  ;;  %v2391_v7 = vshll.u32 %v2042_v23, 16  ;;  %vm15228_vm2 = vcmask 130048   ;;  %v1798_v23 = vld [vmem:[%s10402_s22 + $0x60] sm:$0xff] }
 0x13b   : > { %v1747_v21 = vsel %vm1675_vm15, %v1711_v26, %v1509_v57  ;;  %9268 = vmatmul.msk.bf16.vlgmr.msrb.gmra.mxu2 %vm15228_vm2, %v3100_v53  ;;  %v15229_v24 = vmov 0   ;;  %v15230_v60 = vmov 0  ;;  %v887_v2 = vshrl.u32 %v11333_v38, 16  ;;  %9250 = vmatmul.msk.bf16.gmra.mxu1 %vm15228_vm2, %v11357_v54  ;;  %vm15235_vm1 = vmmov %vm15228_vm2 }
 0x13c   : > { %v889_v52 = vsel %vm888_vm0, 1, %v15229_v24  ;;  %vm11361_vm10 = vcmp.lt.s32.totalorder %v1747_v21, 16  ;;  %vm892_vm4 = vc.u32 %v890_v11, %v886_v62  ;;  %v2689_v12 = vshll.u32 %v11357_v54, 16 }
 0x13d   : > { %v15231_v60 = vsel %vm11361_vm10, 4294967295, %v15230_v60  ;;  %v891_v25 = vadd.s32 %v889_v52, %v883_v8  ;;  %v2007_v42 = vsel %vm11361_vm10, %v1899_v47, 0.0  ;;  %v2390_v57 = vrot.slane %v2388_v20, 6 }
 0x13e   : > { %15232 = vst [vmem:[#allocation32_spill] sm:$0xff] %v15231_v60  ;;  %v2393_v26 = vrot.slane %v2391_v7, 7  ;;  %v2043_v53 = vpack.c.bf16 %v2007_v42, %v2007_v42  ;;  %v893_v21 = vsel %vm892_vm4, 1, %v15229_v24  ;;  %v910_v19 = vmul.u32 58254, %v906_v35 }
 0x13f   : > { %v911_v1 = vmul.u32 14564, %v907_v51  ;;  %v11373_v38 = vrot.slane %v2689_v12, 1  ;;  %v895_v62 = vadd.s32 %v893_v21, %v891_v25  ;;  %v909_v11 = vmul.u32 14564, %v906_v35 }
 0x140   : > { %v2394_v8 = vor.u32 %v2393_v26, %v2390_v57  ;;  %v2398_v52 = vshrl.u32 %v2043_v53, 16  ;;  %v2401_v60 = vshll.u32 %v2043_v53, 16  ;;  %v913_v47 = vshll.u32 %v910_v19, 16 }
 0x141   : > { %v1838_v20 = vmul.f32 %v11218_v58, %v1798_v23  ;;  %vm15233_vm0 = vsmask.f32 7424  ;;  %v15234_v42 = vrot.slane %v11242_v46, 4  ;;  %v896_v56 = vadd.s32 %v895_v62, %v885_v39 }
 0x142   : > { %v2692_v7 = vsel %vm15233_vm0, %v2687_v10, %v11373_v38  ;;  %v912_v12 = vmul.u32 58254, %v907_v51  ;;  %v2396_v25 = vrot.slane %v2394_v8, 4  ;;  %v2400_v35 = vrot.slane %v2398_v52, 6 }
 0x143   : > { %v2395_v5 = vsel %vm10493_vm11, %v15234_v42, %v2394_v8  ;;  %9227 = vmatmul.msk.bf16.gmra.mxu0 %vm15235_vm1, %v2692_v7  ;;  %v2403_v57 = vrot.slane %v2401_v60, 7  ;;  %vm15236_vm15 = vcmask 125952   ;;  %v915_v26 = vshll.u32 %v911_v1, 16 }
 0x144   : > { %2498 = vst.msk [vmem:[#allocation2 + $0x88] sm:$0xf] %vm15236_vm15, %v2395_v5  ;;  %v897_v53 = vadd.s32 %v896_v56, %v887_v2  ;;  %vm917_vm4 = vc.u32 %v909_v11, %v913_v47  ;;  %v919_v23 = vadd.s32 %v913_v47, %v909_v11  ;;  %v1839_v10 = vmul.f32 %v11218_v58, %v1799_v48  ;;  %vm15237_vm0 = vmmov %vm15236_vm15 }
 0x145   : > { %v11386_v21 = vor.u32 %v2403_v57, %v2400_v35  ;;  %v914_v46 = vshrl.u32 %v910_v19, 16  ;;  %v918_v42 = vsel %vm917_vm4, 1, %v15229_v24  ;;  %v1515_v39 = vand.u32 65535, %v11321_v49 }
 0x146   : > { %v898_v51 = vshrl.u32 %v897_v53, 4  ;;  %v920_v62 = vadd.s32 %v918_v42, %v912_v12  ;;  %vm921_vm2 = vc.u32 %v919_v23, %v915_v26  ;;  %v1516_v60 = vshrl.u32 %v11321_v49, 16  ;;  %v1820_v23 = vld [vmem:[%s10402_s22 + $0x110] sm:$0xff] }
 0x147   : > { %v2405_v56 = vsel %vm10493_vm11, %v2396_v25, %v11386_v21  ;;  %v922_v5 = vsel %vm921_vm2, 1, %v15229_v24  ;;  %v1518_v48 = vmul.u32 14564, %v1515_v39  ;;  %v1519_v2 = vmul.u32 58254, %v1515_v39 }
 0x148   : > { %2499 = vst.msk [vmem:[#allocation2 + $0x8c] sm:$0xf] %vm15237_vm0, %v2405_v56  ;;  %v899_v19 = vmul.u32 18, %v898_v51  ;;  %v916_v8 = vshrl.u32 %v911_v1, 16  ;;  %v924_v11 = vadd.s32 %v922_v5, %v920_v62  ;;  %v1520_v52 = vmul.u32 14564, %v1516_v60 }
 0x149   : > { %v15238_v47 = vshrl.u32 %v11270_v27, 16  ;;  %v1878_v12 = vadd.f32 %v11304_v17, %v1838_v20  ;;  %v1522_v35 = vshll.u32 %v1519_v2, 16  ;;  %v1521_v26 = vmul.u32 58254, %v1516_v60 }
 0x14a   : > { %v900_v25 = vsub.s32 %v11308_v32, %v899_v19  ;;  %v925_v57 = vadd.s32 %v924_v11, %v914_v46  ;;  %v1524_v53 = vshll.u32 %v1520_v52, 16  ;;  %v1879_v42 = vadd.f32 %v11304_v17, %v1839_v10 }
 0x14b   : > { %v2775_v7 = vor.u32 %v15238_v47, %v11282_v6  ;;  %v1523_v39 = vshrl.u32 %v1519_v2, 16  ;;  %vm1526_vm1 = vc.u32 %v1518_v48, %v1522_v35  ;;  %v1528_v1 = vadd.s32 %v1522_v35, %v1518_v48 }
 0x14c   : > { %v926_v51 = vadd.s32 %v925_v57, %v916_v8  ;;  %vm1582_vm15 = vcmp.ne.s32.totalorder %v900_v25, 0  ;;  %vm1618_vm4 = vcmp.lt.s32.totalorder %v900_v25, 0  ;;  %v1690_v62 = vadd.s32 18, %v900_v25 }
 0x14d   : > { %vm1654_vm2 = vmand %vm1618_vm4, %vm1582_vm15  ;;  %v1527_v27 = vsel %vm1526_vm1, 1, %v15229_v24  ;;  %vm1530_vm0 = vc.u32 %v1528_v1, %v1524_v53  ;;  %v1860_v6 = vmul.f32 %v11218_v58, %v1820_v23  ;;  %v11406_v32 = vadd.s32 112, %v10365_v3 }
 0x14e   : > { %v927_v20 = vshrl.u32 %v926_v51, 4  ;;  %v1726_v46 = vsel %vm1654_vm2, %v1690_v62, %v900_v25  ;;  %v1529_v60 = vadd.s32 %v1527_v27, %v1521_v26  ;;  %v1531_v10 = vsel %vm1530_vm0, 1, %v15229_v24 }
 0x14f   : > { %v11409_v56 = vld [vmem:[#allocation2 + $0x88] sm:$0xff]  ;;  %vm11411_vm13 = vcmp.lt.s32.totalorder %v1726_v46, 16  ;;  %v15239_v5 = vmov 0  ;;  %v2186_v48 = vrot.slane %v11313_v9, 4  ;;  %v935_v2 = vand.u32 65535, %v11406_v32 }
 0x150   : > { %v15240_v5 = vsel %vm11411_vm13, 4294967295, %v15239_v5  ;;  %v936_v19 = vshrl.u32 %v11406_v32, 16  ;;  %v928_v8 = vmul.u32 18, %v927_v20  ;;  %v1986_v11 = vsel %vm11411_vm13, %v1878_v12, 0.0 }
 0x151   : > { %15241 = vst [vmem:[#allocation33_spill] sm:$0xff] %v15240_v5  ;;  %v1525_v47 = vshrl.u32 %v1520_v52, 16  ;;  %v1533_v35 = vadd.s32 %v1531_v10, %v1529_v60  ;;  %v2777_v25 = vshll.u32 %v11409_v56, 16  ;;  %v2022_v57 = vpack.c.bf16 %v1986_v11, %v1986_v11 }
 0x152   : > { %v11422_v26 = vadd.f32 %v11304_v17, %v1860_v6  ;;  %v939_v53 = vmul.u32 58254, %v935_v2  ;;  %v929_v23 = vsub.s32 %v11311_v14, %v928_v8  ;;  %v938_v1 = vmul.u32 14564, %v935_v2 }
 0x153   : > { %v1534_v9 = vadd.s32 %v1533_v35, %v1523_v39  ;;  %v940_v51 = vmul.u32 14564, %v936_v19  ;;  %v11425_v62 = vrot.slane %v2777_v25, 1  ;;  %v2188_v27 = vshrl.u32 %v2022_v57, 16 }
 0x154   : > { %v2191_v20 = vshll.u32 %v2022_v57, 16  ;;  %v942_v46 = vshll.u32 %v939_v53, 16  ;;  %vm1583_vm1 = vcmp.ne.s32.totalorder %v929_v23, 0  ;;  %vm1619_vm15 = vcmp.lt.s32.totalorder %v929_v23, 0 }
 0x155   : > { %v1691_v52 = vadd.s32 18, %v929_v23  ;;  %v1535_v12 = vadd.s32 %v1534_v9, %v1525_v47  ;;  %vm15242_vm4 = vsmask.f32 7424  ;;  %vm1655_vm2 = vmand %vm1619_vm15, %vm1583_vm1  ;;  %v2190_v6 = vrot.slane %v2188_v27, 6 }
 0x156   : > { %v2780_v60 = vsel %vm15242_vm4, %v2775_v7, %v11425_v62  ;;  %v2193_v10 = vrot.slane %v2191_v20, 7  ;;  %v11430_v14 = vadd.s32 120, %v10365_v3  ;;  %vm15243_vm0 = vcmask 130048  }
 0x157   : > { %9238 = vmatmul.msk.bf16.gmra.mxu3 %vm15243_vm0, %v2780_v60  ;;  %v1727_v39 = vsel %vm1655_vm2, %v1691_v52, %v929_v23  ;;  %v1536_v2 = vshrl.u32 %v1535_v12, 4  ;;  %v941_v8 = vmul.u32 58254, %v936_v19  ;;  %v944_v11 = vshll.u32 %v940_v51, 16 }
 0x158   : > { %vm11433_vm10 = vcmp.lt.s32.totalorder %v1727_v39, 16  ;;  %v15244_v35 = vmov 0  ;;  %v2194_v47 = vor.u32 %v2193_v10, %v2190_v6  ;;  %v943_v25 = vshrl.u32 %v939_v53, 16  ;;  %v11445_v6 = vld [vmem:[#allocation2 + $0x10] sm:$0xff] }
 0x159   : > { %v15245_v35 = vsel %vm11433_vm10, 4294967295, %v15244_v35  ;;  %v945_v57 = vshrl.u32 %v940_v51, 16  ;;  %v1987_v7 = vsel %vm11433_vm10, %v1879_v42, 0.0  ;;  %v1537_v9 = vmul.u32 18, %v1536_v2 }
 0x15a   : > { %15246 = vst [vmem:[#allocation34_spill] sm:$0xff] %v15245_v35  ;;  %vm946_vm1 = vc.u32 %v938_v1, %v942_v46  ;;  %v948_v27 = vadd.s32 %v942_v46, %v938_v1  ;;  %v2023_v20 = vpack.c.bf16 %v1987_v7, %v1987_v7  ;;  %v2195_v23 = vsel %vm10493_vm11, %v2186_v48, %v2194_v47 }
 0x15b   : > { %v2196_v52 = vrot.slane %v2194_v47, 4  ;;  %v947_v19 = vsel %vm946_vm1, 1, %v15229_v24  ;;  %vm15247_vm15 = vcmask 125952   ;;  %v1538_v12 = vsub.s32 %v11321_v49, %v1537_v9 }
 0x15c   : > { %2478 = vst.msk [vmem:[#allocation2 + $0x38] sm:$0xf] %vm15247_vm15, %v2195_v23  ;;  %v949_v60 = vadd.s32 %v947_v19, %v941_v8  ;;  %vm950_vm4 = vc.u32 %v948_v27, %v944_v11  ;;  %v964_v53 = vand.u32 65535, %v11430_v14  ;;  %v2198_v51 = vshrl.u32 %v2023_v20, 16 }
 0x15d   : > { %v2201_v42 = vshll.u32 %v2023_v20, 16  ;;  %v14994_v1 = vrot.slane %v11445_v6, 1  ;;  %v951_v46 = vsel %vm950_vm4, 1, %v15229_v24  ;;  %vm1604_vm2 = vcmp.ne.s32.totalorder %v1538_v12, 0 }
 0x15e   : > { %vm1640_vm0 = vcmp.lt.s32.totalorder %v1538_v12, 0  ;;  %v1712_v48 = vadd.s32 18, %v1538_v12  ;;  %v953_v10 = vadd.s32 %v951_v46, %v949_v60  ;;  %v2200_v39 = vrot.slane %v2198_v51, 6 }
 0x15f   : > { %v2203_v2 = vrot.slane %v2201_v42, 7  ;;  %vm1676_vm1 = vmand %vm1640_vm0, %vm1604_vm2  ;;  %v15248_v49 = vrot.slane %v11340_v4, 1  ;;  %vm15249_vm15 = vcmask 1046528   ;;  %v965_v11 = vshrl.u32 %v11430_v14, 16 }
 0x160   : > { %v1748_v47 = vsel %vm1676_vm1, %v1712_v48, %v1538_v12  ;;  %vm15250_vm10 = vcmask 130048   ;;  %v954_v7 = vadd.s32 %v953_v10, %v943_v25  ;;  %v967_v9 = vmul.u32 14564, %v964_v53  ;;  %v1800_v12 = vld [vmem:[%s10402_s22 + $0x70] sm:$0xff] }
 0x161   : > { %v3102_v8 = vsel %vm15249_vm15, %v15248_v49, %v14994_v1  ;;  %v968_v27 = vmul.u32 58254, %v964_v53  ;;  %v11456_v20 = vor.u32 %v2203_v2, %v2200_v39  ;;  %vm11458_vm4 = vcmp.lt.s32.totalorder %v1748_v47, 16 }
 0x162   : > { %9269 = vmatmul.msk.bf16.gmra.mxu2 %vm15250_vm10, %v3102_v8  ;;  %v15251_v23 = vmov 0  ;;  %v969_v19 = vmul.u32 14564, %v965_v11  ;;  %v2008_v4 = vsel %vm11458_vm4, %v11422_v26, 0.0  ;;  %v955_v60 = vadd.s32 %v954_v7, %v945_v57  ;;  %v1801_v7 = vld [vmem:[%s10402_s22 + $0x78] sm:$0xff] }
 0x163   : > { %v15252_v23 = vsel %vm11458_vm4, 4294967295, %v15251_v23  ;;  %v970_v51 = vmul.u32 58254, %v965_v11  ;;  %v971_v42 = vshll.u32 %v968_v27, 16  ;;  %v2205_v25 = vsel %vm10493_vm11, %v2196_v52, %v11456_v20 }
 0x164   : > { %15253 = vst [vmem:[#allocation35_spill] sm:$0xff] %v15252_v23  ;;  %v2693_v53 = vshrl.u32 %v11357_v54, 16  ;;  %v2044_v46 = vpack.c.bf16 %v2008_v4, %v2008_v4  ;;  %v973_v48 = vshll.u32 %v969_v19, 16  ;;  %vm15254_vm10 = vcmask 125952  }
 0x165   : > { %2479 = vst.msk [vmem:[#allocation2 + $0x3c] sm:$0xf] %vm15254_vm10, %v2205_v25  ;;  %v2406_v10 = vrot.slane %v11386_v21, 4  ;;  %v956_v39 = vshrl.u32 %v955_v60, 4  ;;  %vm975_vm2 = vc.u32 %v967_v9, %v971_v42  ;;  %v977_v26 = vadd.s32 %v971_v42, %v967_v9 }
 0x166   : > { %v2408_v57 = vshrl.u32 %v2044_v46, 16  ;;  %v2411_v2 = vshll.u32 %v2044_v46, 16  ;;  %v976_v49 = vsel %vm975_vm2, 1, %v15229_v24  ;;  %v1840_v8 = vmul.f32 %v11218_v58, %v1800_v12 }
 0x167   : > { %v957_v11 = vmul.u32 18, %v956_v39  ;;  %v972_v52 = vshrl.u32 %v968_v27, 16  ;;  %v978_v47 = vadd.s32 %v976_v49, %v970_v51  ;;  %vm979_vm0 = vc.u32 %v977_v26, %v973_v48 }
 0x168   : > { %v2410_v4 = vrot.slane %v2408_v57, 6  ;;  %v2413_v1 = vrot.slane %v2411_v2, 7  ;;  %v2781_v25 = vshrl.u32 %v11409_v56, 16  ;;  %v980_v21 = vsel %vm979_vm0, 1, %v15229_v24 }
 0x169   : > { %v958_v60 = vsub.s32 %v11406_v32, %v957_v11  ;;  %v974_v9 = vshrl.u32 %v969_v19, 16  ;;  %v982_v42 = vadd.s32 %v980_v21, %v978_v47  ;;  %v11479_v46 = vadd.s32 128, %v10365_v3 }
 0x16a   : > { %v11481_v23 = vor.u32 %v2413_v1, %v2410_v4  ;;  %v1841_v27 = vmul.f32 %v11218_v58, %v1801_v7  ;;  %v1880_v51 = vadd.f32 %v11304_v17, %v1840_v8  ;;  %v11486_v12 = vadd.s32 136, %v10365_v3 }
 0x16b   : > { %v983_v48 = vadd.s32 %v982_v42, %v972_v52  ;;  %vm1584_vm1 = vcmp.ne.s32.totalorder %v958_v60, 0  ;;  %vm1620_vm15 = vcmp.lt.s32.totalorder %v958_v60, 0  ;;  %v1692_v39 = vadd.s32 18, %v958_v60  ;;  %v2859_v42 = vpop.f32.mrf.mxu0 }
 0x16c   : > { %v11488_v26 = vld [vmem:[#allocation2 + $0x38] sm:$0xff]  ;;  %v2415_v32 = vsel %vm10493_vm11, %v2406_v10, %v11481_v23  ;;  %vm1656_vm10 = vmand %vm1620_vm15, %vm1584_vm1  ;;  %v993_v1 = vand.u32 65535, %v11479_v46  ;;  %v994_v19 = vshrl.u32 %v11479_v46, 16  ;;  %v2695_v57 = vor.u32 %v2693_v53, %v11373_v38 }
 0x16d   : > { %vm15255_vm2 = vcmask 125952   ;;  %v11498_v2 = vor.u32 %v2781_v25, %v11425_v62  ;;  %v984_v49 = vadd.s32 %v983_v48, %v974_v9  ;;  %v1728_v8 = vsel %vm1656_vm10, %v1692_v39, %v958_v60 }
 0x16e   : > { %2500 = vst.msk [vmem:[#allocation2 + $0x90] sm:$0xf] %vm15255_vm2, %v2415_v32  ;;  %v2697_v11 = vshll.u32 %v11488_v26, 16  ;;  %vm11501_vm0 = vcmp.lt.s32.totalorder %v1728_v8, 16  ;;  %v15256_v52 = vmov 0  ;;  %v1881_v10 = vadd.f32 %v11304_v17, %v1841_v27  ;;  %v3000_v27 = vpop.f32.mrf.mxu1 }
 0x16f   : > { %v15257_v52 = vsel %vm11501_vm0, 4294967295, %v15256_v52  ;;  %v2206_v47 = vrot.slane %v11456_v20, 4  ;;  %vm15259_vm1 = vcmask 130048   ;;  %v985_v38 = vshrl.u32 %v984_v49, 4  ;;  %v11516_v20 = vld [vmem:[#allocation2 + $0x18] sm:$0xff] }
 0x170   : > { %15258 = vst [vmem:[#allocation36_spill] sm:$0xff] %v15257_v52  ;;  %9251 = vmatmul.msk.bf16.gmra.mxu1 %vm15259_vm1, %v11488_v26  ;;  %v1988_v62 = vsel %vm11501_vm0, %v1880_v51, 0.0  ;;  %v997_v53 = vmul.u32 58254, %v993_v1  ;;  %v1022_v7 = vand.u32 65535, %v11486_v12  ;;  %v11512_v4 = vrot.slane %v2697_v11, 1  ;;  %vm15261_vm10 = vmmov %vm15259_vm1 }
 0x171   : > { %v2024_v25 = vpack.c.bf16 %v1988_v62, %v1988_v62  ;;  %v996_v21 = vmul.u32 14564, %v993_v1  ;;  %v11514_v60 = vmul.u32 14564, %v994_v19  ;;  %v986_v9 = vmul.u32 18, %v985_v38 }
 0x172   : > { %v15003_v48 = vrot.slane %v11516_v20, 1  ;;  %v1000_v39 = vshll.u32 %v997_v53, 16  ;;  %v1023_v32 = vshrl.u32 %v11486_v12, 16  ;;  %vm15260_vm15 = vsmask.f32 7424 }
 0x173   : > { %v2700_v51 = vsel %vm15260_vm15, %v2695_v57, %v11512_v4  ;;  %v2208_v49 = vshrl.u32 %v2024_v25, 16  ;;  %v2211_v8 = vshll.u32 %v2024_v25, 16  ;;  %v999_v11 = vmul.u32 58254, %v994_v19 }
 0x174   : > { %9228 = vmatmul.msk.bf16.gmra.mxu0 %vm15261_vm10, %v2700_v51  ;;  %v987_v1 = vsub.s32 %v11430_v14, %v986_v9  ;;  %v11524_v38 = vadd.f32 %v3000_v27, %v2859_v42  ;;  %v15262_v62 = vrot.slane %v11445_v6, 1  ;;  %vm15263_vm2 = vcmask 1046528  }
 0x175   : > { %v1025_v0 = vmul.u32 14564, %v1022_v7  ;;  %v2543_v29 = vld [vmem:[#allocation2 + $0x90] sm:$0x1]  ;;  %v2210_v63 = vrot.slane %v2208_v49, 6  ;;  %v2213_v59 = vrot.slane %v2211_v8, 7  ;;  %v1002_v19 = vshll.u32 %v11514_v60, 16 }
 0x176   : > { %v3104_v34 = vsel %vm15263_vm2, %v15262_v62, %v15003_v48  ;;  %vm1004_vm15 = vc.u32 %v996_v21, %v1000_v39  ;;  %v2620_v57 = vunpack.c.l.b16 %v2543_v29  ;;  %vm1585_vm10 = vcmp.ne.s32.totalorder %v987_v1, 0  ;;  %v1802_v48 = vld [vmem:[%s10402_s22 + $0x80] sm:$0xff] }
 0x177   : > { %9270 = vmatmul.msk.bf16.gmra.mxu2 %vm15259_vm1, %v3104_v34  ;;  %vm1621_vm4 = vcmp.lt.s32.totalorder %v987_v1, 0  ;;  %v1693_v14 = vadd.s32 18, %v987_v1  ;;  %v2214_v25 = vor.u32 %v2213_v59, %v2210_v63  ;;  %v1005_v9 = vsel %vm1004_vm15, 1, %v15229_v24 }
 0x178   : > { %vm1657_vm0 = vmand %vm1621_vm4, %vm1585_vm10  ;;  %v1006_v6 = vadd.s32 %v1000_v39, %v996_v21  ;;  %v1026_v42 = vmul.u32 58254, %v1022_v7  ;;  %v11534_v27 = vpack.c.b16 %v2620_v57, %v2620_v57  ;;  %v1007_v49 = vadd.s32 %v1005_v9, %v999_v11 }
 0x179   : > { %v1729_v51 = vsel %vm1657_vm0, %v1693_v14, %v987_v1  ;;  %v1027_v8 = vmul.u32 14564, %v1023_v32  ;;  %v15264_v34 = vmov 0  ;;  %v2215_v29 = vsel %vm10493_vm11, %v2206_v47, %v2214_v25 }
 0x17a   : > { %vm11536_vm2 = vcmp.lt.s32.totalorder %v1729_v51, 16  ;;  %v1001_v62 = vshrl.u32 %v997_v53, 16  ;;  %vm1008_vm1 = vc.u32 %v1006_v6, %v1002_v19  ;;  %v2785_v59 = vshll.u32 %v11534_v27, 16 }
 0x17b   : > { %v15265_v34 = vsel %vm11536_vm2, 4294967295, %v15264_v34  ;;  %v1989_v63 = vsel %vm11536_vm2, %v1881_v10, 0.0  ;;  %vm15267_vm4 = vcmask 125952   ;;  %v1003_v7 = vshrl.u32 %v11514_v60, 16 }
 0x17c   : > { %15266 = vst [vmem:[#allocation37_spill] sm:$0xff] %v15265_v34  ;;  %v1009_v21 = vsel %vm1008_vm1, 1, %v15229_v24  ;;  %v2025_v39 = vpack.c.bf16 %v1989_v63, %v1989_v63  ;;  %v1028_v1 = vmul.u32 58254, %v1023_v32  ;;  %v1029_v57 = vshll.u32 %v1026_v42, 16 }
 0x17d   : > { %2480 = vst.msk [vmem:[#allocation2 + $0x40] sm:$0xf] %vm15267_vm4, %v2215_v29  ;;  %v1011_v11 = vadd.s32 %v1009_v21, %v1007_v49  ;;  %v2787_v14 = vrot.slane %v2785_v59, 1  ;;  %v1031_v9 = vshll.u32 %v1027_v8, 16  ;;  %v11549_v47 = vadd.s32 144, %v10365_v3 }
 0x17e   : > { %v2218_v53 = vshrl.u32 %v2025_v39, 16  ;;  %v2221_v19 = vshll.u32 %v2025_v39, 16  ;;  %vm1033_vm0 = vc.u32 %v1025_v0, %v1029_v57  ;;  %vm15268_vm15 = vsmask.f32 7424 }
 0x17f   : > { %v1012_v6 = vadd.s32 %v1011_v11, %v1001_v62  ;;  %v2788_v10 = vsel %vm15268_vm15, %v11498_v2, %v2787_v14  ;;  %v2216_v60 = vrot.slane %v2214_v25, 4  ;;  %v1034_v51 = vsel %vm1033_vm0, 1, %v15229_v24 }
 0x180   : > { %v1035_v29 = vadd.s32 %v1029_v57, %v1025_v0  ;;  %vm15269_vm10 = vcmask 130048   ;;  %v2220_v32 = vrot.slane %v2218_v53, 6  ;;  %v2223_v49 = vrot.slane %v2221_v19, 7 }
 0x181   : > { %9239 = vmatmul.msk.bf16.gmra.mxu3 %vm15269_vm10, %v2788_v10  ;;  %v1013_v59 = vadd.s32 %v1012_v6, %v1003_v7  ;;  %v1036_v63 = vadd.s32 %v1034_v51, %v1028_v1  ;;  %v1030_v21 = vshrl.u32 %v1026_v42, 16  ;;  %v1051_v39 = vand.u32 65535, %v11549_v47  ;;  %v1803_v10 = vld [vmem:[%s10402_s22 + $0x88] sm:$0xff] }
 0x182   : > { %vm1037_vm1 = vc.u32 %v1035_v29, %v1031_v9  ;;  %v11557_v62 = vor.u32 %v2223_v49, %v2220_v32  ;;  %v1052_v25 = vshrl.u32 %v11549_v47, 16  ;;  %v1032_v0 = vshrl.u32 %v1027_v8, 16 }
 0x183   : > { %v1014_v11 = vshrl.u32 %v1013_v59, 4  ;;  %v1038_v2 = vsel %vm1037_vm1, 1, %v15229_v24  ;;  %v1054_v14 = vmul.u32 14564, %v1051_v39  ;;  %v11561_v53 = vmul.u32 58254, %v1051_v39 }
 0x184   : > { %v1040_v57 = vadd.s32 %v1038_v2, %v1036_v63  ;;  %v2225_v42 = vsel %vm10493_vm11, %v2216_v60, %v11557_v62  ;;  %v1842_v1 = vmul.f32 %v11218_v58, %v1802_v48  ;;  %v11567_v9 = vmul.u32 14564, %v1052_v25 }
 0x185   : > { %v1015_v7 = vmul.u32 18, %v1014_v11  ;;  %2481 = vst.msk [vmem:[#allocation2 + $0x44] sm:$0xf] %vm15267_vm4, %v2225_v42  ;;  %v1058_v6 = vshll.u32 %v11561_v53, 16  ;;  %v1057_v51 = vmul.u32 58254, %v1052_v25  ;;  %v2701_v32 = vshrl.u32 %v11488_v26, 16  ;;  %v11586_v42 = vpop.f32.mrf.mxu0 }
 0x186   : > { %v1041_v19 = vadd.s32 %v1040_v57, %v1030_v21  ;;  %v1060_v29 = vshll.u32 %v11567_v9, 16  ;;  %v1882_v59 = vadd.f32 %v11304_v17, %v1842_v1  ;;  %v1843_v21 = vmul.f32 %v11218_v58, %v1803_v10  ;;  %v10095_v11 = vld [vmem:[%s14943_s3 + $0x18] sm:$0xff]  ;;  %v11588_v58 = vld [vmem:[#allocation2 + $0x20] sm:$0xff] }
 0x187   : > { %v1016_v8 = vsub.s32 %v11479_v46, %v1015_v7  ;;  %vm1062_vm0 = vc.u32 %v1054_v14, %v1058_v6  ;;  %v1064_v60 = vadd.s32 %v1058_v6, %v1054_v14  ;;  %v15270_v57 = vmov 0  ;;  %v3055_v14 = vpop.f32.mrf.mxu2  ;;  %3567 = vmatpush.bf16.msra.mxu3 %v10095_v11  ;;  %v11595_v6 = vpop.f32.mrf.mxu1 }
 0x188   : > { %v1042_v49 = vadd.s32 %v1041_v19, %v1032_v0  ;;  %v1063_v46 = vsel %vm1062_vm0, 1, %v15229_v24  ;;  %v15008_v7 = vrot.slane %v11588_v58, 1  ;;  %v1059_v10 = vshrl.u32 %v11561_v53, 16 }
 0x189   : > { %vm1586_vm15 = vcmp.ne.s32.totalorder %v1016_v8, 0  ;;  %vm1622_vm10 = vcmp.lt.s32.totalorder %v1016_v8, 0  ;;  %v1694_v48 = vadd.s32 18, %v1016_v8  ;;  %vm1066_vm4 = vc.u32 %v1064_v60, %v1060_v29 }
 0x18a   : > { %v1043_v63 = vshrl.u32 %v1042_v49, 4  ;;  %vm1658_vm1 = vmand %vm1622_vm10, %vm1586_vm15  ;;  %v1065_v2 = vadd.s32 %v1063_v46, %v1057_v51  ;;  %v1067_v25 = vsel %vm1066_vm4, 1, %v15229_v24  ;;  %v2703_v29 = vor.u32 %v2701_v32, %v11512_v4  ;;  %v11604_v46 = vld [vmem:[#allocation2 + $0xc] sm:$0xf] }
 0x18b   : > { %v1730_v39 = vsel %vm1658_vm1, %v1694_v48, %v1016_v8  ;;  %v2914_v8 = vpop.f32.mrf.mxu3  ;;  %v1883_v60 = vadd.f32 %v11304_v17, %v1843_v21  ;;  %vm15273_vm0 = vcmask 130048   ;;  %v15275_v53 = vrot.slane %v11516_v20, 1 }
 0x18c   : > { %v1044_v0 = vmul.u32 18, %v1043_v63  ;;  %vm11582_vm2 = vcmp.lt.s32.totalorder %v1730_v39, 16  ;;  %v11591_v1 = vld [vmem:[#allocation2 + $0x40] sm:$0xff]  ;;  %v1069_v51 = vadd.s32 %v1067_v25, %v1065_v2  ;;  %v11606_v39 = vadd.f32 %v3055_v14, %v2914_v8  ;;  %vm15277_vm4 = vmmov %vm15273_vm0 }
 0x18d   : > { %v15271_v57 = vsel %vm11582_vm2, 4294967295, %v15270_v57  ;;  %v1990_v19 = vsel %vm11582_vm2, %v1882_v59, 0.0  ;;  %v2705_v63 = vshll.u32 %v11591_v1, 16  ;;  %9252 = vmatmul.msk.bf16.gmra.mxu1 %vm15273_vm0, %v11591_v1  ;;  %v3330_v59 = vld [vmem:[#allocation2 + $0x8] sm:$0xe]  ;;  %vm15276_vm15 = vcmask 1046528  }
 0x18e   : > { %15272 = vst [vmem:[#allocation38_spill] sm:$0xff] %v15271_v57  ;;  %v1045_v49 = vsub.s32 %v11486_v12, %v1044_v0  ;;  %v2026_v48 = vpack.c.bf16 %v1990_v19, %v1990_v19  ;;  %v3106_v4 = vsel %vm15276_vm15, %v15275_v53, %v15008_v7  ;;  %v1061_v12 = vshrl.u32 %v11567_v9, 16 }
 0x18f   : > { %15274 = vst [vmem:[#allocation39_spill] sm:$0xff] %v11606_v39  ;;  %9271 = vmatmul.msk.bf16.gmra.mxu2 %vm15277_vm4, %v3106_v4  ;;  %v11615_v11 = vrot.slane %v2705_v63, 1  ;;  %v1070_v25 = vadd.s32 %v1069_v51, %v1059_v10  ;;  %v3407_v14 = vunpack.c.l.b16 %v3330_v59  ;;  %v15007_v9 = vunpack.c.l.b16 %v11604_v46  ;;  %vm15282_vm4 = vmmov %vm15273_vm0  ;;  %v11630_v10 = vpop.f32.mrf.mxu2  ;;  %v2864_v51 = vpop.f32.mrf.mxu0  ;;  %v12008_v39 = vld [vmem:[#allocation2 + $0x70] sm:$0xff] }
 0x190   : > { %vm1587_vm10 = vcmp.ne.s32.totalorder %v1045_v49, 0  ;;  %vm1623_vm1 = vcmp.lt.s32.totalorder %v1045_v49, 0  ;;  %v1695_v32 = vadd.s32 18, %v1045_v49  ;;  %v2228_v21 = vshrl.u32 %v2026_v48, 16  ;;  %15283 = vst [vmem:[#allocation41_spill] sm:$0xff] %v11630_v10 }
 0x191   : > { %9261 = vmatmul.msk.bf16.vlgmr.msrb.gmra.mxu3 %vm15273_vm0, %v11409_v56  ;;  %vm1659_vm2 = vmand %vm1623_vm1, %vm1587_vm10  ;;  %v2231_v2 = vshll.u32 %v2026_v48, 16  ;;  %vm15278_vm15 = vsmask.f32 7424  ;;  %v15279_v8 = vmov 0  ;;  %v2226_v63 = vrot.slane %v11557_v62, 4  ;;  %v1804_v48 = vld [vmem:[%s10402_s22 + $0x90] sm:$0xff] }
 0x192   : > { %v1731_v20 = vsel %vm1659_vm2, %v1695_v32, %v1045_v49  ;;  %v2230_v0 = vrot.slane %v2228_v21, 6  ;;  %v2708_v19 = vsel %vm15278_vm15, %v2703_v29, %v11615_v11  ;;  %v1071_v49 = vadd.s32 %v1070_v25, %v1061_v12  ;;  %v3005_v29 = vpop.f32.mrf.mxu1  ;;  %v11635_v21 = vld [vmem:[#allocation2 + $0x10] sm:$0xff]  ;;  %v11648_v25 = vld [vmem:[%s14941_s1] ss:$0 sm:$0xff] }
 0x193   : > { %vm11622_vm13 = vcmp.lt.s32.totalorder %v1731_v20, 16  ;;  %v2233_v53 = vrot.slane %v2231_v2, 7  ;;  %9229 = vmatmul.msk.bf16.gmra.mxu0 %vm15282_vm4, %v2708_v19  ;;  %v11633_v32 = vpop.f32.mrf.mxu3  ;;  %v11639_v62 = vpack.c.b16 %v15007_v9, %v3407_v14  ;;  %v11641_v2 = vadd.f32 %v3005_v29, %v2864_v51 }
 0x194   : > { %v15280_v8 = vsel %vm11622_vm13, 4294967295, %v15279_v8  ;;  %v1991_v56 = vsel %vm11622_vm13, %v1883_v60, 0.0  ;;  %15284 = vst [vmem:[#allocation42_spill] sm:$0xff] %v11633_v32  ;;  %v1072_v20 = vshrl.u32 %v1071_v49, 4  ;;  %vm15285_vm2 = vcmask 125952  }
 0x195   : > { %15281 = vst [vmem:[#allocation40_spill] sm:$0xff] %v15280_v8  ;;  %v2027_v59 = vpack.c.bf16 %v1991_v56, %v1991_v56  ;;  %v2234_v4 = vor.u32 %v2233_v53, %v2230_v0  ;;  %v1844_v0 = vmul.f32 %v11648_v25, %v1804_v48  ;;  %v3463_v49 = vrot.slane %v11639_v62, 1  ;;  %vm15286_vm15 = vmmov %vm15285_vm2 }
 0x196   : > { %v1073_v53 = vmul.u32 18, %v1072_v20  ;;  %v3464_v29 = vrot.slane %v11635_v21, 1  ;;  %vm15287_vm4 = vcmask 1046528   ;;  %v4077_v61 = vrot.slane %v11635_v21, 2 }
 0x197   : > { %v2235_v60 = vsel %vm10493_vm11, %v2226_v63, %v2234_v4  ;;  %v2238_v19 = vshrl.u32 %v2027_v59, 16  ;;  %v2241_v12 = vshll.u32 %v2027_v59, 16  ;;  %v2236_v14 = vrot.slane %v2234_v4, 4  ;;  %v3060_v45 = vpop.f32.mrf.mxu2  ;;  %v11656_v48 = vpop.f32.mrf.mxu0 }
 0x198   : > { %2482 = vst.msk [vmem:[#allocation2 + $0x48] sm:$0xf] %vm15285_vm2, %v2235_v60  ;;  %v1074_v63 = vsub.s32 %v11549_v47, %v1073_v53  ;;  %v1884_v9 = vadd.f32 %v11304_v17, %v1844_v0  ;;  %v10237_v60 = vld [vmem:[#allocation2 + $0x28] sm:$0xff]  ;;  %v3465_v47 = vsel %vm15287_vm4, %v3463_v49, %v3464_v29  ;;  %v15289_v53 = vrot.slane %v11588_v58, 1  ;;  %vm15290_vm2 = vmmov %vm15287_vm4 }
 0x199   : > { %v2240_v56 = vrot.slane %v2238_v19, 6  ;;  %v2243_v51 = vrot.slane %v2241_v12, 7  ;;  %v3107_v20 = vrot.slane %v10237_v60, 1  ;;  %vm15299_vm4 = vsmask.f32 7424 }
 0x19a   : > { %vm1588_vm10 = vcmp.ne.s32.totalorder %v1074_v63, 0  ;;  %vm1624_vm1 = vcmp.lt.s32.totalorder %v1074_v63, 0  ;;  %v1696_v7 = vadd.s32 18, %v1074_v63  ;;  %v11660_v19 = vpop.f32.mrf.mxu1  ;;  %v3707_v30 = vshll.u32 %v11639_v62, 16 }
 0x19b   : > { %v2244_v59 = vor.u32 %v2243_v51, %v2240_v56  ;;  %vm1660_vm0 = vmand %vm1624_vm1, %vm1588_vm10  ;;  %v2919_v12 = vpop.f32.mrf.mxu3  ;;  %v3108_v56 = vsel %vm15290_vm2, %v15289_v53, %v3107_v20  ;;  %v15291_v51 = vmov 0  ;;  %vm15294_vm10 = vcmask 130048  }
 0x19c   : > { %v1732_v17 = vsel %vm1660_vm0, %v1696_v7, %v1074_v63  ;;  %v11664_v0 = vadd.f32 %v3060_v45, %v2919_v12  ;;  %vm15295_vm1 = vmmov %vm15294_vm10  ;;  %v2709_v7 = vshrl.u32 %v11591_v1, 16  ;;  %v3709_v40 = vrot.slane %v3707_v30, 2 }
 0x19d   : > { %v2245_v4 = vsel %vm10493_vm11, %v2236_v14, %v2244_v59  ;;  %vm11669_vm13 = vcmp.lt.s32.totalorder %v1732_v17, 16  ;;  %v2246_v12 = vrot.slane %v2244_v59, 4  ;;  %vm15298_vm0 = vmmov %vm15295_vm1 }
 0x19e   : > { %2483 = vst.msk [vmem:[#allocation2 + $0x4c] sm:$0xf] %vm15286_vm15, %v2245_v4  ;;  %v15292_v51 = vsel %vm11669_vm13, 4294967295, %v15291_v51  ;;  %v1992_v14 = vsel %vm11669_vm13, %v1884_v9, 0.0  ;;  %v11684_v9 = vld [vmem:[#allocation2 + $0x18] sm:$0xff]  ;;  %vm15300_vm2 = vmmov %vm15298_vm0 }
 0x19f   : > { %15288 = vst [vmem:[#allocation43_spill] sm:$0xff] %v11664_v0  ;;  %9272 = vmatmul.msk.bf16.gmra.mxu2 %vm15294_vm10, %v3108_v56  ;;  %v2028_v60 = vpack.c.bf16 %v1992_v14, %v1992_v14  ;;  %v11678_v63 = vpop.f32.mrf.mxu2  ;;  %v2869_v58 = vpop.f32.mrf.mxu0  ;;  %vm15301_vm10 = vmmov %vm15286_vm15  ;;  %v4079_v55 = vrot.slane %v11684_v9, 2 }
 0x1a0   : > { %15293 = vst [vmem:[#allocation44_spill] sm:$0xff] %v15292_v51 }
 0x1a1   : > { %9360 = vmatmul.msk.bf16.vlgmr.msra.gmra.mxu3 %vm15295_vm1, %v3465_v47  ;;  %v2248_v45 = vshrl.u32 %v2028_v60, 16  ;;  %v2251_v49 = vshll.u32 %v2028_v60, 16  ;;  %15296 = vst [vmem:[#allocation45_spill] sm:$0xff] %v11678_v63  ;;  %v2711_v47 = vor.u32 %v2709_v7, %v11615_v11  ;;  %vm15302_vm1 = vcmask 1046528  }
 0x1a2   : > { %v3010_v43 = vpop.f32.mrf.mxu1 }
 0x1a3   : > { %v2250_v17 = vrot.slane %v2248_v45, 6  ;;  %v2253_v53 = vrot.slane %v2251_v49, 7  ;;  %v11682_v51 = vpop.f32.mrf.mxu3  ;;  %v11686_v56 = vadd.f32 %v3010_v43, %v2869_v58  ;;  %v3466_v49 = vrot.slane %v11684_v9, 1  ;;  %v10097_v58 = vld [vmem:[%s14943_s3 + $0x28] sm:$0xff] }
 0x1a4   : > { %15297 = vst [vmem:[#allocation46_spill] sm:$0xff] %v11682_v51  ;;  %4180 = vmatpush.bf16.msrb.mxu1 %v10097_v58 }
 0x1a5   : > { %v11680_v4 = vld [vmem:[#allocation2 + $0x48] sm:$0xff]  ;;  %v2254_v60 = vor.u32 %v2253_v53, %v2250_v17  ;;  %v10115_v17 = vld [vmem:[%s14943_s3 + $0x30] sm:$0xff]  ;;  %v10116_v53 = vld [vmem:[%s14943_s3 + $0x38] sm:$0xff] }
 0x1a6   : > { %v2713_v14 = vshll.u32 %v11680_v4, 16  ;;  %9253 = vmatmul.msk.bf16.gmra.mxu1 %vm15298_vm0, %v11680_v4  ;;  %4545 = vmatpush.bf16.msra.mxu2 %v10115_v17  ;;  %vm15304_vm0 = vmmov %vm15302_vm1  ;;  %v11730_v17 = vld [vmem:[#allocation2 + $0x20] sm:$0xff] }
 0x1a7   : > { %v2255_v59 = vsel %vm10493_vm11, %v2246_v12, %v2254_v60  ;;  %v2256_v45 = vrot.slane %v2254_v60, 4  ;;  %v3065_v7 = vpop.f32.mrf.mxu2  ;;  %v11705_v12 = vpop.f32.mrf.mxu0  ;;  %v3467_v60 = vsel %vm15302_vm1, %v3464_v29, %v3466_v49  ;;  %4918 = vmatpush.bf16.msrb.mxu3 %v10116_v53  ;;  %v4068_v53 = vld [vmem:[#allocation2 + $0x8] sm:$0xc]  ;;  %v3468_v52 = vrot.slane %v11730_v17, 1  ;;  %vm15310_vm1 = vmmov %vm15300_vm2 }
 0x1a8   : > { %v2715_v8 = vrot.slane %v2713_v14, 1  ;;  %2484 = vst.msk [vmem:[#allocation2 + $0x50] sm:$0xf] %vm15286_vm15, %v2255_v59  ;;  %vm15305_vm15 = vmmov %vm15300_vm2 }
 0x1a9   : > { %v2265_v11 = vsel %vm10493_vm11, %v2256_v45, %v10485_v15  ;;  %v3109_v15 = vrot.slane %v11357_v54, 1 }
 0x1aa   : > { %v2716_v43 = vsel %vm15299_vm4, %v2711_v47, %v2715_v8  ;;  %2485 = vst.msk [vmem:[#allocation2 + $0x54] sm:$0xf] %vm15301_vm10, %v2265_v11  ;;  %v11714_v47 = vpop.f32.mrf.mxu1  ;;  %vm15306_vm4 = vmmov %vm15300_vm2  ;;  %vm15309_vm10 = vsmask.f32 7424 }
 0x1ab   : > { %9230 = vmatmul.msk.bf16.gmra.mxu0 %vm15300_vm2, %v2716_v43  ;;  %v2924_v14 = vpop.f32.mrf.mxu3  ;;  %v3110_v45 = vsel %vm15304_vm0, %v3107_v20, %v3109_v15  ;;  %v2717_v43 = vshrl.u32 %v11680_v4, 16 }
 0x1ac   : > { %v11717_v59 = vadd.f32 %v3065_v7, %v2924_v14 }
 0x1ad   : > { %v2719_v34 = vor.u32 %v2717_v43, %v2715_v8  ;;  %v10117_v43 = vld [vmem:[%s14943_s3 + $0x40] sm:$0xff] }
 0x1ae   : > { %15303 = vst [vmem:[#allocation47_spill] sm:$0xff] %v11717_v59  ;;  %5158 = vmatpush.bf16.msra.mxu0 %v10117_v43 }
 0x1af   : > { %9273 = vmatmul.msk.bf16.gmra.mxu2 %vm15305_vm15, %v3110_v45  ;;  %v11725_v54 = vpop.f32.mrf.mxu2  ;;  %v2874_v57 = vpop.f32.mrf.mxu0  ;;  %vm15313_vm15 = vmmov %vm15304_vm0 }
 0x1b0   : > { %15307 = vst [vmem:[#allocation48_spill] sm:$0xff] %v11725_v54 }
 0x1b1   : > { %9361 = vmatmul.msk.bf16.gmra.mxu3 %vm15306_vm4, %v3467_v60  ;;  %v11723_v11 = vld [vmem:[#allocation2 + $0x50] sm:$0xff]  ;;  %v4073_v60 = vunpack.c.l.b16 %v4068_v53  ;;  %vm15314_vm4 = vmmov %vm15310_vm1 }
 0x1b2   : > { %v2721_v29 = vshll.u32 %v11723_v11, 16  ;;  %v3015_v58 = vpop.f32.mrf.mxu1 }
 0x1b3   : > { %v11728_v7 = vpop.f32.mrf.mxu3  ;;  %v11732_v20 = vadd.f32 %v3015_v58, %v2874_v57  ;;  %v15311_v57 = vunpack.c.l.b16 %v11604_v46  ;;  %v2725_v46 = vshrl.u32 %v11723_v11, 16 }
 0x1b4   : > { %15308 = vst [vmem:[#allocation49_spill] sm:$0xff] %v11728_v7  ;;  %v2723_v14 = vrot.slane %v2721_v29, 1  ;;  %v3111_v29 = vrot.slane %v11488_v26, 1 }
 0x1b5   : > { %v4074_v58 = vpack.c.b16 %v15311_v57, %v4073_v60 }
 0x1b6   : > { %9254 = vmatmul.msk.bf16.gmra.mxu1 %vm15300_vm2, %v11723_v11  ;;  %v2724_v45 = vsel %vm15309_vm10, %v2719_v34, %v2723_v14  ;;  %v3469_v34 = vsel %vm15304_vm0, %v3466_v49, %v3468_v52  ;;  %vm15315_vm2 = vmmov %vm15310_vm1  ;;  %vm15031_vm10 = vcmask 1045504   ;;  %v2727_v43 = vor.u32 %v2725_v46, %v2723_v14 }
 0x1b7   : > { %v3070_v8 = vpop.f32.mrf.mxu2  ;;  %v11744_v35 = vpop.f32.mrf.mxu0  ;;  %v4076_v18 = vrot.slane %v4074_v58, 2  ;;  %vm15318_vm0 = vsmask.f32 7424  ;;  %v3113_v14 = vrot.slane %v11591_v1, 1  ;;  %v3704_v46 = vshrl.u32 %v11639_v62, 16 }
 0x1b9   : > { %v4078_v26 = vsel %vm15031_vm10, %v4076_v18, %v4077_v61  ;;  %v3706_v1 = vrot.slane %v3704_v46, 1 }
 0x1ba   : > { %v11747_v5 = vpop.f32.mrf.mxu1 }
 0x1bb   : > { %9231 = vmatmul.msk.bf16.gmra.mxu0 %vm15310_vm1, %v2724_v45  ;;  %v2929_v53 = vpop.f32.mrf.mxu3  ;;  %v3112_v45 = vsel %vm15313_vm15, %v3109_v15, %v3111_v29  ;;  %v11762_v15 = vld [vmem:[#allocation2 + $0x28] sm:$0xff]  ;;  %vm15319_vm15 = vmmov %vm15310_vm1 }
 0x1bc   : > { %v11750_v22 = vadd.f32 %v3070_v8, %v2929_v53  ;;  %v2732_v53 = vsel %vm15318_vm0, %v2727_v43, %v10588_v31  ;;  %vm15323_vm0 = vmmov %vm15310_vm1 }
 0x1be   : > { %15312 = vst [vmem:[#allocation50_spill] sm:$0xff] %v11750_v22 }
 0x1bf   : > { %9274 = vmatmul.msk.bf16.gmra.mxu2 %vm15314_vm4, %v3112_v45  ;;  %v11758_v60 = vpop.f32.mrf.mxu2  ;;  %v2879_v49 = vpop.f32.mrf.mxu0  ;;  %vm15320_vm4 = vcmask 1046528  }
 0x1c0   : > { %15316 = vst [vmem:[#allocation51_spill] sm:$0xff] %v11758_v60 }
 0x1c1   : > { %9362 = vmatmul.msk.bf16.gmra.mxu3 %vm15315_vm2, %v3469_v34  ;;  %v3470_v34 = vrot.slane %v11762_v15, 1  ;;  %vm15322_vm2 = vmmov %vm15320_vm4 }
 0x1c2   : > { %v3020_v8 = vpop.f32.mrf.mxu1 }
 0x1c3   : > { %v11760_v57 = vpop.f32.mrf.mxu3  ;;  %v11764_v58 = vadd.f32 %v3020_v8, %v2879_v49  ;;  %v3712_v49 = vshrl.u32 %v11635_v21, 16  ;;  %v3471_v43 = vsel %vm15320_vm4, %v3468_v52, %v3470_v34  ;;  %v3710_v52 = vor.u32 %v3709_v40, %v3706_v1  ;;  %vm15326_vm4 = vmmov %vm15323_vm0 }
 0x1c4   : > { %15317 = vst [vmem:[#allocation52_spill] sm:$0xff] %v11760_v57  ;;  %v3115_v40 = vrot.slane %v11680_v4, 1 }
 0x1c5   : > { %v3714_v62 = vrot.slane %v3712_v49, 1  ;;  %v3724_v49 = vshll.u32 %v11684_v9, 16 }
 0x1c6   : > { %9408 = vmatmul.msk.bf16.vlgmr.msrb.gmra.mxu1 %vm15310_vm1, %v4078_v26  ;;  %v3715_v26 = vshll.u32 %v11635_v21, 16  ;;  %v4080_v21 = vsel %vm15031_vm10, %v4077_v61, %v4079_v55 }
 0x1c7   : > { %v3075_v18 = vpop.f32.mrf.mxu2  ;;  %v11771_v45 = vpop.f32.mrf.mxu0 }
 0x1c8   : > { %v3717_v13 = vrot.slane %v3715_v26, 2 }
 0x1ca   : > { %v11778_v8 = vpop.f32.mrf.mxu1 }
 0x1cb   : > { %9232 = vmatmul.msk.bf16.gmra.mxu0 %vm15319_vm15, %v2732_v53  ;;  %v2934_v31 = vpop.f32.mrf.mxu3  ;;  %v3114_v53 = vsel %vm15322_vm2, %v3111_v29, %v3113_v14  ;;  %vm15036_vm15 = vsmask.f32 6400  ;;  %v11792_v29 = vld [vmem:[#allocation2 + $0x30] sm:$0xff]  ;;  %vm15327_vm2 = vmmov %vm15323_vm0 }
 0x1cc   : > { %v11781_v44 = vadd.f32 %v3075_v18, %v2934_v31  ;;  %v3718_v18 = vor.u32 %v3717_v13, %v3714_v62  ;;  %v3472_v46 = vrot.slane %v11792_v29, 1  ;;  %v3721_v13 = vshrl.u32 %v11684_v9, 16 }
 0x1cd   : > { %v4081_v62 = vrot.slane %v11730_v17, 2 }
 0x1ce   : > { %15321 = vst [vmem:[#allocation53_spill] sm:$0xff] %v11781_v44  ;;  %v3719_v30 = vsel %vm15036_vm15, %v3710_v52, %v3718_v18  ;;  %v3723_v52 = vrot.slane %v3721_v13, 1  ;;  %v11860_v44 = vld [vmem:[#allocation2 + $0x48] sm:$0xff] }
 0x1cf   : > { %9275 = vmatmul.msk.bf16.gmra.mxu2 %vm15310_vm1, %v3114_v53  ;;  %v11788_v16 = vpop.f32.mrf.mxu2  ;;  %v2884_v37 = vpop.f32.mrf.mxu0  ;;  %vm15328_vm1 = vcmask 1046528   ;;  %v4082_v4 = vsel %vm15031_vm10, %v4079_v55, %v4081_v62  ;;  %v3733_v55 = vshll.u32 %v11730_v17, 16 }
 0x1d0   : > { %15324 = vst [vmem:[#allocation54_spill] sm:$0xff] %v11788_v16  ;;  %v3473_v26 = vsel %vm15328_vm1, %v3470_v34, %v3472_v46 }
 0x1d1   : > { %9363 = vmatmul.msk.bf16.gmra.mxu3 %vm15323_vm0, %v3471_v43  ;;  %vm15329_vm0 = vmmov %vm15328_vm1 }
 0x1d2   : > { %v3025_v31 = vpop.f32.mrf.mxu1  ;;  %vm15333_vm1 = vmmov %vm15327_vm2 }
 0x1d3   : > { %v11790_v36 = vpop.f32.mrf.mxu3  ;;  %v11794_v53 = vadd.f32 %v3025_v31, %v2884_v37  ;;  %v3116_v37 = vsel %vm15329_vm0, %v3113_v14, %v3115_v40  ;;  %v3726_v31 = vrot.slane %v3724_v49, 2  ;;  %vm15334_vm0 = vmmov %vm15333_vm1  ;;  %v3730_v49 = vshrl.u32 %v11730_v17, 16 }
 0x1d4   : > { %15325 = vst [vmem:[#allocation55_spill] sm:$0xff] %v11790_v36 }
 0x1d5   : > { %v3727_v34 = vor.u32 %v3726_v31, %v3723_v52  ;;  %v4083_v52 = vrot.slane %v11762_v15, 2  ;;  %v3732_v31 = vrot.slane %v3730_v49, 1 }
 0x1d6   : > { %9409 = vmatmul.msk.bf16.gmra.mxu1 %vm15326_vm4, %v4080_v21  ;;  %vm15331_vm4 = vmmov %vm15327_vm2 }
 0x1d7   : > { %v3080_v61 = vpop.f32.mrf.mxu2  ;;  %v3728_v50 = vsel %vm15036_vm15, %v3718_v18, %v3727_v34  ;;  %v3735_v18 = vrot.slane %v3733_v55, 2  ;;  %v4084_v17 = vsel %vm15031_vm10, %v4081_v62, %v4083_v52 }
 0x1da   : > { %v11804_v43 = vpop.f32.mrf.mxu1 }
 0x1db   : > { %9384 = vmatmul.msk.bf16.vlgmr.msrb.gmra.mxu0 %vm15327_vm2, %v3719_v30  ;;  %v2939_v1 = vpop.f32.mrf.mxu3  ;;  %v11815_v30 = vld [vmem:[#allocation2 + $0x38] sm:$0xff] }
 0x1dc   : > { %v11808_v21 = vadd.f32 %v3080_v61, %v2939_v1  ;;  %v11819_v61 = vpop.f32.mrf.mxu0 }
 0x1de   : > { %15330 = vst [vmem:[#allocation56_spill] sm:$0xff] %v11808_v21 }
 0x1df   : > { %9276 = vmatmul.msk.bf16.gmra.mxu2 %vm15331_vm4, %v3116_v37  ;;  %v11813_v9 = vpop.f32.mrf.mxu2  ;;  %v3474_v37 = vrot.slane %v11815_v30, 1  ;;  %vm15335_vm4 = vcmask 1046528  }
 0x1e0   : > { %15332 = vst [vmem:[#allocation57_spill] sm:$0xff] %v11813_v9 }
 0x1e1   : > { %9364 = vmatmul.msk.bf16.gmra.mxu3 %vm15327_vm2, %v3473_v26  ;;  %v3475_v1 = vsel %vm15335_vm4, %v3472_v46, %v3474_v37  ;;  %vm15336_vm2 = vmmov %vm15334_vm0  ;;  %v3736_v46 = vor.u32 %v3735_v18, %v3732_v31  ;;  %v4085_v18 = vrot.slane %v11792_v29, 2 }
 0x1e2   : > { %v3030_v14 = vpop.f32.mrf.mxu1 }
 0x1e3   : > { %v3737_v49 = vsel %vm15036_vm15, %v3727_v34, %v3736_v46  ;;  %v11845_v55 = vpop.f32.mrf.mxu3 }
 0x1e4   : > { %15339 = vst [vmem:[#allocation58_spill] sm:$0xff] %v11845_v55 }
 0x1e6   : > { %9410 = vmatmul.msk.bf16.gmra.mxu1 %vm15333_vm1, %v4082_v4  ;;  %vm15337_vm1 = vmmov %vm15335_vm4 }
 0x1e7   : > { %v3204_v13 = vpop.f32.mrf.mxu2  ;;  %vm15338_vm4 = vmmov %vm15334_vm0 }
 0x1e8   : > { %v11826_v26 = vadd.f32 %v3204_v13, %v11524_v38  ;;  %v11841_v13 = vld [vmem:[#allocation2 + $0x40] sm:$0xff] }
 0x1ea   : > { %v11831_v4 = vpop.f32.mrf.mxu1 }
 0x1eb   : > { %9385 = vmatmul.msk.bf16.gmra.mxu0 %vm15334_vm0, %v3728_v50  ;;  %v3117_v50 = vrot.slane %v11723_v11, 1  ;;  %v3476_v11 = vrot.slane %v11841_v13, 1 }
 0x1ed   : > { %v3118_v38 = vsel %vm15337_vm1, %v3115_v40, %v3117_v50  ;;  %v3742_v40 = vshll.u32 %v11762_v15, 16  ;;  %v3477_v31 = vsel %vm15337_vm1, %v3474_v37, %v3476_v11 }
 0x1ef   : > { %v11837_v16 = vpop.f32.mrf.mxu2  ;;  %9277 = vmatmul.msk.bf16.gmra.mxu2 %vm15334_vm0, %v3118_v38 }
 0x1f1   : > { %9365 = vmatmul.msk.bf16.gmra.mxu3 %vm15336_vm2, %v3475_v1  ;;  %v2889_v9 = vpop.f32.mrf.mxu0  ;;  %vm15340_vm2 = vmmov %vm15334_vm0 }
 0x1f2   : > { %v11834_v21 = vadd.f32 %v3030_v14, %v2889_v9  ;;  %v3035_v62 = vpop.f32.mrf.mxu1  ;;  %v3739_v14 = vshrl.u32 %v11762_v15, 16 }
 0x1f4   : > { %v3741_v34 = vrot.slane %v3739_v14, 1 }
 0x1f6   : > { %9411 = vmatmul.msk.bf16.gmra.mxu1 %vm15338_vm4, %v4084_v17  ;;  %v3744_v17 = vrot.slane %v3742_v40, 2  ;;  %vm15341_vm4 = vmmov %vm15334_vm0 }
 0x1f7   : > { %v3209_v9 = vpop.f32.mrf.mxu2 }
 0x1f8   : > { %v11852_v1 = vadd.f32 %v3209_v9, %v11641_v2  ;;  %v3745_v36 = vor.u32 %v3744_v17, %v3741_v34  ;;  %v10238_v2 = vld [vmem:[#allocation2 + $0x58] sm:$0xff]  ;;  %v3751_v34 = vshll.u32 %v11792_v29, 16 }
 0x1f9   : > { %v3119_v9 = vrot.slane %v10238_v2, 1  ;;  %v11864_v60 = vpop.f32.mrf.mxu0 }
 0x1fa   : > { %v11862_v15 = vpop.f32.mrf.mxu1  ;;  %v3746_v14 = vsel %vm15036_vm15, %v3736_v46, %v3745_v36  ;;  %v4087_v46 = vrot.slane %v11815_v30, 2  ;;  %v3753_v22 = vrot.slane %v3751_v34, 2 }
 0x1fb   : > { %9386 = vmatmul.msk.bf16.gmra.mxu0 %vm15340_vm2, %v3737_v49  ;;  %v4086_v49 = vsel %vm15031_vm10, %v4083_v52, %v4085_v18  ;;  %vm15342_vm2 = vmmov %vm15337_vm1  ;;  %v3478_v52 = vrot.slane %v11860_v44, 1 }
 0x1fc   : > { %v3120_v37 = vsel %vm15342_vm2, %v3117_v50, %v3119_v9  ;;  %vm15343_vm1 = vmmov %vm15334_vm0 }
 0x1fd   : > { %vm15344_vm10 = vmmov %vm15342_vm2  ;;  %vm15346_vm2 = vcmask 1045504  }
 0x1fe   : > { %v3479_v2 = vsel %vm15344_vm10, %v3476_v11, %v3478_v52  ;;  %v4088_v7 = vsel %vm15346_vm2, %v4085_v18, %v4087_v46  ;;  %vm15348_vm10 = vmmov %vm15334_vm0  ;;  %v3757_v18 = vshrl.u32 %v11815_v30, 16 }
 0x1ff   : > { %v11858_v55 = vpop.f32.mrf.mxu2  ;;  %9278 = vmatmul.msk.bf16.gmra.mxu2 %vm15343_vm1, %v3120_v37  ;;  %vm15349_vm1 = vcmask 1046528  }
 0x200   : > { %vm15352_vm2 = vmmov %vm15349_vm1 }
 0x201   : > { %9366 = vmatmul.msk.bf16.gmra.mxu3 %vm15334_vm0, %v3477_v31  ;;  %v3748_v31 = vshrl.u32 %v11792_v29, 16 }
 0x203   : > { %v3750_v37 = vrot.slane %v3748_v31, 1 }
 0x204   : > { %v2944_v38 = vpop.f32.mrf.mxu3 }
 0x205   : > { %v3754_v29 = vor.u32 %v3753_v22, %v3750_v37  ;;  %v4089_v37 = vrot.slane %v11841_v13, 2 }
 0x206   : > { %9412 = vmatmul.msk.bf16.gmra.mxu1 %vm15341_vm4, %v4086_v49  ;;  %vm15345_vm4 = vmmov %vm15334_vm0 }
 0x207   : > { %v3214_v17 = vpop.f32.mrf.mxu2  ;;  %v3755_v34 = vsel %vm15036_vm15, %v3745_v36, %v3754_v29 }
 0x208   : > { %v11876_v49 = vadd.f32 %v3214_v17, %v11686_v56  ;;  %v11887_v56 = vld [vmem:[#allocation2 + $0x50] sm:$0xff]  ;;  %v10239_v17 = vld [vmem:[#allocation2 + $0x60] sm:$0xff] }
 0x209   : > { %v3121_v63 = vrot.slane %v10239_v17, 1  ;;  %v3759_v17 = vrot.slane %v3757_v18, 1 }
 0x20a   : > { %v3040_v50 = vpop.f32.mrf.mxu1 }
 0x20b   : > { %9387 = vmatmul.msk.bf16.gmra.mxu0 %vm15334_vm0, %v3746_v14  ;;  %v3122_v31 = vsel %vm15349_vm1, %v3119_v9, %v3121_v63  ;;  %vm15354_vm1 = vcmask 1045504  }
 0x20c   : > { %v2946_v40 = vpop.f32.mrf.mxu3 }
 0x20f   : > { %v11885_v11 = vpop.f32.mrf.mxu2  ;;  %9279 = vmatmul.msk.bf16.gmra.mxu2 %vm15334_vm0, %v3122_v31 }
 0x210   : > { %v2894_v57 = vpop.f32.mrf.mxu0 }
 0x211   : > { %9367 = vmatmul.msk.bf16.gmra.mxu3 %vm15345_vm4, %v3479_v2  ;;  %v11880_v14 = vadd.f32 %v3035_v62, %v2894_v57  ;;  %v3480_v57 = vrot.slane %v11887_v56, 1  ;;  %vm15350_vm4 = vmmov %vm15334_vm0 }
 0x212   : > { %v3042_v62 = vpop.f32.mrf.mxu1 }
 0x214   : > { %v3085_v54 = vpop.f32.mrf.mxu3 }
 0x215   : > { %v11883_v59 = vadd.f32 %v3085_v54, %v2944_v38  ;;  %v3760_v38 = vshll.u32 %v11815_v30, 16 }
 0x216   : > { %9413 = vmatmul.msk.bf16.gmra.mxu1 %vm15348_vm10, %v4088_v7  ;;  %v3481_v7 = vsel %vm15352_vm2, %v3478_v52, %v3480_v57  ;;  %vm15353_vm10 = vmmov %vm15334_vm0 }
 0x217   : > { %15347 = vst [vmem:[#allocation59_spill] sm:$0xff] %v11883_v59  ;;  %v3219_v2 = vpop.f32.mrf.mxu2  ;;  %v3762_v31 = vrot.slane %v3760_v38, 2  ;;  %v3003_v38 = vadd.f32 %v11595_v6, %v11586_v42  ;;  %v3769_v42 = vshll.u32 %v11841_v13, 16 }
 0x218   : > { %v11901_v9 = vadd.f32 %v3219_v2, %v11732_v20  ;;  %v11903_v36 = vpop.f32.mrf.mxu0  ;;  %v11913_v20 = vld [vmem:[#allocation2 + $0x58] sm:$0xff]  ;;  %v10240_v2 = vld [vmem:[#allocation2 + $0x68] sm:$0xff] }
 0x219   : > { %v3123_v59 = vrot.slane %v10240_v2, 1 }
 0x21b   : > { %9388 = vmatmul.msk.bf16.gmra.mxu0 %vm15350_vm4, %v3755_v34  ;;  %vm15355_vm4 = vmmov %vm15352_vm2 }
 0x21c   : > { %v3087_v22 = vpop.f32.mrf.mxu3  ;;  %v3124_v18 = vsel %vm15355_vm4, %v3121_v63, %v3123_v59  ;;  %vm15356_vm2 = vmmov %vm15334_vm0  ;;  %v3766_v63 = vshrl.u32 %v11841_v13, 16 }
 0x21d   : > { %v11895_v54 = vadd.f32 %v3087_v22, %v2946_v40  ;;  %v4090_v22 = vsel %vm15354_vm1, %v4087_v46, %v4089_v37  ;;  %vm15358_vm1 = vmmov %vm15355_vm4  ;;  %vm15359_vm4 = vcmask 1045504  }
 0x21f   : > { %15351 = vst [vmem:[#allocation60_spill] sm:$0xff] %v11895_v54  ;;  %v3763_v54 = vor.u32 %v3762_v31, %v3759_v17  ;;  %v11911_v52 = vpop.f32.mrf.mxu2  ;;  %9280 = vmatmul.msk.bf16.gmra.mxu2 %vm15356_vm2, %v3124_v18  ;;  %v3482_v17 = vrot.slane %v11913_v20, 1  ;;  %v3295_v31 = vadd.f32 %v11837_v16, %v3003_v38  ;;  %v4091_v18 = vrot.slane %v11860_v44, 2  ;;  %vm15360_vm2 = vmmov %vm15358_vm1 }
 0x220   : > { %v3768_v16 = vrot.slane %v3766_v63, 1  ;;  %v3771_v38 = vrot.slane %v3769_v42, 2 }
 0x221   : > { %9368 = vmatmul.msk.bf16.gmra.mxu3 %vm15353_vm10, %v3481_v7  ;;  %v3764_v46 = vsel %vm15036_vm15, %v3754_v29, %v3763_v54  ;;  %vm15357_vm10 = vmmov %vm15334_vm0  ;;  %v3483_v29 = vsel %vm15358_vm1, %v3480_v57, %v3482_v17  ;;  %v4092_v13 = vsel %vm15359_vm4, %v4089_v37, %v4091_v18 }
 0x222   : > { %v3772_v10 = vor.u32 %v3771_v38, %v3768_v16  ;;  %vm15362_vm1 = vmmov %vm15334_vm0  ;;  %v3775_v38 = vshrl.u32 %v11860_v44, 16 }
 0x223   : > { %v3045_v34 = vpop.f32.mrf.mxu1  ;;  %vm15363_vm4 = vmmov %vm15360_vm2 }
 0x224   : > { %v3569_v40 = vpop.f32.mrf.mxu3 }
 0x225   : > { %v11909_v30 = vadd.f32 %v3569_v40, %v11826_v26 }
 0x226   : > { %9414 = vmatmul.msk.bf16.gmra.mxu1 %vm15334_vm0, %v4090_v22 }
 0x227   : > { %v3224_v6 = vpop.f32.mrf.mxu2 }
 0x228   : > { %v2899_v7 = vpop.f32.mrf.mxu0 }
 0x229   : > { %v11921_v26 = vadd.f32 %v3040_v50, %v2899_v7  ;;  %v11932_v50 = vadd.f32 %v3224_v6, %v11764_v58  ;;  %v11944_v6 = vld [vmem:[#allocation2 + $0x60] sm:$0xff] }
 0x22b   : > { %9389 = vmatmul.msk.bf16.gmra.mxu0 %vm15357_vm10, %v3764_v46  ;;  %v3047_v22 = vpop.f32.mrf.mxu1  ;;  %vm15361_vm10 = vmmov %vm15334_vm0 }
 0x22c   : > { %v3571_v40 = vpop.f32.mrf.mxu3 }
 0x22d   : > { %v11926_v2 = vadd.f32 %v3571_v40, %v3295_v31  ;;  %v10241_v31 = vld [vmem:[#allocation2 + $0x70] sm:$0xff] }
 0x22e   : > { %v3125_v40 = vrot.slane %v10241_v31, 1  ;;  %v4093_v31 = vrot.slane %v11887_v56, 2 }
 0x22f   : > { %v11942_v58 = vpop.f32.mrf.mxu2 }
 0x230   : > { %v2901_v7 = vpop.f32.mrf.mxu0  ;;  %v3126_v63 = vsel %vm15360_vm2, %v3123_v59, %v3125_v40  ;;  %vm15364_vm2 = vmmov %vm15334_vm0 }
 0x231   : > { %9369 = vmatmul.msk.bf16.gmra.mxu3 %vm15334_vm0, %v3483_v29  ;;  %v11936_v46 = vadd.f32 %v3042_v62, %v2901_v7  ;;  %v3008_v62 = vadd.f32 %v11660_v19, %v11656_v48  ;;  %v3773_v29 = vsel %vm15036_vm15, %v3763_v54, %v3772_v10  ;;  %9281 = vmatmul.msk.bf16.gmra.mxu2 %vm15362_vm1, %v3126_v63  ;;  %v3778_v48 = vshll.u32 %v11860_v44, 16  ;;  %v10242_v44 = vld [vmem:[#allocation2 + $0x78] sm:$0xff]  ;;  %vm15366_vm1 = vmmov %vm15363_vm4 }
 0x233   : > { %v3050_v0 = vpop.f32.mrf.mxu1  ;;  %v3780_v63 = vrot.slane %v3778_v48, 2 }
 0x234   : > { %v3574_v51 = vpop.f32.mrf.mxu3 }
 0x235   : > { %v11940_v57 = vadd.f32 %v3574_v51, %v11852_v1  ;;  %v3484_v51 = vrot.slane %v11944_v6, 1  ;;  %v3297_v1 = vadd.f32 %v11858_v55, %v3008_v62  ;;  %v3777_v55 = vrot.slane %v3775_v38, 1 }
 0x236   : > { %9415 = vmatmul.msk.bf16.gmra.mxu1 %vm15361_vm10, %v4092_v13  ;;  %vm15365_vm10 = vcmask 1045504  }
 0x237   : > { %v3229_v19 = vpop.f32.mrf.mxu2  ;;  %v3485_v54 = vsel %vm15363_vm4, %v3482_v17, %v3484_v51  ;;  %v3781_v32 = vor.u32 %v3780_v63, %v3777_v55  ;;  %vm15367_vm4 = vmmov %vm15334_vm0 }
 0x238   : > { %v2904_v42 = vpop.f32.mrf.mxu0 }
 0x239   : > { %v11952_v37 = vadd.f32 %v3045_v34, %v2904_v42  ;;  %v11963_v34 = vadd.f32 %v3229_v19, %v11794_v53  ;;  %v11975_v19 = vld [vmem:[#allocation2 + $0x68] sm:$0xff] }
 0x23b   : > { %9390 = vmatmul.msk.bf16.gmra.mxu0 %vm15334_vm0, %v3773_v29  ;;  %v3052_v59 = vpop.f32.mrf.mxu1 }
 0x23c   : > { %v3576_v7 = vpop.f32.mrf.mxu3 }
 0x23d   : > { %v11957_v16 = vadd.f32 %v3576_v7, %v3297_v1  ;;  %v4094_v1 = vsel %vm15365_vm10, %v4091_v18, %v4093_v31  ;;  %v3127_v7 = vrot.slane %v10242_v44, 1  ;;  %v3782_v18 = vsel %vm15036_vm15, %v3772_v10, %v3781_v32  ;;  %vm15369_vm10 = vmmov %vm15366_vm1 }
 0x23f   : > { %v11973_v53 = vpop.f32.mrf.mxu2  ;;  %v3128_v38 = vsel %vm15366_vm1, %v3125_v40, %v3127_v7  ;;  %vm15370_vm1 = vmmov %vm15334_vm0 }
 0x240   : > { %v2906_v13 = vpop.f32.mrf.mxu0 }
 0x241   : > { %9370 = vmatmul.msk.bf16.gmra.mxu3 %vm15364_vm2, %v3485_v54  ;;  %v11967_v62 = vadd.f32 %v3047_v22, %v2906_v13  ;;  %v3013_v22 = vadd.f32 %v11714_v47, %v11705_v12  ;;  %9282 = vmatmul.msk.bf16.gmra.mxu2 %vm15367_vm4, %v3128_v38  ;;  %vm15368_vm2 = vmmov %vm15334_vm0  ;;  %v3787_v12 = vshll.u32 %v11887_v56, 16 }
 0x242   : > { %vm15372_vm4 = vmmov %vm15369_vm10 }
 0x243   : > { %v4182_v29 = vpop.f32.mrf.mxu1  ;;  %v3299_v13 = vadd.f32 %v11885_v11, %v3013_v22  ;;  %v3789_v38 = vrot.slane %v3787_v12, 2 }
 0x244   : > { %v3579_v42 = vpop.f32.mrf.mxu3 }
 0x245   : > { %v11971_v17 = vadd.f32 %v3579_v42, %v11876_v49  ;;  %v3486_v49 = vrot.slane %v11975_v19, 1  ;;  %v3784_v42 = vshrl.u32 %v11887_v56, 16 }
 0x246   : > { %9416 = vmatmul.msk.bf16.gmra.mxu1 %vm15334_vm0, %v4094_v1  ;;  %v4095_v1 = vrot.slane %v11913_v20, 2  ;;  %vm15371_vm0 = vcmask 1045504  }
 0x247   : > { %v3234_v47 = vpop.f32.mrf.mxu2  ;;  %v3487_v10 = vsel %vm15369_vm10, %v3484_v51, %v3486_v49  ;;  %v3786_v11 = vrot.slane %v3784_v42, 1  ;;  %vm15374_vm10 = vmmov %vm15370_vm1 }
 0x248   : > { %v2909_v48 = vpop.f32.mrf.mxu0  ;;  %v4096_v56 = vsel %vm15371_vm0, %v4093_v31, %v4095_v1  ;;  %vm15375_vm0 = vmmov %vm15372_vm4 }
 0x249   : > { %v11983_v54 = vadd.f32 %v3050_v0, %v2909_v48  ;;  %v11994_v0 = vadd.f32 %v3234_v47, %v11834_v21  ;;  %v3790_v51 = vor.u32 %v3789_v38, %v3786_v11 }
 0x24b   : > { %9391 = vmatmul.msk.bf16.gmra.mxu0 %vm15368_vm2, %v3782_v18  ;;  %v4184_v40 = vpop.f32.mrf.mxu1  ;;  %vm15373_vm2 = vmmov %vm15370_vm1  ;;  %v3791_v31 = vsel %vm15036_vm15, %v3781_v32, %v3790_v51  ;;  %v3793_v32 = vshrl.u32 %v11913_v20, 16 }
 0x24c   : > { %v3581_v55 = vpop.f32.mrf.mxu3 }
 0x24d   : > { %v11988_v63 = vadd.f32 %v3581_v55, %v3299_v13  ;;  %v10243_v13 = vld [vmem:[#allocation2 + $0x80] sm:$0xff] }
 0x24e   : > { %v3129_v55 = vrot.slane %v10243_v13, 1  ;;  %v15033_v13 = vrot.slane %v11944_v6, 2 }
 0x24f   : > { %v12006_v47 = vpop.f32.mrf.mxu2 }
 0x250   : > { %v2911_v44 = vpop.f32.mrf.mxu0  ;;  %v3130_v42 = vsel %vm15372_vm4, %v3127_v7, %v3129_v55  ;;  %vm15376_vm4 = vmmov %vm15370_vm1 }
 0x251   : > { %9371 = vmatmul.msk.bf16.gmra.mxu3 %vm15370_vm1, %v3487_v10  ;;  %v11998_v22 = vadd.f32 %v3052_v59, %v2911_v44  ;;  %v3018_v59 = vadd.f32 %v11747_v5, %v11744_v35  ;;  %9283 = vmatmul.msk.bf16.gmra.mxu2 %vm15374_vm10, %v3130_v42  ;;  %v10138_v5 = vld [vmem:[%s14945_s5 + $0x18] sm:$0xff]  ;;  %vm15378_vm10 = vmmov %vm15375_vm0 }
 0x252   : > { %6285 = vmatpush.bf16.msra.mxu1 %v10138_v5 }
 0x253   : > { %v12000_v18 = vpop.f32.mrf.mxu1  ;;  %v3301_v44 = vadd.f32 %v11911_v52, %v3018_v59 }
 0x254   : > { %v3584_v48 = vpop.f32.mrf.mxu3 }
 0x255   : > { %v12004_v21 = vadd.f32 %v3584_v48, %v11901_v9  ;;  %v15032_v9 = vrot.slane %v12008_v39, 1 }
 0x256   : > { %9417 = vmatmul.msk.bf16.gmra.mxu1 %vm15373_vm2, %v4096_v56  ;;  %v12038_v56 = vadd.s32 280, %v10365_v3  ;;  %vm15377_vm2 = vcmask 1045504  }
 0x257   : > { %v3239_v48 = vpop.f32.mrf.mxu2  ;;  %v3489_v52 = vsel %vm15375_vm0, %v3486_v49, %v15032_v9  ;;  %v4098_v3 = vsel %vm15377_vm2, %v4095_v1, %v15033_v13  ;;  %v12062_v9 = vld [vmem:[#allocation2 + $0x78] sm:$0xff] }
 0x258   : > { %v3942_v12 = vpop.f32.mrf.mxu0  ;;  %v1544_v42 = vand.u32 65535, %v12038_v56  ;;  %v1545_v49 = vshrl.u32 %v12038_v56, 16 }
 0x259   : > { %v4032_v10 = vadd.f32 %v3942_v12, %v11909_v30  ;;  %v3796_v30 = vshll.u32 %v11913_v20, 16  ;;  %v3795_v12 = vrot.slane %v3793_v32, 1  ;;  %v12054_v32 = vld [vmem:[#allocation2 + $0x88] sm:$0xff] }
 0x25b   : > { %v12019_v11 = vadd.f32 %v4182_v29, %v4032_v10  ;;  %9392 = vmatmul.msk.bf16.gmra.mxu0 %vm15370_vm1, %v3791_v31  ;;  %v12022_v38 = vpop.f32.mrf.mxu1  ;;  %v12035_v29 = vadd.f32 %v3239_v48, %v11880_v14  ;;  %v3798_v31 = vrot.slane %v3796_v30, 2  ;;  %v1548_v10 = vmul.u32 58254, %v1544_v42 }
 0x25c   : > { %v3586_v7 = vpop.f32.mrf.mxu3  ;;  %v3038_v14 = vadd.f32 %v11862_v15, %v11903_v36  ;;  %v3131_v30 = vrot.slane %v12054_v32, 1  ;;  %v1549_v48 = vmul.u32 14564, %v1545_v49 }
 0x25d   : > { %v12027_v35 = vadd.f32 %v3586_v7, %v3301_v44  ;;  %v1551_v36 = vshll.u32 %v1548_v10, 16 }
 0x25e   : > { %v3132_v1 = vsel %vm15378_vm10, %v3129_v55, %v3131_v30  ;;  %v1553_v13 = vshll.u32 %v1549_v48, 16  ;;  %vm15380_vm10 = vmmov %vm15370_vm1 }
 0x25f   : > { %v3241_v15 = vpop.f32.mrf.mxu2 }
 0x260   : > { %v3944_v59 = vpop.f32.mrf.mxu0 }
 0x261   : > { %9372 = vmatmul.msk.bf16.gmra.mxu3 %vm15376_vm4, %v3489_v52  ;;  %v4033_v20 = vadd.f32 %v3944_v59, %v11926_v2  ;;  %v1547_v2 = vmul.u32 14564, %v1544_v42  ;;  %v12057_v52 = vor.u32 %v3798_v31, %v3795_v12  ;;  %vm15379_vm4 = vmmov %vm15370_vm1 }
 0x262   : > { %9284 = vmatmul.msk.bf16.gmra.mxu2 %vm15379_vm4, %v3132_v1 }
 0x263   : > { %v12050_v44 = vadd.f32 %v4184_v40, %v4033_v20  ;;  %v12052_v5 = vpop.f32.mrf.mxu1  ;;  %v12064_v40 = vadd.f32 %v3241_v15, %v3038_v14  ;;  %v1550_v20 = vmul.u32 58254, %v1545_v49  ;;  %vm1555_vm0 = vc.u32 %v1547_v2, %v1551_v36 }
 0x264   : > { %v3589_v7 = vpop.f32.mrf.mxu3  ;;  %v1557_v42 = vadd.s32 %v1551_v36, %v1547_v2  ;;  %v1556_v12 = vsel %vm1555_vm0, 1, %v15229_v24  ;;  %v3490_v49 = vrot.slane %v12062_v9, 1  ;;  %v1554_v36 = vshrl.u32 %v1549_v48, 16  ;;  %vm15383_vm0 = vmmov %vm15379_vm4 }
 0x265   : > { %v12060_v59 = vadd.f32 %v3589_v7, %v11932_v50  ;;  %v3023_v50 = vadd.f32 %v11778_v8, %v11771_v45  ;;  %v3800_v7 = vsel %vm15036_vm15, %v3790_v51, %v12057_v52  ;;  %v1558_v14 = vadd.s32 %v1556_v12, %v1550_v20 }
 0x266   : > { %9418 = vmatmul.msk.bf16.gmra.mxu1 %vm15370_vm1, %v4098_v3  ;;  %vm1559_vm2 = vc.u32 %v1557_v42, %v1553_v13  ;;  %v1552_v3 = vshrl.u32 %v1548_v10, 16  ;;  %v3805_v10 = vshll.u32 %v11944_v6, 16  ;;  %vm15382_vm1 = vcmask 1046528  }
 0x267   : > { %v1560_v32 = vsel %vm1559_vm2, 1, %v15229_v24  ;;  %v3303_v2 = vadd.f32 %v11942_v58, %v3023_v50  ;;  %v3244_v1 = vpop.f32.mrf.mxu2  ;;  %v15381_v58 = vrot.slane %v12008_v39, 1  ;;  %v4099_v48 = vrot.slane %v11975_v19, 2  ;;  %vm15386_vm2 = vmmov %vm15382_vm1 }
 0x268   : > { %v3947_v31 = vpop.f32.mrf.mxu0  ;;  %v1562_v15 = vadd.s32 %v1560_v32, %v1558_v14  ;;  %v12094_v42 = vadd.f32 %v3244_v1, %v11921_v26  ;;  %v15384_v26 = vrot.slane %v11944_v6, 2  ;;  %vm15385_vm4 = vcmask 1045504   ;;  %v1821_v1 = vld [vmem:[%s10402_s22 + $0x118] sm:$0xff] }
 0x269   : > { %v4034_v55 = vadd.f32 %v3947_v31, %v11940_v57  ;;  %v3802_v57 = vshrl.u32 %v11944_v6, 16 }
 0x26a   : > { %v1563_v20 = vadd.s32 %v1562_v15, %v1552_v3 }
 0x26b   : > { %v12079_v45 = vadd.f32 %v12000_v18, %v4034_v55  ;;  %9393 = vmatmul.msk.bf16.gmra.mxu0 %vm15380_vm10, %v3800_v7  ;;  %v12082_v51 = vpop.f32.mrf.mxu1  ;;  %v3491_v18 = vsel %vm15382_vm1, %v15381_v58, %v3490_v49  ;;  %v3804_v31 = vrot.slane %v3802_v57, 1  ;;  %v3807_v7 = vrot.slane %v3805_v10, 2  ;;  %vm15387_vm10 = vmmov %vm15383_vm0 }
 0x26c   : > { %v3591_v8 = vpop.f32.mrf.mxu3  ;;  %v1564_v12 = vadd.s32 %v1563_v20, %v1554_v36  ;;  %v3133_v36 = vrot.slane %v11534_v27, 1  ;;  %v12117_v20 = vld [vmem:[#allocation2 + $0x80] sm:$0xff] }
 0x26d   : > { %v12084_v13 = vadd.f32 %v3591_v8, %v3303_v2  ;;  %v4100_v8 = vsel %vm15385_vm4, %v15384_v26, %v4099_v48  ;;  %v12110_v57 = vor.u32 %v3807_v7, %v3804_v31 }
 0x26e   : > { %v1565_v14 = vshrl.u32 %v1564_v12, 4  ;;  %v3134_v6 = vsel %vm15386_vm2, %v3131_v30, %v3133_v36  ;;  %v3028_v12 = vadd.f32 %v11804_v43, %v11819_v61  ;;  %vm15388_vm2 = vmmov %vm15387_vm10 }
 0x26f   : > { %v3809_v30 = vsel %vm15036_vm15, %v12057_v52, %v12110_v57  ;;  %v3811_v52 = vshrl.u32 %v11975_v19, 16 }
 0x270   : > { %v3949_v50 = vpop.f32.mrf.mxu0  ;;  %v1566_v3 = vmul.u32 18, %v1565_v14  ;;  %v3305_v7 = vadd.f32 %v11973_v53, %v3028_v12  ;;  %v15389_v14 = vmov 0 }
 0x271   : > { %9373 = vmatmul.msk.bf16.gmra.mxu3 %vm15383_vm0, %v3491_v18  ;;  %v4035_v55 = vadd.f32 %v3949_v50, %v11957_v16  ;;  %v3246_v16 = vpop.f32.mrf.mxu2  ;;  %v1861_v18 = vmul.f32 %v11648_v25, %v1821_v1  ;;  %v3492_v50 = vrot.slane %v12117_v20, 1  ;;  %v3813_v1 = vrot.slane %v3811_v52, 1  ;;  %v12176_v52 = vld [vmem:[#allocation2 + $0x18] sm:$0xff] }
 0x272   : > { %v12120_v58 = vadd.f32 %v3246_v16, %v11936_v46  ;;  %9285 = vmatmul.msk.bf16.gmra.mxu2 %vm15388_vm2, %v3134_v6 }
 0x273   : > { %v12100_v32 = vadd.f32 %v12022_v38, %v4035_v55  ;;  %v12102_v15 = vpop.f32.mrf.mxu1  ;;  %v1567_v38 = vsub.s32 %v12038_v56, %v1566_v3  ;;  %v3814_v55 = vshll.u32 %v11975_v19, 16 }
 0x274   : > { %v3594_v2 = vpop.f32.mrf.mxu3 }
 0x275   : > { %v12113_v10 = vadd.f32 %v3594_v2, %v11963_v34  ;;  %vm1605_vm1 = vcmp.ne.s32.totalorder %v1567_v38, 0  ;;  %vm1641_vm0 = vcmp.lt.s32.totalorder %v1567_v38, 0  ;;  %v1713_v27 = vadd.s32 18, %v1567_v38  ;;  %v10245_v34 = vld [vmem:[%s14942_s2] ss:$0 sm:$0xff] }
 0x276   : > { %9419 = vmatmul.msk.bf16.gmra.mxu1 %vm15387_vm10, %v4100_v8  ;;  %vm1677_vm4 = vmand %vm1641_vm0, %vm1605_vm1  ;;  %v1901_v56 = vadd.f32 %v10245_v34, %v1861_v18  ;;  %vm15393_vm0 = vcmask 1046528   ;;  %v3816_v6 = vrot.slane %v3814_v55, 2  ;;  %v4101_v18 = vrot.slane %v12008_v39, 2  ;;  %v4308_v34 = vld [vmem:[#allocation2 + $0x10] sm:$0xc] }
 0x277   : > { %v1749_v31 = vsel %vm1677_vm4, %v1713_v27, %v1567_v38  ;;  %vm15392_vm1 = vmmov %vm15388_vm2  ;;  %v2416_v38 = vrot.slane %v11481_v23, 4  ;;  %vm15395_vm2 = vcmask 1045504  }
 0x278   : > { %v3952_v46 = vpop.f32.mrf.mxu0  ;;  %vm12137_vm10 = vcmp.lt.s32.totalorder %v1749_v31, 16  ;;  %vm15394_vm4 = vmmov %vm15392_vm1 }
 0x279   : > { %v4036_v25 = vadd.f32 %v3952_v46, %v11971_v17  ;;  %v15390_v14 = vsel %vm12137_vm10, 4294967295, %v15389_v14  ;;  %v2009_v3 = vsel %vm12137_vm10, %v1901_v56, 0.0  ;;  %v3249_v2 = vpop.f32.mrf.mxu2  ;;  %v12164_v56 = vld [vmem:[#allocation2 + $0x14] sm:$0xf] }
 0x27a   : > { %15391 = vst [vmem:[#allocation61_spill] sm:$0xff] %v15390_v14  ;;  %v2045_v26 = vpack.c.bf16 %v2009_v3, %v2009_v3  ;;  %v12159_v8 = vadd.f32 %v3249_v2, %v11952_v37  ;;  %v4385_v37 = vunpack.c.l.b16 %v4308_v34  ;;  %v12185_v2 = vld [vmem:[#allocation2 + $0x88] sm:$0xff] }
 0x27b   : > { %v12142_v43 = vadd.f32 %v12052_v5, %v4036_v25  ;;  %9394 = vmatmul.msk.bf16.gmra.mxu0 %vm15392_vm1, %v3809_v30  ;;  %v12147_v17 = vpop.f32.mrf.mxu1  ;;  %v3493_v5 = vsel %vm15393_vm0, %v3490_v49, %v3492_v50  ;;  %v15034_v30 = vunpack.c.l.b16 %v12164_v56  ;;  %vm15396_vm1 = vcmask 125952   ;;  %vm15397_vm0 = vmmov %vm15394_vm4 }
 0x27c   : > { %v3596_v61 = vpop.f32.mrf.mxu3  ;;  %v2418_v36 = vshrl.u32 %v2045_v26, 16  ;;  %v2421_v16 = vshll.u32 %v2045_v26, 16 }
 0x27d   : > { %v12151_v53 = vadd.f32 %v3596_v61, %v3305_v7  ;;  %v4102_v61 = vsel %vm15395_vm2, %v4099_v48, %v4101_v18  ;;  %v12180_v55 = vpack.c.b16 %v15034_v30, %v4385_v37 }
 0x27e   : > { %v2420_v12 = vrot.slane %v2418_v36, 6  ;;  %v2423_v46 = vrot.slane %v2421_v16, 7  ;;  %v2058_v36 = vld [vmem:[#allocation2 + $0x98] sm:$0xe] }
 0x27f   : > { %v4441_v48 = vrot.slane %v12180_v55, 2 }
 0x280   : > { %v3954_v27 = vpop.f32.mrf.mxu0  ;;  %v2424_v25 = vor.u32 %v2423_v46, %v2420_v12 }
 0x281   : > { %9374 = vmatmul.msk.bf16.gmra.mxu3 %vm15394_vm4, %v3493_v5  ;;  %v4037_v49 = vadd.f32 %v3954_v27, %v11988_v63  ;;  %v3817_v63 = vor.u32 %v3816_v6, %v3813_v1  ;;  %v4442_v5 = vrot.slane %v12176_v52, 2  ;;  %vm15398_vm4 = vmmov %vm15395_vm2  ;;  %v3494_v27 = vrot.slane %v12185_v2, 1 }
 0x282   : > { %v2425_v26 = vsel %vm10493_vm11, %v2416_v38, %v2424_v25  ;;  %v3033_v38 = vadd.f32 %v11831_v4, %v11864_v60  ;;  %vm15399_vm2 = vmmov %vm15397_vm0  ;;  %v3820_v4 = vshrl.u32 %v12008_v39, 16 }
 0x283   : > { %v12169_v23 = vadd.f32 %v12082_v51, %v4037_v49  ;;  %v12171_v7 = vpop.f32.mrf.mxu1  ;;  %v3251_v51 = vpop.f32.mrf.mxu2  ;;  %2501 = vst.msk [vmem:[#allocation2 + $0x94] sm:$0xf] %vm15396_vm1, %v2425_v26  ;;  %v4443_v16 = vsel %vm15398_vm4, %v4441_v48, %v4442_v5  ;;  %v3818_v1 = vsel %vm15036_vm15, %v12110_v57, %v3817_v63  ;;  %v3823_v57 = vshll.u32 %v12008_v39, 16 }
 0x284   : > { %v3599_v31 = vpop.f32.mrf.mxu3  ;;  %v12190_v19 = vadd.f32 %v3251_v51, %v11967_v62  ;;  %9500 = vmatmul.msk.bf16.vlgmr.msra.gmra.mxu2 %vm15399_vm2, %v4443_v16  ;;  %v3307_v34 = vadd.f32 %v12006_v47, %v3033_v38  ;;  %vm15401_vm1 = vcmask 1046528   ;;  %v3822_v26 = vrot.slane %v3820_v4, 1  ;;  %vm15403_vm2 = vmmov %vm15398_vm4 }
 0x285   : > { %v12183_v3 = vadd.f32 %v3599_v31, %v11994_v0  ;;  %v2059_v0 = vsel %vm10547_vm14, 0, %v2058_v36  ;;  %vm15400_vm14 = vmmov %vm15397_vm0  ;;  %v4103_v31 = vrot.slane %v12062_v9, 2  ;;  %v3825_v48 = vrot.slane %v3823_v57, 2 }
 0x286   : > { %9420 = vmatmul.msk.bf16.gmra.mxu1 %vm15397_vm0, %v4102_v61  ;;  %2060 = vst [vmem:[#allocation2 + $0x98] sm:$0xe] %v2059_v0  ;;  %v12230_v0 = vld [vmem:[#allocation2 + $0x20] sm:$0xff] }
 0x287   : > { %v3826_v16 = vor.u32 %v3825_v48, %v3822_v26 }
 0x288   : > { %v3957_v62 = vpop.f32.mrf.mxu0 }
 0x289   : > { %v4038_v6 = vadd.f32 %v3957_v62, %v12004_v21  ;;  %v3495_v21 = vsel %vm15401_vm1, %v3492_v50, %v3494_v27  ;;  %vm15405_vm1 = vmmov %vm15397_vm0 }
 0x28a   : > { %v12235_v62 = vld [vmem:[#allocation2 + $0x90] sm:$0xff] }
 0x28b   : > { %v12208_v28 = vadd.f32 %v12102_v15, %v4038_v6  ;;  %9395 = vmatmul.msk.bf16.gmra.mxu0 %vm15400_vm14, %v3818_v1  ;;  %v4204_v46 = vpop.f32.mrf.mxu1  ;;  %v3254_v49 = vpop.f32.mrf.mxu2  ;;  %v2426_v15 = vrot.slane %v2424_v25, 4  ;;  %v4104_v25 = vsel %vm15398_vm4, %v4101_v18, %v4103_v31  ;;  %v3827_v18 = vsel %vm15036_vm15, %v3817_v63, %v3826_v16  ;;  %vm15404_vm14 = vmmov %vm15397_vm0 }
 0x28c   : > { %v3601_v12 = vpop.f32.mrf.mxu3  ;;  %v12219_v47 = vadd.f32 %v3254_v49, %v11983_v54  ;;  %v3832_v63 = vshll.u32 %v12062_v9, 16  ;;  %vm15408_vm4 = vmmov %vm15405_vm1 }
 0x28d   : > { %v12211_v60 = vadd.f32 %v3601_v12, %v3307_v34  ;;  %v2502_v37 = vld [vmem:[#allocation2 + $0x98] sm:$0x3]  ;;  %v3496_v34 = vrot.slane %v12235_v62, 1 }
 0x28e   : > { %v2503_v61 = vsel %vm10506_vm3, %v2426_v15, %v2502_v37  ;;  %vm15402_vm3 = vmmov %vm15397_vm0  ;;  %v3834_v26 = vrot.slane %v3832_v63, 2 }
 0x28f   : > { %2504 = vst [vmem:[#allocation2 + $0x98] sm:$0x3] %v2503_v61 }
 0x290   : > { %v3959_v51 = vpop.f32.mrf.mxu0 }
 0x291   : > { %9375 = vmatmul.msk.bf16.gmra.mxu3 %vm15397_vm0, %v3495_v21  ;;  %v4039_v39 = vadd.f32 %v3959_v51, %v12027_v35  ;;  %v4444_v35 = vrot.slane %v12230_v0, 2  ;;  %vm15406_vm0 = vcmask 1046528  }
 0x292   : > { %v3497_v21 = vsel %vm15406_vm0, %v3494_v27, %v3496_v34  ;;  %vm15414_vm0 = vmmov %vm15405_vm1 }
 0x293   : > { %v12227_v50 = vadd.f32 %v12147_v17, %v4039_v39  ;;  %v4207_v36 = vpop.f32.mrf.mxu1  ;;  %v3256_v38 = vpop.f32.mrf.mxu2  ;;  %v4445_v17 = vsel %vm15403_vm2, %v4442_v5, %v4444_v35  ;;  %v3829_v5 = vshrl.u32 %v12062_v9, 16  ;;  %v15409_v39 = vld [vmem:[#allocation42_spill] sm:$0xff] }
 0x294   : > { %v3604_v54 = vpop.f32.mrf.mxu3  ;;  %v12238_v1 = vadd.f32 %v3256_v38, %v11998_v22  ;;  %9501 = vmatmul.msk.bf16.gmra.mxu2 %vm15404_vm14, %v4445_v17 }
 0x295   : > { %v12233_v41 = vadd.f32 %v3604_v54, %v12035_v29  ;;  %v3831_v51 = vrot.slane %v3829_v5, 1  ;;  %v15410_v54 = vld [vmem:[#allocation41_spill] sm:$0xff] }
 0x296   : > { %9421 = vmatmul.msk.bf16.gmra.mxu1 %vm15402_vm3, %v4104_v25  ;;  %v3366_v37 = vld [vmem:[#allocation2 + $0x98] sm:$0x1]  ;;  %v3058_v9 = vadd.f32 %v15410_v54, %v15409_v39  ;;  %vm15411_vm3 = vmmov %vm15403_vm2 }
 0x297   : > { %v3443_v48 = vunpack.c.l.b16 %v3366_v37  ;;  %vm15412_vm2 = vmmov %vm15405_vm1 }
 0x298   : > { %v3962_v6 = vpop.f32.mrf.mxu0  ;;  %vm15413_vm14 = vmmov %vm15411_vm3 }
 0x299   : > { %v4040_v29 = vadd.f32 %v3962_v6, %v12060_v59  ;;  %v15407_v59 = vld [vmem:[#allocation39_spill] sm:$0xff]  ;;  %v12268_v6 = vld [vmem:[#allocation2 + $0x28] sm:$0xff]  ;;  %v3462_v5 = vpack.c.b16 %v3443_v48, %v3443_v48 }
 0x29a   : > { %v15416_v48 = vld [vmem:[#allocation43_spill] sm:$0xff] }
 0x29b   : > { %v12248_v12 = vadd.f32 %v12171_v7, %v4040_v29  ;;  %9396 = vmatmul.msk.bf16.gmra.mxu0 %vm15405_vm1, %v3827_v18  ;;  %v4209_v4 = vpop.f32.mrf.mxu1  ;;  %v3259_v49 = vpop.f32.mrf.mxu2  ;;  %v4105_v7 = vrot.slane %v12117_v20, 2  ;;  %v3835_v18 = vor.u32 %v3834_v26, %v3831_v51  ;;  %v3841_v26 = vshll.u32 %v12117_v20, 16 }
 0x29c   : > { %v3606_v22 = vpop.f32.mrf.mxu3  ;;  %v12258_v15 = vadd.f32 %v3259_v49, %v15407_v59  ;;  %v3498_v59 = vrot.slane %v3462_v5, 1  ;;  %v15419_v5 = vld [vmem:[#allocation45_spill] sm:$0xff] }
 0x29d   : > { %v12252_v57 = vadd.f32 %v3606_v22, %v12064_v40  ;;  %v4106_v17 = vsel %vm15411_vm3, %v4103_v31, %v4105_v7  ;;  %vm15417_vm3 = vmmov %vm15414_vm0 }
 0x2a0   : > { %v3964_v61 = vpop.f32.mrf.mxu0 }
 0x2a1   : > { %9376 = vmatmul.msk.bf16.gmra.mxu3 %vm15408_vm4, %v3497_v21  ;;  %v4041_v40 = vadd.f32 %v3964_v61, %v12084_v13  ;;  %v4446_v13 = vrot.slane %v12268_v6, 2  ;;  %v3836_v21 = vsel %vm15036_vm15, %v3826_v16, %v3835_v18  ;;  %vm15415_vm4 = vcmask 1046528  }
 0x2a3   : > { %v12265_v25 = vadd.f32 %v4204_v46, %v4041_v40  ;;  %v4212_v38 = vpop.f32.mrf.mxu1  ;;  %v3261_v22 = vpop.f32.mrf.mxu2  ;;  %v4447_v46 = vsel %vm15413_vm14, %v4444_v35, %v4446_v13  ;;  %v3838_v35 = vshrl.u32 %v12117_v20, 16  ;;  %v3499_v40 = vsel %vm15415_vm4, %v3496_v34, %v3498_v59 }
 0x2a4   : > { %v3609_v27 = vpop.f32.mrf.mxu3  ;;  %v12273_v63 = vadd.f32 %v3261_v22, %v3058_v9  ;;  %9502 = vmatmul.msk.bf16.gmra.mxu2 %vm15405_vm1, %v4447_v46  ;;  %v3843_v9 = vrot.slane %v3841_v26, 2  ;;  %v4690_v20 = vshrl.u32 %v12176_v52, 16  ;;  %v4693_v34 = vshll.u32 %v12176_v52, 16  ;;  %v15418_v22 = vld [vmem:[#allocation46_spill] sm:$0xff] }
 0x2a5   : > { %v12271_v29 = vadd.f32 %v3609_v27, %v12094_v42  ;;  %v3840_v54 = vrot.slane %v3838_v35, 1  ;;  %v4685_v27 = vshll.u32 %v12180_v55, 16  ;;  %v3063_v46 = vadd.f32 %v15419_v5, %v15418_v22 }
 0x2a6   : > { %9422 = vmatmul.msk.bf16.gmra.mxu1 %vm15412_vm2, %v4106_v17  ;;  %vm15420_vm2 = vmmov %vm15413_vm14  ;;  %vm4680_vm4 = vsmask.f32 5376 }
 0x2a7   : > { %v3844_v35 = vor.u32 %v3843_v9, %v3840_v54  ;;  %v4687_v26 = vrot.slane %v4685_v27, 3  ;;  %vm15421_vm14 = vmmov %vm15414_vm0 }
 0x2a8   : > { %v3967_v49 = vpop.f32.mrf.mxu0  ;;  %vm15422_vm1 = vmmov %vm15420_vm2 }
 0x2a9   : > { %v4042_v31 = vadd.f32 %v3967_v49, %v12113_v10  ;;  %v3845_v22 = vsel %vm15036_vm15, %v3835_v18, %v3844_v35  ;;  %v3850_v18 = vshll.u32 %v12185_v2, 16 }
 0x2ab   : > { %v12281_v42 = vadd.f32 %v4207_v36, %v4042_v31  ;;  %9397 = vmatmul.msk.bf16.gmra.mxu0 %vm15414_vm0, %v3836_v21  ;;  %v12284_v61 = vpop.f32.mrf.mxu1  ;;  %v3264_v16 = vpop.f32.mrf.mxu2  ;;  %v4107_v36 = vrot.slane %v12185_v2, 2 }
 0x2ac   : > { %v3611_v37 = vpop.f32.mrf.mxu3  ;;  %v12293_v10 = vadd.f32 %v3264_v16, %v15416_v48  ;;  %v4695_v48 = vrot.slane %v4693_v34, 3 }
 0x2ad   : > { %v12287_v51 = vadd.f32 %v3611_v37, %v12120_v58  ;;  %v4682_v58 = vshrl.u32 %v12180_v55, 16  ;;  %v4108_v59 = vsel %vm15420_vm2, %v4105_v7, %v4107_v36  ;;  %v12307_v37 = vld [vmem:[#allocation2 + $0x30] sm:$0xff]  ;;  %vm15426_vm2 = vmmov %vm15414_vm0 }
 0x2b0   : > { %v3969_v39 = vpop.f32.mrf.mxu0 }
 0x2b1   : > { %9377 = vmatmul.msk.bf16.gmra.mxu3 %vm15417_vm3, %v3499_v40  ;;  %v4043_v17 = vadd.f32 %v3969_v39, %v12151_v53  ;;  %v4684_v53 = vrot.slane %v4682_v58, 2  ;;  %v4692_v40 = vrot.slane %v4690_v20, 2  ;;  %vm15423_vm3 = vmmov %vm15414_vm0 }
 0x2b3   : > { %v12304_v49 = vadd.f32 %v4209_v4, %v4043_v17  ;;  %v4217_v31 = vpop.f32.mrf.mxu1  ;;  %v3266_v16 = vpop.f32.mrf.mxu2  ;;  %v4448_v4 = vrot.slane %v12307_v37, 2  ;;  %v4688_v54 = vor.u32 %v4687_v26, %v4684_v53  ;;  %v4696_v9 = vor.u32 %v4695_v48, %v4692_v40  ;;  %v15427_v40 = vld [vmem:[#allocation49_spill] sm:$0xff]  ;;  %v15428_v48 = vld [vmem:[#allocation48_spill] sm:$0xff] }
 0x2b4   : > { %v3614_v21 = vpop.f32.mrf.mxu3  ;;  %v12312_v39 = vadd.f32 %v3266_v16, %v3063_v46  ;;  %v15425_v46 = vld [vmem:[#allocation47_spill] sm:$0xff]  ;;  %v3852_v26 = vrot.slane %v3850_v18, 2  ;;  %v4699_v16 = vshrl.u32 %v12230_v0, 16 }
 0x2b5   : > { %v12310_v55 = vadd.f32 %v3614_v21, %v12159_v8  ;;  %v4449_v17 = vsel %vm15422_vm1, %v4446_v13, %v4448_v4  ;;  %v3847_v13 = vshrl.u32 %v12185_v2, 16  ;;  %v4702_v2 = vshll.u32 %v12230_v0, 16 }
 0x2b6   : > { %9423 = vmatmul.msk.bf16.gmra.mxu1 %vm15421_vm14, %v4108_v59  ;;  %9503 = vmatmul.msk.bf16.gmra.mxu2 %vm15414_vm0, %v4449_v17  ;;  %v3068_v17 = vadd.f32 %v15428_v48, %v15427_v40  ;;  %vm15429_vm14 = vmmov %vm15422_vm1 }
 0x2b7   : > { %v3849_v53 = vrot.slane %v3847_v13, 1  ;;  %vm15430_vm1 = vmmov %vm15414_vm0 }
 0x2b8   : > { %v3972_v7 = vpop.f32.mrf.mxu0  ;;  %vm15431_vm0 = vmmov %vm15429_vm14 }
 0x2b9   : > { %v4044_v8 = vadd.f32 %v3972_v7, %v12183_v3  ;;  %v4697_v3 = vsel %vm4680_vm4, %v4688_v54, %v4696_v9  ;;  %v12344_v54 = vld [vmem:[#allocation2 + $0x38] sm:$0xff] }
 0x2bb   : > { %v12320_v58 = vadd.f32 %v4212_v38, %v4044_v8  ;;  %9398 = vmatmul.msk.bf16.gmra.mxu0 %vm15423_vm3, %v3845_v22  ;;  %v12323_v20 = vpop.f32.mrf.mxu1  ;;  %v3269_v5 = vpop.f32.mrf.mxu2  ;;  %v4109_v38 = vrot.slane %v12235_v62, 2  ;;  %vm15432_vm3 = vmmov %vm15430_vm1 }
 0x2bc   : > { %v3616_v27 = vpop.f32.mrf.mxu3  ;;  %15424 = vst [vmem:[#allocation39_spill] sm:$0xff] %v12323_v20  ;;  %v12332_v21 = vadd.f32 %v3269_v5, %v15425_v46  ;;  %v4704_v5 = vrot.slane %v4702_v2, 3  ;;  %v4450_v46 = vrot.slane %v12344_v54, 2 }
 0x2bd   : > { %v12326_v34 = vadd.f32 %v3616_v27, %v12190_v19  ;;  %v4110_v8 = vsel %vm15429_vm14, %v4107_v36, %v4109_v38  ;;  %v3853_v27 = vor.u32 %v3852_v26, %v3849_v53  ;;  %vm15437_vm14 = vmmov %vm15430_vm1 }
 0x2be   : > { %v4451_v40 = vsel %vm15431_vm0, %v4448_v4, %v4450_v46  ;;  %v3856_v4 = vshrl.u32 %v12235_v62, 16 }
 0x2bf   : > { %v3854_v36 = vsel %vm15036_vm15, %v3844_v35, %v3853_v27  ;;  %v3859_v35 = vshll.u32 %v12235_v62, 16  ;;  %v4711_v62 = vshll.u32 %v12268_v6, 16 }
 0x2c0   : > { %v3974_v59 = vpop.f32.mrf.mxu0 }
 0x2c1   : > { %9524 = vmatmul.msk.bf16.vlgmr.msrb.gmra.mxu3 %vm15426_vm2, %v4697_v3  ;;  %v12337_v19 = vadd.f32 %v3974_v59, %v12211_v60  ;;  %v4701_v60 = vrot.slane %v4699_v16, 2  ;;  %v3695_v59 = vld [vmem:[#allocation2 + $0x98] sm:$0x3]  ;;  %vm15434_vm2 = vmmov %vm15430_vm1 }
 0x2c2   : > { %v3700_v26 = vunpack.c.l.b16 %v3695_v59 }
 0x2c3   : > { %v4222_v22 = vpop.f32.mrf.mxu1  ;;  %v3271_v18 = vpop.f32.mrf.mxu2  ;;  %v4705_v53 = vor.u32 %v4704_v5, %v4701_v60 }
 0x2c4   : > { %v3619_v7 = vpop.f32.mrf.mxu3  ;;  %v12349_v3 = vadd.f32 %v3271_v18, %v3068_v17 }
 0x2c5   : > { %v12347_v13 = vadd.f32 %v3619_v7, %v12219_v47  ;;  %v4706_v18 = vsel %vm4680_vm4, %v4696_v9, %v4705_v53 }
 0x2c6   : > { %9424 = vmatmul.msk.bf16.gmra.mxu1 %vm15430_vm1, %v4110_v8  ;;  %9504 = vmatmul.msk.bf16.gmra.mxu2 %vm15432_vm3, %v4451_v40  ;;  %v3858_v40 = vrot.slane %v3856_v4, 1  ;;  %vm15441_vm1 = vmmov %vm15431_vm0 }
 0x2c7   : > { %vm15442_vm0 = vmmov %vm15434_vm2 }
 0x2c8   : > { %v3977_v48 = vpop.f32.mrf.mxu0  ;;  %vm15443_vm3 = vmmov %vm15441_vm1 }
 0x2c9   : > { %v4046_v47 = vadd.f32 %v3977_v48, %v12233_v41  ;;  %v15436_v41 = vld [vmem:[#allocation50_spill] sm:$0xff]  ;;  %v3861_v48 = vrot.slane %v3859_v35, 2 }
 0x2cb   : > { %v12357_v16 = vadd.f32 %v4217_v31, %v4046_v47  ;;  %9399 = vmatmul.msk.bf16.gmra.mxu0 %vm15434_vm2, %v3854_v36  ;;  %v12360_v17 = vpop.f32.mrf.mxu1  ;;  %v3274_v8 = vpop.f32.mrf.mxu2  ;;  %v3701_v31 = vpack.c.b16 %v3700_v26, %v3700_v26  ;;  %v4708_v36 = vshrl.u32 %v12268_v6, 16  ;;  %v15439_v47 = vld [vmem:[#allocation52_spill] sm:$0xff]  ;;  %v3862_v4 = vor.u32 %v3861_v48, %v3858_v40  ;;  %vm15444_vm2 = vmmov %vm15442_vm0 }
 0x2cc   : > { %v3621_v2 = vpop.f32.mrf.mxu3  ;;  %15435 = vst [vmem:[#allocation41_spill] sm:$0xff] %v12360_v17  ;;  %v12369_v60 = vadd.f32 %v3274_v8, %v15436_v41  ;;  %v12380_v41 = vld [vmem:[#allocation2 + $0x40] sm:$0xff] }
 0x2cd   : > { %15433 = vst [vmem:[#allocation42_spill] sm:$0xff] %v12357_v16  ;;  %v12363_v7 = vadd.f32 %v3621_v2, %v12238_v1  ;;  %v4111_v5 = vrot.slane %v3701_v31, 2  ;;  %v15440_v2 = vld [vmem:[#allocation51_spill] sm:$0xff]  ;;  %v4452_v17 = vrot.slane %v12380_v41, 2 }
 0x2ce   : > { %v3073_v9 = vadd.f32 %v15440_v2, %v15439_v47 }
 0x2cf   : > { %v4112_v26 = vsel %vm15441_vm1, %v4109_v38, %v4111_v5  ;;  %v4453_v47 = vsel %vm15443_vm3, %v4450_v46, %v4452_v17  ;;  %v3863_v38 = vsel %vm15036_vm15, %v3853_v27, %v3862_v4  ;;  %v3868_v46 = vshll.u32 %v3701_v31, 16  ;;  %vm15449_vm1 = vmmov %vm15442_vm0 }
 0x2d0   : > { %v3979_v59 = vpop.f32.mrf.mxu0 }
 0x2d1   : > { %9525 = vmatmul.msk.bf16.gmra.mxu3 %vm15437_vm14, %v4706_v18  ;;  %v12373_v1 = vadd.f32 %v3979_v59, %v12252_v57  ;;  %v4710_v57 = vrot.slane %v4708_v36, 2  ;;  %v4713_v59 = vrot.slane %v4711_v62, 3  ;;  %vm15446_vm14 = vmmov %vm15442_vm0  ;;  %v3865_v62 = vshrl.u32 %v3701_v31, 16  ;;  %v15452_v31 = vld [vmem:[#allocation54_spill] sm:$0xff] }
 0x2d3   : > { %15438 = vst [vmem:[#allocation43_spill] sm:$0xff] %v12373_v1  ;;  %v4227_v8 = vpop.f32.mrf.mxu1  ;;  %v3276_v18 = vpop.f32.mrf.mxu2 }
 0x2d4   : > { %v3624_v30 = vpop.f32.mrf.mxu3  ;;  %v12385_v14 = vadd.f32 %v3276_v18, %v3073_v9 }
 0x2d5   : > { %v12383_v35 = vadd.f32 %v3624_v30, %v12258_v15  ;;  %v4714_v30 = vor.u32 %v4713_v59, %v4710_v57  ;;  %v3867_v57 = vrot.slane %v3865_v62, 1 }
 0x2d6   : > { %9425 = vmatmul.msk.bf16.gmra.mxu1 %vm15442_vm0, %v4112_v26  ;;  %9505 = vmatmul.msk.bf16.gmra.mxu2 %vm15444_vm2, %v4453_v47  ;;  %v15448_v26 = vld [vmem:[#allocation53_spill] sm:$0xff]  ;;  %v4717_v47 = vshrl.u32 %v12307_v37, 16  ;;  %vm15453_vm0 = vmmov %vm15443_vm3 }
 0x2d7   : > { %v4715_v27 = vsel %vm4680_vm4, %v4705_v53, %v4714_v30  ;;  %vm15454_vm3 = vmmov %vm15449_vm1 }
 0x2d8   : > { %v3982_v2 = vpop.f32.mrf.mxu0  ;;  %vm15456_vm2 = vmmov %vm15449_vm1 }
 0x2d9   : > { %v4048_v5 = vadd.f32 %v3982_v2, %v12271_v29  ;;  %v15451_v2 = vld [vmem:[#allocation55_spill] sm:$0xff] }
 0x2db   : > { %v12393_v15 = vadd.f32 %v4222_v22, %v4048_v5  ;;  %9400 = vmatmul.msk.bf16.gmra.mxu0 %vm15446_vm14, %v3863_v38  ;;  %v12396_v48 = vpop.f32.mrf.mxu1  ;;  %v3279_v9 = vpop.f32.mrf.mxu2  ;;  %v3870_v22 = vrot.slane %v3868_v46, 2  ;;  %v3078_v38 = vadd.f32 %v15452_v31, %v15451_v2  ;;  %vm15460_vm14 = vmmov %vm15449_vm1 }
 0x2dc   : > { %v3626_v40 = vpop.f32.mrf.mxu3  ;;  %15447 = vst [vmem:[#allocation45_spill] sm:$0xff] %v12396_v48  ;;  %v12403_v18 = vadd.f32 %v3279_v9, %v15448_v26 }
 0x2dd   : > { %15445 = vst [vmem:[#allocation46_spill] sm:$0xff] %v12393_v15  ;;  %v12399_v36 = vadd.f32 %v3626_v40, %v12273_v63  ;;  %v4720_v63 = vshll.u32 %v12307_v37, 16  ;;  %v12413_v40 = vld [vmem:[#allocation2 + $0x48] sm:$0xff]  ;;  %v3871_v9 = vor.u32 %v3870_v22, %v3867_v57  ;;  %v5046_v57 = vld [vmem:[#allocation2 + $0x10] sm:$0x8] }
 0x2df   : > { %v4722_v26 = vrot.slane %v4720_v63, 3  ;;  %v3872_v2 = vsel %vm15036_vm15, %v3862_v4, %v3871_v9  ;;  %v5051_v4 = vunpack.c.l.b16 %v5046_v57  ;;  %v15459_v9 = vunpack.c.l.b16 %v12164_v56 }
 0x2e0   : > { %v3984_v29 = vpop.f32.mrf.mxu0  ;;  %v5055_v56 = vrot.slane %v12176_v52, 3 }
 0x2e1   : > { %9526 = vmatmul.msk.bf16.gmra.mxu3 %vm15449_vm1, %v4715_v27  ;;  %v12407_v59 = vadd.f32 %v3984_v29, %v12287_v51  ;;  %v4719_v27 = vrot.slane %v4717_v47, 2  ;;  %v4454_v29 = vrot.slane %v12413_v40, 2  ;;  %vm15037_vm1 = vcmask 1044480  }
 0x2e3   : > { %15450 = vst [vmem:[#allocation47_spill] sm:$0xff] %v12407_v59  ;;  %v4232_v53 = vpop.f32.mrf.mxu1  ;;  %v3281_v46 = vpop.f32.mrf.mxu2  ;;  %v4455_v48 = vsel %vm15453_vm0, %v4452_v17, %v4454_v29  ;;  %v4723_v22 = vor.u32 %v4722_v26, %v4719_v27  ;;  %v10137_v17 = vld [vmem:[%s14945_s5 + $0x10] sm:$0xff]  ;;  %v4729_v26 = vshll.u32 %v12344_v54, 16 }
 0x2e4   : > { %v3629_v5 = vpop.f32.mrf.mxu3  ;;  %v12418_v51 = vadd.f32 %v3281_v46, %v3078_v38  ;;  %6286 = vmatpush.bf16.msra.mxu1 %v10137_v17  ;;  %v5052_v46 = vpack.c.b16 %v15459_v9, %v5051_v4 }
 0x2e5   : > { %v12416_v62 = vadd.f32 %v3629_v5, %v12293_v10 }
 0x2e6   : > { %9506 = vmatmul.msk.bf16.gmra.mxu2 %vm15454_vm3, %v4455_v48  ;;  %v5054_v17 = vrot.slane %v5052_v46, 3  ;;  %vm15464_vm3 = vmmov %vm15456_vm2 }
 0x2e8   : > { %v3987_v59 = vpop.f32.mrf.mxu0 }
 0x2e9   : > { %v4050_v31 = vadd.f32 %v3987_v59, %v12310_v55  ;;  %v4724_v55 = vsel %vm4680_vm4, %v4714_v30, %v4723_v22  ;;  %v15458_v59 = vld [vmem:[#allocation56_spill] sm:$0xff] }
 0x2eb   : > { %v12425_v10 = vadd.f32 %v4227_v8, %v4050_v31  ;;  %9401 = vmatmul.msk.bf16.gmra.mxu0 %vm15456_vm2, %v3872_v2  ;;  %v12428_v63 = vpop.f32.mrf.mxu1  ;;  %v3284_v48 = vpop.f32.mrf.mxu2  ;;  %v15462_v2 = vld [vmem:[#allocation58_spill] sm:$0xff]  ;;  %v15463_v31 = vld [vmem:[#allocation57_spill] sm:$0xff] }
 0x2ec   : > { %v3631_v47 = vpop.f32.mrf.mxu3  ;;  %15457 = vst [vmem:[#allocation48_spill] sm:$0xff] %v12428_v63  ;;  %v12438_v5 = vadd.f32 %v3284_v48, %v15458_v59  ;;  %v3083_v30 = vadd.f32 %v15463_v31, %v15462_v2  ;;  %v12450_v48 = vld [vmem:[#allocation2 + $0x50] sm:$0xff]  ;;  %v4731_v59 = vrot.slane %v4729_v26, 3  ;;  %v5056_v63 = vsel %vm15037_vm1, %v5054_v17, %v5055_v56 }
 0x2ed   : > { %15455 = vst [vmem:[#allocation49_spill] sm:$0xff] %v12425_v10  ;;  %v12434_v38 = vadd.f32 %v3631_v47, %v12312_v39  ;;  %v4726_v39 = vshrl.u32 %v12344_v54, 16  ;;  %v4456_v9 = vrot.slane %v12450_v48, 2 }
 0x2ef   : > { %v4457_v2 = vsel %vm15453_vm0, %v4454_v29, %v4456_v9 }
 0x2f0   : > { %v3989_v8 = vpop.f32.mrf.mxu0 }
 0x2f1   : > { %9527 = vmatmul.msk.bf16.gmra.mxu3 %vm15460_vm14, %v4724_v55  ;;  %v12444_v27 = vadd.f32 %v3989_v8, %v12326_v34  ;;  %v4728_v55 = vrot.slane %v4726_v39, 2  ;;  %vm15468_vm14 = vmmov %vm15456_vm2 }
 0x2f3   : > { %15461 = vst [vmem:[#allocation50_spill] sm:$0xff] %v12444_v27  ;;  %v4237_v47 = vpop.f32.mrf.mxu1  ;;  %v3286_v34 = vpop.f32.mrf.mxu2  ;;  %v4732_v52 = vor.u32 %v4731_v59, %v4728_v55  ;;  %v12481_v59 = vld [vmem:[#allocation2 + $0x58] sm:$0xff] }
 0x2f4   : > { %v3634_v57 = vpop.f32.mrf.mxu3  ;;  %v12456_v8 = vadd.f32 %v3286_v34, %v3083_v30 }
 0x2f5   : > { %v12454_v4 = vadd.f32 %v3634_v57, %v12332_v21  ;;  %v4733_v29 = vsel %vm4680_vm4, %v4723_v22, %v4732_v52  ;;  %v15467_v57 = vld [vmem:[#allocation59_spill] sm:$0xff] }
 0x2f6   : > { %9507 = vmatmul.msk.bf16.gmra.mxu2 %vm15464_vm3, %v4457_v2  ;;  %vm15471_vm3 = vmmov %vm15456_vm2 }
 0x2f8   : > { %v3992_v31 = vpop.f32.mrf.mxu0 }
 0x2f9   : > { %v4052_v46 = vadd.f32 %v3992_v31, %v12347_v13 }
 0x2fb   : > { %v12463_v27 = vadd.f32 %v4232_v53, %v4052_v46  ;;  %9548 = vmatmul.msk.bf16.vlgmr.msra.gmra.mxu0 %vm15456_vm2, %v5056_v63  ;;  %v12466_v39 = vpop.f32.mrf.mxu1  ;;  %v3289_v30 = vpop.f32.mrf.mxu2  ;;  %v4735_v53 = vshrl.u32 %v12380_v41, 16  ;;  %v4738_v63 = vshll.u32 %v12380_v41, 16 }
 0x2fc   : > { %v3636_v21 = vpop.f32.mrf.mxu3  ;;  %15466 = vst [vmem:[#allocation51_spill] sm:$0xff] %v12466_v39  ;;  %v12473_v17 = vadd.f32 %v3289_v30, %v15467_v57  ;;  %v15470_v30 = vld [vmem:[#allocation60_spill] sm:$0xff] }
 0x2fd   : > { %15465 = vst [vmem:[#allocation52_spill] sm:$0xff] %v12463_v27  ;;  %v12469_v26 = vadd.f32 %v3636_v21, %v12349_v3  ;;  %v5057_v3 = vrot.slane %v12230_v0, 3  ;;  %v4737_v46 = vrot.slane %v4735_v53, 2  ;;  %v4740_v21 = vrot.slane %v4738_v63, 3 }
 0x2ff   : > { %v5058_v39 = vsel %vm15037_vm1, %v5055_v56, %v5057_v3 }
 0x300   : > { %v3994_v34 = vpop.f32.mrf.mxu0 }
 0x301   : > { %9528 = vmatmul.msk.bf16.gmra.mxu3 %vm15468_vm14, %v4733_v29  ;;  %v12477_v13 = vadd.f32 %v3994_v34, %v12363_v7  ;;  %v4458_v7 = vrot.slane %v12481_v59, 2  ;;  %vm15474_vm14 = vmmov %vm15456_vm2 }
 0x303   : > { %15469 = vst [vmem:[#allocation53_spill] sm:$0xff] %v12477_v13  ;;  %v4242_v2 = vpop.f32.mrf.mxu1  ;;  %v3291_v31 = vpop.f32.mrf.mxu2  ;;  %v4459_v57 = vsel %vm15453_vm0, %v4456_v9, %v4458_v7 }
 0x304   : > { %v3639_v55 = vpop.f32.mrf.mxu3  ;;  %v12488_v29 = vadd.f32 %v3291_v31, %v15470_v30 }
 0x305   : > { %v12485_v22 = vadd.f32 %v3639_v55, %v12369_v60  ;;  %v4741_v60 = vor.u32 %v4740_v21, %v4737_v46  ;;  %v12512_v21 = vld [vmem:[#allocation2 + $0x60] sm:$0xff] }
 0x306   : > { %9508 = vmatmul.msk.bf16.gmra.mxu2 %vm15471_vm3, %v4459_v57  ;;  %vm15476_vm3 = vmmov %vm15456_vm2 }
 0x307   : > { %v4742_v9 = vsel %vm4680_vm4, %v4732_v52, %v4741_v60 }
 0x308   : > { %v3997_v34 = vpop.f32.mrf.mxu0 }
 0x309   : > { %v4054_v0 = vadd.f32 %v3997_v34, %v12383_v35 }
 0x30b   : > { %v12495_v55 = vadd.f32 %v4237_v47, %v4054_v0  ;;  %9549 = vmatmul.msk.bf16.gmra.mxu0 %vm15456_vm2, %v5058_v39  ;;  %v12501_v31 = vpop.f32.mrf.mxu2  ;;  %v12504_v30 = vpop.f32.mrf.mxu1  ;;  %v4744_v47 = vshrl.u32 %v12413_v40, 16  ;;  %v4747_v39 = vshll.u32 %v12413_v40, 16 }
 0x30c   : > { %v3641_v53 = vpop.f32.mrf.mxu3  ;;  %15473 = vst [vmem:[#allocation54_spill] sm:$0xff] %v12504_v30 }
 0x30d   : > { %15472 = vst [vmem:[#allocation55_spill] sm:$0xff] %v12495_v55  ;;  %v12499_v63 = vadd.f32 %v3641_v53, %v12385_v14  ;;  %v5059_v14 = vrot.slane %v12268_v6, 3  ;;  %v4746_v34 = vrot.slane %v4744_v47, 2  ;;  %v4749_v0 = vrot.slane %v4747_v39, 3 }
 0x30e   : > { %v4460_v53 = vrot.slane %v12512_v21, 2 }
 0x30f   : > { %v4750_v6 = vor.u32 %v4749_v0, %v4746_v34  ;;  %v12542_v0 = vld [vmem:[#allocation2 + $0x68] sm:$0xff] }
 0x310   : > { %v3999_v56 = vpop.f32.mrf.mxu0 }
 0x311   : > { %9529 = vmatmul.msk.bf16.gmra.mxu3 %vm15474_vm14, %v4742_v9  ;;  %v12508_v35 = vadd.f32 %v3999_v56, %v12399_v36  ;;  %v4461_v36 = vsel %vm15453_vm0, %v4458_v7, %v4460_v53  ;;  %v5060_v56 = vsel %vm15037_vm1, %v5057_v3, %v5059_v14  ;;  %v4751_v7 = vsel %vm4680_vm4, %v4741_v60, %v4750_v6  ;;  %vm15478_vm14 = vmmov %vm15456_vm2 }
 0x313   : > { %15475 = vst [vmem:[#allocation56_spill] sm:$0xff] %v12508_v35  ;;  %v12518_v52 = vpop.f32.mrf.mxu2  ;;  %v4247_v30 = vpop.f32.mrf.mxu1 }
 0x314   : > { %v3644_v46 = vpop.f32.mrf.mxu3 }
 0x315   : > { %v12516_v57 = vadd.f32 %v3644_v46, %v12403_v18 }
 0x316   : > { %9509 = vmatmul.msk.bf16.gmra.mxu2 %vm15476_vm3, %v4461_v36  ;;  %vm15481_vm3 = vmmov %vm15456_vm2 }
 0x318   : > { %v4002_v9 = vpop.f32.mrf.mxu0 }
 0x319   : > { %v4056_v35 = vadd.f32 %v4002_v9, %v12416_v62  ;;  %v4753_v62 = vshrl.u32 %v12450_v48, 16 }
 0x31b   : > { %v12525_v55 = vadd.f32 %v4242_v2, %v4056_v35  ;;  %9550 = vmatmul.msk.bf16.gmra.mxu0 %vm15456_vm2, %v5060_v56  ;;  %v12531_v39 = vpop.f32.mrf.mxu2  ;;  %v4756_v2 = vshll.u32 %v12450_v48, 16  ;;  %v12540_v35 = vpop.f32.mrf.mxu1  ;;  %v4755_v9 = vrot.slane %v4753_v62, 2 }
 0x31c   : > { %v3646_v18 = vpop.f32.mrf.mxu3  ;;  %15480 = vst [vmem:[#allocation59_spill] sm:$0xff] %v12540_v35 }
 0x31d   : > { %15477 = vst [vmem:[#allocation58_spill] sm:$0xff] %v12525_v55  ;;  %v12529_v47 = vadd.f32 %v3646_v18, %v12418_v51  ;;  %v5061_v51 = vrot.slane %v12307_v37, 3  ;;  %v4758_v56 = vrot.slane %v4756_v2, 3 }
 0x320   : > { %v4004_v46 = vpop.f32.mrf.mxu0 }
 0x321   : > { %9530 = vmatmul.msk.bf16.gmra.mxu3 %vm15478_vm14, %v4751_v7  ;;  %v12536_v3 = vadd.f32 %v4004_v46, %v12434_v38  ;;  %v4462_v38 = vrot.slane %v12542_v0, 2  ;;  %v5062_v46 = vsel %vm15037_vm1, %v5059_v14, %v5061_v51  ;;  %vm15483_vm14 = vmmov %vm15456_vm2 }
 0x323   : > { %15479 = vst [vmem:[#allocation57_spill] sm:$0xff] %v12536_v3  ;;  %v12548_v60 = vpop.f32.mrf.mxu2  ;;  %v4463_v18 = vsel %vm15453_vm0, %v4460_v53, %v4462_v38  ;;  %v4759_v3 = vor.u32 %v4758_v56, %v4755_v9  ;;  %v4252_v2 = vpop.f32.mrf.mxu1  ;;  %v12570_v9 = vld [vmem:[#allocation2 + $0x70] sm:$0xff] }
 0x324   : > { %v3649_v34 = vpop.f32.mrf.mxu3 }
 0x325   : > { %v12546_v36 = vadd.f32 %v3649_v34, %v12438_v5  ;;  %v4760_v53 = vsel %vm4680_vm4, %v4750_v6, %v4759_v3 }
 0x326   : > { %9510 = vmatmul.msk.bf16.gmra.mxu2 %vm15481_vm3, %v4463_v18  ;;  %vm15486_vm3 = vmmov %vm15456_vm2 }
 0x328   : > { %v4007_v7 = vpop.f32.mrf.mxu0 }
 0x329   : > { %v4058_v35 = vadd.f32 %v4007_v7, %v12454_v4  ;;  %v4762_v4 = vshrl.u32 %v12481_v59, 16 }
 0x32b   : > { %v12555_v37 = vadd.f32 %v4247_v30, %v4058_v35  ;;  %9551 = vmatmul.msk.bf16.gmra.mxu0 %vm15456_vm2, %v5062_v46  ;;  %v12561_v34 = vpop.f32.mrf.mxu2  ;;  %v4765_v30 = vshll.u32 %v12481_v59, 16  ;;  %v4764_v6 = vrot.slane %v4762_v4, 2  ;;  %v4464_v46 = vrot.slane %v12570_v9, 2 }
 0x32c   : > { %v3651_v5 = vpop.f32.mrf.mxu3 }
 0x32d   : > { %15482 = vst [vmem:[#allocation60_spill] sm:$0xff] %v12555_v37  ;;  %v12559_v62 = vadd.f32 %v3651_v5, %v12456_v8  ;;  %v5063_v8 = vrot.slane %v12344_v54, 3  ;;  %v4767_v7 = vrot.slane %v4765_v30, 3 }
 0x330   : > { %v4009_v55 = vpop.f32.mrf.mxu0 }
 0x331   : > { %9531 = vmatmul.msk.bf16.gmra.mxu3 %vm15483_vm14, %v4760_v53  ;;  %v12566_v14 = vadd.f32 %v4009_v55, %v12469_v26  ;;  %v12579_v26 = vpop.f32.mrf.mxu1  ;;  %v4465_v55 = vsel %vm15453_vm0, %v4462_v38, %v4464_v46  ;;  %v5064_v53 = vsel %vm15037_vm1, %v5061_v51, %v5063_v8  ;;  %vm15488_vm14 = vmmov %vm15456_vm2 }
 0x332   : > { %15485 = vst [vmem:[#allocation63_spill] sm:$0xff] %v12579_v26 }
 0x333   : > { %15484 = vst [vmem:[#allocation62_spill] sm:$0xff] %v12566_v14  ;;  %v12576_v18 = vpop.f32.mrf.mxu2  ;;  %v4768_v14 = vor.u32 %v4767_v7, %v4764_v6  ;;  %v12602_v7 = vld [vmem:[#allocation2 + $0x78] sm:$0xff] }
 0x334   : > { %v3654_v35 = vpop.f32.mrf.mxu3 }
 0x335   : > { %v12574_v56 = vadd.f32 %v3654_v35, %v12473_v17  ;;  %v4769_v38 = vsel %vm4680_vm4, %v4759_v3, %v4768_v14 }
 0x336   : > { %9511 = vmatmul.msk.bf16.gmra.mxu2 %vm15486_vm3, %v4465_v55  ;;  %vm15490_vm3 = vmmov %vm15456_vm2 }
 0x338   : > { %v4012_v5 = vpop.f32.mrf.mxu0 }
 0x339   : > { %v4060_v54 = vadd.f32 %v4012_v5, %v12485_v22  ;;  %v4257_v37 = vpop.f32.mrf.mxu1  ;;  %v4771_v22 = vshrl.u32 %v12512_v21, 16 }
 0x33b   : > { %v12585_v17 = vadd.f32 %v4252_v2, %v4060_v54  ;;  %9552 = vmatmul.msk.bf16.gmra.mxu0 %vm15456_vm2, %v5064_v53  ;;  %v12591_v35 = vpop.f32.mrf.mxu2  ;;  %v4774_v2 = vshll.u32 %v12512_v21, 16  ;;  %v4773_v3 = vrot.slane %v4771_v22, 2  ;;  %v4466_v53 = vrot.slane %v12602_v7, 2 }
 0x33c   : > { %v3656_v4 = vpop.f32.mrf.mxu3 }
 0x33d   : > { %15487 = vst [vmem:[#allocation64_spill] sm:$0xff] %v12585_v17  ;;  %v12589_v30 = vadd.f32 %v3656_v4, %v12488_v29  ;;  %v5065_v29 = vrot.slane %v12380_v41, 3  ;;  %v4776_v5 = vrot.slane %v4774_v2, 3  ;;  %v4467_v54 = vsel %vm15453_vm0, %v4464_v46, %v4466_v53 }
 0x340   : > { %v4014_v26 = vpop.f32.mrf.mxu0 }
 0x341   : > { %9532 = vmatmul.msk.bf16.gmra.mxu3 %vm15488_vm14, %v4769_v38  ;;  %v12596_v51 = vadd.f32 %v4014_v26, %v12499_v63  ;;  %v5066_v26 = vsel %vm15037_vm1, %v5063_v8, %v5065_v29  ;;  %v4777_v38 = vor.u32 %v4776_v5, %v4773_v3  ;;  %vm15493_vm14 = vmmov %vm15456_vm2  ;;  %v4783_v3 = vshll.u32 %v12542_v0, 16  ;;  %v12630_v5 = vld [vmem:[#allocation2 + $0x80] sm:$0xff] }
 0x343   : > { %15489 = vst [vmem:[#allocation65_spill] sm:$0xff] %v12596_v51  ;;  %v12605_v55 = vpop.f32.mrf.mxu2  ;;  %v12612_v51 = vpop.f32.mrf.mxu1  ;;  %v4778_v46 = vsel %vm4680_vm4, %v4768_v14, %v4777_v38 }
 0x344   : > { %v12600_v6 = vpop.f32.mrf.mxu3  ;;  %15491 = vst [vmem:[#allocation66_spill] sm:$0xff] %v12612_v51 }
 0x346   : > { %9512 = vmatmul.msk.bf16.gmra.mxu2 %vm15490_vm3, %v4467_v54  ;;  %vm15495_vm3 = vmmov %vm15456_vm2 }
 0x348   : > { %v4017_v63 = vpop.f32.mrf.mxu0 }
 0x349   : > { %v4062_v4 = vadd.f32 %v4017_v63, %v12516_v57  ;;  %v4780_v57 = vshrl.u32 %v12542_v0, 16  ;;  %v5067_v63 = vrot.slane %v12413_v40, 3 }
 0x34b   : > { %v12614_v17 = vadd.f32 %v4257_v37, %v4062_v4  ;;  %9553 = vmatmul.msk.bf16.gmra.mxu0 %vm15456_vm2, %v5066_v26  ;;  %v12619_v22 = vpop.f32.mrf.mxu2  ;;  %v4262_v54 = vpop.f32.mrf.mxu1  ;;  %v4782_v14 = vrot.slane %v4780_v57, 2  ;;  %v4785_v4 = vrot.slane %v4783_v3, 3  ;;  %v5068_v51 = vsel %vm15037_vm1, %v5065_v29, %v5067_v63  ;;  %v5475_v29 = vld [vmem:[#allocation3 + $0x8] sm:$0x3] }
 0x34c   : > { %v12617_v41 = vpop.f32.mrf.mxu3  ;;  %vm15502_vm1 = vsmask.f32 7942 }
 0x34d   : > { %15492 = vst [vmem:[#allocation67_spill] sm:$0xff] %v12614_v17  ;;  %v4786_v17 = vor.u32 %v4785_v4, %v4782_v14  ;;  %v4789_v4 = vshrl.u32 %v12570_v9, 16 }
 0x34f   : > { %v4787_v3 = vsel %vm4680_vm4, %v4777_v38, %v4786_v17 }
 0x350   : > { %v4019_v2 = vpop.f32.mrf.mxu0 }
 0x351   : > { %9533 = vmatmul.msk.bf16.gmra.mxu3 %vm15493_vm14, %v4778_v46  ;;  %v12624_v8 = vadd.f32 %v4019_v2, %v12529_v47  ;;  %v4468_v46 = vrot.slane %v12630_v5, 2  ;;  %vm5473_vm14 = vcmask 254976  }
 0x353   : > { %15494 = vst [vmem:[#allocation68_spill] sm:$0xff] %v12624_v8  ;;  %v12633_v26 = vpop.f32.mrf.mxu2  ;;  %v4469_v47 = vsel %vm15453_vm0, %v4466_v53, %v4468_v46  ;;  %vm15497_vm0 = vsmask.f32 1280  ;;  %v15498_v53 = vmov 0 }
 0x354   : > { %v12628_v37 = vpop.f32.mrf.mxu3  ;;  %vm12649_vm15 = vmand %vm5473_vm14, %vm15497_vm0  ;;  %vm15507_vm14 = vcmask 1044480   ;;  %vm15040_vm0 = vcmask 257024  }
 0x355   : > { %v15499_v53 = vsel %vm12649_vm15, 4294967295, %v15498_v53  ;;  %5471 = vst.msk [vmem:[#allocation3] sm:$0xf] %vm15040_vm0, %v15229_v24 }
 0x356   : > { %9513 = vmatmul.msk.bf16.gmra.mxu2 %vm15495_vm3, %v4469_v47  ;;  %15500 = vst [vmem:[#allocation70_spill] sm:$0xff] %v15499_v53  ;;  %v12653_v47 = vpop.f32.mrf.mxu1  ;;  %vm5478_vm3 = vcmask 257025  }
 0x357   : > { %15501 = vst [vmem:[#allocation71_spill] sm:$0xff] %v12653_v47  ;;  %vm12659_vm10 = vmand %vm5478_vm3, %vm15502_vm1  ;;  %v4791_v47 = vrot.slane %v4789_v4, 2  ;;  %vm15506_vm1 = vcmask 1045504  }
 0x358   : > { %v4022_v2 = vpop.f32.mrf.mxu0  ;;  %vm15508_vm3 = vmmov %vm15456_vm2  ;;  %5472 = vst.msk [vmem:[#allocation3 + $0x4] sm:$0xf] %vm15040_vm0, %v15229_v24 }
 0x359   : > { %v4064_v8 = vadd.f32 %v4022_v2, %v12546_v36  ;;  %v5476_v36 = vsel %vm12649_vm15, 0, %v5475_v29  ;;  %v4792_v2 = vshll.u32 %v12570_v9, 16  ;;  %5483 = vst.msk [vmem:[#allocation3 + $0x9c] sm:$0xf] %vm15040_vm0, %v15229_v24 }
 0x35a   : > { %5477 = vst [vmem:[#allocation3 + $0x8] sm:$0x3] %v5476_v36  ;;  %v12672_v36 = vld [vmem:[#allocation2 + $0x88] sm:$0xff] }
 0x35b   : > { %v12640_v13 = vadd.f32 %v4262_v54, %v4064_v8  ;;  %9554 = vmatmul.msk.bf16.gmra.mxu0 %vm15456_vm2, %v5068_v51  ;;  %v12645_v57 = vpop.f32.mrf.mxu2  ;;  %v5480_v51 = vld [vmem:[#allocation3 + $0x98] sm:$0xe]  ;;  %5484 = vst.msk [vmem:[#allocation3 + $0xa0] sm:$0xf] %vm15040_vm0, %v15229_v24  ;;  %v5071_v24 = vrot.slane %v12481_v59, 3 }
 0x35c   : > { %v12643_v40 = vpop.f32.mrf.mxu3  ;;  %v5481_v14 = vsel %vm12659_vm10, 0, %v5480_v51 }
 0x35d   : > { %15496 = vst [vmem:[#allocation69_spill] sm:$0xff] %v12640_v13  ;;  %v4794_v13 = vrot.slane %v4792_v2, 3  ;;  %v12706_v2 = vld [vmem:[#allocation2 + $0x90] sm:$0xff] }
 0x35e   : > { %5482 = vst [vmem:[#allocation3 + $0x98] sm:$0xe] %v5481_v14 }
 0x35f   : > { %v4795_v10 = vor.u32 %v4794_v13, %v4791_v47 }
 0x360   : > { %v4024_v8 = vpop.f32.mrf.mxu0 }
 0x361   : > { %9534 = vmatmul.msk.bf16.gmra.mxu3 %vm15456_vm2, %v4787_v3  ;;  %v12664_v54 = vadd.f32 %v4024_v8, %v12559_v62  ;;  %v5069_v3 = vrot.slane %v12450_v48, 3  ;;  %v4470_v62 = vrot.slane %v12672_v36, 2  ;;  %v4796_v13 = vsel %vm4680_vm4, %v4786_v17, %v4795_v10 }
 0x362   : > { %v4637_v17 = vadd.f32 %v12501_v31, %v12019_v11 }
 0x363   : > { %15505 = vst [vmem:[#allocation72_spill] sm:$0xff] %v12664_v54  ;;  %v12675_v53 = vpop.f32.mrf.mxu2  ;;  %v4471_v8 = vsel %vm15506_vm1, %v4468_v46, %v4470_v62  ;;  %v4267_v54 = vpop.f32.mrf.mxu1  ;;  %v5070_v27 = vsel %vm15507_vm14, %v5067_v63, %v5069_v3  ;;  %vm15510_vm1 = vmmov %vm15456_vm2  ;;  %vm15512_vm14 = vcmask 1045504  }
 0x364   : > { %v12670_v29 = vpop.f32.mrf.mxu3 }
 0x366   : > { %9514 = vmatmul.msk.bf16.gmra.mxu2 %vm15508_vm3, %v4471_v8  ;;  %vm15513_vm3 = vcmask 1044480  }
 0x367   : > { %v5072_v59 = vsel %vm15513_vm3, %v5069_v3, %v5071_v24 }
 0x368   : > { %v4027_v51 = vpop.f32.mrf.mxu0 }
 0x369   : > { %v4066_v14 = vadd.f32 %v4027_v51, %v12574_v56 }
 0x36b   : > { %v12686_v48 = vadd.f32 %v4267_v54, %v4066_v14  ;;  %9555 = vmatmul.msk.bf16.gmra.mxu0 %vm15456_vm2, %v5070_v27  ;;  %v12695_v56 = vpop.f32.mrf.mxu2  ;;  %v4798_v27 = vshrl.u32 %v12602_v7, 16  ;;  %v4801_v54 = vshll.u32 %v12602_v7, 16  ;;  %vm15514_vm2 = vmmov %vm15510_vm1 }
 0x36c   : > { %v12689_v46 = vpop.f32.mrf.mxu3  ;;  %vm15515_vm0 = vmmov %vm15514_vm2 }
 0x36d   : > { %15509 = vst [vmem:[#allocation73_spill] sm:$0xff] %v12686_v48  ;;  %v4800_v51 = vrot.slane %v4798_v27, 2  ;;  %v4803_v14 = vrot.slane %v4801_v54, 3 }
 0x36f   : > { %v12723_v11 = vor.u32 %v4803_v14, %v4800_v51 }
 0x370   : > { %v4029_v63 = vpop.f32.mrf.mxu0 }
 0x371   : > { %9535 = vmatmul.msk.bf16.gmra.mxu3 %vm15510_vm1, %v4796_v13  ;;  %v12700_v47 = vadd.f32 %v4029_v63, %v12589_v30  ;;  %v4472_v30 = vrot.slane %v12706_v2, 2  ;;  %v5010_v13 = vadd.f32 %v12600_v6, %v4637_v17  ;;  %v12718_v63 = vld [vmem:[%s14944_s4] ss:$0 sm:$0xff]  ;;  %v4805_v3 = vsel %vm4680_vm4, %v4795_v10, %v12723_v11 }
 0x373   : > { %15511 = vst [vmem:[#allocation74_spill] sm:$0xff] %v12700_v47  ;;  %v12709_v8 = vpop.f32.mrf.mxu2  ;;  %v4473_v47 = vsel %vm15512_vm14, %v4470_v62, %v4472_v30  ;;  %v4638_v62 = vadd.f32 %v12518_v52, %v12050_v44  ;;  %vm15518_vm14 = vmmov %vm15515_vm0  ;;  %v10140_v44 = vld [vmem:[%s14945_s5 + $0x28] sm:$0xff] }
 0x374   : > { %v12704_v4 = vpop.f32.mrf.mxu3  ;;  %6643 = vmatpush.bf16.msra.mxu3 %v10140_v44 }
 0x375   : > { %v5011_v17 = vadd.f32 %v12617_v41, %v4638_v62 }
 0x376   : > { %9515 = vmatmul.msk.bf16.gmra.mxu2 %vm15514_vm2, %v4473_v47  ;;  %v4639_v47 = vadd.f32 %v12531_v39, %v12079_v45 }
 0x378   : > { %v5160_v48 = vpop.f32.mrf.mxu0  ;;  %v5012_v16 = vadd.f32 %v12628_v37, %v4639_v47 }
 0x379   : > { %v5250_v15 = vadd.f32 %v5160_v48, %v5010_v13  ;;  %v10136_v13 = vld [vmem:[%s14945_s5 + $0x8] sm:$0xff] }
 0x37a   : > { %6432 = vmatpush.bf16.msrb.mxu2 %v10136_v13 }
 0x37b   : > { %vm5286_vm1 = vcmp.gt.f32.partialorder %v5250_v15, 0.0  ;;  %v5326_v31 = vmul.f32 %v12718_v63, %v5250_v15  ;;  %9556 = vmatmul.msk.bf16.gmra.mxu0 %vm15515_vm0, %v5072_v59  ;;  %v12729_v27 = vpop.f32.mrf.mxu2  ;;  %vm15522_vm0 = vmmov %vm15513_vm3 }
 0x37c   : > { %v12727_v6 = vpop.f32.mrf.mxu3  ;;  %15516 = vst [vmem:[#allocation75_spill] sm:$0xff] %v12729_v27 }
 0x37d   : > { %v5362_v54 = vsel %vm5286_vm1, %v5250_v15, %v5326_v31  ;;  %v4807_v15 = vshrl.u32 %v12630_v5, 16  ;;  %v4810_v31 = vshll.u32 %v12630_v5, 16  ;;  %vm15526_vm1 = vcmask 257024  }
 0x37e   : > { %v5398_v48 = vsel %vm10521_vm5, %v5362_v54, 0.0 }
 0x37f   : > { %v5434_v51 = vpack.c.bf16 %v5398_v48, %v5398_v48  ;;  %v5884_v48 = vld [vmem:[#allocation3 + $0x8] sm:$0xe]  ;;  %v4809_v13 = vrot.slane %v4807_v15, 2  ;;  %v4812_v44 = vrot.slane %v4810_v31, 3  ;;  %v10159_v15 = vld [vmem:[%s14945_s5 + $0x38] sm:$0xff] }
 0x380   : > { %v5162_v14 = vpop.f32.mrf.mxu0  ;;  %7016 = vmatpush.bf16.msrb.mxu0 %v10159_v15  ;;  %v12794_v15 = vld [vmem:[#allocation3] sm:$0xff]  }
 0x381   : > { %9536 = vmatmul.msk.bf16.gmra.mxu3 %vm15518_vm14, %v4805_v3  ;;  %v5489_v10 = vshrl.u32 %v5434_v51, 16  ;;  %v5492_v52 = vshll.u32 %v5434_v51, 16  ;;  %v5251_v59 = vadd.f32 %v5162_v14, %v5011_v17  ;;  %v12755_v17 = vld [vmem:[#allocation2 + $0x98] sm:$0xff]  ;;  %vm15527_vm14 = vmmov %vm15514_vm2 }
 0x382   : > { %v15041_v27 = vrot.slane %v12755_v17, 2 }
 0x383   : > { %v5491_v41 = vrot.slane %v5489_v10, 6  ;;  %v5494_v62 = vrot.slane %v5492_v52, 7  ;;  %vm5287_vm5 = vcmp.gt.f32.partialorder %v5251_v59, 0.0  ;;  %v5327_v54 = vmul.f32 %v12718_v63, %v5251_v59  ;;  %v12753_v1 = vpop.f32.mrf.mxu2 }
 0x384   : > { %v12748_v3 = vpop.f32.mrf.mxu3  ;;  %15519 = vst [vmem:[#allocation9_spill] sm:$0xff] %v12753_v1  ;;  %v15521_v1 = vrot.slane %v12512_v21, 3 }
 0x385   : > { %v5495_v51 = vor.u32 %v5494_v62, %v5491_v41  ;;  %v5363_v14 = vsel %vm5287_vm5, %v5251_v59, %v5327_v54  ;;  %v10161_v59 = vld [vmem:[%s14945_s5 + $0x48] sm:$0xff]  ;;  %v12775_v54 = vor.u32 %v4812_v44, %v4809_v13  ;;  %vm15529_vm5 = vmmov %vm15526_vm1 }
 0x386   : > { %v5399_v52 = vsel %vm10554_vm6, %v5363_v14, 0.0  ;;  %v5074_v41 = vsel %vm15522_vm0, %v5071_v24, %v15521_v1  ;;  %vm15523_vm6 = vcmask 1045504   ;;  %7396 = vmatpush.bf16.msrb.mxu1 %v10161_v59 }
 0x387   : > { %v5885_v45 = vsel %vm12659_vm10, %v5495_v51, %v5884_v48  ;;  %v5435_v39 = vpack.c.bf16 %v5399_v52, %v5399_v52  ;;  %v4475_v37 = vsel %vm15523_vm6, %v4472_v30, %v15041_v27  ;;  %vm15524_vm10 = vmmov %vm15514_vm2  ;;  %v4640_v30 = vadd.f32 %v12548_v60, %v12100_v32 }
 0x388   : > { %5886 = vst [vmem:[#allocation3 + $0x8] sm:$0xe] %v5885_v45  ;;  %v5165_v20 = vpop.f32.mrf.mxu0  ;;  %9516 = vmatmul.msk.bf16.gmra.mxu2 %vm15524_vm10, %v4475_v37  ;;  %v4814_v44 = vsel %vm4680_vm4, %v12723_v11, %v12775_v54  ;;  %v4816_v60 = vshrl.u32 %v12672_v36, 16  ;;  %v4819_v11 = vshll.u32 %v12672_v36, 16 }
 0x389   : > { %v5498_v38 = vshrl.u32 %v5435_v39, 16  ;;  %v5501_v31 = vshll.u32 %v5435_v39, 16  ;;  %v5252_v62 = vadd.f32 %v5165_v20, %v5012_v16  ;;  %v5496_v20 = vrot.slane %v5495_v51, 4 }
 0x38a   : > { %v5013_v45 = vadd.f32 %v12643_v40, %v4640_v30  ;;  %v6067_v40 = vshll.u32 %v12794_v15, 16 }
 0x38b   : > { %v5500_v1 = vrot.slane %v5498_v38, 6  ;;  %v5503_v24 = vrot.slane %v5501_v31, 7  ;;  %vm5288_vm3 = vcmp.gt.f32.partialorder %v5252_v62, 0.0  ;;  %v5328_v47 = vmul.f32 %v12718_v63, %v5252_v62  ;;  %9557 = vmatmul.msk.bf16.gmra.mxu0 %vm15514_vm2, %v5074_v41  ;;  %v12784_v14 = vpop.f32.mrf.mxu2  ;;  %v4344_v38 = vld [vmem:[#allocation2 + $0xa0] sm:$0x3] }
 0x38c   : > { %v12780_v48 = vpop.f32.mrf.mxu3  ;;  %v4421_v31 = vunpack.c.l.b16 %v4344_v38  ;;  %v6069_v38 = vrot.slane %v6067_v40, 1  ;;  %v15533_v40 = vrot.slane %v12755_v17, 2 }
 0x38d   : > { %v5504_v16 = vor.u32 %v5503_v24, %v5500_v1  ;;  %v5364_v13 = vsel %vm5288_vm3, %v5252_v62, %v5328_v47  ;;  %vm15536_vm3 = vmmov %vm15514_vm2 }
 0x38e   : > { %v5400_v52 = vsel %vm10667_vm9, %v5364_v13, 0.0  ;;  %v4821_v13 = vrot.slane %v4819_v11, 3  ;;  %v4440_v10 = vpack.c.b16 %v4421_v31, %v4421_v31 }
 0x38f   : > { %v5505_v39 = vsel %vm10493_vm11, %v5496_v20, %v5504_v16  ;;  %v5436_v41 = vpack.c.bf16 %v5400_v52, %v5400_v52  ;;  %v4818_v20 = vrot.slane %v4816_v60, 2  ;;  %v4641_v52 = vadd.f32 %v12561_v34, %v12142_v43 }
 0x390   : > { %5887 = vst.msk [vmem:[#allocation3 + $0xc] sm:$0xf] %vm15526_vm1, %v5505_v39  ;;  %v5167_v32 = vpop.f32.mrf.mxu0  ;;  %v4476_v27 = vrot.slane %v4440_v10, 2  ;;  %v15530_v34 = vrot.slane %v12542_v0, 3  ;;  %vm15538_vm1 = vsmask.f32 7424 }
 0x391   : > { %9537 = vmatmul.msk.bf16.gmra.mxu3 %vm15527_vm14, %v4814_v44  ;;  %v5508_v51 = vshrl.u32 %v5436_v41, 16  ;;  %v5511_v59 = vshll.u32 %v5436_v41, 16  ;;  %v5253_v37 = vadd.f32 %v5167_v32, %v5013_v45  ;;  %v5506_v45 = vrot.slane %v5504_v16, 4  ;;  %vm15539_vm14 = vmmov %vm15529_vm5 }
 0x392   : > { %v5014_v30 = vadd.f32 %v12670_v29, %v4641_v52  ;;  %v15531_v16 = vrot.slane %v12512_v21, 3 }
 0x393   : > { %v5510_v62 = vrot.slane %v5508_v51, 6  ;;  %v5513_v1 = vrot.slane %v5511_v59, 7  ;;  %vm5289_vm9 = vcmp.gt.f32.partialorder %v5253_v37, 0.0  ;;  %v5329_v24 = vmul.f32 %v12718_v63, %v5253_v37  ;;  %v12805_v44 = vpop.f32.mrf.mxu2 }
 0x394   : > { %v12802_v47 = vpop.f32.mrf.mxu3  ;;  %v6065_v59 = vshrl.u32 %v12794_v15, 16 }
 0x395   : > { %v5514_v39 = vor.u32 %v5513_v1, %v5510_v62  ;;  %v5365_v41 = vsel %vm5289_vm9, %v5253_v37, %v5329_v24  ;;  %v12823_v62 = vor.u32 %v4821_v13, %v4818_v20  ;;  %vm15540_vm9 = vmmov %vm15536_vm3 }
 0x396   : > { %v5401_v51 = vsel %vm10685_vm12, %v5365_v41, 0.0  ;;  %vm15532_vm12 = vmmov %vm15522_vm0 }
 0x397   : > { %v5515_v60 = vsel %vm10493_vm11, %v5506_v45, %v5514_v39  ;;  %v5437_v11 = vpack.c.bf16 %v5401_v51, %v5401_v51  ;;  %v12815_v31 = vld [vmem:[#allocation3 + $0x8] sm:$0xff]  ;;  %v5076_v37 = vsel %vm15532_vm12, %v15531_v16, %v15530_v34  ;;  %vm15534_vm0 = vmmov %vm15523_vm6  ;;  %v6070_v45 = vor.u32 %v6069_v38, %v6065_v59 }
 0x398   : > { %5888 = vst.msk [vmem:[#allocation3 + $0x10] sm:$0xf] %vm15529_vm5, %v5515_v60  ;;  %v5170_v43 = vpop.f32.mrf.mxu0  ;;  %v4477_v29 = vsel %vm15534_vm0, %v15533_v40, %v4476_v27  ;;  %v6072_v52 = vshll.u32 %v12815_v31, 16  ;;  %vm15535_vm6 = vmmov %vm15514_vm2  ;;  %v4642_v27 = vadd.f32 %v12576_v18, %v12169_v23  ;;  %vm6224_vm2 = vcmask 261120   ;;  %v12841_v38 = vld [vmem:[#allocation3 + $0xc] sm:$0xf] }
 0x399   : > { %v5518_v1 = vshrl.u32 %v5437_v11, 16  ;;  %v5521_v24 = vshll.u32 %v5437_v11, 16  ;;  %v5254_v10 = vadd.f32 %v5170_v43, %v5014_v30  ;;  %9517 = vmatmul.msk.bf16.gmra.mxu2 %vm15535_vm6, %v4477_v29  ;;  %v5516_v51 = vrot.slane %v5514_v39, 4  ;;  %v6772_v39 = vld [vmem:[#allocation3 + $0x8] sm:$0xe]  ;;  %vm15545_vm0 = vmmov %vm15536_vm3 }
 0x39a   : > { %v6074_v13 = vrot.slane %v6072_v52, 1  ;;  %v4823_v59 = vsel %vm4680_vm4, %v12775_v54, %v12823_v62  ;;  %v5015_v23 = vadd.f32 %v12689_v46, %v4642_v27  ;;  %v4825_v54 = vshrl.u32 %v12706_v2, 16 }
 0x39b   : > { %v5520_v41 = vrot.slane %v5518_v1, 6  ;;  %v5523_v32 = vrot.slane %v5521_v24, 7  ;;  %vm5290_vm10 = vcmp.gt.f32.partialorder %v5254_v10, 0.0  ;;  %v5330_v21 = vmul.f32 %v12718_v63, %v5254_v10  ;;  %9558 = vmatmul.msk.bf16.gmra.mxu0 %vm15536_vm3, %v5076_v37  ;;  %v12836_v30 = vpop.f32.mrf.mxu2  ;;  %vm15550_vm3 = vmmov %vm15529_vm5 }
 0x39c   : > { %v12832_v20 = vpop.f32.mrf.mxu3  ;;  %v6075_v16 = vsel %vm15538_vm1, %v6070_v45, %v6074_v13  ;;  %v4828_v29 = vshll.u32 %v12706_v2, 16  ;;  %v6852_v1 = vunpack.c.l.b16 %v12841_v38  ;;  %v6851_v52 = vunpack.c.l.b16 %v6772_v39  ;;  %v10135_v38 = vld [vmem:[%s14945_s5] sm:$0xff] }
 0x39d   : > { %v5524_v60 = vor.u32 %v5523_v32, %v5520_v41  ;;  %v5366_v11 = vsel %vm5290_vm10, %v5254_v10, %v5330_v21  ;;  %9646 = vmatmul.msk.bf16.vlgmr.msra.gmra.mxu1 %vm6224_vm2, %v6075_v16  ;;  %v15042_v27 = vrot.slane %v12570_v9, 3  ;;  %6433 = vmatpush.bf16.msrb.mxu2 %v10135_v38  ;;  %vm15549_vm10 = vmmov %vm15538_vm1 }
 0x39e   : > { %v5402_v34 = vsel %vm10806_vm7, %v5366_v11, 0.0  ;;  %v4830_v11 = vrot.slane %v4828_v29, 3  ;;  %v12864_v43 = vpack.c.b16 %v6852_v1, %v6851_v52  ;;  %v7525_v52 = vld [vmem:[#allocation3 + $0x8] sm:$0xc]  ;;  %vm15551_vm1 = vmmov %vm15545_vm0 }
 0x39f   : > { %v5525_v18 = vsel %vm10493_vm11, %v5516_v51, %v5524_v60  ;;  %v5438_v37 = vpack.c.bf16 %v5402_v34, %v5402_v34  ;;  %v4827_v51 = vrot.slane %v4825_v54, 2  ;;  %v4643_v34 = vadd.f32 %v12591_v35, %v12208_v28 }
 0x3a0   : > { %5889 = vst.msk [vmem:[#allocation3 + $0x14] sm:$0xf] %vm15539_vm14, %v5525_v18  ;;  %v5172_v40 = vpop.f32.mrf.mxu0  ;;  %v5526_v16 = vrot.slane %v5524_v60, 4  ;;  %v15543_v35 = vrot.slane %v12542_v0, 3  ;;  %v7158_v0 = vshll.u32 %v12864_v43, 16  ;;  %vm15552_vm14 = vcmask 1046528  }
 0x3a1   : > { %9538 = vmatmul.msk.bf16.gmra.mxu3 %vm15540_vm9, %v4823_v59  ;;  %v5528_v24 = vshrl.u32 %v5438_v37, 16  ;;  %v5531_v46 = vshll.u32 %v5438_v37, 16  ;;  %v5255_v10 = vadd.f32 %v5172_v40, %v5015_v23  ;;  %15541 = vst [vmem:[#allocation10_spill] sm:$0xff] %v12864_v43  ;;  %v4644_v40 = vadd.f32 %v12605_v55, %v12227_v50 }
 0x3a2   : > { %v5016_v54 = vadd.f32 %v12704_v4, %v4643_v34  ;;  %v6076_v50 = vshrl.u32 %v12815_v31, 16  ;;  %v12884_v55 = vor.u32 %v4830_v11, %v4827_v51  ;;  %v7155_v4 = vshrl.u32 %v12864_v43, 16 }
 0x3a3   : > { %v5530_v45 = vrot.slane %v5528_v24, 6  ;;  %v5533_v41 = vrot.slane %v5531_v46, 7  ;;  %vm5291_vm7 = vcmp.gt.f32.partialorder %v5255_v10, 0.0  ;;  %v5331_v32 = vmul.f32 %v12718_v63, %v5255_v10  ;;  %v12859_v59 = vpop.f32.mrf.mxu2 }
 0x3a4   : > { %v12856_v21 = vpop.f32.mrf.mxu3  ;;  %v5017_v38 = vadd.f32 %v12727_v6, %v4644_v40  ;;  %v6078_v34 = vor.u32 %v6076_v50, %v6074_v13  ;;  %v15043_v13 = vrot.slane %v12815_v31, 1 }
 0x3a5   : > { %v5534_v23 = vor.u32 %v5533_v41, %v5530_v45  ;;  %v5367_v18 = vsel %vm5291_vm7, %v5255_v10, %v5331_v32  ;;  %vm15553_vm7 = vcmask 1045504  }
 0x3a6   : > { %v5403_v39 = vsel %vm10824_vm8, %v5367_v18, 0.0  ;;  %vm15544_vm8 = vmmov %vm15532_vm12 }
 0x3a7   : > { %v5535_v29 = vsel %vm10493_vm11, %v5526_v16, %v5534_v23  ;;  %v5439_v24 = vpack.c.bf16 %v5403_v39, %v5403_v39  ;;  %v12875_v46 = vld [vmem:[#allocation3 + $0x10] sm:$0xff]  ;;  %v5078_v60 = vsel %vm15544_vm8, %v15543_v35, %v15042_v27  ;;  %v7532_v16 = vunpack.c.l.b16 %v7525_v52  ;;  %v15547_v35 = vld [vmem:[#allocation21_spill] sm:$0xff] }
 0x3a8   : > { %5890 = vst.msk [vmem:[#allocation3 + $0x18] sm:$0xf] %vm15529_vm5, %v5535_v29  ;;  %v5175_v28 = vpop.f32.mrf.mxu0  ;;  %v6080_v32 = vshll.u32 %v12875_v46, 16  ;;  %v12904_v40 = vld [vmem:[#allocation3 + $0x10] sm:$0xff]  ;;  %v5536_v29 = vrot.slane %v5534_v23, 4  ;;  %vm15548_vm6 = vnez %v15547_v35  ;;  %v4834_v23 = vshrl.u32 %v12755_v17, 16 }
 0x3a9   : > { %v5538_v10 = vshrl.u32 %v5439_v24, 16  ;;  %v5541_v45 = vshll.u32 %v5439_v24, 16  ;;  %v5256_v41 = vadd.f32 %v5175_v28, %v5016_v54  ;;  %9672 = vmatmul.msk.bf16.vlgmr.msrb.gmra.mxu2 %vm6224_vm2, %v12794_v15  ;;  %v4832_v15 = vsel %vm4680_vm4, %v12823_v62, %v12884_v55 }
 0x3aa   : > { %v12896_v39 = vrot.slane %v6080_v32, 1  ;;  %v7533_v54 = vpack.c.b16 %v6852_v1, %v7532_v16  ;;  %v7157_v28 = vrot.slane %v7155_v4, 1  ;;  %v7160_v62 = vrot.slane %v7158_v0, 2 }
 0x3ab   : > { %v5540_v18 = vrot.slane %v5538_v10, 6  ;;  %v5543_v37 = vrot.slane %v5541_v45, 7  ;;  %vm5292_vm12 = vcmp.gt.f32.partialorder %v5256_v41, 0.0  ;;  %v5332_v51 = vmul.f32 %v12718_v63, %v5256_v41  ;;  %9559 = vmatmul.msk.bf16.gmra.mxu0 %vm15545_vm0, %v5078_v60  ;;  %v12901_v6 = vpop.f32.mrf.mxu2 }
 0x3ac   : > { %v12894_v11 = vpop.f32.mrf.mxu3  ;;  %15546 = vst [vmem:[#allocation13_spill] sm:$0xff] %v12901_v6  ;;  %v6083_v50 = vsel %vm15549_vm10, %v6078_v34, %v12896_v39  ;;  %v15044_v10 = vrot.slane %v12875_v46, 1  ;;  %v7163_v0 = vshrl.u32 %v12904_v40, 16  ;;  %v7166_v16 = vshll.u32 %v12904_v40, 16  ;;  %v4673_v6 = vld [vmem:[#allocation2 + $0xa0] sm:$0x7]  ;;  %vm15562_vm10 = vmmov %vm15551_vm1 }
 0x3ad   : > { %v5544_v24 = vor.u32 %v5543_v37, %v5540_v18  ;;  %v5368_v52 = vsel %vm5292_vm12, %v5256_v41, %v5332_v51  ;;  %9647 = vmatmul.msk.bf16.gmra.mxu1 %vm6224_vm2, %v6083_v50  ;;  %v4837_v41 = vshll.u32 %v12755_v17, 16  ;;  %vm15557_vm8 = vsmask.f32 6400  ;;  %vm15558_vm12 = vmmov %vm15550_vm3 }
 0x3ae   : > { %v5404_v60 = vsel %vm15548_vm6, %v5368_v52, 0.0  ;;  %v12924_v34 = vsel %vm15552_vm14, %v15043_v13, %v15044_v10  ;;  %v7161_v52 = vor.u32 %v7160_v62, %v7157_v28  ;;  %v7165_v35 = vrot.slane %v7163_v0, 1  ;;  %v15555_v0 = vld [vmem:[#allocation22_spill] sm:$0xff]  ;;  %vm15566_vm14 = vmmov %vm15558_vm12 }
 0x3af   : > { %v5545_v45 = vsel %vm10493_vm11, %v5536_v29, %v5544_v24  ;;  %v5440_v32 = vpack.c.bf16 %v5404_v60, %v5404_v60  ;;  %v7534_v29 = vrot.slane %v7533_v54, 2  ;;  %v15047_v60 = vrot.slane %v12904_v40, 2 }
 0x3b0   : > { %5891 = vst.msk [vmem:[#allocation3 + $0x1c] sm:$0xf] %vm15550_vm3, %v5545_v45  ;;  %v5177_v4 = vpop.f32.mrf.mxu0  ;;  %v4836_v10 = vrot.slane %v4834_v23, 2  ;;  %v4839_v1 = vrot.slane %v4837_v41, 3  ;;  %v4645_v54 = vadd.f32 %v12619_v22, %v12248_v12  ;;  %v5546_v28 = vrot.slane %v5544_v24, 4 }
 0x3b1   : > { %9539 = vmatmul.msk.bf16.gmra.mxu3 %vm15551_vm1, %v4832_v15  ;;  %v5548_v18 = vshrl.u32 %v5440_v32, 16  ;;  %v5551_v37 = vshll.u32 %v5440_v32, 16  ;;  %v5257_v51 = vadd.f32 %v5177_v4, %v5017_v38  ;;  %v7168_v15 = vrot.slane %v7166_v16, 2 }
 0x3b2   : > { %v12939_v38 = vsel %vm15553_vm7, %v7534_v29, %v15047_v60  ;;  %vm15556_vm5 = vnez %v15555_v0  ;;  %v4678_v41 = vunpack.c.l.b16 %v4673_v6  ;;  %v15559_v22 = vrot.slane %v12602_v7, 3 }
 0x3b3   : > { %v5550_v50 = vrot.slane %v5548_v18, 6  ;;  %v5553_v45 = vrot.slane %v5551_v37, 7  ;;  %vm5293_vm9 = vcmp.gt.f32.partialorder %v5257_v51, 0.0  ;;  %v5333_v27 = vmul.f32 %v12718_v63, %v5257_v51  ;;  %v12932_v43 = vpop.f32.mrf.mxu2  ;;  %15554 = vst [vmem:[#allocation14_spill] sm:$0xff] %v12939_v38 }
 0x3b4   : > { %v12930_v13 = vpop.f32.mrf.mxu3  ;;  %v12934_v32 = vor.u32 %v7168_v15, %v7165_v35  ;;  %v5018_v18 = vadd.f32 %v12748_v3, %v4645_v54  ;;  %vm15561_vm0 = vcmask 1044480   ;;  %v12960_v24 = vor.u32 %v4839_v1, %v4836_v10 }
 0x3b5   : > { %v5554_v62 = vor.u32 %v5553_v45, %v5550_v50  ;;  %v5369_v4 = vsel %vm5293_vm9, %v5257_v51, %v5333_v27  ;;  %v15560_v27 = vrot.slane %v12570_v9, 3  ;;  %v6084_v50 = vshrl.u32 %v12875_v46, 16  ;;  %vm15567_vm9 = vmmov %vm15562_vm10 }
 0x3b6   : > { %v5405_v23 = vsel %vm15556_vm5, %v5369_v4, 0.0  ;;  %v12947_v16 = vsel %vm15557_vm8, %v7161_v52, %v12934_v32  ;;  %v12966_v45 = vpack.c.b16 %v4678_v41, %v4678_v41  ;;  %v4646_v1 = vadd.f32 %v12633_v26, %v12265_v25 }
 0x3b7   : > { %v5555_v37 = vsel %vm10493_vm11, %v5546_v28, %v5554_v62  ;;  %v5441_v29 = vpack.c.bf16 %v5405_v23, %v5405_v23  ;;  %v12952_v35 = vld [vmem:[#allocation3 + $0x18] sm:$0xff]  ;;  %v5080_v6 = vsel %vm15561_vm0, %v15560_v27, %v15559_v22  ;;  %v6086_v4 = vor.u32 %v6084_v50, %v12896_v39  ;;  %v15563_v22 = vld [vmem:[#allocation25_spill] sm:$0xff] }
 0x3b8   : > { %5892 = vst.msk [vmem:[#allocation3 + $0x20] sm:$0xf] %vm15558_vm12, %v5555_v37  ;;  %v5180_v12 = vpop.f32.mrf.mxu0  ;;  %v6088_v15 = vshll.u32 %v12952_v35, 16  ;;  %v12979_v41 = vld [vmem:[#allocation3 + $0x18] sm:$0xff]  ;;  %vm15564_vm3 = vnez %v15563_v22  ;;  %vm15565_vm1 = vsmask.f32 7424  ;;  %v5019_v39 = vadd.f32 %v12780_v48, %v4646_v1 }
 0x3b9   : > { %v5558_v51 = vshrl.u32 %v5441_v29, 16  ;;  %v5561_v52 = vshll.u32 %v5441_v29, 16  ;;  %v5258_v3 = vadd.f32 %v5180_v12, %v5018_v18  ;;  %9673 = vmatmul.msk.bf16.gmra.mxu2 %vm6224_vm2, %v12815_v31  ;;  %v5556_v18 = vrot.slane %v5554_v62, 4 }
 0x3ba   : > { %v12975_v0 = vrot.slane %v6088_v15, 1  ;;  %v4841_v12 = vsel %vm4680_vm4, %v12884_v55, %v12960_v24  ;;  %v15046_v26 = vrot.slane %v12952_v35, 1  ;;  %vm15569_vm7 = vcmask 1046528  }
 0x3bb   : > { %v5560_v54 = vrot.slane %v5558_v51, 6  ;;  %v5563_v28 = vrot.slane %v5561_v52, 7  ;;  %vm5294_vm6 = vcmp.gt.f32.partialorder %v5258_v3, 0.0  ;;  %v5334_v9 = vmul.f32 %v12718_v63, %v5258_v3  ;;  %9560 = vmatmul.msk.bf16.gmra.mxu0 %vm15562_vm10, %v5080_v6  ;;  %v12977_v23 = vpop.f32.mrf.mxu2 }
 0x3bc   : > { %v12970_v10 = vpop.f32.mrf.mxu3  ;;  %v6091_v25 = vsel %vm15565_vm1, %v6086_v4, %v12975_v0  ;;  %v4843_v51 = vshrl.u32 %v12966_v45, 16  ;;  %v4846_v52 = vshll.u32 %v12966_v45, 16  ;;  %v7172_v15 = vshrl.u32 %v12979_v41, 16  ;;  %vm15581_vm1 = vmmov %vm15567_vm9 }
 0x3bd   : > { %v5564_v37 = vor.u32 %v5563_v28, %v5560_v54  ;;  %v5370_v29 = vsel %vm5294_vm6, %v5258_v3, %v5334_v9  ;;  %9648 = vmatmul.msk.bf16.gmra.mxu1 %vm6224_vm2, %v6091_v25  ;;  %v15568_v3 = vrot.slane %v12875_v46, 1  ;;  %v7175_v50 = vshll.u32 %v12979_v41, 16  ;;  %vm15578_vm6 = vmmov %vm15566_vm14 }
 0x3be   : > { %v5406_v27 = vsel %vm15564_vm3, %v5370_v29, 0.0  ;;  %v15049_v1 = vrot.slane %v12630_v5, 3  ;;  %v7174_v4 = vrot.slane %v7172_v15, 1  ;;  %v15048_v29 = vrot.slane %v12979_v41, 2 }
 0x3bf   : > { %v5565_v6 = vsel %vm10493_vm11, %v5556_v18, %v5564_v37  ;;  %v5442_v62 = vpack.c.bf16 %v5406_v27, %v5406_v27  ;;  %v13002_v48 = vsel %vm15569_vm7, %v15568_v3, %v15046_v26  ;;  %v7177_v18 = vrot.slane %v7175_v50, 2 }
 0x3c0   : > { %5893 = vst.msk [vmem:[#allocation3 + $0x24] sm:$0xf] %vm15566_vm14, %v5565_v6  ;;  %v5182_v55 = vpop.f32.mrf.mxu0  ;;  %v4845_v6 = vrot.slane %v4843_v51, 2  ;;  %v4848_v3 = vrot.slane %v4846_v52, 3  ;;  %vm15571_vm8 = vcmask 1045504   ;;  %v5566_v15 = vrot.slane %v5564_v37, 4  ;;  %vm15583_vm14 = vmmov %vm15569_vm7 }
 0x3c1   : > { %9540 = vmatmul.msk.bf16.gmra.mxu3 %vm15567_vm9, %v4841_v12  ;;  %v5568_v54 = vshrl.u32 %v5442_v62, 16  ;;  %v5571_v28 = vshll.u32 %v5442_v62, 16  ;;  %v5259_v9 = vadd.f32 %v5182_v55, %v5019_v39  ;;  %v13013_v60 = vor.u32 %v7177_v18, %v7174_v4 }
 0x3c2   : > { %v15570_v39 = vrot.slane %v12904_v40, 2  ;;  %v4647_v55 = vadd.f32 %v12645_v57, %v12281_v42  ;;  %vm15575_vm0 = vsmask.f32 6400  ;;  %v13036_v42 = vld [vmem:[#allocation3 + $0x14] sm:$0xf]  ;;  %v15579_v37 = vrot.slane %v12602_v7, 3 }
 0x3c3   : > { %v5570_v12 = vrot.slane %v5568_v54, 6  ;;  %v5573_v22 = vrot.slane %v5571_v28, 7  ;;  %vm5295_vm5 = vcmp.gt.f32.partialorder %v5259_v9, 0.0  ;;  %v5335_v27 = vmul.f32 %v12718_v63, %v5259_v9  ;;  %v13011_v26 = vpop.f32.mrf.mxu2  ;;  %v15573_v28 = vld [vmem:[#allocation26_spill] sm:$0xff]  ;;  %15577 = vst [vmem:[#allocation21_spill] sm:$0xff] %v13036_v42 }
 0x3c4   : > { %v13009_v25 = vpop.f32.mrf.mxu3  ;;  %v13020_v62 = vsel %vm15571_vm8, %v15570_v39, %v15048_v29  ;;  %vm15574_vm12 = vnez %v15573_v28  ;;  %v13029_v52 = vsel %vm15575_vm0, %v12934_v32, %v13013_v60  ;;  %v5020_v4 = vadd.f32 %v12802_v47, %v4647_v55  ;;  %v8525_v55 = vld [vmem:[#allocation3 + $0x10] sm:$0x8]  ;;  %vm15589_vm8 = vmmov %vm15581_vm1 }
 0x3c5   : > { %15572 = vst [vmem:[#allocation17_spill] sm:$0xff] %v13020_v62  ;;  %v5574_v50 = vor.u32 %v5573_v22, %v5570_v12  ;;  %v5371_v54 = vsel %vm5295_vm5, %v5259_v9, %v5335_v27  ;;  %vm15580_vm10 = vcmask 1044480   ;;  %v4849_v9 = vor.u32 %v4848_v3, %v4845_v6  ;;  %v15584_v62 = vld [vmem:[#allocation29_spill] sm:$0xff]  ;;  %vm15588_vm5 = vmmov %vm15578_vm6 }
 0x3c6   : > { %v5407_v51 = vsel %vm15574_vm12, %v5371_v54, 0.0  ;;  %15576 = vst [vmem:[#allocation18_spill] sm:$0xff] %v13029_v52  ;;  %v5082_v32 = vsel %vm15580_vm10, %v15579_v37, %v15049_v1  ;;  %v6092_v54 = vshrl.u32 %v12952_v35, 16  ;;  %v10164_v37 = vld [vmem:[#allocation3 + $0x18] sm:$0xff]  ;;  %vm15585_vm9 = vnez %v15584_v62 }
 0x3c7   : > { %v5575_v18 = vsel %vm10493_vm11, %v5566_v15, %v5574_v50  ;;  %v5443_v39 = vpack.c.bf16 %v5407_v51, %v5407_v51  ;;  %v13034_v29 = vld [vmem:[#allocation3 + $0x20] sm:$0xff]  ;;  %v4648_v15 = vadd.f32 %v12675_v53, %v12304_v49  ;;  %v10139_v49 = vld [vmem:[%s14945_s5 + $0x20] sm:$0xff]  ;;  %v4850_v6 = vsel %vm4680_vm4, %v12960_v24, %v4849_v9 }
 0x3c8   : > { %5894 = vst.msk [vmem:[#allocation3 + $0x28] sm:$0xf] %vm15578_vm6, %v5575_v18  ;;  %v5185_v57 = vpop.f32.mrf.mxu0  ;;  %v6096_v27 = vshll.u32 %v13034_v29, 16  ;;  %v15050_v28 = vrot.slane %v13034_v29, 1  ;;  %v13051_v7 = vld [vmem:[#allocation3 + $0x20] sm:$0xff]  ;;  %v6094_v53 = vor.u32 %v6092_v54, %v12975_v0  ;;  %6644 = vmatpush.bf16.msra.mxu3 %v10139_v49  ;;  %vm15591_vm12 = vcmask 1045504   ;;  %vm15593_vm6 = vmmov %vm15580_vm10 }
 0x3c9   : > { %v5578_v12 = vshrl.u32 %v5443_v39, 16  ;;  %v5581_v47 = vshll.u32 %v5443_v39, 16  ;;  %v5260_v22 = vadd.f32 %v5185_v57, %v5020_v4  ;;  %9674 = vmatmul.msk.bf16.gmra.mxu2 %vm6224_vm2, %v12875_v46  ;;  %v15582_v39 = vrot.slane %v12952_v35, 1  ;;  %v10201_v49 = vld [vmem:[#allocation3] sm:$0xf0] }
 0x3ca   : > { %v13062_v18 = vrot.slane %v6096_v27, 1  ;;  %vm15586_vm7 = vsmask.f32 7424 }
 0x3cb   : > { %v5580_v3 = vrot.slane %v5578_v12, 6  ;;  %v5583_v51 = vrot.slane %v5581_v47, 7  ;;  %vm5296_vm3 = vcmp.gt.f32.partialorder %v5260_v22, 0.0  ;;  %v5336_v4 = vmul.f32 %v12718_v63, %v5260_v22  ;;  %9561 = vmatmul.msk.bf16.gmra.mxu0 %vm15581_vm1, %v5082_v32  ;;  %v13077_v54 = vpop.f32.mrf.mxu2  ;;  %vm15599_vm1 = vmmov %vm15588_vm5 }
 0x3cc   : > { %v13056_v46 = vpop.f32.mrf.mxu3  ;;  %v13069_v57 = vsel %vm15583_vm14, %v15582_v39, %v15050_v28  ;;  %v8532_v12 = vunpack.c.l.b16 %v8525_v55  ;;  %v5576_v32 = vrot.slane %v5574_v50, 4  ;;  %v6099_v27 = vsel %vm15586_vm7, %v6094_v53, %v13062_v18  ;;  %vm15601_vm14 = vmmov %vm15593_vm6 }
 0x3cd   : > { %v5584_v47 = vor.u32 %v5583_v51, %v5580_v3  ;;  %v5372_v1 = vsel %vm5296_vm3, %v5260_v22, %v5336_v4  ;;  %v7181_v39 = vshrl.u32 %v13051_v7, 16  ;;  %v15587_v28 = vunpack.c.l.b16 %v13036_v42  ;;  %9649 = vmatmul.msk.bf16.gmra.mxu1 %vm6224_vm2, %v6099_v27 }
 0x3ce   : > { %v5408_v0 = vsel %vm15585_vm9, %v5372_v1, 0.0  ;;  %v5021_v50 = vadd.f32 %v12832_v20, %v4648_v15  ;;  %v7184_v1 = vshll.u32 %v13051_v7, 16  ;;  %v15051_v3 = vrot.slane %v13051_v7, 2  ;;  %vm15602_vm9 = vmmov %vm15593_vm6 }
 0x3cf   : > { %v8533_v55 = vpack.c.b16 %v15587_v28, %v8532_v12  ;;  %v5585_v22 = vsel %vm10493_vm11, %v5576_v32, %v5584_v47  ;;  %v5444_v24 = vpack.c.bf16 %v5408_v0, %v5408_v0  ;;  %v7183_v9 = vrot.slane %v7181_v39, 1  ;;  %v13097_v32 = vld [vmem:[#allocation3 + $0x20] sm:$0xff] }
 0x3d0   : > { %5895 = vst.msk [vmem:[#allocation3 + $0x2c] sm:$0xf] %vm15588_vm5, %v5585_v22  ;;  %v5187_v62 = vpop.f32.mrf.mxu0  ;;  %v8535_v51 = vrot.slane %v10164_v37, 3  ;;  %v7186_v15 = vrot.slane %v7184_v1, 2  ;;  %v15590_v53 = vrot.slane %v12979_v41, 2  ;;  %v4649_v22 = vadd.f32 %v12695_v56, %v12320_v58  ;;  %vm15604_vm5 = vmmov %vm15589_vm8 }
 0x3d1   : > { %9541 = vmatmul.msk.bf16.gmra.mxu3 %vm15589_vm8, %v4850_v6  ;;  %v5588_v28 = vshrl.u32 %v5444_v24, 16  ;;  %v5591_v4 = vshll.u32 %v5444_v24, 16  ;;  %v5261_v20 = vadd.f32 %v5187_v62, %v5021_v50  ;;  %v8534_v0 = vrot.slane %v8533_v55, 3  ;;  %v10202_v50 = vld [vmem:[#allocation3] sm:$0xe] }
 0x3d2   : > { %v13095_v12 = vsel %vm15591_vm12, %v15590_v53, %v15051_v3  ;;  %v5083_v24 = vrot.slane %v12672_v36, 3  ;;  %v13105_v1 = vor.u32 %v7186_v15, %v7183_v9  ;;  %v5586_v62 = vrot.slane %v5584_v47, 4 }
 0x3d3   : > { %15592 = vst [vmem:[#allocation22_spill] sm:$0xff] %v13095_v12  ;;  %v5590_v6 = vrot.slane %v5588_v28, 6  ;;  %v5593_v27 = vrot.slane %v5591_v4, 7  ;;  %vm5297_vm0 = vcmp.gt.f32.partialorder %v5261_v20, 0.0  ;;  %v5337_v37 = vmul.f32 %v12718_v63, %v5261_v20  ;;  %v15595_v28 = vld [vmem:[#allocation30_spill] sm:$0xff] }
 0x3d4   : > { %v13100_v39 = vpop.f32.mrf.mxu3  ;;  %v13108_v55 = vsel %vm15593_vm6, %v8534_v0, %v8535_v51  ;;  %vm15596_vm10 = vnez %v15595_v28  ;;  %v10203_v42 = vor.u32 %v10202_v50, %v10201_v49  ;;  %vm15597_vm3 = vsmask.f32 6400  ;;  %v13129_v49 = vpop.f32.mrf.mxu2 }
 0x3d5   : > { %v5594_v53 = vor.u32 %v5593_v27, %v5590_v6  ;;  %v5373_v3 = vsel %vm5297_vm0, %v5261_v20, %v5337_v37  ;;  %15594 = vst [vmem:[#allocation25_spill] sm:$0xff] %v13108_v55  ;;  %v13115_v12 = vsel %vm15597_vm3, %v13013_v60, %v13105_v1  ;;  %v15053_v58 = vrot.slane %v13097_v32, 3  ;;  %v15644_v55 = vld [vmem:[#allocation47_spill] sm:$0xff] }
 0x3d6   : > { %v5409_v4 = vsel %vm15596_vm10, %v5373_v3, 0.0  ;;  %15598 = vst [vmem:[#allocation26_spill] sm:$0xff] %v13115_v12  ;;  %v5022_v56 = vadd.f32 %v12856_v21, %v4649_v22  ;;  %v15600_v3 = vrot.slane %v12630_v5, 3  ;;  %v4285_v5 = vadd.f32 %v12284_v61, %v12337_v19  ;;  %vm15612_vm10 = vmmov %vm15599_vm1 }
 0x3d7   : > { %v5595_v47 = vsel %vm10493_vm11, %v5586_v62, %v5594_v53  ;;  %v5445_v9 = vpack.c.bf16 %v5409_v4, %v5409_v4  ;;  %v13121_v20 = vld [vmem:[#allocation3 + $0x28] sm:$0xff]  ;;  %v13134_v21 = vsel %vm15602_vm9, %v8535_v51, %v15053_v58  ;;  %v6100_v22 = vshrl.u32 %v13034_v29, 16 }
 0x3d8   : > { %5896 = vst.msk [vmem:[#allocation3 + $0x30] sm:$0xf] %vm15599_vm1, %v5595_v47  ;;  %v5190_v15 = vpop.f32.mrf.mxu0  ;;  %v5084_v60 = vsel %vm15601_vm14, %v15600_v3, %v5083_v24  ;;  %v6104_v37 = vshll.u32 %v13121_v20, 16  ;;  %v13139_v50 = vld [vmem:[#allocation3 + $0x28] sm:$0xff]  ;;  %v6534_v62 = vrot.slane %v10203_v42, 1  ;;  %v15055_v28 = vrot.slane %v13121_v20, 1 }
 0x3d9   : > { %15603 = vst [vmem:[#allocation29_spill] sm:$0xff] %v13134_v21  ;;  %v5598_v0 = vshrl.u32 %v5445_v9, 16  ;;  %v5601_v6 = vshll.u32 %v5445_v9, 16  ;;  %v5262_v27 = vadd.f32 %v5190_v15, %v5022_v56  ;;  %9675 = vmatmul.msk.bf16.gmra.mxu2 %vm6224_vm2, %v12952_v35  ;;  %v4650_v35 = vadd.f32 %v12709_v8, %v4285_v5 }
 0x3da   : > { %v6102_v9 = vor.u32 %v6100_v22, %v13062_v18  ;;  %v13151_v15 = vrot.slane %v6104_v37, 1  ;;  %v15605_v61 = vrot.slane %v13034_v29, 1  ;;  %vm15606_vm8 = vcmask 1046528  }
 0x3db   : > { %v5600_v51 = vrot.slane %v5598_v0, 6  ;;  %v5603_v4 = vrot.slane %v5601_v6, 7  ;;  %vm5298_vm7 = vcmp.gt.f32.partialorder %v5262_v27, 0.0  ;;  %v5338_v56 = vmul.f32 %v12718_v63, %v5262_v27  ;;  %9562 = vmatmul.msk.bf16.gmra.mxu0 %vm15604_vm5, %v5084_v60  ;;  %v15607_v6 = vld [vmem:[#allocation33_spill] sm:$0xff]  ;;  %vm15611_vm6 = vmmov %vm15606_vm8 }
 0x3dc   : > { %v13147_v47 = vpop.f32.mrf.mxu3  ;;  %v13158_v19 = vsel %vm15606_vm8, %v15605_v61, %v15055_v28  ;;  %v5596_v42 = vrot.slane %v5594_v53, 4  ;;  %v7190_v60 = vshrl.u32 %v13139_v50, 16  ;;  %vm15608_vm12 = vnez %v15607_v6 }
 0x3dd   : > { %v5604_v3 = vor.u32 %v5603_v4, %v5600_v51  ;;  %v5374_v0 = vsel %vm5298_vm7, %v5262_v27, %v5338_v56  ;;  %vm15609_vm0 = vsmask.f32 7424  ;;  %v7193_v18 = vshll.u32 %v13139_v50, 16  ;;  %v13175_v4 = vpop.f32.mrf.mxu2  ;;  %vm15622_vm7 = vmmov %vm15612_vm10 }
 0x3de   : > { %v5410_v58 = vsel %vm15608_vm12, %v5374_v0, 0.0  ;;  %v6107_v8 = vsel %vm15609_vm0, %v6102_v9, %v13151_v15  ;;  %v5023_v37 = vadd.f32 %v12894_v11, %v4650_v35  ;;  %v15610_v53 = vrot.slane %v12815_v31, 1 }
 0x3df   : > { %v5605_v5 = vsel %vm10493_vm11, %v5596_v42, %v5604_v3  ;;  %v5446_v22 = vpack.c.bf16 %v5410_v58, %v5410_v58  ;;  %9650 = vmatmul.msk.bf16.gmra.mxu1 %vm6224_vm2, %v6107_v8  ;;  %v7192_v56 = vrot.slane %v7190_v60, 1  ;;  %v7195_v9 = vrot.slane %v7193_v18, 2  ;;  %v13178_v42 = vld [vmem:[#allocation3 + $0x28] sm:$0xff] }
 0x3e0   : > { %v6536_v27 = vsel %vm15611_vm6, %v6534_v62, %v15610_v53  ;;  %5897 = vst.msk [vmem:[#allocation3 + $0x34] sm:$0xf] %vm15612_vm10, %v5605_v5  ;;  %v5192_v51 = vpop.f32.mrf.mxu0  ;;  %v15054_v11 = vrot.slane %v13139_v50, 2  ;;  %v15613_v31 = vrot.slane %v13051_v7, 2  ;;  %vm15614_vm3 = vcmask 1045504   ;;  %v15616_v5 = vld [vmem:[#allocation42_spill] sm:$0xff] }
 0x3e1   : > { %9702 = vmatmul.msk.bf16.vlgmr.msra.gmra.mxu3 %vm6224_vm2, %v6536_v27  ;;  %v5608_v35 = vshrl.u32 %v5446_v22, 16  ;;  %v5611_v61 = vshll.u32 %v5446_v22, 16  ;;  %v5263_v58 = vadd.f32 %v5192_v51, %v5023_v37  ;;  %v13180_v0 = vor.u32 %v7195_v9, %v7192_v56  ;;  %v15617_v37 = vld [vmem:[#allocation75_spill] sm:$0xff] }
 0x3e2   : > { %v13187_v62 = vsel %vm15614_vm3, %v15613_v31, %v15054_v11  ;;  %v4651_v22 = vadd.f32 %v15617_v37, %v15616_v5  ;;  %v15057_v53 = vrot.slane %v12706_v2, 3  ;;  %vm15618_vm14 = vsmask.f32 6400 }
 0x3e3   : > { %15615 = vst [vmem:[#allocation30_spill] sm:$0xff] %v13187_v62  ;;  %v5610_v6 = vrot.slane %v5608_v35, 6  ;;  %v5613_v8 = vrot.slane %v5611_v61, 7  ;;  %vm5299_vm1 = vcmp.gt.f32.partialorder %v5263_v58, 0.0  ;;  %v5339_v60 = vmul.f32 %v12718_v63, %v5263_v58  ;;  %v15620_v61 = vld [vmem:[#allocation34_spill] sm:$0xff] }
 0x3e4   : > { %v13190_v18 = vpop.f32.mrf.mxu3  ;;  %v13198_v27 = vsel %vm15618_vm14, %v13105_v1, %v13180_v0  ;;  %v5606_v51 = vrot.slane %v5604_v3, 4  ;;  %v15056_v35 = vrot.slane %v13178_v42, 3  ;;  %vm15621_vm9 = vnez %v15620_v61 }
 0x3e5   : > { %15619 = vst [vmem:[#allocation33_spill] sm:$0xff] %v13198_v27  ;;  %v5614_v56 = vor.u32 %v5613_v8, %v5610_v6  ;;  %v5375_v9 = vsel %vm5299_vm1, %v5263_v58, %v5339_v60  ;;  %v5024_v11 = vadd.f32 %v12930_v13, %v4651_v22  ;;  %vm15623_vm5 = vcmask 1044480   ;;  %v13214_v58 = vpop.f32.mrf.mxu2  ;;  %vm15635_vm1 = vmmov %vm15622_vm7  ;;  %v15698_v27 = vld [vmem:[#allocation7_spill] sm:$0xff] }
 0x3e6   : > { %v5411_v31 = vsel %vm15621_vm9, %v5375_v9, 0.0  ;;  %v5086_v3 = vsel %vm15623_vm5, %v5083_v24, %v15057_v53  ;;  %v15624_v13 = vrot.slane %v13097_v32, 3  ;;  %vm15625_vm8 = vmmov %vm15623_vm5  ;;  %v15627_v24 = vld [vmem:[#allocation43_spill] sm:$0xff]  ;;  %vm15629_vm0 = vcmask 130048  }
 0x3e7   : > { %v5615_v5 = vsel %vm10493_vm11, %v5606_v51, %v5614_v56  ;;  %v5447_v37 = vpack.c.bf16 %v5411_v31, %v5411_v31  ;;  %v13206_v28 = vld [vmem:[#allocation3 + $0x30] sm:$0xff]  ;;  %v6108_v31 = vshrl.u32 %v13121_v20, 16  ;;  %vm15634_vm3 = vsmask.f32 7424 }
 0x3e8   : > { %5898 = vst.msk [vmem:[#allocation3 + $0x38] sm:$0xf] %vm15622_vm7, %v5615_v5  ;;  %v5195_v1 = vpop.f32.mrf.mxu0  ;;  %v13221_v6 = vsel %vm15625_vm8, %v15624_v13, %v15056_v35  ;;  %v6112_v51 = vshll.u32 %v13206_v28, 16  ;;  %v13226_v36 = vld [vmem:[#allocation3 + $0x30] sm:$0xff]  ;;  %v15059_v32 = vrot.slane %v13206_v28, 1  ;;  %vm15637_vm14 = vcmask 1045504   ;;  %vm15646_vm8 = vmmov %vm15635_vm1 }
 0x3e9   : > { %15626 = vst [vmem:[#allocation42_spill] sm:$0xff] %v13221_v6  ;;  %v5618_v8 = vshrl.u32 %v5447_v37, 16  ;;  %v5621_v60 = vshll.u32 %v5447_v37, 16  ;;  %v5264_v22 = vadd.f32 %v5195_v1, %v5024_v11  ;;  %9676 = vmatmul.msk.bf16.gmra.mxu2 %vm6224_vm2, %v13034_v29  ;;  %v15628_v9 = vld [vmem:[#allocation39_spill] sm:$0xff]  ;;  %v15630_v1 = vld [vmem:[#allocation9_spill] sm:$0xff]  ;;  %v6110_v35 = vor.u32 %v6108_v31, %v13151_v15  ;;  %v15632_v6 = vld [vmem:[#allocation36_spill] sm:$0xff] }
 0x3ea   : > { %v4287_v61 = vadd.f32 %v15628_v9, %v15627_v24  ;;  %v13238_v53 = vrot.slane %v6112_v51, 1  ;;  %v15631_v24 = vrot.slane %v13121_v20, 1  ;;  %vm15633_vm10 = vnez %v15632_v6 }
 0x3eb   : > { %v5620_v5 = vrot.slane %v5618_v8, 6  ;;  %v5623_v13 = vrot.slane %v5621_v60, 7  ;;  %vm5300_vm12 = vcmp.gt.f32.partialorder %v5264_v22, 0.0  ;;  %v5340_v37 = vmul.f32 %v12718_v63, %v5264_v22  ;;  %9563 = vmatmul.msk.bf16.gmra.mxu0 %vm15629_vm0, %v5086_v3 }
 0x3ec   : > { %v13234_v11 = vpop.f32.mrf.mxu3  ;;  %v4652_v29 = vadd.f32 %v15630_v1, %v4287_v61  ;;  %v13245_v8 = vsel %vm15611_vm6, %v15631_v24, %v15059_v32  ;;  %v5616_v60 = vrot.slane %v5614_v56, 4  ;;  %v7199_v3 = vshrl.u32 %v13226_v36, 16 }
 0x3ed   : > { %v5624_v9 = vor.u32 %v5623_v13, %v5620_v5  ;;  %v5376_v63 = vsel %vm5300_vm12, %v5264_v22, %v5340_v37  ;;  %v6115_v15 = vsel %vm15634_vm3, %v6110_v35, %v13238_v53  ;;  %v7202_v51 = vshll.u32 %v13226_v36, 16  ;;  %v13260_v6 = vpop.f32.mrf.mxu2 }
 0x3ee   : > { %v5412_v21 = vsel %vm15633_vm10, %v5376_v63, 0.0  ;;  %v5025_v61 = vadd.f32 %v12970_v10, %v4652_v29  ;;  %v7201_v22 = vrot.slane %v7199_v3, 1  ;;  %v15058_v5 = vrot.slane %v13226_v36, 2  ;;  %v13263_v29 = vld [vmem:[#allocation3 + $0x30] sm:$0xff] }
 0x3ef   : > { %v5625_v31 = vsel %vm10493_vm11, %v5616_v60, %v5624_v9  ;;  %v5448_v1 = vpack.c.bf16 %v5412_v21, %v5412_v21  ;;  %9651 = vmatmul.msk.bf16.gmra.mxu1 %vm6224_vm2, %v6115_v15  ;;  %v7204_v35 = vrot.slane %v7202_v51, 2  ;;  %v15636_v24 = vrot.slane %v13139_v50, 2  ;;  %v13277_v3 = vld [vmem:[%s14944_s4] ss:$0 sm:$0xff] }
 0x3f0   : > { %5899 = vst.msk [vmem:[#allocation3 + $0x3c] sm:$0xf] %vm15635_vm1, %v5625_v31  ;;  %v5197_v56 = vpop.f32.mrf.mxu0  ;;  %vm15640_vm7 = vsmask.f32 6400  ;;  %vm15649_vm12 = vcmask 1044480   ;;  %vm15653_vm10 = vcmask 130048  }
 0x3f1   : > { %9703 = vmatmul.msk.bf16.gmra.mxu3 %vm6224_vm2, %v12924_v34  ;;  %v5628_v13 = vshrl.u32 %v5448_v1, 16  ;;  %v5631_v10 = vshll.u32 %v5448_v1, 16  ;;  %v5265_v37 = vadd.f32 %v5197_v56, %v5025_v61  ;;  %v13265_v21 = vor.u32 %v7204_v35, %v7201_v22  ;;  %v15639_v61 = vld [vmem:[#allocation46_spill] sm:$0xff]  ;;  %vm15651_vm0 = vmmov %vm15649_vm12 }
 0x3f2   : > { %v13272_v60 = vsel %vm15637_vm14, %v15636_v24, %v15058_v5  ;;  %v4653_v31 = vadd.f32 %v12784_v14, %v15639_v61  ;;  %v5626_v22 = vrot.slane %v5624_v9, 4  ;;  %v15642_v24 = vld [vmem:[#allocation37_spill] sm:$0xff]  ;;  %vm15655_vm3 = vcmask 1046528  }
 0x3f3   : > { %15638 = vst [vmem:[#allocation75_spill] sm:$0xff] %v13272_v60  ;;  %v5630_v34 = vrot.slane %v5628_v13, 6  ;;  %v5633_v63 = vrot.slane %v5631_v10, 7  ;;  %vm5301_vm9 = vcmp.gt.f32.partialorder %v5265_v37, 0.0  ;;  %v5341_v15 = vmul.f32 %v13277_v3, %v5265_v37  ;;  %v15645_v60 = vld [vmem:[#allocation41_spill] sm:$0xff] }
 0x3f4   : > { %v13280_v51 = vpop.f32.mrf.mxu3  ;;  %v13288_v56 = vsel %vm15640_vm7, %v13180_v0, %v13265_v21  ;;  %v15060_v10 = vrot.slane %v13263_v29, 3  ;;  %vm15643_vm5 = vnez %v15642_v24  ;;  %v5026_v32 = vadd.f32 %v13009_v25, %v4653_v31 }
 0x3f5   : > { %15641 = vst [vmem:[#allocation34_spill] sm:$0xff] %v13288_v56  ;;  %v5634_v35 = vor.u32 %v5633_v63, %v5630_v34  ;;  %v5377_v13 = vsel %vm5301_vm9, %v5265_v37, %v5341_v15  ;;  %v4289_v0 = vadd.f32 %v15645_v60, %v15644_v55  ;;  %v15647_v37 = vrot.slane %v12755_v17, 3  ;;  %v13306_v15 = vpop.f32.mrf.mxu2  ;;  %vm15659_vm9 = vmmov %vm15646_vm8 }
 0x3f6   : > { %v5413_v5 = vsel %vm15643_vm5, %v5377_v13, 0.0  ;;  %v15648_v34 = vrot.slane %v12706_v2, 3  ;;  %v15650_v25 = vrot.slane %v13178_v42, 3  ;;  %v6116_v24 = vshrl.u32 %v13206_v28, 16 }
 0x3f7   : > { %v5635_v14 = vsel %vm10493_vm11, %v5626_v22, %v5634_v35  ;;  %v5449_v61 = vpack.c.bf16 %v5413_v5, %v5413_v5  ;;  %v13296_v1 = vld [vmem:[#allocation3 + $0x38] sm:$0xff]  ;;  %v4654_v13 = vadd.f32 %v12805_v44, %v4289_v0  ;;  %vm15658_vm14 = vsmask.f32 7424 }
 0x3f8   : > { %5900 = vst.msk [vmem:[#allocation3 + $0x40] sm:$0xf] %vm15646_vm8, %v5635_v14  ;;  %v5200_v9 = vpop.f32.mrf.mxu0  ;;  %v5088_v63 = vsel %vm15649_vm12, %v15648_v34, %v15647_v37  ;;  %v13313_v5 = vsel %vm15651_vm0, %v15650_v25, %v15060_v10  ;;  %v6120_v22 = vshll.u32 %v13296_v1, 16  ;;  %v13318_v2 = vld [vmem:[#allocation3 + $0x38] sm:$0xff]  ;;  %v15061_v14 = vrot.slane %v13296_v1, 1 }
 0x3f9   : > { %15652 = vst [vmem:[#allocation43_spill] sm:$0xff] %v13313_v5  ;;  %v5638_v31 = vshrl.u32 %v5449_v61, 16  ;;  %v5641_v55 = vshll.u32 %v5449_v61, 16  ;;  %v5266_v60 = vadd.f32 %v5200_v9, %v5026_v32  ;;  %9677 = vmatmul.msk.bf16.gmra.mxu2 %vm6224_vm2, %v13121_v20  ;;  %v10158_v20 = vld [vmem:[%s14945_s5 + $0x30] sm:$0xff]  ;;  %v5636_v61 = vrot.slane %v5634_v35, 4  ;;  %v15656_v5 = vld [vmem:[#allocation38_spill] sm:$0xff] }
 0x3fa   : > { %v6118_v44 = vor.u32 %v6116_v24, %v13238_v53  ;;  %v13331_v0 = vrot.slane %v6120_v22, 1  ;;  %v15654_v9 = vrot.slane %v13206_v28, 1  ;;  %7017 = vmatpush.bf16.msrb.mxu0 %v10158_v20  ;;  %v7211_v10 = vshll.u32 %v13318_v2, 16 }
 0x3fb   : > { %v5640_v42 = vrot.slane %v5638_v31, 6  ;;  %v5643_v37 = vrot.slane %v5641_v55, 7  ;;  %vm5302_vm6 = vcmp.gt.f32.partialorder %v5266_v60, 0.0  ;;  %v5342_v34 = vmul.f32 %v13277_v3, %v5266_v60  ;;  %9564 = vmatmul.msk.bf16.gmra.mxu0 %vm15653_vm10, %v5088_v63  ;;  %vm15672_vm10 = vmmov %vm15651_vm0 }
 0x3fc   : > { %v13325_v32 = vpop.f32.mrf.mxu3  ;;  %v13338_v25 = vsel %vm15655_vm3, %v15654_v9, %v15061_v14  ;;  %v7208_v55 = vshrl.u32 %v13318_v2, 16  ;;  %vm15657_vm1 = vnez %v15656_v5  ;;  %v6123_v53 = vsel %vm15658_vm14, %v6118_v44, %v13331_v0 }
 0x3fd   : > { %v5644_v31 = vor.u32 %v5643_v37, %v5640_v42  ;;  %v5378_v63 = vsel %vm5302_vm6, %v5266_v60, %v5342_v34  ;;  %v15062_v22 = vrot.slane %v13318_v2, 2  ;;  %v5027_v24 = vadd.f32 %v13056_v46, %v4654_v13  ;;  %v13354_v5 = vpop.f32.mrf.mxu2  ;;  %vm15670_vm6 = vmmov %vm15659_vm9 }
 0x3fe   : > { %v5414_v35 = vsel %vm15657_vm1, %v5378_v63, 0.0  ;;  %v7210_v60 = vrot.slane %v7208_v55, 1  ;;  %v7213_v34 = vrot.slane %v7211_v10, 2  ;;  %v15660_v46 = vrot.slane %v13226_v36, 2  ;;  %v13363_v63 = vld [vmem:[#allocation3 + $0x38] sm:$0xff] }
 0x3ff   : > { %v5645_v9 = vsel %vm10493_vm11, %v5636_v61, %v5644_v31  ;;  %v5450_v42 = vpack.c.bf16 %v5414_v35, %v5414_v35  ;;  %9652 = vmatmul.msk.bf16.gmra.mxu1 %vm6224_vm2, %v6123_v53  ;;  %vm15661_vm7 = vcmask 1045504   ;;  %vm15664_vm8 = vsmask.f32 6400 }
 0x400   : > { %5901 = vst.msk [vmem:[#allocation3 + $0x44] sm:$0xf] %vm15659_vm9, %v5645_v9  ;;  %v5202_v37 = vpop.f32.mrf.mxu0  ;;  %v13361_v13 = vsel %vm15661_vm7, %v15660_v46, %v15062_v22  ;;  %v13365_v55 = vor.u32 %v7213_v34, %v7210_v60  ;;  %v15663_v9 = vld [vmem:[#allocation49_spill] sm:$0xff]  ;;  %v5089_v46 = vrot.slane %v12966_v45, 3  ;;  %v15063_v34 = vrot.slane %v13363_v63, 3  ;;  %vm15680_vm7 = vmmov %vm15670_vm6 }
 0x401   : > { %9704 = vmatmul.msk.bf16.gmra.mxu3 %vm6224_vm2, %v13002_v48  ;;  %15662 = vst [vmem:[#allocation39_spill] sm:$0xff] %v13361_v13  ;;  %v5648_v20 = vshrl.u32 %v5450_v42, 16  ;;  %v5651_v61 = vshll.u32 %v5450_v42, 16  ;;  %v5267_v44 = vadd.f32 %v5202_v37, %v5027_v24  ;;  %v4655_v14 = vadd.f32 %v12836_v30, %v15663_v9 }
 0x402   : > { %v13376_v24 = vsel %vm15664_vm8, %v13265_v21, %v13365_v55  ;;  %v5646_v42 = vrot.slane %v5644_v31, 4  ;;  %v15668_v21 = vrot.slane %v13263_v29, 3  ;;  %v15674_v29 = vld [vmem:[#allocation45_spill] sm:$0xff]  ;;  %vm15675_vm1 = vcmask 130048  }
 0x403   : > { %v5650_v35 = vrot.slane %v5648_v20, 6  ;;  %v5653_v53 = vrot.slane %v5651_v61, 7  ;;  %vm5303_vm5 = vcmp.gt.f32.partialorder %v5267_v44, 0.0  ;;  %v5343_v48 = vmul.f32 %v13277_v3, %v5267_v44  ;;  %15665 = vst [vmem:[#allocation9_spill] sm:$0xff] %v13376_v24  ;;  %v15666_v20 = vld [vmem:[#allocation40_spill] sm:$0xff] }
 0x404   : > { %v13368_v10 = vpop.f32.mrf.mxu3  ;;  %vm15667_vm12 = vnez %v15666_v20  ;;  %v5028_v22 = vadd.f32 %v13100_v39, %v4655_v14  ;;  %v13393_v31 = vsel %vm15651_vm0, %v15668_v21, %v15063_v34  ;;  %v15671_v39 = vrot.slane %v12755_v17, 3 }
 0x405   : > { %v5654_v60 = vor.u32 %v5653_v53, %v5650_v35  ;;  %v5379_v37 = vsel %vm5303_vm5, %v5267_v44, %v5343_v48  ;;  %15669 = vst [vmem:[#allocation36_spill] sm:$0xff] %v13393_v31  ;;  %v13405_v21 = vpop.f32.mrf.mxu2  ;;  %vm15677_vm14 = vcmask 1046528   ;;  %vm15679_vm9 = vsmask.f32 7424 }
 0x406   : > { %v5415_v61 = vsel %vm15667_vm12, %v5379_v37, 0.0  ;;  %v5090_v14 = vsel %vm15672_vm10, %v15671_v39, %v5089_v46  ;;  %v15673_v37 = vld [vmem:[#allocation50_spill] sm:$0xff]  ;;  %vm15695_vm10 = vmmov %vm15677_vm14 }
 0x407   : > { %v5655_v30 = vsel %vm10493_vm11, %v5646_v42, %v5654_v60  ;;  %v5451_v9 = vpack.c.bf16 %v5415_v61, %v5415_v61  ;;  %v13384_v45 = vld [vmem:[#allocation3 + $0x40] sm:$0xff]  ;;  %v4291_v20 = vadd.f32 %v15674_v29, %v15673_v37  ;;  %v6124_v61 = vshrl.u32 %v13296_v1, 16 }
 0x408   : > { %v13386_v13 = vld [vmem:[#allocation3 + $0x40] sm:$0xff]  ;;  %5902 = vst.msk [vmem:[#allocation3 + $0x48] sm:$0xf] %vm15670_vm6, %v5655_v30  ;;  %v5205_v44 = vpop.f32.mrf.mxu0  ;;  %v6128_v42 = vshll.u32 %v13384_v45, 16  ;;  %v15064_v30 = vrot.slane %v13384_v45, 1  ;;  %v15676_v37 = vrot.slane %v13296_v1, 1 }
 0x409   : > { %v5658_v35 = vshrl.u32 %v5451_v9, 16  ;;  %v5661_v53 = vshll.u32 %v5451_v9, 16  ;;  %v5268_v48 = vadd.f32 %v5205_v44, %v5028_v22  ;;  %9678 = vmatmul.msk.bf16.gmra.mxu2 %vm6224_vm2, %v13206_v28  ;;  %v7217_v17 = vshrl.u32 %v13386_v13, 16 }
 0x40a   : > { %v6126_v28 = vor.u32 %v6124_v61, %v13331_v0  ;;  %v13414_v44 = vrot.slane %v6128_v42, 1  ;;  %v13421_v29 = vsel %vm15677_vm14, %v15676_v37, %v15064_v30  ;;  %v7220_v61 = vshll.u32 %v13386_v13, 16 }
 0x40b   : > { %v5660_v46 = vrot.slane %v5658_v35, 6  ;;  %v5663_v39 = vrot.slane %v5661_v53, 7  ;;  %vm5304_vm3 = vcmp.gt.f32.partialorder %v5268_v48, 0.0  ;;  %v5344_v22 = vmul.f32 %v13277_v3, %v5268_v48  ;;  %9565 = vmatmul.msk.bf16.gmra.mxu0 %vm15675_vm1, %v5090_v14  ;;  %vm15697_vm1 = vmmov %vm15695_vm10 }
 0x40c   : > { %v13411_v9 = vpop.f32.mrf.mxu3  ;;  %v4656_v35 = vadd.f32 %v12859_v59, %v4291_v20  ;;  %v5656_v53 = vrot.slane %v5654_v60, 4  ;;  %v6131_v0 = vsel %vm15679_vm9, %v6126_v28, %v13414_v44  ;;  %v7219_v42 = vrot.slane %v7217_v17, 1 }
 0x40d   : > { %v5664_v34 = vor.u32 %v5663_v39, %v5660_v46  ;;  %v5380_v31 = vsel %vm5304_vm3, %v5268_v48, %v5344_v22  ;;  %v15065_v59 = vrot.slane %v13386_v13, 2  ;;  %v7222_v60 = vrot.slane %v7220_v61, 2  ;;  %v13444_v46 = vld [vmem:[#allocation3 + $0x40] sm:$0xff]  ;;  %v13446_v39 = vpop.f32.mrf.mxu2 }
 0x40e   : > { %v5416_v14 = vsel %vm11669_vm13, %v5380_v31, 0.0  ;;  %v5029_v56 = vadd.f32 %v13147_v47, %v4656_v35  ;;  %v15681_v47 = vrot.slane %v13318_v2, 2  ;;  %vm15682_vm13 = vcmask 1045504  }
 0x40f   : > { %v5665_v37 = vsel %vm10493_vm11, %v5656_v53, %v5664_v34  ;;  %v5452_v30 = vpack.c.bf16 %v5416_v14, %v5416_v14  ;;  %9653 = vmatmul.msk.bf16.gmra.mxu1 %vm6224_vm2, %v6131_v0  ;;  %v13448_v22 = vor.u32 %v7222_v60, %v7219_v42  ;;  %v15684_v53 = vld [vmem:[#allocation52_spill] sm:$0xff]  ;;  %v15685_v14 = vld [vmem:[#allocation13_spill] sm:$0xff]  ;;  %v15066_v60 = vrot.slane %v13444_v46, 3 }
 0x410   : > { %5903 = vst.msk [vmem:[#allocation3 + $0x4c] sm:$0xf] %vm15680_vm7, %v5665_v37  ;;  %v5207_v24 = vpop.f32.mrf.mxu0  ;;  %v13442_v17 = vsel %vm15682_vm13, %v15681_v47, %v15065_v59  ;;  %v4657_v0 = vadd.f32 %v15685_v14, %v15684_v53  ;;  %v5666_v37 = vrot.slane %v5664_v34, 4  ;;  %v15689_v34 = vrot.slane %v13363_v63, 3  ;;  %vm15700_vm7 = vmmov %vm15670_vm6 }
 0x411   : > { %9705 = vmatmul.msk.bf16.gmra.mxu3 %vm6224_vm2, %v13069_v57  ;;  %v5668_v31 = vshrl.u32 %v5452_v30, 16  ;;  %v5671_v48 = vshll.u32 %v5452_v30, 16  ;;  %v5269_v20 = vadd.f32 %v5207_v24, %v5029_v56  ;;  %15683 = vst [vmem:[#allocation46_spill] sm:$0xff] %v13442_v17  ;;  %v13453_v56 = vpop.f32.mrf.mxu1  ;;  %v13460_v61 = vsel %vm15664_vm8, %v13365_v55, %v13448_v22 }
 0x412   : > { %15686 = vst [vmem:[#allocation37_spill] sm:$0xff] %v13460_v61  ;;  %v5030_v59 = vadd.f32 %v13190_v18, %v4657_v0  ;;  %v15693_v0 = vld [vmem:[#allocation10_spill] sm:$0xff]  ;;  %vm15699_vm14 = vnez %v15698_v27 }
 0x413   : > { %v5670_v28 = vrot.slane %v5668_v31, 6  ;;  %v5673_v35 = vrot.slane %v5671_v48, 7  ;;  %vm5305_vm5 = vcmp.gt.f32.partialorder %v5269_v20, 0.0  ;;  %v5345_v57 = vmul.f32 %v13277_v3, %v5269_v20  ;;  %v15687_v31 = vld [vmem:[#allocation6_spill] sm:$0xff] }
 0x414   : > { %v13451_v30 = vpop.f32.mrf.mxu3  ;;  %vm15688_vm12 = vnez %v15687_v31 }
 0x415   : > { %v5674_v42 = vor.u32 %v5673_v35, %v5670_v28  ;;  %v5381_v24 = vsel %vm5305_vm5, %v5269_v20, %v5345_v57  ;;  %v13478_v20 = vsel %vm15651_vm0, %v15689_v34, %v15066_v60  ;;  %v15691_v28 = vld [vmem:[#allocation53_spill] sm:$0xff]  ;;  %v15692_v35 = vld [vmem:[#allocation48_spill] sm:$0xff]  ;;  %v15694_v34 = vrot.slane %v12904_v40, 1 }
 0x416   : > { %v5417_v48 = vsel %vm15688_vm12, %v5381_v24, 0.0  ;;  %15690 = vst [vmem:[#allocation47_spill] sm:$0xff] %v13478_v20  ;;  %v4293_v57 = vadd.f32 %v15692_v35, %v15691_v28  ;;  %v10160_v24 = vld [vmem:[%s14945_s5 + $0x40] sm:$0xff]  ;;  %v13494_v35 = vpop.f32.mrf.mxu2 }
 0x417   : > { %v5675_v53 = vsel %vm10493_vm11, %v5666_v37, %v5674_v42  ;;  %v5453_v14 = vpack.c.bf16 %v5417_v48, %v5417_v48  ;;  %v13469_v17 = vld [vmem:[#allocation3 + $0x48] sm:$0xff]  ;;  %v6907_v37 = vrot.slane %v15693_v0, 1  ;;  %7397 = vmatpush.bf16.msrb.mxu1 %v10160_v24  ;;  %v5676_v61 = vrot.slane %v5674_v42, 4 }
 0x418   : > { %v13471_v55 = vld [vmem:[#allocation3 + $0x48] sm:$0xff]  ;;  %5904 = vst.msk [vmem:[#allocation3 + $0x50] sm:$0xf] %vm15670_vm6, %v5675_v53  ;;  %v5210_v18 = vpop.f32.mrf.mxu0  ;;  %v6136_v63 = vshll.u32 %v13469_v17, 16  ;;  %v6132_v53 = vshrl.u32 %v13384_v45, 16  ;;  %v15067_v0 = vrot.slane %v13469_v17, 1 }
 0x419   : > { %v5678_v31 = vshrl.u32 %v5453_v14, 16  ;;  %v5681_v48 = vshll.u32 %v5453_v14, 16  ;;  %v5270_v47 = vadd.f32 %v5210_v18, %v5030_v59  ;;  %9679 = vmatmul.msk.bf16.gmra.mxu2 %vm6224_vm2, %v13296_v1  ;;  %v6909_v28 = vsel %vm15695_vm10, %v6907_v37, %v15694_v34  ;;  %vm15712_vm10 = vmmov %vm15697_vm1 }
 0x41a   : > { %v7226_v60 = vshrl.u32 %v13471_v55, 16  ;;  %v13502_v20 = vpop.f32.mrf.mxu1  ;;  %v6134_v37 = vor.u32 %v6132_v53, %v13414_v44  ;;  %v13505_v24 = vrot.slane %v6136_v63, 1  ;;  %v15696_v34 = vrot.slane %v13384_v45, 1 }
 0x41b   : > { %v5680_v14 = vrot.slane %v5678_v31, 6  ;;  %v5683_v59 = vrot.slane %v5681_v48, 7  ;;  %vm5306_vm3 = vcmp.gt.f32.partialorder %v5270_v47, 0.0  ;;  %v5346_v18 = vmul.f32 %v13277_v3, %v5270_v47  ;;  %9800 = vmatmul.msk.bf16.vlgmr.msrb.gmra.mxu0 %vm6224_vm2, %v6909_v28 }
 0x41c   : > { %v13500_v1 = vpop.f32.mrf.mxu3  ;;  %v13512_v31 = vsel %vm15697_vm1, %v15696_v34, %v15067_v0  ;;  %v4658_v48 = vadd.f32 %v12932_v43, %v4293_v57  ;;  %v6139_v44 = vsel %vm15679_vm9, %v6134_v37, %v13505_v24  ;;  %v7228_v63 = vrot.slane %v7226_v60, 1 }
 0x41d   : > { %v5684_v62 = vor.u32 %v5683_v59, %v5680_v14  ;;  %v5382_v28 = vsel %vm5306_vm3, %v5270_v47, %v5346_v18  ;;  %v7229_v53 = vshll.u32 %v13471_v55, 16  ;;  %v15068_v43 = vrot.slane %v13471_v55, 2 }
 0x41e   : > { %v5418_v12 = vsel %vm15699_vm14, %v5382_v28, 0.0  ;;  %v5031_v52 = vadd.f32 %v13234_v11, %v4658_v48  ;;  %v15701_v11 = vrot.slane %v13386_v13, 2  ;;  %v13537_v14 = vpop.f32.mrf.mxu2 }
 0x41f   : > { %v5685_v34 = vsel %vm10493_vm11, %v5676_v61, %v5684_v62  ;;  %v5454_v0 = vpack.c.bf16 %v5418_v12, %v5418_v12  ;;  %9654 = vmatmul.msk.bf16.gmra.mxu1 %vm6224_vm2, %v6139_v44  ;;  %v7231_v42 = vrot.slane %v7229_v53, 2  ;;  %v13535_v61 = vld [vmem:[#allocation3 + $0x48] sm:$0xff]  ;;  %v5686_v53 = vrot.slane %v5684_v62, 4 }
 0x420   : > { %5905 = vst.msk [vmem:[#allocation3 + $0x54] sm:$0xf] %vm15700_vm7, %v5685_v34  ;;  %v5212_v27 = vpop.f32.mrf.mxu0  ;;  %v13533_v12 = vsel %vm15682_vm13, %v15701_v11, %v15068_v43  ;;  %v15707_v62 = vrot.slane %v13444_v46, 3  ;;  %v15711_v46 = vrot.slane %v12904_v40, 1  ;;  %vm15716_vm7 = vmmov %vm15670_vm6 }
 0x421   : > { %9706 = vmatmul.msk.bf16.gmra.mxu3 %vm6224_vm2, %v13158_v19  ;;  %v5688_v60 = vshrl.u32 %v5454_v0, 16  ;;  %v5691_v47 = vshll.u32 %v5454_v0, 16  ;;  %v5271_v57 = vadd.f32 %v5212_v27, %v5031_v52  ;;  %15702 = vst [vmem:[#allocation41_spill] sm:$0xff] %v13533_v12  ;;  %v13539_v59 = vor.u32 %v7231_v42, %v7228_v63  ;;  %v15703_v52 = vld [vmem:[#allocation55_spill] sm:$0xff]  ;;  %v15705_v42 = vld [vmem:[#allocation8_spill] sm:$0xff] }
 0x422   : > { %v4659_v48 = vadd.f32 %v12977_v23, %v15703_v52  ;;  %v13546_v28 = vpop.f32.mrf.mxu1  ;;  %v15070_v27 = vrot.slane %v13535_v61, 3  ;;  %vm15706_vm12 = vnez %v15705_v42 }
 0x423   : > { %v5690_v18 = vrot.slane %v5688_v60, 6  ;;  %v5693_v37 = vrot.slane %v5691_v47, 7  ;;  %vm5307_vm5 = vcmp.gt.f32.partialorder %v5271_v57, 0.0  ;;  %v5347_v19 = vmul.f32 %v13277_v3, %v5271_v57 }
 0x424   : > { %v13542_v0 = vpop.f32.mrf.mxu3  ;;  %v13551_v44 = vsel %vm15664_vm8, %v13448_v22, %v13539_v59  ;;  %v15069_v47 = vrot.slane %v12979_v41, 1  ;;  %v5032_v11 = vadd.f32 %v13280_v51, %v4659_v48 }
 0x425   : > { %15704 = vst [vmem:[#allocation38_spill] sm:$0xff] %v13551_v44  ;;  %v5694_v63 = vor.u32 %v5693_v37, %v5690_v18  ;;  %v5383_v34 = vsel %vm5307_vm5, %v5271_v57, %v5347_v19  ;;  %v13569_v57 = vsel %vm15651_vm0, %v15707_v62, %v15070_v27  ;;  %v15709_v18 = vld [vmem:[#allocation56_spill] sm:$0xff]  ;;  %v15710_v37 = vld [vmem:[#allocation51_spill] sm:$0xff]  ;;  %v6140_v62 = vshrl.u32 %v13469_v17, 16 }
 0x426   : > { %v5419_v60 = vsel %vm15706_vm12, %v5383_v34, 0.0  ;;  %15708 = vst [vmem:[#allocation49_spill] sm:$0xff] %v13569_v57  ;;  %v4295_v19 = vadd.f32 %v15710_v37, %v15709_v18  ;;  %v13583_v18 = vpop.f32.mrf.mxu2  ;;  %v15713_v27 = vrot.slane %v13469_v17, 1 }
 0x427   : > { %v5695_v23 = vsel %vm10493_vm11, %v5686_v53, %v5694_v63  ;;  %v5455_v52 = vpack.c.bf16 %v5419_v60, %v5419_v60  ;;  %v13560_v43 = vld [vmem:[#allocation3 + $0x50] sm:$0xff]  ;;  %v6911_v60 = vsel %vm15712_vm10, %v15711_v46, %v15069_v47  ;;  %v6142_v46 = vor.u32 %v6140_v62, %v13505_v24  ;;  %vm15727_vm10 = vmmov %vm15697_vm1 }
 0x428   : > { %v13562_v22 = vld [vmem:[#allocation3 + $0x50] sm:$0xff]  ;;  %5906 = vst.msk [vmem:[#allocation3 + $0x58] sm:$0xf] %vm15670_vm6, %v5695_v23  ;;  %v5215_v51 = vpop.f32.mrf.mxu0  ;;  %v6144_v42 = vshll.u32 %v13560_v43, 16  ;;  %v15071_v23 = vrot.slane %v13560_v43, 1 }
 0x429   : > { %v5698_v48 = vshrl.u32 %v5455_v52, 16  ;;  %v5701_v53 = vshll.u32 %v5455_v52, 16  ;;  %v5272_v34 = vadd.f32 %v5215_v51, %v5032_v11  ;;  %9680 = vmatmul.msk.bf16.gmra.mxu2 %vm6224_vm2, %v13384_v45  ;;  %v7235_v52 = vshrl.u32 %v13562_v22, 16 }
 0x42a   : > { %v6293_v40 = vpop.f32.mrf.mxu1  ;;  %v13592_v47 = vrot.slane %v6144_v42, 1  ;;  %v13599_v57 = vsel %vm15697_vm1, %v15713_v27, %v15071_v23  ;;  %v7238_v62 = vshll.u32 %v13562_v22, 16 }
 0x42b   : > { %v5700_v11 = vrot.slane %v5698_v48, 6  ;;  %v5703_v37 = vrot.slane %v5701_v53, 7  ;;  %vm5308_vm3 = vcmp.gt.f32.partialorder %v5272_v34, 0.0  ;;  %v5348_v51 = vmul.f32 %v13277_v3, %v5272_v34  ;;  %9801 = vmatmul.msk.bf16.gmra.mxu0 %vm6224_vm2, %v6911_v60  ;;  %v15714_v60 = vld [vmem:[#allocation11_spill] sm:$0xff] }
 0x42c   : > { %v13589_v45 = vpop.f32.mrf.mxu3  ;;  %v4660_v48 = vadd.f32 %v13011_v26, %v4295_v19  ;;  %v5696_v53 = vrot.slane %v5694_v63, 4  ;;  %vm15715_vm14 = vnez %v15714_v60  ;;  %v6147_v24 = vsel %vm15679_vm9, %v6142_v46, %v13592_v47 }
 0x42d   : > { %v5704_v12 = vor.u32 %v5703_v37, %v5700_v11  ;;  %v5384_v44 = vsel %vm5308_vm3, %v5272_v34, %v5348_v51  ;;  %v7237_v42 = vrot.slane %v7235_v52, 1  ;;  %v15074_v26 = vrot.slane %v13562_v22, 2  ;;  %v13622_v11 = vld [vmem:[#allocation3 + $0x50] sm:$0xff] }
 0x42e   : > { %v5420_v38 = vsel %vm15715_vm14, %v5384_v44, 0.0  ;;  %v5033_v40 = vadd.f32 %v13325_v32, %v4660_v48  ;;  %v7240_v44 = vrot.slane %v7238_v62, 2  ;;  %v15717_v32 = vrot.slane %v13471_v55, 2  ;;  %v6435_v37 = vpop.f32.mrf.mxu2 }
 0x42f   : > { %v5705_v27 = vsel %vm10493_vm11, %v5696_v53, %v5704_v12  ;;  %v5456_v23 = vpack.c.bf16 %v5420_v38, %v5420_v38  ;;  %9655 = vmatmul.msk.bf16.gmra.mxu1 %vm6224_vm2, %v6147_v24  ;;  %v13632_v62 = vadd.f32 %v6435_v37, %v13502_v20 }
 0x430   : > { %5907 = vst.msk [vmem:[#allocation3 + $0x5c] sm:$0xf] %vm15716_vm7, %v5705_v27  ;;  %v5217_v63 = vpop.f32.mrf.mxu0  ;;  %v13620_v38 = vsel %vm15682_vm13, %v15717_v32, %v15074_v26  ;;  %v13624_v51 = vor.u32 %v7240_v44, %v7237_v42  ;;  %v5706_v42 = vrot.slane %v5704_v12, 4  ;;  %v15073_v44 = vrot.slane %v13622_v11, 3  ;;  %vm15731_vm7 = vmmov %vm15670_vm6 }
 0x431   : > { %9707 = vmatmul.msk.bf16.gmra.mxu3 %vm6224_vm2, %v13245_v8  ;;  %v5708_v19 = vshrl.u32 %v5456_v23, 16  ;;  %v5711_v34 = vshll.u32 %v5456_v23, 16  ;;  %v5273_v52 = vadd.f32 %v5217_v63, %v5033_v40  ;;  %15718 = vst [vmem:[#allocation40_spill] sm:$0xff] %v13620_v38  ;;  %v15719_v23 = vld [vmem:[#allocation58_spill] sm:$0xff]  ;;  %v15072_v32 = vrot.slane %v13051_v7, 1  ;;  %v15729_v38 = vld [vmem:[#allocation15_spill] sm:$0xff] }
 0x432   : > { %v4661_v60 = vadd.f32 %v13077_v54, %v15719_v23  ;;  %v6295_v24 = vpop.f32.mrf.mxu1  ;;  %v13637_v40 = vsel %vm15664_vm8, %v13539_v59, %v13624_v51  ;;  %v15722_v12 = vrot.slane %v13535_v61, 3  ;;  %v15726_v61 = vrot.slane %v12979_v41, 1 }
 0x433   : > { %v5710_v46 = vrot.slane %v5708_v19, 6  ;;  %v5713_v48 = vrot.slane %v5711_v34, 7  ;;  %vm5309_vm5 = vcmp.gt.f32.partialorder %v5273_v52, 0.0  ;;  %v5349_v8 = vmul.f32 %v13277_v3, %v5273_v52  ;;  %v15720_v19 = vld [vmem:[#allocation12_spill] sm:$0xff] }
 0x434   : > { %v13627_v53 = vpop.f32.mrf.mxu3  ;;  %vm15721_vm12 = vnez %v15720_v19  ;;  %v5034_v54 = vadd.f32 %v13368_v10, %v4661_v60  ;;  %v6913_v19 = vsel %vm15727_vm10, %v15726_v61, %v15072_v32  ;;  %vm15730_vm14 = vnez %v15729_v38  ;;  %vm15743_vm10 = vmmov %vm15697_vm1 }
 0x435   : > { %v5714_v27 = vor.u32 %v5713_v48, %v5710_v46  ;;  %v5385_v63 = vsel %vm5309_vm5, %v5273_v52, %v5349_v8  ;;  %v13655_v52 = vsel %vm15651_vm0, %v15722_v12, %v15073_v44  ;;  %v15724_v46 = vld [vmem:[#allocation57_spill] sm:$0xff]  ;;  %v15725_v48 = vld [vmem:[#allocation54_spill] sm:$0xff] }
 0x436   : > { %v5421_v34 = vsel %vm15721_vm12, %v5385_v63, 0.0  ;;  %15723 = vst [vmem:[#allocation50_spill] sm:$0xff] %v13655_v52  ;;  %v4297_v8 = vadd.f32 %v15725_v48, %v15724_v46  ;;  %v6437_v12 = vpop.f32.mrf.mxu2 }
 0x437   : > { %v5715_v20 = vsel %vm10493_vm11, %v5706_v42, %v5714_v27  ;;  %v5457_v37 = vpack.c.bf16 %v5421_v34, %v5421_v34  ;;  %v13646_v23 = vld [vmem:[#allocation3 + $0x58] sm:$0xff]  ;;  %v6148_v34 = vshrl.u32 %v13560_v43, 16  ;;  %v13681_v32 = vadd.f32 %v6437_v12, %v13546_v28 }
 0x438   : > { %v13648_v59 = vld [vmem:[#allocation3 + $0x58] sm:$0xff]  ;;  %5908 = vst.msk [vmem:[#allocation3 + $0x60] sm:$0xf] %vm15670_vm6, %v5715_v20  ;;  %v5220_v10 = vpop.f32.mrf.mxu0  ;;  %v6152_v63 = vshll.u32 %v13646_v23, 16  ;;  %v15075_v20 = vrot.slane %v13646_v23, 1  ;;  %v5716_v44 = vrot.slane %v5714_v27, 4 }
 0x439   : > { %v5718_v60 = vshrl.u32 %v5457_v37, 16  ;;  %v5721_v24 = vshll.u32 %v5457_v37, 16  ;;  %v5274_v42 = vadd.f32 %v5220_v10, %v5034_v54  ;;  %9681 = vmatmul.msk.bf16.gmra.mxu2 %vm6224_vm2, %v13469_v17  ;;  %v7244_v46 = vshrl.u32 %v13648_v59, 16 }
 0x43a   : > { %v13675_v10 = vpop.f32.mrf.mxu1  ;;  %v6150_v41 = vor.u32 %v6148_v34, %v13592_v47  ;;  %v13678_v61 = vrot.slane %v6152_v63, 1  ;;  %v7247_v34 = vshll.u32 %v13648_v59, 16 }
 0x43b   : > { %v5720_v37 = vrot.slane %v5718_v60, 6  ;;  %v5723_v54 = vrot.slane %v5721_v24, 7  ;;  %vm5310_vm3 = vcmp.gt.f32.partialorder %v5274_v42, 0.0  ;;  %v5350_v48 = vmul.f32 %v13277_v3, %v5274_v42  ;;  %9802 = vmatmul.msk.bf16.gmra.mxu0 %vm6224_vm2, %v6913_v19 }
 0x43c   : > { %v13673_v17 = vpop.f32.mrf.mxu3  ;;  %v15728_v60 = vrot.slane %v13560_v43, 1  ;;  %v4662_v19 = vadd.f32 %v13129_v49, %v4297_v8  ;;  %v6155_v63 = vsel %vm15679_vm9, %v6150_v41, %v13678_v61  ;;  %v7246_v28 = vrot.slane %v7244_v46, 1  ;;  %v13711_v46 = vld [vmem:[#allocation3 + $0x58] sm:$0xff] }
 0x43d   : > { %v5724_v26 = vor.u32 %v5723_v54, %v5720_v37  ;;  %v5386_v52 = vsel %vm5310_vm3, %v5274_v42, %v5350_v48  ;;  %v15078_v49 = vrot.slane %v13648_v59, 2  ;;  %v7249_v27 = vrot.slane %v7247_v34, 2 }
 0x43e   : > { %v13688_v24 = vsel %vm15697_vm1, %v15728_v60, %v15075_v20  ;;  %v5422_v47 = vsel %vm15730_vm14, %v5386_v52, 0.0  ;;  %v5035_v12 = vadd.f32 %v13411_v9, %v4662_v19  ;;  %v15732_v9 = vrot.slane %v13562_v22, 2  ;;  %v6440_v37 = vpop.f32.mrf.mxu2 }
 0x43f   : > { %v5725_v60 = vsel %vm10493_vm11, %v5716_v44, %v5724_v26  ;;  %v5458_v20 = vpack.c.bf16 %v5422_v47, %v5422_v47  ;;  %9656 = vmatmul.msk.bf16.gmra.mxu1 %vm6224_vm2, %v6155_v63  ;;  %v13713_v54 = vor.u32 %v7249_v27, %v7246_v28  ;;  %v15736_v27 = vld [vmem:[#allocation16_spill] sm:$0xff] }
 0x440   : > { %5909 = vst.msk [vmem:[#allocation3 + $0x64] sm:$0xf] %vm15731_vm7, %v5725_v60  ;;  %v5222_v38 = vpop.f32.mrf.mxu0  ;;  %v13709_v44 = vsel %vm15682_vm13, %v15732_v9, %v15078_v49  ;;  %vm15737_vm12 = vnez %v15736_v27  ;;  %vm15747_vm7 = vmmov %vm15670_vm6 }
 0x441   : > { %9708 = vmatmul.msk.bf16.gmra.mxu3 %vm6224_vm2, %v13338_v25  ;;  %v5728_v52 = vshrl.u32 %v5458_v20, 16  ;;  %v5731_v8 = vshll.u32 %v5458_v20, 16  ;;  %v5275_v42 = vadd.f32 %v5222_v38, %v5035_v12  ;;  %15733 = vst [vmem:[#allocation45_spill] sm:$0xff] %v13709_v44  ;;  %v15734_v20 = vld [vmem:[#allocation60_spill] sm:$0xff]  ;;  %v13725_v34 = vsel %vm15664_vm8, %v13624_v51, %v13713_v54 }
 0x442   : > { %v4663_v47 = vadd.f32 %v13175_v4, %v15734_v20  ;;  %v13720_v63 = vpop.f32.mrf.mxu1  ;;  %15735 = vst [vmem:[#allocation44_spill] sm:$0xff] %v13725_v34  ;;  %v5726_v12 = vrot.slane %v5724_v26, 4  ;;  %v15076_v38 = vrot.slane %v13711_v46, 3  ;;  %v15738_v26 = vrot.slane %v13622_v11, 3 }
 0x443   : > { %v5730_v48 = vrot.slane %v5728_v52, 6  ;;  %v5733_v41 = vrot.slane %v5731_v8, 7  ;;  %vm5311_vm5 = vcmp.gt.f32.partialorder %v5275_v42, 0.0  ;;  %v5351_v25 = vmul.f32 %v13277_v3, %v5275_v42 }
 0x444   : > { %v13716_v19 = vpop.f32.mrf.mxu3  ;;  %v15077_v8 = vrot.slane %v13139_v50, 1  ;;  %v5036_v9 = vadd.f32 %v13451_v30, %v4663_v47  ;;  %v15742_v11 = vrot.slane %v13051_v7, 1 }
 0x445   : > { %v5734_v28 = vor.u32 %v5733_v41, %v5730_v48  ;;  %v5387_v60 = vsel %vm5311_vm5, %v5275_v42, %v5351_v25  ;;  %v13743_v42 = vsel %vm15651_vm0, %v15738_v26, %v15076_v38  ;;  %v15740_v48 = vld [vmem:[#allocation62_spill] sm:$0xff]  ;;  %v15741_v41 = vld [vmem:[#allocation59_spill] sm:$0xff]  ;;  %v6156_v26 = vshrl.u32 %v13646_v23, 16 }
 0x446   : > { %v5423_v52 = vsel %vm15737_vm12, %v5387_v60, 0.0  ;;  %15739 = vst [vmem:[#allocation52_spill] sm:$0xff] %v13743_v42  ;;  %v4299_v25 = vadd.f32 %v15741_v41, %v15740_v48  ;;  %v6442_v48 = vpop.f32.mrf.mxu2  ;;  %v15745_v42 = vld [vmem:[#allocation19_spill] sm:$0xff] }
 0x447   : > { %v5735_v4 = vsel %vm10493_vm11, %v5726_v12, %v5734_v28  ;;  %v5459_v37 = vpack.c.bf16 %v5423_v52, %v5423_v52  ;;  %v13734_v20 = vld [vmem:[#allocation3 + $0x60] sm:$0xff]  ;;  %v6915_v52 = vsel %vm15743_vm10, %v15742_v11, %v15077_v8  ;;  %v6158_v7 = vor.u32 %v6156_v26, %v13678_v61  ;;  %vm15758_vm10 = vmmov %vm15697_vm1 }
 0x448   : > { %v13736_v51 = vld [vmem:[#allocation3 + $0x60] sm:$0xff]  ;;  %5910 = vst.msk [vmem:[#allocation3 + $0x68] sm:$0xf] %vm15670_vm6, %v5735_v4  ;;  %v5225_v30 = vpop.f32.mrf.mxu0  ;;  %v6160_v27 = vshll.u32 %v13734_v20, 16  ;;  %v15079_v4 = vrot.slane %v13734_v20, 1  ;;  %v15744_v48 = vrot.slane %v13646_v23, 1  ;;  %vm15746_vm14 = vnez %v15745_v42 }
 0x449   : > { %v5738_v47 = vshrl.u32 %v5459_v37, 16  ;;  %v5741_v12 = vshll.u32 %v5459_v37, 16  ;;  %v5276_v60 = vadd.f32 %v5225_v30, %v5036_v9  ;;  %9682 = vmatmul.msk.bf16.gmra.mxu2 %vm6224_vm2, %v13560_v43  ;;  %v7253_v41 = vshrl.u32 %v13736_v51, 16 }
 0x44a   : > { %v13763_v38 = vpop.f32.mrf.mxu1  ;;  %v13766_v11 = vrot.slane %v6160_v27, 1  ;;  %v5736_v8 = vrot.slane %v5734_v28, 4  ;;  %v7256_v26 = vshll.u32 %v13736_v51, 16 }
 0x44b   : > { %v5740_v37 = vrot.slane %v5738_v47, 6  ;;  %v5743_v9 = vrot.slane %v5741_v12, 7  ;;  %vm5312_vm3 = vcmp.gt.f32.partialorder %v5276_v60, 0.0  ;;  %v5352_v30 = vmul.f32 %v13277_v3, %v5276_v60  ;;  %9803 = vmatmul.msk.bf16.gmra.mxu0 %vm6224_vm2, %v6915_v52 }
 0x44c   : > { %v13761_v43 = vpop.f32.mrf.mxu3  ;;  %v13773_v47 = vsel %vm15697_vm1, %v15744_v48, %v15079_v4  ;;  %v4664_v12 = vadd.f32 %v13214_v58, %v4299_v25  ;;  %v6163_v61 = vsel %vm15679_vm9, %v6158_v7, %v13766_v11  ;;  %v7255_v27 = vrot.slane %v7253_v41, 1 }
 0x44d   : > { %v5744_v49 = vor.u32 %v5743_v9, %v5740_v37  ;;  %v5388_v52 = vsel %vm5312_vm3, %v5276_v60, %v5352_v30  ;;  %v15082_v58 = vrot.slane %v13736_v51, 2  ;;  %v7258_v42 = vrot.slane %v7256_v26, 2 }
 0x44e   : > { %v5424_v44 = vsel %vm15746_vm14, %v5388_v52, 0.0  ;;  %v5037_v34 = vadd.f32 %v13500_v1, %v4664_v12  ;;  %v15748_v1 = vrot.slane %v13648_v59, 2  ;;  %v6445_v37 = vpop.f32.mrf.mxu2 }
 0x44f   : > { %v5745_v48 = vsel %vm10493_vm11, %v5736_v8, %v5744_v49  ;;  %v5460_v4 = vpack.c.bf16 %v5424_v44, %v5424_v44  ;;  %9657 = vmatmul.msk.bf16.gmra.mxu1 %vm6224_vm2, %v6163_v61  ;;  %v13796_v8 = vld [vmem:[#allocation3 + $0x60] sm:$0xff]  ;;  %v13798_v9 = vor.u32 %v7258_v42, %v7255_v27  ;;  %v13806_v61 = vadd.f32 %v6445_v37, %v13675_v10 }
 0x450   : > { %5911 = vst.msk [vmem:[#allocation3 + $0x6c] sm:$0xf] %vm15747_vm7, %v5745_v48  ;;  %v5227_v28 = vpop.f32.mrf.mxu0  ;;  %v13794_v44 = vsel %vm15682_vm13, %v15748_v1, %v15082_v58  ;;  %v5746_v27 = vrot.slane %v5744_v49, 4  ;;  %v15081_v42 = vrot.slane %v13796_v8, 3  ;;  %v15080_v1 = vrot.slane %v13226_v36, 1  ;;  %vm15762_vm7 = vmmov %vm15670_vm6 }
 0x451   : > { %9709 = vmatmul.msk.bf16.gmra.mxu3 %vm6224_vm2, %v13421_v29  ;;  %v5748_v25 = vshrl.u32 %v5460_v4, 16  ;;  %v5751_v60 = vshll.u32 %v5460_v4, 16  ;;  %v5277_v41 = vadd.f32 %v5227_v28, %v5037_v34  ;;  %15749 = vst [vmem:[#allocation13_spill] sm:$0xff] %v13794_v44  ;;  %v15750_v34 = vld [vmem:[#allocation64_spill] sm:$0xff]  ;;  %v13811_v26 = vsel %vm15664_vm8, %v13713_v54, %v13798_v9  ;;  %v15760_v44 = vld [vmem:[#allocation23_spill] sm:$0xff] }
 0x452   : > { %v4665_v4 = vadd.f32 %v13260_v6, %v15750_v34  ;;  %v6305_v52 = vpop.f32.mrf.mxu1  ;;  %v15753_v49 = vrot.slane %v13711_v46, 3  ;;  %v15757_v46 = vrot.slane %v13139_v50, 1  ;;  %vm15761_vm14 = vnez %v15760_v44 }
 0x453   : > { %v5750_v30 = vrot.slane %v5748_v25, 6  ;;  %v5753_v7 = vrot.slane %v5751_v60, 7  ;;  %vm5313_vm5 = vcmp.gt.f32.partialorder %v5277_v41, 0.0  ;;  %v5353_v29 = vmul.f32 %v13277_v3, %v5277_v41  ;;  %v15751_v25 = vld [vmem:[#allocation20_spill] sm:$0xff] }
 0x454   : > { %v13801_v12 = vpop.f32.mrf.mxu3  ;;  %vm15752_vm12 = vnez %v15751_v25  ;;  %v5038_v6 = vadd.f32 %v13542_v0, %v4665_v4  ;;  %v6917_v25 = vsel %vm15758_vm10, %v15757_v46, %v15080_v1  ;;  %vm15772_vm10 = vmmov %vm15697_vm1 }
 0x455   : > { %v5754_v48 = vor.u32 %v5753_v7, %v5750_v30  ;;  %v5389_v28 = vsel %vm5313_vm5, %v5277_v41, %v5353_v29  ;;  %v13829_v41 = vsel %vm15651_vm0, %v15753_v49, %v15081_v42  ;;  %v15755_v30 = vld [vmem:[#allocation65_spill] sm:$0xff]  ;;  %v15756_v7 = vld [vmem:[#allocation63_spill] sm:$0xff]  ;;  %v15759_v42 = vrot.slane %v13734_v20, 1 }
 0x456   : > { %v5425_v60 = vsel %vm15752_vm12, %v5389_v28, 0.0  ;;  %15754 = vst [vmem:[#allocation6_spill] sm:$0xff] %v13829_v41  ;;  %v4301_v29 = vadd.f32 %v15756_v7, %v15755_v30  ;;  %v6447_v49 = vpop.f32.mrf.mxu2 }
 0x457   : > { %v5755_v10 = vsel %vm10493_vm11, %v5746_v27, %v5754_v48  ;;  %v5461_v37 = vpack.c.bf16 %v5425_v60, %v5425_v60  ;;  %v13820_v34 = vld [vmem:[#allocation3 + $0x68] sm:$0xff]  ;;  %v6164_v60 = vshrl.u32 %v13734_v20, 16  ;;  %v13851_v1 = vadd.f32 %v6447_v49, %v13720_v63 }
 0x458   : > { %v13822_v54 = vld [vmem:[#allocation3 + $0x68] sm:$0xff]  ;;  %5912 = vst.msk [vmem:[#allocation3 + $0x70] sm:$0xf] %vm15670_vm6, %v5755_v10  ;;  %v5230_v0 = vpop.f32.mrf.mxu0  ;;  %v6168_v28 = vshll.u32 %v13820_v34, 16  ;;  %v6559_v10 = vrot.slane %v13820_v34, 1  ;;  %v5756_v58 = vrot.slane %v5754_v48, 4 }
 0x459   : > { %v5758_v4 = vshrl.u32 %v5461_v37, 16  ;;  %v5761_v52 = vshll.u32 %v5461_v37, 16  ;;  %v5278_v27 = vadd.f32 %v5230_v0, %v5038_v6  ;;  %9683 = vmatmul.msk.bf16.gmra.mxu2 %vm6224_vm2, %v13646_v23  ;;  %v7262_v30 = vshrl.u32 %v13822_v54, 16 }
 0x45a   : > { %v6166_v50 = vor.u32 %v6164_v60, %v13766_v11  ;;  %v6170_v46 = vrot.slane %v6168_v28, 1  ;;  %v7265_v63 = vshll.u32 %v13822_v54, 16 }
 0x45b   : > { %v5760_v37 = vrot.slane %v5758_v4, 6  ;;  %v5763_v6 = vrot.slane %v5761_v52, 7  ;;  %vm5314_vm3 = vcmp.gt.f32.partialorder %v5278_v27, 0.0  ;;  %v5354_v7 = vmul.f32 %v13277_v3, %v5278_v27  ;;  %9804 = vmatmul.msk.bf16.gmra.mxu0 %vm6224_vm2, %v6917_v25 }
 0x45c   : > { %v13847_v23 = vpop.f32.mrf.mxu3  ;;  %v6308_v0 = vpop.f32.mrf.mxu1  ;;  %v13858_v4 = vsel %vm15697_vm1, %v15759_v42, %v6559_v10  ;;  %v4666_v52 = vadd.f32 %v13306_v15, %v4301_v29  ;;  %v6171_v11 = vsel %vm15679_vm9, %v6166_v50, %v6170_v46  ;;  %v7264_v28 = vrot.slane %v7262_v30, 1  ;;  %v13880_v30 = vld [vmem:[#allocation3 + $0x68] sm:$0xff] }
 0x45d   : > { %v5764_v25 = vor.u32 %v5763_v6, %v5760_v37  ;;  %v5390_v41 = vsel %vm5314_vm3, %v5278_v27, %v5354_v7  ;;  %v15085_v15 = vrot.slane %v13822_v54, 2  ;;  %v7267_v44 = vrot.slane %v7265_v63, 2 }
 0x45e   : > { %v5426_v0 = vsel %vm15761_vm14, %v5390_v41, 0.0  ;;  %v5039_v60 = vadd.f32 %v13589_v45, %v4666_v52  ;;  %v15763_v45 = vrot.slane %v13736_v51, 2  ;;  %v6450_v37 = vpop.f32.mrf.mxu2 }
 0x45f   : > { %v5765_v49 = vsel %vm10493_vm11, %v5756_v58, %v5764_v25  ;;  %v5462_v42 = vpack.c.bf16 %v5426_v0, %v5426_v0  ;;  %9658 = vmatmul.msk.bf16.gmra.mxu1 %vm6224_vm2, %v6171_v11  ;;  %v13882_v6 = vor.u32 %v7267_v44, %v7264_v28  ;;  %v15764_v0 = vld [vmem:[#allocation67_spill] sm:$0xff]  ;;  %v15084_v44 = vrot.slane %v13880_v30, 3 }
 0x460   : > { %5913 = vst.msk [vmem:[#allocation3 + $0x74] sm:$0xf] %vm15762_vm7, %v5765_v49  ;;  %v5232_v48 = vpop.f32.mrf.mxu0  ;;  %v13878_v58 = vsel %vm15682_vm13, %v15763_v45, %v15085_v15  ;;  %v4667_v11 = vadd.f32 %v13354_v5, %v15764_v0  ;;  %v13893_v49 = vadd.f32 %v6450_v37, %v13763_v38  ;;  %vm15775_vm7 = vmmov %vm15670_vm6 }
 0x461   : > { %9710 = vmatmul.msk.bf16.gmra.mxu3 %vm6224_vm2, %v13512_v31  ;;  %v5768_v41 = vshrl.u32 %v5462_v42, 16  ;;  %v5771_v29 = vshll.u32 %v5462_v42, 16  ;;  %v5279_v27 = vadd.f32 %v5232_v48, %v5039_v60  ;;  %v13898_v28 = vsel %vm15664_vm8, %v13798_v9, %v13882_v6 }
 0x462   : > { %v5766_v42 = vrot.slane %v5764_v25, 4  ;;  %v15767_v25 = vrot.slane %v13796_v8, 3  ;;  %v15771_v8 = vrot.slane %v13226_v36, 1 }
 0x463   : > { %v5770_v7 = vrot.slane %v5768_v41, 6  ;;  %v5773_v50 = vrot.slane %v5771_v29, 7  ;;  %vm5315_vm5 = vcmp.gt.f32.partialorder %v5279_v27, 0.0  ;;  %v5355_v31 = vmul.f32 %v13277_v3, %v5279_v27  ;;  %v15765_v41 = vld [vmem:[#allocation24_spill] sm:$0xff] }
 0x464   : > { %v6646_v52 = vpop.f32.mrf.mxu3  ;;  %v13887_v63 = vpop.f32.mrf.mxu1  ;;  %vm15766_vm12 = vnez %v15765_v41  ;;  %v15083_v29 = vrot.slane %v13318_v2, 1 }
 0x465   : > { %v13890_v60 = vadd.f32 %v6646_v52, %v13632_v62  ;;  %v5774_v48 = vor.u32 %v5773_v50, %v5770_v7  ;;  %v5391_v3 = vsel %vm5315_vm5, %v5279_v27, %v5355_v31  ;;  %v5040_v62 = vadd.f32 %v13627_v53, %v4667_v11  ;;  %v15769_v7 = vld [vmem:[#allocation68_spill] sm:$0xff]  ;;  %v15770_v50 = vld [vmem:[#allocation66_spill] sm:$0xff] }
 0x466   : > { %v5427_v5 = vsel %vm15766_vm12, %v5391_v3, 0.0  ;;  %v13916_v27 = vsel %vm15651_vm0, %v15767_v25, %v15084_v44  ;;  %v4303_v31 = vadd.f32 %v15770_v50, %v15769_v7  ;;  %v6172_v52 = vshrl.u32 %v13820_v34, 16  ;;  %v6452_v25 = vpop.f32.mrf.mxu2 }
 0x467   : > { %v5775_v38 = vsel %vm10493_vm11, %v5766_v42, %v5774_v48  ;;  %v5463_v45 = vpack.c.bf16 %v5427_v5, %v5427_v5  ;;  %v13907_v37 = vld [vmem:[#allocation3 + $0x70] sm:$0xff]  ;;  %15768 = vst [vmem:[#allocation53_spill] sm:$0xff] %v13916_v27  ;;  %v6919_v41 = vsel %vm15772_vm10, %v15771_v8, %v15083_v29  ;;  %v5776_v8 = vrot.slane %v5774_v48, 4  ;;  %vm15784_vm10 = vmmov %vm15697_vm1 }
 0x468   : > { %v13909_v9 = vld [vmem:[#allocation3 + $0x70] sm:$0xff]  ;;  %5914 = vst.msk [vmem:[#allocation3 + $0x78] sm:$0xf] %vm15670_vm6, %v5775_v38  ;;  %v5235_v53 = vpop.f32.mrf.mxu0  ;;  %v6176_v3 = vshll.u32 %v13907_v37, 16  ;;  %v6174_v5 = vor.u32 %v6172_v52, %v6170_v46  ;;  %v6561_v38 = vrot.slane %v13907_v37, 1 }
 0x469   : > { %v5778_v0 = vshrl.u32 %v5463_v45, 16  ;;  %v5781_v11 = vshll.u32 %v5463_v45, 16  ;;  %v5280_v42 = vadd.f32 %v5235_v53, %v5040_v62  ;;  %9684 = vmatmul.msk.bf16.gmra.mxu2 %vm6224_vm2, %v13734_v20  ;;  %v7271_v7 = vshrl.u32 %v13909_v9, 16  ;;  %v13935_v62 = vld [vmem:[%s14944_s4] ss:$0 sm:$0xff] }
 0x46a   : > { %v6178_v46 = vrot.slane %v6176_v3, 1 }
 0x46b   : > { %v5780_v50 = vrot.slane %v5778_v0, 6  ;;  %v5783_v45 = vrot.slane %v5781_v11, 7  ;;  %vm5316_vm3 = vcmp.gt.f32.partialorder %v5280_v42, 0.0  ;;  %v5356_v20 = vmul.f32 %v13935_v62, %v5280_v42  ;;  %9805 = vmatmul.msk.bf16.gmra.mxu0 %vm6224_vm2, %v6919_v41  ;;  %v15773_v41 = vld [vmem:[#allocation27_spill] sm:$0xff] }
 0x46c   : > { %v6648_v36 = vpop.f32.mrf.mxu3  ;;  %v13939_v53 = vpop.f32.mrf.mxu1  ;;  %v13949_v0 = vsel %vm15697_vm1, %v6559_v10, %v6561_v38  ;;  %v4668_v11 = vadd.f32 %v13405_v21, %v4303_v31  ;;  %vm15774_vm14 = vnez %v15773_v41  ;;  %v6179_v3 = vsel %vm15679_vm9, %v6174_v5, %v6178_v46 }
 0x46d   : > { %v13942_v52 = vadd.f32 %v6648_v36, %v13681_v32  ;;  %v5784_v25 = vor.u32 %v5783_v45, %v5780_v50  ;;  %v5392_v29 = vsel %vm5316_vm3, %v5280_v42, %v5356_v20  ;;  %v7273_v15 = vrot.slane %v7271_v7, 1  ;;  %v13971_v7 = vld [vmem:[#allocation3 + $0x70] sm:$0xff] }
 0x46e   : > { %v5428_v44 = vsel %vm15774_vm14, %v5392_v29, 0.0  ;;  %v7274_v32 = vshll.u32 %v13909_v9, 16  ;;  %v5041_v36 = vadd.f32 %v13673_v17, %v4668_v11  ;;  %v7559_v21 = vrot.slane %v13909_v9, 2  ;;  %v6455_v50 = vpop.f32.mrf.mxu2 }
 0x46f   : > { %v5785_v27 = vsel %vm10493_vm11, %v5776_v8, %v5784_v25  ;;  %v5464_v10 = vpack.c.bf16 %v5428_v44, %v5428_v44  ;;  %9659 = vmatmul.msk.bf16.gmra.mxu1 %vm6224_vm2, %v6179_v3  ;;  %v15776_v17 = vrot.slane %v13822_v54, 2  ;;  %v15777_v8 = vld [vmem:[#allocation69_spill] sm:$0xff] }
 0x470   : > { %5915 = vst.msk [vmem:[#allocation3 + $0x7c] sm:$0xf] %vm15775_vm7, %v5785_v27  ;;  %v5237_v48 = vpop.f32.mrf.mxu0  ;;  %v7276_v29 = vrot.slane %v7274_v32, 2  ;;  %v4669_v41 = vadd.f32 %v13446_v39, %v15777_v8  ;;  %v6180_v8 = vshrl.u32 %v13907_v37, 16  ;;  %vm15787_vm7 = vmmov %vm15670_vm6 }
 0x471   : > { %9711 = vmatmul.msk.bf16.gmra.mxu3 %vm6224_vm2, %v13599_v57  ;;  %v5788_v31 = vshrl.u32 %v5464_v10, 16  ;;  %v5791_v42 = vshll.u32 %v5464_v10, 16  ;;  %v5281_v5 = vadd.f32 %v5237_v48, %v5041_v36  ;;  %v13969_v44 = vsel %vm15682_vm13, %v15776_v17, %v7559_v21 }
 0x472   : > { %v13973_v45 = vor.u32 %v7276_v29, %v7273_v15  ;;  %v5786_v36 = vrot.slane %v5784_v25, 4  ;;  %v15086_v15 = vrot.slane %v13971_v7, 3  ;;  %v15778_v29 = vld [vmem:[#allocation28_spill] sm:$0xff]  ;;  %v5042_v17 = vadd.f32 %v13716_v19, %v4669_v41 }
 0x473   : > { %v5790_v27 = vrot.slane %v5788_v31, 6  ;;  %v5793_v20 = vrot.slane %v5791_v42, 7  ;;  %vm5317_vm5 = vcmp.gt.f32.partialorder %v5281_v5, 0.0  ;;  %v5357_v57 = vmul.f32 %v13935_v62, %v5281_v5 }
 0x474   : > { %v6651_v11 = vpop.f32.mrf.mxu3  ;;  %v6315_v3 = vpop.f32.mrf.mxu1  ;;  %v13981_v32 = vsel %vm15664_vm8, %v13882_v6, %v13973_v45  ;;  %vm15779_vm12 = vnez %v15778_v29  ;;  %v15087_v42 = vrot.slane %v13386_v13, 1  ;;  %v15780_v25 = vrot.slane %v13880_v30, 3 }
 0x475   : > { %v5794_v10 = vor.u32 %v5793_v20, %v5790_v27  ;;  %v5393_v48 = vsel %vm5317_vm5, %v5281_v5, %v5357_v57  ;;  %v15781_v27 = vld [vmem:[#allocation72_spill] sm:$0xff]  ;;  %v15782_v20 = vld [vmem:[#allocation71_spill] sm:$0xff]  ;;  %v15783_v30 = vrot.slane %v13318_v2, 1 }
 0x476   : > { %v5429_v31 = vsel %vm15779_vm12, %v5393_v48, 0.0  ;;  %v13999_v5 = vsel %vm15651_vm0, %v15780_v25, %v15086_v15  ;;  %v4305_v57 = vadd.f32 %v15782_v20, %v15781_v27  ;;  %v6457_v25 = vpop.f32.mrf.mxu2  ;;  %vm15792_vm0 = vmmov %vm15670_vm6 }
 0x477   : > { %v5795_v39 = vsel %vm10493_vm11, %v5786_v36, %v5794_v10  ;;  %v5465_v50 = vpack.c.bf16 %v5429_v31, %v5429_v31  ;;  %v13990_v11 = vld [vmem:[#allocation3 + $0x78] sm:$0xff]  ;;  %v6921_v29 = vsel %vm15784_vm10, %v15783_v30, %v15087_v42  ;;  %v6182_v31 = vor.u32 %v6180_v8, %v6178_v46  ;;  %vm15796_vm10 = vmmov %vm15697_vm1 }
 0x478   : > { %v13992_v6 = vld [vmem:[#allocation3 + $0x78] sm:$0xff]  ;;  %5916 = vst.msk [vmem:[#allocation3 + $0x80] sm:$0xf] %vm15670_vm6, %v5795_v39  ;;  %v5240_v19 = vpop.f32.mrf.mxu0  ;;  %v6184_v48 = vshll.u32 %v13990_v11, 16  ;;  %v6563_v39 = vrot.slane %v13990_v11, 1  ;;  %v14018_v2 = vadd.f32 %v6457_v25, %v13887_v63  ;;  %v4670_v8 = vadd.f32 %v13494_v35, %v4305_v57 }
 0x479   : > { %v5798_v41 = vshrl.u32 %v5465_v50, 16  ;;  %v5801_v3 = vshll.u32 %v5465_v50, 16  ;;  %v5282_v36 = vadd.f32 %v5240_v19, %v5042_v17  ;;  %9685 = vmatmul.msk.bf16.gmra.mxu2 %vm6224_vm2, %v13820_v34  ;;  %v7280_v27 = vshrl.u32 %v13992_v6, 16  ;;  %v15785_v42 = vld [vmem:[#allocation31_spill] sm:$0xff] }
 0x47a   : > { %v6186_v15 = vrot.slane %v6184_v48, 1  ;;  %v14025_v46 = vsel %vm15697_vm1, %v6561_v38, %v6563_v39  ;;  %vm15786_vm14 = vnez %v15785_v42  ;;  %v7283_v63 = vshll.u32 %v13992_v6, 16 }
 0x47b   : > { %v5800_v20 = vrot.slane %v5798_v41, 6  ;;  %v5803_v50 = vrot.slane %v5801_v3, 7  ;;  %vm5318_vm3 = vcmp.gt.f32.partialorder %v5282_v36, 0.0  ;;  %v5358_v17 = vmul.f32 %v13935_v62, %v5282_v36  ;;  %9806 = vmatmul.msk.bf16.gmra.mxu0 %vm6224_vm2, %v6921_v29 }
 0x47c   : > { %v6653_v34 = vpop.f32.mrf.mxu3  ;;  %v6318_v19 = vpop.f32.mrf.mxu1  ;;  %v5796_v41 = vrot.slane %v5794_v10, 4  ;;  %v6187_v48 = vsel %vm15679_vm9, %v6182_v31, %v6186_v15  ;;  %v5043_v25 = vadd.f32 %v13761_v43, %v4670_v8  ;;  %v7561_v35 = vrot.slane %v13992_v6, 2 }
 0x47d   : > { %v5804_v3 = vor.u32 %v5803_v50, %v5800_v20  ;;  %v5394_v30 = vsel %vm5318_vm3, %v5282_v36, %v5358_v17  ;;  %v7282_v34 = vrot.slane %v7280_v27, 1  ;;  %v7285_v42 = vrot.slane %v7283_v63, 2  ;;  %v14047_v27 = vld [vmem:[#allocation3 + $0x78] sm:$0xff] }
 0x47e   : > { %v5430_v29 = vsel %vm15786_vm14, %v5394_v30, 0.0  ;;  %v14045_v43 = vsel %vm15682_vm13, %v7559_v21, %v7561_v35  ;;  %v6460_v20 = vpop.f32.mrf.mxu2  ;;  %v15788_v30 = vld [vmem:[#allocation73_spill] sm:$0xff]  ;;  %vm15794_vm6 = vcmask 1044480  }
 0x47f   : > { %v5805_v19 = vsel %vm10493_vm11, %v5796_v41, %v5804_v3  ;;  %v5466_v38 = vpack.c.bf16 %v5430_v29, %v5430_v29  ;;  %9660 = vmatmul.msk.bf16.gmra.mxu1 %vm6224_vm2, %v6187_v48  ;;  %v14049_v50 = vor.u32 %v7285_v42, %v7282_v34  ;;  %v4671_v29 = vadd.f32 %v13537_v14, %v15788_v30  ;;  %v15789_v42 = vld [vmem:[#allocation32_spill] sm:$0xff] }
 0x480   : > { %5917 = vst.msk [vmem:[#allocation3 + $0x84] sm:$0xf] %vm15787_vm7, %v5805_v19  ;;  %v5242_v10 = vpop.f32.mrf.mxu0  ;;  %v14060_v21 = vadd.f32 %v6460_v20, %v13939_v53  ;;  %vm15790_vm12 = vnez %v15789_v42  ;;  %vm15799_vm7 = vmmov %vm15792_vm0 }
 0x481   : > { %9712 = vmatmul.msk.bf16.gmra.mxu3 %vm6224_vm2, %v13688_v24  ;;  %v5808_v57 = vshrl.u32 %v5466_v38, 16  ;;  %v5811_v36 = vshll.u32 %v5466_v38, 16  ;;  %v5283_v31 = vadd.f32 %v5242_v10, %v5043_v25  ;;  %v14065_v34 = vsel %vm15664_vm8, %v13973_v45, %v14049_v50 }
 0x482   : > { %v5806_v25 = vrot.slane %v5804_v3, 4  ;;  %v15089_v10 = vrot.slane %v14047_v27, 3  ;;  %v15791_v3 = vld [vmem:[#allocation74_spill] sm:$0xff] }
 0x483   : > { %v5810_v17 = vrot.slane %v5808_v57, 6  ;;  %v5813_v8 = vrot.slane %v5811_v36, 7  ;;  %vm5319_vm5 = vcmp.gt.f32.partialorder %v5283_v31, 0.0  ;;  %v5359_v24 = vmul.f32 %v13935_v62, %v5283_v31 }
 0x484   : > { %v6656_v41 = vpop.f32.mrf.mxu3  ;;  %v14054_v48 = vpop.f32.mrf.mxu1  ;;  %v15088_v57 = vrot.slane %v13471_v55, 1 }
 0x485   : > { %v14057_v63 = vadd.f32 %v6656_v41, %v13806_v61  ;;  %v5814_v19 = vor.u32 %v5813_v8, %v5810_v17  ;;  %v5395_v38 = vsel %vm5319_vm5, %v5283_v31, %v5359_v24  ;;  %v5044_v61 = vadd.f32 %v13801_v12, %v4671_v29 }
 0x486   : > { %v5431_v14 = vsel %vm15790_vm12, %v5395_v38, 0.0  ;;  %v4307_v31 = vadd.f32 %v13453_v56, %v15791_v3  ;;  %v6188_v8 = vshrl.u32 %v13990_v11, 16  ;;  %v15793_v12 = vrot.slane %v13971_v7, 3 }
 0x487   : > { %v5815_v53 = vsel %vm10493_vm11, %v5806_v25, %v5814_v19  ;;  %v5467_v36 = vpack.c.bf16 %v5431_v14, %v5431_v14  ;;  %v14074_v20 = vld [vmem:[#allocation3 + $0x80] sm:$0xff]  ;;  %v15795_v56 = vrot.slane %v13386_v13, 1  ;;  %v6462_v14 = vpop.f32.mrf.mxu2 }
 0x488   : > { %v14076_v45 = vld [vmem:[#allocation3 + $0x80] sm:$0xff]  ;;  %5918 = vst.msk [vmem:[#allocation3 + $0x88] sm:$0xf] %vm15792_vm0, %v5815_v53  ;;  %v5245_v17 = vpop.f32.mrf.mxu0  ;;  %v14087_v24 = vsel %vm15794_vm6, %v15793_v12, %v15089_v10  ;;  %v6192_v25 = vshll.u32 %v14074_v20, 16  ;;  %v6190_v42 = vor.u32 %v6188_v8, %v6186_v15  ;;  %v6565_v7 = vrot.slane %v14074_v20, 1  ;;  %vm15803_vm0 = vmmov %vm15794_vm6 }
 0x489   : > { %v5818_v41 = vshrl.u32 %v5467_v36, 16  ;;  %v5821_v30 = vshll.u32 %v5467_v36, 16  ;;  %v5284_v29 = vadd.f32 %v5245_v17, %v5044_v61  ;;  %9686 = vmatmul.msk.bf16.gmra.mxu2 %vm6224_vm2, %v13907_v37  ;;  %v6923_v38 = vsel %vm15796_vm10, %v15795_v56, %v15088_v57  ;;  %vm15805_vm6 = vmmov %vm15799_vm7 }
 0x48a   : > { %v7289_v53 = vshrl.u32 %v14076_v45, 16  ;;  %v6194_v12 = vrot.slane %v6192_v25, 1  ;;  %v14111_v15 = vsel %vm15697_vm1, %v6563_v39, %v6565_v7  ;;  %v4672_v8 = vadd.f32 %v13583_v18, %v4307_v31  ;;  %vm15807_vm10 = vmmov %vm15697_vm1 }
 0x48b   : > { %v5820_v3 = vrot.slane %v5818_v41, 6  ;;  %v5823_v36 = vrot.slane %v5821_v30, 7  ;;  %vm5320_vm3 = vcmp.gt.f32.partialorder %v5284_v29, 0.0  ;;  %v5360_v61 = vmul.f32 %v13935_v62, %v5284_v29  ;;  %9807 = vmatmul.msk.bf16.gmra.mxu0 %vm6224_vm2, %v6923_v38  ;;  %v15797_v38 = vld [vmem:[#allocation35_spill] sm:$0xff] }
 0x48c   : > { %v6658_v37 = vpop.f32.mrf.mxu3  ;;  %v14101_v17 = vpop.f32.mrf.mxu1  ;;  %v5816_v41 = vrot.slane %v5814_v19, 4  ;;  %vm15798_vm14 = vnez %v15797_v38  ;;  %v6195_v25 = vsel %vm15679_vm9, %v6190_v42, %v6194_v12  ;;  %v7291_v57 = vrot.slane %v7289_v53, 1 }
 0x48d   : > { %v14104_v13 = vadd.f32 %v6658_v37, %v13851_v1  ;;  %v5824_v30 = vor.u32 %v5823_v36, %v5820_v3  ;;  %v5396_v56 = vsel %vm5320_vm3, %v5284_v29, %v5360_v61  ;;  %v7292_v1 = vshll.u32 %v14076_v45, 16  ;;  %vm15808_vm3 = vmmov %vm15697_vm1 }
 0x48e   : > { %v5432_v14 = vsel %vm15798_vm14, %v5396_v56, 0.0  ;;  %v5045_v37 = vadd.f32 %v13847_v23, %v4672_v8  ;;  %v7563_v18 = vrot.slane %v14076_v45, 2  ;;  %v10163_v23 = vld [vmem:[%s14945_s5 + $0x58] sm:$0xff]  ;;  %vm15809_vm1 = vmmov %vm15679_vm9 }
 0x48f   : > { %v5825_v10 = vsel %vm10493_vm11, %v5816_v41, %v5824_v30  ;;  %v5468_v39 = vpack.c.bf16 %v5432_v14, %v5432_v14  ;;  %9661 = vmatmul.msk.bf16.gmra.mxu1 %vm6224_vm2, %v6195_v25  ;;  %v7294_v31 = vrot.slane %v7292_v1, 2  ;;  %v6465_v36 = vpop.f32.mrf.mxu2  ;;  %7643 = vmatpush.bf16.msra.mxu2 %v10163_v23  ;;  %v5826_v25 = vrot.slane %v5824_v30, 4  ;;  %vm15810_vm14 = vmmov %vm15805_vm6 }
 0x490   : > { %5919 = vst.msk [vmem:[#allocation3 + $0x8c] sm:$0xf] %vm15799_vm7, %v5825_v10  ;;  %v5247_v19 = vpop.f32.mrf.mxu0  ;;  %v14134_v3 = vsel %vm15682_vm13, %v7561_v35, %v7563_v18  ;;  %v14136_v10 = vld [vmem:[#allocation3 + $0x80] sm:$0xff]  ;;  %vm15813_vm9 = vmmov %vm15803_vm0 }
 0x491   : > { %9713 = vmatmul.msk.bf16.gmra.mxu3 %vm6224_vm2, %v13773_v47  ;;  %v5828_v29 = vshrl.u32 %v5468_v39, 16  ;;  %v5831_v42 = vshll.u32 %v5468_v39, 16  ;;  %v5285_v53 = vadd.f32 %v5247_v19, %v5045_v37  ;;  %v14138_v61 = vor.u32 %v7294_v31, %v7291_v57  ;;  %v10182_v35 = vld [vmem:[%s14945_s5 + $0x68] sm:$0xff]  ;;  %v15800_v39 = vld [vmem:[#allocation61_spill] sm:$0xff]  ;;  %vm15815_vm7 = vmmov %vm15664_vm8 }
 0x492   : > { %vm15801_vm12 = vnez %v15800_v39  ;;  %8016 = vmatpush.bf16.msrb.mxu3 %v10182_v35 }
 0x493   : > { %v5830_v47 = vrot.slane %v5828_v29, 6  ;;  %v5833_v8 = vrot.slane %v5831_v42, 7  ;;  %vm5321_vm5 = vcmp.gt.f32.partialorder %v5285_v53, 0.0  ;;  %v5361_v41 = vmul.f32 %v13935_v62, %v5285_v53 }
 0x494   : > { %v6661_v56 = vpop.f32.mrf.mxu3  ;;  %v14141_v38 = vpop.f32.mrf.mxu1  ;;  %v14152_v57 = vsel %vm15664_vm8, %v14049_v50, %v14138_v61  ;;  %v8561_v62 = vrot.slane %v14136_v10, 3  ;;  %v15802_v50 = vrot.slane %v14047_v27, 3  ;;  %v6196_v10 = vshrl.u32 %v14074_v20, 16  ;;  %vm15819_vm8 = vmmov %vm15809_vm1 }
 0x495   : > { %v14144_v14 = vadd.f32 %v6661_v56, %v13893_v49  ;;  %v5834_v1 = vor.u32 %v5833_v8, %v5830_v47  ;;  %v5397_v37 = vsel %vm5321_vm5, %v5285_v53, %v5361_v41  ;;  %v6924_v49 = vrot.slane %v13562_v22, 1 }
 0x496   : > { %v5433_v19 = vsel %vm15801_vm12, %v5397_v37, 0.0  ;;  %v14167_v30 = vsel %vm15803_vm0, %v15802_v50, %v8561_v62  ;;  %v15806_v27 = vrot.slane %v13471_v55, 1  ;;  %v6198_v35 = vor.u32 %v6196_v10, %v6194_v12  ;;  %v10184_v12 = vld [vmem:[%s14945_s5 + $0x78] sm:$0xff]  ;;  %vm15820_vm12 = vmmov %vm15815_vm7 }
 0x497   : > { %v5835_v31 = vsel %vm10493_vm11, %v5826_v25, %v5834_v1  ;;  %v5469_v29 = vpack.c.bf16 %v5433_v19, %v5433_v19  ;;  %v14160_v42 = vld [vmem:[#allocation3 + $0x88] sm:$0xff]  ;;  %15804 = vst [vmem:[#allocation48_spill] sm:$0xff] %v14167_v30  ;;  %v6467_v25 = vpop.f32.mrf.mxu2  ;;  %v5836_v55 = vrot.slane %v5834_v1, 4  ;;  %8396 = vmatpush.bf16.msra.mxu0 %v10184_v12 }
 0x498   : > { %v14162_v23 = vld [vmem:[#allocation3 + $0x88] sm:$0xff]  ;;  %5920 = vst.msk [vmem:[#allocation3 + $0x90] sm:$0xf] %vm15805_vm6, %v5835_v31  ;;  %v7019_v53 = vpop.f32.mrf.mxu0  ;;  %v6200_v41 = vshll.u32 %v14160_v42, 16  ;;  %v6925_v56 = vsel %vm15807_vm10, %v15806_v27, %v6924_v49  ;;  %v6567_v37 = vrot.slane %v14160_v42, 1  ;;  %vm15822_vm6 = vmmov %vm15803_vm0 }
 0x499   : > { %v5838_v36 = vshrl.u32 %v5469_v29, 16  ;;  %v5841_v47 = vshll.u32 %v5469_v29, 16  ;;  %v14172_v8 = vadd.f32 %v7019_v53, %v13890_v60  ;;  %9687 = vmatmul.msk.bf16.gmra.mxu2 %vm6224_vm2, %v13990_v11  ;;  %v7298_v39 = vshrl.u32 %v14162_v23, 16  ;;  %v14188_v50 = vld [vmem:[#allocation3 + $0x88] sm:$0xff]  ;;  %v5922_v27 = vld [vmem:[#allocation3 + $0x98] sm:$0x3]  ;;  %vm15824_vm10 = vmmov %vm15803_vm0 }
 0x49a   : > { %v6202_v31 = vrot.slane %v6200_v41, 1  ;;  %v14186_v11 = vadd.f32 %v6467_v25, %v14054_v48  ;;  %v14196_v10 = vsel %vm15808_vm3, %v6565_v7, %v6567_v37  ;;  %v7301_v48 = vshll.u32 %v14162_v23, 16  ;;  %v10186_v7 = vld [vmem:[%s14945_s5 + $0x88] sm:$0xff]  ;;  %v15853_v30 = vld [vmem:[#allocation41_spill] sm:$0xff] }
 0x49b   : > { %v5840_v19 = vrot.slane %v5838_v36, 6  ;;  %v5843_v60 = vrot.slane %v5841_v47, 7  ;;  %9808 = vmatmul.msk.bf16.gmra.mxu0 %vm6224_vm2, %v6925_v56  ;;  %v7300_v41 = vrot.slane %v7298_v39, 1  ;;  %v7565_v1 = vrot.slane %v14162_v23, 2  ;;  %8643 = vmatpush.bf16.msra.mxu1 %v10186_v7 }
 0x49c   : > { %v6663_v29 = vpop.f32.mrf.mxu3  ;;  %v6328_v53 = vpop.f32.mrf.mxu1  ;;  %v6203_v47 = vsel %vm15809_vm1, %v6198_v35, %v6202_v31  ;;  %v8563_v35 = vrot.slane %v14188_v50, 3  ;;  %vm15827_vm1 = vmmov %vm15808_vm3 }
 0x49d   : > { %v5844_v36 = vor.u32 %v5843_v60, %v5840_v19  ;;  %v7303_v19 = vrot.slane %v7301_v48, 2 }
 0x49e   : > { %v14222_v48 = vsel %vm15813_vm9, %v8561_v62, %v8563_v35  ;;  %v8145_v62 = vld [vmem:[#allocation3 + $0xa0] sm:$0x7]  ;;  %vm15838_vm9 = vmmov %vm15827_vm1 }
 0x49f   : > { %v5845_v56 = vsel %vm10493_vm11, %v5836_v55, %v5844_v36  ;;  %v5846_v25 = vrot.slane %v5844_v36, 4  ;;  %9662 = vmatmul.msk.bf16.gmra.mxu1 %vm6224_vm2, %v6203_v47  ;;  %v5965_v29 = vld [vmem:[#allocation3 + $0x90] sm:$0x1]  ;;  %vm15811_vm11 = vmmov %vm15682_vm13  ;;  %v7304_v50 = vor.u32 %v7303_v19, %v7300_v41  ;;  %v6470_v47 = vpop.f32.mrf.mxu2  ;;  %15814 = vst [vmem:[#allocation10_spill] sm:$0xff] %v14222_v48 }
 0x4a0   : > { %5921 = vst.msk [vmem:[#allocation3 + $0x94] sm:$0xf] %vm15810_vm14, %v5845_v56  ;;  %v7021_v39 = vpop.f32.mrf.mxu0  ;;  %v6044_v60 = vunpack.c.l.b16 %v5965_v29  ;;  %v14214_v33 = vsel %vm15811_vm11, %v7563_v18, %v7565_v1  ;;  %v14225_v56 = vadd.f32 %v6470_v47, %v14101_v17  ;;  %vm15817_vm13 = vmmov %vm15808_vm3 }
 0x4a1   : > { %9714 = vmatmul.msk.bf16.gmra.mxu3 %vm6224_vm2, %v13858_v4  ;;  %v5923_v53 = vsel %vm12649_vm15, %v5846_v25, %v5922_v27  ;;  %v14219_v12 = vadd.f32 %v7021_v39, %v13942_v52  ;;  %v14229_v18 = vsel %vm15815_vm7, %v14138_v61, %v7304_v50  ;;  %v6926_v52 = vrot.slane %v13648_v59, 1  ;;  %vm15816_vm15 = vmmov %vm15808_vm3 }
 0x4a2   : > { %5924 = vst [vmem:[#allocation3 + $0x98] sm:$0x3] %v5923_v53  ;;  %v6063_v36 = vpack.c.b16 %v6044_v60, %v6044_v60  ;;  %v6204_v59 = vshrl.u32 %v14160_v42, 16  ;;  %v8152_v53 = vunpack.c.l.b16 %v8145_v62  ;;  %vm15818_vm5 = vmmov %vm15811_vm11 }
 0x4a3   : > { %v6927_v17 = vsel %vm15817_vm13, %v6924_v49, %v6926_v52  ;;  %vm15830_vm14 = vmmov %vm15827_vm1 }
 0x4a4   : > { %v6666_v4 = vpop.f32.mrf.mxu3  ;;  %v6330_v27 = vpop.f32.mrf.mxu1  ;;  %v6569_v25 = vrot.slane %v6063_v36, 1  ;;  %v6208_v29 = vshll.u32 %v6063_v36, 16  ;;  %vm15833_vm11 = vmmov %vm15827_vm1 }
 0x4a5   : > { %v6206_v4 = vor.u32 %v6204_v59, %v6202_v31  ;;  %vm15840_vm7 = vmmov %vm15818_vm5 }
 0x4a6   : > { %v14233_v41 = vsel %vm15816_vm15, %v6567_v37, %v6569_v25  ;;  %v6210_v60 = vrot.slane %v6208_v29, 1  ;;  %vm15842_vm15 = vmmov %vm15827_vm1 }
 0x4a7   : > { %v14235_v7 = vld [vmem:[#allocation3 + $0x90] sm:$0xff]  ;;  %v6472_v37 = vpop.f32.mrf.mxu2  ;;  %vm15844_vm13 = vmmov %vm15818_vm5 }
 0x4a8   : > { %v7024_v19 = vpop.f32.mrf.mxu0  ;;  %v7307_v61 = vshrl.u32 %v14235_v7, 16  ;;  %v7310_v39 = vshll.u32 %v14235_v7, 16  ;;  %v15090_v55 = vrot.slane %v14235_v7, 2  ;;  %v14248_v22 = vadd.f32 %v6472_v37, %v14141_v38 }
 0x4a9   : > { %9688 = vmatmul.msk.bf16.gmra.mxu2 %vm6224_vm2, %v14074_v20  ;;  %v6211_v62 = vsel %vm15819_vm8, %v6206_v4, %v6210_v60  ;;  %v14261_v19 = vpack.c.b16 %v8152_v53, %v8152_v53  ;;  %vm15848_vm8 = vmmov %vm15840_vm7 }
 0x4aa   : > { %v7309_v49 = vrot.slane %v7307_v61, 1  ;;  %v7312_v47 = vrot.slane %v7310_v39, 2  ;;  %v14256_v25 = vsel %vm15818_vm5, %v7565_v1, %v15090_v55  ;;  %vm15846_vm5 = vmmov %vm15827_vm1 }
 0x4ab   : > { %9809 = vmatmul.msk.bf16.gmra.mxu0 %vm6224_vm2, %v6927_v17  ;;  %v10180_v17 = vld [vmem:[#allocation3 + $0x98] sm:$0xff]  ;;  %v8569_v61 = vrot.slane %v14261_v19, 3 }
 0x4ac   : > { %v6668_v36 = vpop.f32.mrf.mxu3  ;;  %v6333_v20 = vpop.f32.mrf.mxu1  ;;  %v14258_v29 = vor.u32 %v7312_v47, %v7309_v49  ;;  %v8567_v53 = vrot.slane %v10180_v17, 3 }
 0x4ad   : > { %v14251_v27 = vadd.f32 %v6668_v36, %v14018_v2  ;;  %v10179_v2 = vld [vmem:[#allocation3 + $0x90] sm:$0xff]  ;;  %v6928_v36 = vrot.slane %v13736_v51, 1 }
 0x4ae   : > { %v14266_v38 = vsel %vm15820_vm12, %v7304_v50, %v14258_v29  ;;  %v8565_v37 = vrot.slane %v10179_v2, 3  ;;  %vm15850_vm12 = vmmov %vm15827_vm1 }
 0x4af   : > { %9663 = vmatmul.msk.bf16.gmra.mxu1 %vm6224_vm2, %v6211_v62  ;;  %v6475_v1 = vpop.f32.mrf.mxu2 }
 0x4b0   : > { %v7026_v31 = vpop.f32.mrf.mxu0  ;;  %v14274_v50 = vsel %vm15803_vm0, %v8563_v35, %v8565_v37  ;;  %v14277_v49 = vsel %vm15822_vm6, %v8565_v37, %v8567_v53  ;;  %v15826_v37 = vld [vmem:[#allocation14_spill] sm:$0xff]  ;;  %vm15852_vm0 = vmmov %vm15840_vm7 }
 0x4b1   : > { %9715 = vmatmul.msk.bf16.gmra.mxu3 %vm6224_vm2, %v13949_v0  ;;  %15821 = vst [vmem:[#allocation7_spill] sm:$0xff] %v14274_v50  ;;  %v14280_v0 = vsel %vm15824_vm10, %v8567_v53, %v8569_v61  ;;  %v6930_v61 = vrot.slane %v13822_v54, 1  ;;  %v15828_v54 = vld [vmem:[#allocation18_spill] sm:$0xff]  ;;  %vm15854_vm6 = vmmov %vm15852_vm0 }
 0x4b2   : > { %15823 = vst [vmem:[#allocation55_spill] sm:$0xff] %v14277_v49  ;;  %vm15857_vm10 = vmmov %vm15852_vm0 }
 0x4b3   : > { %15825 = vst [vmem:[#allocation8_spill] sm:$0xff] %v14280_v0 }
 0x4b4   : > { %v6671_v39 = vpop.f32.mrf.mxu3  ;;  %v6335_v59 = vpop.f32.mrf.mxu1 }
 0x4b5   : > { %v6746_v60 = vadd.f32 %v6671_v39, %v14060_v21  ;;  %v6929_v21 = vsel %vm15808_vm3, %v6926_v52, %v6928_v36  ;;  %v10162_v52 = vld [vmem:[%s14945_s5 + $0x50] sm:$0xff]  ;;  %vm15859_vm3 = vmmov %vm15852_vm0 }
 0x4b6   : > { %7644 = vmatpush.bf16.msra.mxu2 %v10162_v52 }
 0x4b7   : > { %v6477_v62 = vpop.f32.mrf.mxu2 }
 0x4b8   : > { %v7029_v47 = vpop.f32.mrf.mxu0 }
 0x4b9   : > { %v14283_v4 = vadd.f32 %v7029_v47, %v14057_v63  ;;  %9689 = vmatmul.msk.bf16.gmra.mxu2 %vm6224_vm2, %v14160_v42 }
 0x4bb   : > { %9810 = vmatmul.msk.bf16.gmra.mxu0 %vm6224_vm2, %v6929_v21 }
 0x4bc   : > { %v6673_v51 = vpop.f32.mrf.mxu3  ;;  %v6338_v35 = vpop.f32.mrf.mxu1 }
 0x4bf   : > { %9830 = vmatmul.msk.bf16.vlgmr.msrb.gmra.mxu1 %vm6224_vm2, %v12947_v16  ;;  %v6480_v2 = vpop.f32.mrf.mxu2 }
 0x4c0   : > { %v7031_v31 = vpop.f32.mrf.mxu0  ;;  %v6481_v42 = vadd.f32 %v6480_v2, %v6333_v20  ;;  %v15829_v2 = vld [vmem:[#allocation17_spill] sm:$0xff] }
 0x4c1   : > { %9716 = vmatmul.msk.bf16.gmra.mxu3 %vm6224_vm2, %v14025_v46  ;;  %v14294_v63 = vadd.f32 %v7031_v31, %v14104_v13  ;;  %v6931_v46 = vsel %vm15827_vm1, %v6928_v36, %v6930_v61  ;;  %v6932_v31 = vrot.slane %v13909_v9, 1  ;;  %vm15861_vm1 = vmmov %vm15852_vm0 }
 0x4c4   : > { %v6676_v17 = vpop.f32.mrf.mxu3  ;;  %v6340_v1 = vpop.f32.mrf.mxu1 }
 0x4c7   : > { %v6482_v13 = vpop.f32.mrf.mxu2 }
 0x4c8   : > { %v7034_v39 = vpop.f32.mrf.mxu0  ;;  %v6483_v53 = vadd.f32 %v6482_v13, %v6335_v59 }
 0x4c9   : > { %v14301_v16 = vadd.f32 %v7034_v39, %v14144_v14  ;;  %9860 = vmatmul.msk.bf16.vlgmr.msra.gmra.mxu2 %vm6224_vm2, %v15826_v37  ;;  %v15831_v39 = vld [vmem:[#allocation26_spill] sm:$0xff] }
 0x4cb   : > { %9811 = vmatmul.msk.bf16.gmra.mxu0 %vm6224_vm2, %v6931_v46 }
 0x4cc   : > { %v6678_v20 = vpop.f32.mrf.mxu3  ;;  %v6343_v47 = vpop.f32.mrf.mxu1 }
 0x4cd   : > { %v14308_v21 = vadd.f32 %v6678_v20, %v14186_v11  ;;  %v6933_v11 = vsel %vm15830_vm14, %v6930_v61, %v6932_v31  ;;  %v6934_v20 = vrot.slane %v13992_v6, 1  ;;  %v15834_v6 = vld [vmem:[#allocation33_spill] sm:$0xff]  ;;  %vm15862_vm14 = vmmov %vm15852_vm0 }
 0x4cf   : > { %9831 = vmatmul.msk.bf16.gmra.mxu1 %vm6224_vm2, %v15828_v54  ;;  %v6485_v14 = vpop.f32.mrf.mxu2 }
 0x4d0   : > { %v7036_v62 = vpop.f32.mrf.mxu0  ;;  %v6935_v14 = vsel %vm15833_vm11, %v6932_v31, %v6934_v20  ;;  %vm15863_vm11 = vmmov %vm15852_vm0 }
 0x4d1   : > { %9717 = vmatmul.msk.bf16.gmra.mxu3 %vm6224_vm2, %v14111_v15  ;;  %v15832_v62 = vld [vmem:[#allocation22_spill] sm:$0xff] }
 0x4d4   : > { %v6681_v51 = vpop.f32.mrf.mxu3  ;;  %v6345_v35 = vpop.f32.mrf.mxu1 }
 0x4d5   : > { %v14315_v36 = vadd.f32 %v6681_v51, %v14225_v56 }
 0x4d7   : > { %v6487_v17 = vpop.f32.mrf.mxu2 }
 0x4d8   : > { %v7039_v59 = vpop.f32.mrf.mxu0 }
 0x4d9   : > { %9861 = vmatmul.msk.bf16.gmra.mxu2 %vm6224_vm2, %v15829_v2 }
 0x4db   : > { %9812 = vmatmul.msk.bf16.gmra.mxu0 %vm6224_vm2, %v6933_v11 }
 0x4dc   : > { %v6683_v1 = vpop.f32.mrf.mxu3  ;;  %v6348_v52 = vpop.f32.mrf.mxu1 }
 0x4dd   : > { %v14323_v15 = vadd.f32 %v6683_v1, %v14248_v22  ;;  %v7772_v1 = vld [vmem:[#allocation3 + $0x10] sm:$0xc] }
 0x4df   : > { %9832 = vmatmul.msk.bf16.gmra.mxu1 %vm6224_vm2, %v15831_v39  ;;  %v6490_v37 = vpop.f32.mrf.mxu2  ;;  %v6936_v39 = vrot.slane %v14076_v45, 1 }
 0x4e0   : > { %v7041_v56 = vpop.f32.mrf.mxu0  ;;  %v14332_v46 = vadd.f32 %v6490_v37, %v6343_v47  ;;  %v10181_v47 = vld [vmem:[%s14945_s5 + $0x60] sm:$0xff] }
 0x4e1   : > { %9718 = vmatmul.msk.bf16.gmra.mxu3 %vm6224_vm2, %v14196_v10  ;;  %v14330_v9 = vadd.f32 %v7041_v56, %v14251_v27  ;;  %v7851_v56 = vunpack.c.l.b16 %v7772_v1 }
 0x4e2   : > { %8017 = vmatpush.bf16.msrb.mxu3 %v10181_v47  ;;  %v15839_v47 = vld [vmem:[#allocation34_spill] sm:$0xff] }
 0x4e4   : > { %v6686_v61 = vpop.f32.mrf.mxu3  ;;  %v6350_v13 = vpop.f32.mrf.mxu1 }
 0x4e5   : > { %v15835_v61 = vld [vmem:[#allocation21_spill] sm:$0xff] }
 0x4e6   : > { %v15836_v13 = vunpack.c.l.b16 %v15835_v61  ;;  %v15841_v61 = vld [vmem:[#allocation75_spill] sm:$0xff] }
 0x4e7   : > { %v6492_v51 = vpop.f32.mrf.mxu2 }
 0x4e8   : > { %v7044_v54 = vpop.f32.mrf.mxu0  ;;  %v14341_v27 = vadd.f32 %v6492_v51, %v6345_v35 }
 0x4e9   : > { %v14335_v22 = vadd.f32 %v7044_v54, %v6746_v60  ;;  %9862 = vmatmul.msk.bf16.gmra.mxu2 %vm6224_vm2, %v15832_v62  ;;  %v14357_v54 = vpack.c.b16 %v15836_v13, %v7851_v56  ;;  %v15837_v62 = vld [vmem:[#allocation30_spill] sm:$0xff]  ;;  %v6938_v56 = vrot.slane %v14162_v23, 1 }
 0x4eb   : > { %9813 = vmatmul.msk.bf16.gmra.mxu0 %vm6224_vm2, %v6935_v14  ;;  %v6939_v13 = vsel %vm15842_vm15, %v6936_v39, %v6938_v56  ;;  %vm15866_vm15 = vmmov %vm15852_vm0 }
 0x4ec   : > { %v6688_v10 = vpop.f32.mrf.mxu3  ;;  %v6353_v59 = vpop.f32.mrf.mxu1 }
 0x4ed   : > { %v7907_v59 = vrot.slane %v14357_v54, 2 }
 0x4ef   : > { %9833 = vmatmul.msk.bf16.gmra.mxu1 %vm6224_vm2, %v15834_v6  ;;  %v6495_v31 = vpop.f32.mrf.mxu2 }
 0x4f0   : > { %v7046_v60 = vpop.f32.mrf.mxu0  ;;  %v14350_v11 = vadd.f32 %v6495_v31, %v6348_v52 }
 0x4f1   : > { %9719 = vmatmul.msk.bf16.gmra.mxu3 %vm6224_vm2, %v14233_v41  ;;  %v6937_v41 = vsel %vm15838_vm9, %v6934_v20, %v6936_v39  ;;  %vm15864_vm9 = vmmov %vm15852_vm0 }
 0x4f4   : > { %v6691_v2 = vpop.f32.mrf.mxu3  ;;  %v6355_v17 = vpop.f32.mrf.mxu1 }
 0x4f5   : > { %v14352_v35 = vadd.f32 %v6691_v2, %v6481_v42  ;;  %v14363_v42 = vld [vmem:[#allocation3 + $0x18] sm:$0xff] }
 0x4f6   : > { %v7908_v51 = vrot.slane %v14363_v42, 2 }
 0x4f7   : > { %v6497_v14 = vpop.f32.mrf.mxu2 }
 0x4f8   : > { %v7049_v37 = vpop.f32.mrf.mxu0  ;;  %v7909_v6 = vsel %vm15840_vm7, %v7907_v59, %v7908_v51  ;;  %v15843_v59 = vld [vmem:[#allocation9_spill] sm:$0xff]  ;;  %vm15865_vm7 = vmmov %vm15852_vm0 }
 0x4f9   : > { %9863 = vmatmul.msk.bf16.gmra.mxu2 %vm6224_vm2, %v15837_v62 }
 0x4fb   : > { %9814 = vmatmul.msk.bf16.gmra.mxu0 %vm6224_vm2, %v6937_v41 }
 0x4fc   : > { %v6693_v52 = vpop.f32.mrf.mxu3  ;;  %v6358_v45 = vpop.f32.mrf.mxu1 }
 0x4fd   : > { %v14366_v10 = vadd.f32 %v6693_v52, %v6483_v53 }
 0x4ff   : > { %9834 = vmatmul.msk.bf16.gmra.mxu1 %vm6224_vm2, %v15839_v47  ;;  %v6500_v31 = vpop.f32.mrf.mxu2 }
 0x500   : > { %v7051_v60 = vpop.f32.mrf.mxu0 }
 0x501   : > { %9958 = vmatmul.msk.bf16.vlgmr.msrb.gmra.mxu3 %vm6224_vm2, %v7909_v6  ;;  %v14374_v20 = vadd.f32 %v7051_v60, %v14308_v21  ;;  %v14384_v21 = vld [vmem:[#allocation3 + $0x20] sm:$0xff] }
 0x502   : > { %v7910_v14 = vrot.slane %v14384_v21, 2 }
 0x504   : > { %v6696_v2 = vpop.f32.mrf.mxu3  ;;  %v6360_v1 = vpop.f32.mrf.mxu1 }
 0x505   : > { %v6940_v1 = vrot.slane %v14235_v7, 1 }
 0x507   : > { %v6502_v62 = vpop.f32.mrf.mxu2 }
 0x508   : > { %v7054_v53 = vpop.f32.mrf.mxu0  ;;  %v14387_v52 = vadd.f32 %v6502_v62, %v6355_v17  ;;  %v6808_v62 = vld [vmem:[#allocation3 + $0x98] sm:$0x1] }
 0x509   : > { %v14378_v37 = vadd.f32 %v7054_v53, %v14315_v36  ;;  %9864 = vmatmul.msk.bf16.gmra.mxu2 %vm6224_vm2, %v15841_v61  ;;  %v7911_v36 = vsel %vm15844_vm13, %v7908_v51, %v7910_v14  ;;  %v15845_v61 = vld [vmem:[#allocation39_spill] sm:$0xff]  ;;  %v10183_v51 = vld [vmem:[%s14945_s5 + $0x70] sm:$0xff]  ;;  %vm15867_vm13 = vsmask.f32 6400 }
 0x50a   : > { %8397 = vmatpush.bf16.msra.mxu0 %v10183_v51 }
 0x50b   : > { %9815 = vmatmul.msk.bf16.gmra.mxu0 %vm6224_vm2, %v6939_v13 }
 0x50c   : > { %v6698_v41 = vpop.f32.mrf.mxu3  ;;  %v6363_v23 = vpop.f32.mrf.mxu1 }
 0x50d   : > { %v14409_v41 = vld [vmem:[#allocation3 + $0x28] sm:$0xff] }
 0x50f   : > { %9835 = vmatmul.msk.bf16.gmra.mxu1 %vm6224_vm2, %v15843_v59  ;;  %v6505_v6 = vpop.f32.mrf.mxu2 }
 0x510   : > { %v7056_v47 = vpop.f32.mrf.mxu0  ;;  %v14396_v31 = vadd.f32 %v6505_v6, %v6358_v45 }
 0x511   : > { %9959 = vmatmul.msk.bf16.gmra.mxu3 %vm6224_vm2, %v7911_v36  ;;  %v14394_v39 = vadd.f32 %v7056_v47, %v14323_v15  ;;  %v6941_v15 = vsel %vm15846_vm5, %v6938_v56, %v6940_v1  ;;  %v6887_v36 = vunpack.c.l.b16 %v6808_v62  ;;  %v15847_v47 = vld [vmem:[#allocation37_spill] sm:$0xff]  ;;  %vm15868_vm5 = vmmov %vm15852_vm0 }
 0x514   : > { %v6701_v60 = vpop.f32.mrf.mxu3  ;;  %v6365_v2 = vpop.f32.mrf.mxu1 }
 0x515   : > { %v14399_v17 = vadd.f32 %v6701_v60, %v14332_v46  ;;  %v7912_v46 = vrot.slane %v14409_v41, 2  ;;  %v6906_v60 = vpack.c.b16 %v6887_v36, %v6887_v36 }
 0x517   : > { %v6507_v13 = vpop.f32.mrf.mxu2  ;;  %v7913_v56 = vsel %vm15848_vm8, %v7910_v14, %v7912_v46  ;;  %v6942_v55 = vrot.slane %v6906_v60, 1  ;;  %v8163_v60 = vshrl.u32 %v14363_v42, 16  ;;  %vm15870_vm8 = vmmov %vm15852_vm0 }
 0x518   : > { %v7059_v53 = vpop.f32.mrf.mxu0 }
 0x519   : > { %9865 = vmatmul.msk.bf16.gmra.mxu2 %vm6224_vm2, %v15845_v61  ;;  %v6943_v14 = vsel %vm15850_vm12, %v6940_v1, %v6942_v55  ;;  %v10185_v1 = vld [vmem:[%s14945_s5 + $0x80] sm:$0xff]  ;;  %vm15872_vm12 = vmmov %vm15852_vm0 }
 0x51a   : > { %8644 = vmatpush.bf16.msra.mxu1 %v10185_v1 }
 0x51b   : > { %9816 = vmatmul.msk.bf16.gmra.mxu0 %vm6224_vm2, %v6941_v15 }
 0x51c   : > { %v6703_v45 = vpop.f32.mrf.mxu3  ;;  %v6368_v23 = vpop.f32.mrf.mxu1 }
 0x51d   : > { %v14413_v59 = vadd.f32 %v6703_v45, %v14341_v27  ;;  %v15849_v45 = vld [vmem:[#allocation46_spill] sm:$0xff] }
 0x51f   : > { %9836 = vmatmul.msk.bf16.gmra.mxu1 %vm6224_vm2, %v15847_v47  ;;  %v6510_v53 = vpop.f32.mrf.mxu2  ;;  %v14429_v47 = vld [vmem:[#allocation3 + $0x30] sm:$0xff] }
 0x520   : > { %v7061_v6 = vpop.f32.mrf.mxu0  ;;  %v15851_v53 = vld [vmem:[#allocation38_spill] sm:$0xff] }
 0x521   : > { %9960 = vmatmul.msk.bf16.gmra.mxu3 %vm6224_vm2, %v7913_v56  ;;  %v7914_v56 = vrot.slane %v14429_v47, 2 }
 0x523   : > { %v7915_v55 = vsel %vm15852_vm0, %v7912_v46, %v7914_v56 }
 0x524   : > { %v6706_v61 = vpop.f32.mrf.mxu3  ;;  %v6370_v15 = vpop.f32.mrf.mxu1 }
 0x525   : > { %v14420_v13 = vadd.f32 %v6706_v61, %v14350_v11 }
 0x527   : > { %v6512_v62 = vpop.f32.mrf.mxu2 }
 0x528   : > { %v7064_v27 = vpop.f32.mrf.mxu0  ;;  %v14432_v11 = vadd.f32 %v6512_v62, %v6365_v2  ;;  %v8158_v2 = vshll.u32 %v14357_v54, 16 }
 0x529   : > { %v14423_v51 = vadd.f32 %v7064_v27, %v14352_v35  ;;  %9866 = vmatmul.msk.bf16.gmra.mxu2 %vm6224_vm2, %v15849_v45  ;;  %v8166_v35 = vshll.u32 %v14363_v42, 16  ;;  %v8155_v27 = vshrl.u32 %v14357_v54, 16  ;;  %v8165_v42 = vrot.slane %v8163_v60, 2 }
 0x52a   : > { %v8160_v0 = vrot.slane %v8158_v2, 3 }
 0x52b   : > { %9817 = vmatmul.msk.bf16.gmra.mxu0 %vm6224_vm2, %v6943_v14  ;;  %v8168_v14 = vrot.slane %v8166_v35, 3  ;;  %v14454_v35 = vld [vmem:[#allocation3 + $0x38] sm:$0xff] }
 0x52c   : > { %v6708_v36 = vpop.f32.mrf.mxu3  ;;  %v6373_v6 = vpop.f32.mrf.mxu1 }
 0x52d   : > { %v8169_v49 = vor.u32 %v8168_v14, %v8165_v42 }
 0x52f   : > { %9837 = vmatmul.msk.bf16.gmra.mxu1 %vm6224_vm2, %v15851_v53  ;;  %v6515_v62 = vpop.f32.mrf.mxu2  ;;  %v8157_v53 = vrot.slane %v8155_v27, 2 }
 0x530   : > { %v7066_v61 = vpop.f32.mrf.mxu0  ;;  %v14448_v46 = vadd.f32 %v6515_v62, %v6368_v23  ;;  %v7916_v23 = vrot.slane %v14454_v35, 2 }
 0x531   : > { %9961 = vmatmul.msk.bf16.gmra.mxu3 %vm6224_vm2, %v7915_v55  ;;  %v14446_v45 = vadd.f32 %v7066_v61, %v14366_v10  ;;  %v8161_v48 = vor.u32 %v8160_v0, %v8157_v53 }
 0x532   : > { %v7917_v0 = vsel %vm15854_vm6, %v7914_v56, %v7916_v23  ;;  %vm15875_vm6 = vmmov %vm15852_vm0 }
 0x533   : > { %v8170_v54 = vsel %vm4680_vm4, %v8161_v48, %v8169_v49  ;;  %v8175_v48 = vshll.u32 %v14384_v21, 16 }
 0x534   : > { %v6711_v36 = vpop.f32.mrf.mxu3  ;;  %v6375_v6 = vpop.f32.mrf.mxu1 }
 0x535   : > { %v8177_v2 = vrot.slane %v8175_v48, 3 }
 0x537   : > { %v6517_v10 = vpop.f32.mrf.mxu2 }
 0x538   : > { %v7069_v50 = vpop.f32.mrf.mxu0  ;;  %v14457_v55 = vadd.f32 %v6517_v10, %v6370_v15  ;;  %v14480_v10 = vld [vmem:[#allocation3 + $0x40] sm:$0xff] }
 0x539   : > { %9867 = vmatmul.msk.bf16.gmra.mxu2 %vm6224_vm2, %v15853_v30  ;;  %v8172_v30 = vshrl.u32 %v14384_v21, 16 }
 0x53b   : > { %9988 = vmatmul.msk.bf16.vlgmr.msra.gmra.mxu0 %vm6224_vm2, %v8170_v54  ;;  %v8174_v15 = vrot.slane %v8172_v30, 2 }
 0x53c   : > { %v6713_v60 = vpop.f32.mrf.mxu3  ;;  %v7399_v1 = vpop.f32.mrf.mxu1 }
 0x53d   : > { %v14460_v61 = vadd.f32 %v6713_v60, %v14387_v52  ;;  %v7489_v50 = vadd.f32 %v7399_v1, %v14172_v8  ;;  %v8178_v36 = vor.u32 %v8177_v2, %v8174_v15  ;;  %v8184_v1 = vshll.u32 %v14409_v41, 16 }
 0x53f   : > { %9838 = vmatmul.msk.bf16.gmra.mxu1 %vm6224_vm2, %v13637_v40  ;;  %v6520_v42 = vpop.f32.mrf.mxu2  ;;  %v15855_v40 = vld [vmem:[#allocation40_spill] sm:$0xff]  ;;  %v8179_v56 = vsel %vm4680_vm4, %v8169_v49, %v8178_v36 }
 0x540   : > { %v7071_v27 = vpop.f32.mrf.mxu0 }
 0x541   : > { %9962 = vmatmul.msk.bf16.gmra.mxu3 %vm6224_vm2, %v7917_v0  ;;  %v8186_v27 = vrot.slane %v8184_v1, 3  ;;  %v8190_v1 = vshrl.u32 %v14429_v47, 16 }
 0x544   : > { %v6716_v14 = vpop.f32.mrf.mxu3  ;;  %v7401_v52 = vpop.f32.mrf.mxu1 }
 0x545   : > { %v14470_v62 = vadd.f32 %v6716_v14, %v14396_v31  ;;  %v7490_v8 = vadd.f32 %v7401_v52, %v14219_v12  ;;  %v7918_v31 = vrot.slane %v14480_v10, 2  ;;  %v8181_v12 = vshrl.u32 %v14409_v41, 16 }
 0x547   : > { %v6522_v53 = vpop.f32.mrf.mxu2  ;;  %v7919_v30 = vsel %vm15857_vm10, %v7916_v23, %v7918_v31  ;;  %v8183_v0 = vrot.slane %v8181_v12, 2  ;;  %vm15877_vm10 = vmmov %vm15852_vm0 }
 0x548   : > { %v7074_v21 = vpop.f32.mrf.mxu0  ;;  %v14501_v53 = vld [vmem:[#allocation3 + $0x48] sm:$0xff] }
 0x549   : > { %v14474_v6 = vadd.f32 %v7074_v21, %v14399_v17  ;;  %9868 = vmatmul.msk.bf16.gmra.mxu2 %vm6224_vm2, %v15855_v40  ;;  %v15856_v17 = vld [vmem:[#allocation44_spill] sm:$0xff]  ;;  %v8187_v52 = vor.u32 %v8186_v27, %v8183_v0  ;;  %v15858_v40 = vld [vmem:[#allocation45_spill] sm:$0xff] }
 0x54b   : > { %9989 = vmatmul.msk.bf16.gmra.mxu0 %vm6224_vm2, %v8179_v56  ;;  %v8188_v23 = vsel %vm4680_vm4, %v8178_v36, %v8187_v52  ;;  %v8193_v36 = vshll.u32 %v14429_v47, 16 }
 0x54c   : > { %v6718_v54 = vpop.f32.mrf.mxu3  ;;  %v7404_v60 = vpop.f32.mrf.mxu1 }
 0x54f   : > { %9839 = vmatmul.msk.bf16.gmra.mxu1 %vm6224_vm2, %v15856_v17  ;;  %v7646_v15 = vpop.f32.mrf.mxu2 }
 0x550   : > { %v7076_v48 = vpop.f32.mrf.mxu0  ;;  %v14492_v42 = vadd.f32 %v7646_v15, %v7489_v50  ;;  %v7920_v50 = vrot.slane %v14501_v53, 2 }
 0x551   : > { %9963 = vmatmul.msk.bf16.gmra.mxu3 %vm6224_vm2, %v7919_v30  ;;  %v14490_v49 = vadd.f32 %v7076_v48, %v14413_v59  ;;  %v8195_v48 = vrot.slane %v8193_v36, 3 }
 0x552   : > { %v7921_v17 = vsel %vm15859_vm3, %v7918_v31, %v7920_v50  ;;  %vm15890_vm3 = vcmask 130048  }
 0x554   : > { %v6721_v2 = vpop.f32.mrf.mxu3  ;;  %v7406_v14 = vpop.f32.mrf.mxu1 }
 0x555   : > { %v15860_v14 = vld [vmem:[#allocation13_spill] sm:$0xff] }
 0x557   : > { %v7648_v56 = vpop.f32.mrf.mxu2 }
 0x558   : > { %v7079_v41 = vpop.f32.mrf.mxu0  ;;  %v14504_v54 = vadd.f32 %v7648_v56, %v7490_v8  ;;  %v8192_v8 = vrot.slane %v8190_v1, 2 }
 0x559   : > { %v14495_v21 = vadd.f32 %v7079_v41, %v14420_v13  ;;  %9869 = vmatmul.msk.bf16.gmra.mxu2 %vm6224_vm2, %v15858_v40  ;;  %v14524_v40 = vld [vmem:[#allocation3 + $0x50] sm:$0xff] }
 0x55a   : > { %v8196_v2 = vor.u32 %v8195_v48, %v8192_v8 }
 0x55b   : > { %9990 = vmatmul.msk.bf16.gmra.mxu0 %vm6224_vm2, %v8188_v23  ;;  %v7922_v23 = vrot.slane %v14524_v40, 2 }
 0x55c   : > { %v6723_v59 = vpop.f32.mrf.mxu3  ;;  %v7409_v60 = vpop.f32.mrf.mxu1 }
 0x55d   : > { %v14507_v12 = vadd.f32 %v6723_v59, %v14432_v11  ;;  %v7493_v13 = vadd.f32 %v7409_v60, %v14283_v4  ;;  %v8199_v59 = vshrl.u32 %v14454_v35, 16  ;;  %v8202_v60 = vshll.u32 %v14454_v35, 16 }
 0x55f   : > { %9840 = vmatmul.msk.bf16.gmra.mxu1 %vm6224_vm2, %v13811_v26  ;;  %v7651_v0 = vpop.f32.mrf.mxu2  ;;  %v8197_v26 = vsel %vm4680_vm4, %v8187_v52, %v8196_v2  ;;  %v7923_v52 = vsel %vm15861_vm1, %v7920_v50, %v7922_v23  ;;  %vm15891_vm1 = vmmov %vm15890_vm3 }
 0x560   : > { %v7081_v30 = vpop.f32.mrf.mxu0 }
 0x561   : > { %9964 = vmatmul.msk.bf16.gmra.mxu3 %vm6224_vm2, %v7921_v17  ;;  %v8201_v17 = vrot.slane %v8199_v59, 2 }
 0x564   : > { %v6726_v27 = vpop.f32.mrf.mxu3  ;;  %v7411_v11 = vpop.f32.mrf.mxu1 }
 0x565   : > { %v14517_v15 = vadd.f32 %v6726_v27, %v14448_v46  ;;  %v7494_v4 = vadd.f32 %v7411_v11, %v14294_v63  ;;  %v14549_v11 = vld [vmem:[#allocation3 + $0x58] sm:$0xff] }
 0x567   : > { %v7653_v31 = vpop.f32.mrf.mxu2 }
 0x568   : > { %v7084_v47 = vpop.f32.mrf.mxu0 }
 0x569   : > { %9870 = vmatmul.msk.bf16.gmra.mxu2 %vm6224_vm2, %v15860_v14 }
 0x56b   : > { %9991 = vmatmul.msk.bf16.gmra.mxu0 %vm6224_vm2, %v8197_v26  ;;  %v8208_v26 = vshrl.u32 %v14480_v10, 16 }
 0x56c   : > { %v6728_v41 = vpop.f32.mrf.mxu3  ;;  %v7414_v56 = vpop.f32.mrf.mxu1 }
 0x56d   : > { %v14528_v46 = vadd.f32 %v6728_v41, %v14457_v55  ;;  %v7495_v63 = vadd.f32 %v7414_v56, %v14301_v16  ;;  %v8204_v55 = vrot.slane %v8202_v60, 3  ;;  %v8210_v31 = vrot.slane %v8208_v26, 2 }
 0x56f   : > { %9841 = vmatmul.msk.bf16.gmra.mxu1 %vm6224_vm2, %v13898_v28  ;;  %v7656_v30 = vpop.f32.mrf.mxu2  ;;  %v8205_v0 = vor.u32 %v8204_v55, %v8201_v17 }
 0x570   : > { %v7086_v1 = vpop.f32.mrf.mxu0  ;;  %v14540_v16 = vadd.f32 %v7656_v30, %v7493_v13  ;;  %v7924_v13 = vrot.slane %v14549_v11, 2  ;;  %v14570_v30 = vld [vmem:[#allocation3 + $0x60] sm:$0xff] }
 0x571   : > { %9965 = vmatmul.msk.bf16.gmra.mxu3 %vm6224_vm2, %v7923_v52  ;;  %v14538_v36 = vadd.f32 %v7086_v1, %v14460_v61  ;;  %v8206_v28 = vsel %vm4680_vm4, %v8196_v2, %v8205_v0 }
 0x574   : > { %v6731_v8 = vpop.f32.mrf.mxu3  ;;  %v7416_v48 = vpop.f32.mrf.mxu1 }
 0x575   : > { %v8217_v48 = vshrl.u32 %v14501_v53, 16 }
 0x577   : > { %v7658_v50 = vpop.f32.mrf.mxu2 }
 0x578   : > { %v7089_v35 = vpop.f32.mrf.mxu0  ;;  %v14552_v47 = vadd.f32 %v7658_v50, %v7494_v4  ;;  %v8219_v50 = vrot.slane %v8217_v48, 2 }
 0x579   : > { %v14543_v27 = vadd.f32 %v7089_v35, %v14470_v62  ;;  %9871 = vmatmul.msk.bf16.gmra.mxu2 %vm6224_vm2, %v13878_v58  ;;  %v8211_v62 = vshll.u32 %v14480_v10, 16  ;;  %v7925_v58 = vsel %vm15862_vm14, %v7922_v23, %v7924_v13  ;;  %vm15892_vm14 = vmmov %vm15891_vm1 }
 0x57b   : > { %9992 = vmatmul.msk.bf16.gmra.mxu0 %vm6224_vm2, %v8206_v28  ;;  %v8213_v41 = vrot.slane %v8211_v62, 3 }
 0x57c   : > { %v6733_v61 = vpop.f32.mrf.mxu3  ;;  %v7419_v14 = vpop.f32.mrf.mxu1 }
 0x57d   : > { %v8214_v1 = vor.u32 %v8213_v41, %v8210_v31 }
 0x57f   : > { %9842 = vmatmul.msk.bf16.gmra.mxu1 %vm6224_vm2, %v13981_v32  ;;  %v7661_v56 = vpop.f32.mrf.mxu2  ;;  %v8215_v32 = vsel %vm4680_vm4, %v8205_v0, %v8214_v1 }
 0x580   : > { %v7091_v2 = vpop.f32.mrf.mxu0  ;;  %v14560_v60 = vadd.f32 %v7661_v56, %v7495_v63  ;;  %v7926_v63 = vrot.slane %v14570_v30, 2  ;;  %v8226_v56 = vshrl.u32 %v14524_v40, 16 }
 0x581   : > { %9966 = vmatmul.msk.bf16.gmra.mxu3 %vm6224_vm2, %v7925_v58  ;;  %v14593_v58 = vld [vmem:[#allocation3 + $0x68] sm:$0xff] }
 0x582   : > { %v7927_v0 = vsel %vm15863_vm11, %v7924_v13, %v7926_v63  ;;  %v7928_v2 = vrot.slane %v14593_v58, 2  ;;  %vm15893_vm11 = vmmov %vm15891_vm1 }
 0x584   : > { %v8019_v59 = vpop.f32.mrf.mxu3  ;;  %v7421_v4 = vpop.f32.mrf.mxu1 }
 0x585   : > { %v14563_v52 = vadd.f32 %v8019_v59, %v14492_v42  ;;  %v7498_v10 = vadd.f32 %v7421_v4, %v14330_v9 }
 0x587   : > { %v7663_v23 = vpop.f32.mrf.mxu2 }
 0x588   : > { %v7094_v17 = vpop.f32.mrf.mxu0 }
 0x589   : > { %9872 = vmatmul.msk.bf16.gmra.mxu2 %vm6224_vm2, %v13969_v44  ;;  %v8220_v44 = vshll.u32 %v14501_v53, 16 }
 0x58b   : > { %9993 = vmatmul.msk.bf16.gmra.mxu0 %vm6224_vm2, %v8215_v32 }
 0x58c   : > { %v8021_v55 = vpop.f32.mrf.mxu3  ;;  %v7424_v8 = vpop.f32.mrf.mxu1 }
 0x58d   : > { %v14574_v42 = vadd.f32 %v8021_v55, %v14504_v54  ;;  %v7499_v9 = vadd.f32 %v7424_v8, %v14335_v22  ;;  %v8222_v54 = vrot.slane %v8220_v44, 3 }
 0x58f   : > { %9843 = vmatmul.msk.bf16.gmra.mxu1 %vm6224_vm2, %v14065_v34  ;;  %v7666_v61 = vpop.f32.mrf.mxu2  ;;  %v8223_v26 = vor.u32 %v8222_v54, %v8219_v50  ;;  %v8235_v50 = vshrl.u32 %v14549_v11, 16 }
 0x590   : > { %v7096_v35 = vpop.f32.mrf.mxu0 }
 0x591   : > { %9967 = vmatmul.msk.bf16.gmra.mxu3 %vm6224_vm2, %v7927_v0  ;;  %v14584_v28 = vadd.f32 %v7096_v35, %v14507_v12  ;;  %v8224_v34 = vsel %vm4680_vm4, %v8214_v1, %v8223_v26  ;;  %v8228_v1 = vrot.slane %v8226_v56, 2 }
 0x594   : > { %v8024_v14 = vpop.f32.mrf.mxu3  ;;  %v7426_v22 = vpop.f32.mrf.mxu1 }
 0x595   : > { %v8237_v14 = vrot.slane %v8235_v50, 2 }
 0x597   : > { %v7668_v13 = vpop.f32.mrf.mxu2 }
 0x598   : > { %v7099_v62 = vpop.f32.mrf.mxu0  ;;  %v14596_v31 = vadd.f32 %v7668_v13, %v7498_v10 }
 0x599   : > { %v14587_v53 = vadd.f32 %v7099_v62, %v14517_v15  ;;  %9873 = vmatmul.msk.bf16.gmra.mxu2 %vm6224_vm2, %v14045_v43  ;;  %v8229_v15 = vshll.u32 %v14524_v40, 16  ;;  %v7929_v43 = vsel %vm15864_vm9, %v7926_v63, %v7928_v2  ;;  %vm8921_vm9 = vcmask 15360  }
 0x59b   : > { %9994 = vmatmul.msk.bf16.gmra.mxu0 %vm6224_vm2, %v8224_v34  ;;  %v8231_v17 = vrot.slane %v8229_v15, 3  ;;  %v8244_v15 = vshrl.u32 %v14570_v30, 16 }
 0x59c   : > { %v8026_v12 = vpop.f32.mrf.mxu3  ;;  %v7429_v41 = vpop.f32.mrf.mxu1 }
 0x59d   : > { %v8232_v63 = vor.u32 %v8231_v17, %v8228_v1  ;;  %v8246_v17 = vrot.slane %v8244_v15, 2 }
 0x59f   : > { %9844 = vmatmul.msk.bf16.gmra.mxu1 %vm6224_vm2, %v14152_v57  ;;  %v7671_v10 = vpop.f32.mrf.mxu2 }
 0x5a0   : > { %v7101_v59 = vpop.f32.mrf.mxu0  ;;  %v14607_v23 = vadd.f32 %v7671_v10, %v7499_v9  ;;  %v14619_v9 = vld [vmem:[#allocation3 + $0x70] sm:$0xff] }
 0x5a1   : > { %9968 = vmatmul.msk.bf16.gmra.mxu3 %vm6224_vm2, %v7929_v43  ;;  %v14605_v4 = vadd.f32 %v7101_v59, %v14528_v46  ;;  %v8233_v46 = vsel %vm4680_vm4, %v8223_v26, %v8232_v63  ;;  %v7930_v0 = vrot.slane %v14619_v9, 2  ;;  %v8247_v43 = vshll.u32 %v14570_v30, 16 }
 0x5a3   : > { %v7931_v54 = vsel %vm15865_vm7, %v7928_v2, %v7930_v0  ;;  %v8249_v10 = vrot.slane %v8247_v43, 3  ;;  %v14694_v43 = vld [vmem:[#allocation3 + $0x88] sm:$0xff] }
 0x5a4   : > { %v8029_v32 = vpop.f32.mrf.mxu3  ;;  %v7431_v55 = vpop.f32.mrf.mxu1 }
 0x5a5   : > { %v14610_v40 = vadd.f32 %v8029_v32, %v14540_v16  ;;  %v14613_v57 = vadd.f32 %v7431_v55, %v14374_v20 }
 0x5a7   : > { %v7673_v48 = vpop.f32.mrf.mxu2 }
 0x5a8   : > { %v7104_v8 = vpop.f32.mrf.mxu0 }
 0x5a9   : > { %9874 = vmatmul.msk.bf16.gmra.mxu2 %vm6224_vm2, %v14134_v3  ;;  %v8238_v3 = vshll.u32 %v14549_v11, 16  ;;  %v7145_v11 = vld [vmem:[#allocation3 + $0x98] sm:$0x3] }
 0x5aa   : > { %v7152_v2 = vunpack.c.l.b16 %v7145_v11 }
 0x5ab   : > { %9995 = vmatmul.msk.bf16.gmra.mxu0 %vm6224_vm2, %v8233_v46  ;;  %v8240_v22 = vrot.slane %v8238_v3, 3  ;;  %v8250_v46 = vor.u32 %v8249_v10, %v8246_v17 }
 0x5ac   : > { %v8031_v44 = vpop.f32.mrf.mxu3  ;;  %v7434_v16 = vpop.f32.mrf.mxu1 }
 0x5ad   : > { %v14623_v35 = vadd.f32 %v8031_v44, %v14552_v47  ;;  %v14626_v20 = vadd.f32 %v7434_v16, %v14378_v37  ;;  %v8241_v34 = vor.u32 %v8240_v22, %v8237_v14  ;;  %v14663_v16 = vld [vmem:[#allocation3 + $0x80] sm:$0xff]  ;;  %v8253_v14 = vshrl.u32 %v14593_v58, 16 }
 0x5ae   : > { %v7934_v50 = vrot.slane %v14663_v16, 2  ;;  %v8256_v22 = vshll.u32 %v14593_v58, 16 }
 0x5af   : > { %9845 = vmatmul.msk.bf16.gmra.mxu1 %vm6224_vm2, %v14229_v18  ;;  %v8242_v12 = vsel %vm4680_vm4, %v8232_v63, %v8241_v34 }
 0x5b0   : > { %v7106_v61 = vpop.f32.mrf.mxu0 }
 0x5b1   : > { %9969 = vmatmul.msk.bf16.gmra.mxu3 %vm6224_vm2, %v7931_v54 }
 0x5b4   : > { %v8034_v26 = vpop.f32.mrf.mxu3  ;;  %v7436_v47 = vpop.f32.mrf.mxu1 }
 0x5b5   : > { %v14635_v62 = vadd.f32 %v8034_v26, %v14560_v60  ;;  %v14638_v37 = vadd.f32 %v7436_v47, %v14394_v39  ;;  %v14647_v60 = vld [vmem:[#allocation3 + $0x78] sm:$0xff] }
 0x5b6   : > { %v7932_v39 = vrot.slane %v14647_v60, 2 }
 0x5b8   : > { %v8399_v13 = vpop.f32.mrf.mxu0  ;;  %v7935_v26 = vsel %vm15868_vm5, %v7932_v39, %v7934_v50 }
 0x5b9   : > { %v14641_v18 = vadd.f32 %v8399_v13, %v14563_v52  ;;  %9875 = vmatmul.msk.bf16.gmra.mxu2 %vm6224_vm2, %v14214_v33  ;;  %v7153_v52 = vpack.c.b16 %v7152_v2, %v7152_v2  ;;  %v7933_v33 = vsel %vm15866_vm15, %v7930_v0, %v7932_v39 }
 0x5bb   : > { %9996 = vmatmul.msk.bf16.gmra.mxu0 %vm6224_vm2, %v8242_v12  ;;  %v7316_v32 = vshrl.u32 %v7153_v52, 16  ;;  %v7319_v55 = vshll.u32 %v7153_v52, 16  ;;  %v7569_v12 = vrot.slane %v7153_v52, 2 }
 0x5bc   : > { %v8036_v41 = vpop.f32.mrf.mxu3  ;;  %v7439_v56 = vpop.f32.mrf.mxu1 }
 0x5bd   : > { %v7318_v30 = vrot.slane %v7316_v32, 1  ;;  %v7321_v48 = vrot.slane %v7319_v55, 2  ;;  %v15869_v41 = vrot.slane %v14235_v7, 2  ;;  %v8265_v7 = vshll.u32 %v14619_v9, 16 }
 0x5bf   : > { %9846 = vmatmul.msk.bf16.gmra.mxu1 %vm6224_vm2, %v14266_v38  ;;  %v8251_v38 = vsel %vm4680_vm4, %v8241_v34, %v8250_v46  ;;  %v7322_v0 = vor.u32 %v7321_v48, %v7318_v30  ;;  %v8255_v34 = vrot.slane %v8253_v14, 2  ;;  %v7570_v39 = vsel %vm15870_vm8, %v15869_v41, %v7569_v12  ;;  %v10263_v48 = vld [vmem:[#allocation3 + $0x90] sm:$0xff] }
 0x5c0   : > { %v8401_v59 = vpop.f32.mrf.mxu0  ;;  %v8267_v55 = vrot.slane %v8265_v7, 3  ;;  %v8280_v12 = vshrl.u32 %v14663_v16, 16 }
 0x5c1   : > { %9970 = vmatmul.msk.bf16.gmra.mxu3 %vm6224_vm2, %v7933_v33  ;;  %v14657_v1 = vadd.f32 %v8401_v59, %v14574_v42  ;;  %v8262_v33 = vshrl.u32 %v14619_v9, 16  ;;  %v15871_v59 = vld [vmem:[#allocation25_spill] sm:$0xff] }
 0x5c3   : > { %v8264_v32 = vrot.slane %v8262_v33, 2 }
 0x5c4   : > { %v8039_v63 = vpop.f32.mrf.mxu3  ;;  %v7441_v8 = vpop.f32.mrf.mxu1 }
 0x5c5   : > { %v8268_v8 = vor.u32 %v8267_v55, %v8264_v32  ;;  %v8289_v55 = vshrl.u32 %v14694_v43, 16 }
 0x5c8   : > { %v8404_v44 = vpop.f32.mrf.mxu0 }
 0x5c9   : > { %9876 = vmatmul.msk.bf16.gmra.mxu2 %vm6224_vm2, %v14256_v25  ;;  %v7323_v25 = vsel %vm15867_vm13, %v14258_v29, %v7322_v0  ;;  %v7938_v44 = vrot.slane %v10263_v48, 2 }
 0x5cb   : > { %9997 = vmatmul.msk.bf16.gmra.mxu0 %vm6224_vm2, %v8251_v38 }
 0x5cc   : > { %v8041_v42 = vpop.f32.mrf.mxu3  ;;  %v7444_v3 = vpop.f32.mrf.mxu1 }
 0x5cd   : > { %v14667_v54 = vadd.f32 %v8041_v42, %v14596_v31  ;;  %v14670_v61 = vadd.f32 %v7444_v3, %v14423_v51  ;;  %v8258_v31 = vrot.slane %v8256_v22, 3  ;;  %v8274_v42 = vshll.u32 %v14647_v60, 16 }
 0x5cf   : > { %9847 = vmatmul.msk.bf16.gmra.mxu1 %vm6224_vm2, %v7323_v25  ;;  %v8259_v2 = vor.u32 %v8258_v31, %v8255_v34  ;;  %v8276_v14 = vrot.slane %v8274_v42, 3 }
 0x5d0   : > { %v8406_v47 = vpop.f32.mrf.mxu0 }
 0x5d1   : > { %9971 = vmatmul.msk.bf16.gmra.mxu3 %vm6224_vm2, %v7935_v26  ;;  %v8260_v15 = vsel %vm4680_vm4, %v8250_v46, %v8259_v2  ;;  %v8269_v9 = vsel %vm4680_vm4, %v8259_v2, %v8268_v8  ;;  %v8283_v2 = vshll.u32 %v14663_v16, 16 }
 0x5d4   : > { %v8044_v11 = vpop.f32.mrf.mxu3  ;;  %v7446_v13 = vpop.f32.mrf.mxu1 }
 0x5d5   : > { %v14680_v51 = vadd.f32 %v8044_v11, %v14607_v23  ;;  %v14683_v29 = vadd.f32 %v7446_v13, %v14446_v45  ;;  %v7936_v45 = vrot.slane %v14694_v43, 2 }
 0x5d8   : > { %v8409_v58 = vpop.f32.mrf.mxu0 }
 0x5d9   : > { %v14689_v56 = vadd.f32 %v8409_v58, %v14610_v40  ;;  %9877 = vmatmul.msk.bf16.gmra.mxu2 %vm6224_vm2, %v7570_v39  ;;  %v7937_v40 = vsel %vm15872_vm12, %v7934_v50, %v7936_v45  ;;  %v15873_v50 = vld [vmem:[#allocation29_spill] sm:$0xff]  ;;  %v15874_v58 = vld [vmem:[#allocation42_spill] sm:$0xff]  ;;  %v7808_v39 = vld [vmem:[#allocation3 + $0xa0] sm:$0x3] }
 0x5db   : > { %9998 = vmatmul.msk.bf16.gmra.mxu0 %vm6224_vm2, %v8260_v15 }
 0x5dc   : > { %v8046_v23 = vpop.f32.mrf.mxu3  ;;  %v7449_v52 = vpop.f32.mrf.mxu1 }
 0x5dd   : > { %v8282_v23 = vrot.slane %v8280_v12, 2  ;;  %v15879_v12 = vld [vmem:[#allocation47_spill] sm:$0xff] }
 0x5df   : > { %10018 = vmatmul.msk.bf16.vlgmr.msra.gmra.mxu1 %vm6224_vm2, %v15871_v59 }
 0x5e0   : > { %v8411_v17 = vpop.f32.mrf.mxu0 }
 0x5e1   : > { %9972 = vmatmul.msk.bf16.gmra.mxu3 %vm6224_vm2, %v7937_v40  ;;  %v14704_v10 = vadd.f32 %v8411_v17, %v14623_v35  ;;  %v8271_v35 = vshrl.u32 %v14647_v60, 16  ;;  %v10264_v60 = vld [vmem:[#allocation3 + $0x98] sm:$0xff] }
 0x5e2   : > { %v7940_v31 = vrot.slane %v10264_v60, 2 }
 0x5e3   : > { %v8273_v25 = vrot.slane %v8271_v35, 2 }
 0x5e4   : > { %v7451_v63 = vpop.f32.mrf.mxu1 }
 0x5e5   : > { %v15876_v63 = vld [vmem:[#allocation43_spill] sm:$0xff] }
 0x5e8   : > { %v8414_v46 = vpop.f32.mrf.mxu0 }
 0x5e9   : > { %v14707_v30 = vadd.f32 %v8414_v46, %v14635_v62  ;;  %v7939_v62 = vsel %vm15852_vm0, %v7936_v45, %v7938_v44  ;;  %v8285_v45 = vrot.slane %v8283_v2, 3 }
 0x5eb   : > { %9999 = vmatmul.msk.bf16.gmra.mxu0 %vm6224_vm2, %v8269_v9  ;;  %v8286_v33 = vor.u32 %v8285_v45, %v8282_v23  ;;  %v8319_v45 = vshll.u32 %v14261_v19, 16 }
 0x5ec   : > { %v7454_v38 = vpop.f32.mrf.mxu1 }
 0x5ed   : > { %v14712_v0 = vadd.f32 %v7454_v38, %v14474_v6  ;;  %v8277_v6 = vor.u32 %v8276_v14, %v8273_v25  ;;  %v15878_v25 = vld [vmem:[#allocation36_spill] sm:$0xff] }
 0x5ef   : > { %10019 = vmatmul.msk.bf16.gmra.mxu1 %vm6224_vm2, %v15873_v50  ;;  %v8278_v34 = vsel %vm4680_vm4, %v8268_v8, %v8277_v6  ;;  %v8287_v40 = vsel %vm4680_vm4, %v8277_v6, %v8286_v33 }
 0x5f0   : > { %v8416_v3 = vpop.f32.mrf.mxu0 }
 0x5f1   : > { %9973 = vmatmul.msk.bf16.gmra.mxu3 %vm6224_vm2, %v7939_v62  ;;  %v8298_v62 = vshrl.u32 %v10263_v48, 16  ;;  %v8301_v3 = vshll.u32 %v10263_v48, 16 }
 0x5f3   : > { %v8300_v14 = vrot.slane %v8298_v62, 2 }
 0x5f4   : > { %v7456_v22 = vpop.f32.mrf.mxu1 }
 0x5f5   : > { %v14721_v26 = vadd.f32 %v7456_v22, %v14490_v49  ;;  %v7941_v49 = vsel %vm15875_vm6, %v7938_v44, %v7940_v31  ;;  %v8303_v22 = vrot.slane %v8301_v3, 3  ;;  %v8049_v3 = vpop.f32.mrf.mxu3 }
 0x5f8   : > { %v8419_v47 = vpop.f32.mrf.mxu0 }
 0x5f9   : > { %v8304_v47 = vor.u32 %v8303_v22, %v8300_v14 }
 0x5fb   : > { %10000 = vmatmul.msk.bf16.gmra.mxu0 %vm6224_vm2, %v8278_v34 }
 0x5fc   : > { %v7459_v11 = vpop.f32.mrf.mxu1 }
 0x5fd   : > { %v14726_v13 = vadd.f32 %v7459_v11, %v14495_v21  ;;  %v7887_v21 = vunpack.c.l.b16 %v7808_v39  ;;  %v8310_v11 = vshll.u32 %v10264_v60, 16 }
 0x5ff   : > { %10020 = vmatmul.msk.bf16.gmra.mxu1 %vm6224_vm2, %v15874_v58  ;;  %v7906_v7 = vpack.c.b16 %v7887_v21, %v7887_v21  ;;  %v8312_v2 = vrot.slane %v8310_v11, 3  ;;  %v15880_v21 = vld [vmem:[#allocation49_spill] sm:$0xff] }
 0x600   : > { %v8421_v41 = vpop.f32.mrf.mxu0 }
 0x601   : > { %9974 = vmatmul.msk.bf16.gmra.mxu3 %vm6224_vm2, %v7941_v49  ;;  %v14735_v15 = vadd.f32 %v8421_v41, %v14667_v54  ;;  %v7942_v17 = vrot.slane %v7906_v7, 2  ;;  %v8292_v54 = vshll.u32 %v14694_v43, 16 }
 0x603   : > { %v7943_v8 = vsel %vm15877_vm10, %v7940_v31, %v7942_v17  ;;  %v8294_v9 = vrot.slane %v8292_v54, 3  ;;  %v8307_v31 = vshrl.u32 %v10264_v60, 16  ;;  %v8316_v60 = vshrl.u32 %v14261_v19, 16  ;;  %v15881_v17 = vld [vmem:[#allocation50_spill] sm:$0xff]  ;;  %v10188_v19 = vld [vmem:[%s14948_s8 + $0x8] sm:$0xff] }
 0x604   : > { %v7461_v52 = vpop.f32.mrf.mxu1  ;;  %8911 = vmatpush.bf16.msrb.mxu2 %v10188_v19 }
 0x605   : > { %v8318_v52 = vrot.slane %v8316_v60, 2  ;;  %v15885_v60 = vld [vmem:[#allocation48_spill] sm:$0xff] }
 0x608   : > { %v8424_v59 = vpop.f32.mrf.mxu0 }
 0x609   : > { %v14738_v16 = vadd.f32 %v8424_v59, %v14680_v51  ;;  %v8291_v51 = vrot.slane %v8289_v55, 2 }
 0x60b   : > { %10001 = vmatmul.msk.bf16.gmra.mxu0 %vm6224_vm2, %v8287_v40  ;;  %v8295_v35 = vor.u32 %v8294_v9, %v8291_v51  ;;  %v15883_v9 = vld [vmem:[#allocation6_spill] sm:$0xff] }
 0x60c   : > { %v7464_v32 = vpop.f32.mrf.mxu1 }
 0x60d   : > { %v8296_v42 = vsel %vm4680_vm4, %v8286_v33, %v8295_v35  ;;  %v8321_v33 = vrot.slane %v8319_v45, 3 }
 0x60f   : > { %10021 = vmatmul.msk.bf16.gmra.mxu1 %vm6224_vm2, %v15876_v63  ;;  %v8322_v59 = vor.u32 %v8321_v33, %v8318_v52 }
 0x610   : > { %v8426_v46 = vpop.f32.mrf.mxu0 }
 0x611   : > { %9975 = vmatmul.msk.bf16.gmra.mxu3 %vm6224_vm2, %v7943_v8 }
 0x614   : > { %v7466_v44 = vpop.f32.mrf.mxu1 }
 0x615   : > { %v14749_v38 = vadd.f32 %v7466_v44, %v14538_v36  ;;  %v8305_v36 = vsel %vm4680_vm4, %v8295_v35, %v8304_v47 }
 0x61b   : > { %10002 = vmatmul.msk.bf16.gmra.mxu0 %vm6224_vm2, %v8296_v42  ;;  %v15884_v42 = vld [vmem:[#allocation53_spill] sm:$0xff] }
 0x61c   : > { %v7469_v43 = vpop.f32.mrf.mxu1 }
 0x61d   : > { %v14754_v50 = vadd.f32 %v7469_v43, %v14543_v27  ;;  %v8309_v27 = vrot.slane %v8307_v31, 2 }
 0x61f   : > { %10022 = vmatmul.msk.bf16.gmra.mxu1 %vm6224_vm2, %v15878_v25  ;;  %v8313_v49 = vor.u32 %v8312_v2, %v8309_v27  ;;  %v8429_v25 = vpop.f32.mrf.mxu0 }
 0x621   : > { %v8314_v41 = vsel %vm4680_vm4, %v8304_v47, %v8313_v49  ;;  %v8323_v40 = vsel %vm4680_vm4, %v8313_v49, %v8322_v59  ;;  %vm8925_vm4 = vcmask 1040384  }
 0x624   : > { %v7471_v6 = vpop.f32.mrf.mxu1 }
 0x627   : > { %v8431_v47 = vpop.f32.mrf.mxu0 }
 0x62b   : > { %10003 = vmatmul.msk.bf16.gmra.mxu0 %vm6224_vm2, %v8305_v36 }
 0x62c   : > { %v7474_v34 = vpop.f32.mrf.mxu1 }
 0x62f   : > { %10023 = vmatmul.msk.bf16.gmra.mxu1 %vm6224_vm2, %v15879_v12  ;;  %v8434_v12 = vpop.f32.mrf.mxu0 }
 0x634   : > { %v7476_v48 = vpop.f32.mrf.mxu1 }
 0x635   : > { %v14763_v58 = vadd.f32 %v7476_v48, %v14584_v28 }
 0x63b   : > { %10004 = vmatmul.msk.bf16.gmra.mxu0 %vm6224_vm2, %v8314_v41 }
 0x63c   : > { %v7479_v39 = vpop.f32.mrf.mxu1 }
 0x63d   : > { %v14768_v23 = vadd.f32 %v7479_v39, %v14587_v53 }
 0x63f   : > { %10024 = vmatmul.msk.bf16.gmra.mxu1 %vm6224_vm2, %v15880_v21 }
 0x644   : > { %v7481_v28 = vpop.f32.mrf.mxu1 }
 0x645   : > { %v14775_v7 = vadd.f32 %v7481_v28, %v14605_v4  ;;  %v15882_v4 = vld [vmem:[#allocation52_spill] sm:$0xff] }
 0x64b   : > { %10005 = vmatmul.msk.bf16.gmra.mxu0 %vm6224_vm2, %v8323_v40 }
 0x64c   : > { %v7484_v53 = vpop.f32.mrf.mxu1 }
 0x64d   : > { %v15886_v53 = vld [vmem:[#allocation10_spill] sm:$0xff] }
 0x64f   : > { %10025 = vmatmul.msk.bf16.gmra.mxu1 %vm6224_vm2, %v15881_v17 }
 0x654   : > { %v7486_v32 = vpop.f32.mrf.mxu1 }
 0x65c   : > { %v8646_v55 = vpop.f32.mrf.mxu1 }
 0x65d   : > { %v8736_v54 = vadd.f32 %v8646_v55, %v14641_v18 }
 0x65f   : > { %8772 = vst.msk [vmem:[#allocation4] sm:$0xff] %vm6224_vm2, %v8736_v54  ;;  %10026 = vmatmul.msk.bf16.gmra.mxu1 %vm6224_vm2, %v15882_v4 }
 0x664   : > { %v8648_v63 = vpop.f32.mrf.mxu1 }
 0x665   : > { %v8737_v8 = vadd.f32 %v8648_v63, %v14657_v1  ;;  %v7676_v1 = vpop.f32.mrf.mxu2 }
 0x667   : > { %8773 = vst.msk [vmem:[#allocation4 + $0x8] sm:$0xff] %vm6224_vm2, %v8737_v8 }
 0x66c   : > { %v8651_v46 = vpop.f32.mrf.mxu1 }
 0x66d   : > { %v7678_v6 = vpop.f32.mrf.mxu2 }
 0x66e   : > { %v8808_v51 = vld [vmem:[#allocation4] ss:$2 sm:$0xff]  ;;  %v7749_v40 = vadd.f32 %v7678_v6, %v14613_v57 }
 0x66f   : > { %8809 = vst.msk [vmem:[#allocation5] sm:$0xff] %vm6224_vm2, %v8808_v51  ;;  %10027 = vmatmul.msk.bf16.gmra.mxu1 %vm6224_vm2, %v15883_v9 }
 0x674   : > { %v8653_v44 = vpop.f32.mrf.mxu1 }
 0x67c   : > { %v8656_v35 = vpop.f32.mrf.mxu1 }
 0x67d   : > { %v8740_v18 = vadd.f32 %v8656_v35, %v14689_v56  ;;  %v8051_v56 = vpop.f32.mrf.mxu3 }
 0x67f   : > { %8776 = vst.msk [vmem:[#allocation4 + $0x20] sm:$0xff] %vm6224_vm2, %v8740_v18  ;;  %10028 = vmatmul.msk.bf16.gmra.mxu1 %vm6224_vm2, %v15884_v42  ;;  %v15887_v18 = vld [vmem:[#allocation7_spill] sm:$0xff] }
 0x684   : > { %v8658_v43 = vpop.f32.mrf.mxu1 }
 0x685   : > { %v8741_v62 = vadd.f32 %v8658_v43, %v14704_v10  ;;  %v7681_v10 = vpop.f32.mrf.mxu2  ;;  %v8054_v31 = vpop.f32.mrf.mxu3 }
 0x686   : > { %v7750_v63 = vadd.f32 %v7681_v10, %v14626_v20 }
 0x687   : > { %8777 = vst.msk [vmem:[#allocation4 + $0x28] sm:$0xff] %vm6224_vm2, %v8741_v62 }
 0x688   : > { %v8123_v8 = vadd.f32 %v8054_v31, %v7750_v63 }
 0x68a   : > { %v8503_v51 = vadd.f32 %v8434_v12, %v8123_v8 }
 0x68c   : > { %v8661_v14 = vpop.f32.mrf.mxu1 }
 0x68d   : > { %v8742_v22 = vadd.f32 %v8661_v14, %v14707_v30  ;;  %v7683_v30 = vpop.f32.mrf.mxu2  ;;  %v8056_v48 = vpop.f32.mrf.mxu3 }
 0x68e   : > { %v7751_v35 = vadd.f32 %v7683_v30, %v14638_v37  ;;  %v15888_v37 = vld [vmem:[#allocation55_spill] sm:$0xff] }
 0x68f   : > { %8778 = vst.msk [vmem:[#allocation4 + $0x30] sm:$0xff] %vm6224_vm2, %v8742_v22  ;;  %10029 = vmatmul.msk.bf16.gmra.mxu1 %vm6224_vm2, %v13999_v5  ;;  %v8436_v5 = vpop.f32.mrf.mxu0 }
 0x690   : > { %v8124_v43 = vadd.f32 %v8056_v48, %v7751_v35 }
 0x692   : > { %v8504_v1 = vadd.f32 %v8436_v5, %v8124_v43 }
 0x694   : > { %v8663_v36 = vpop.f32.mrf.mxu1 }
 0x695   : > { %v7686_v41 = vpop.f32.mrf.mxu2  ;;  %v8059_v45 = vpop.f32.mrf.mxu3 }
 0x696   : > { %v8811_v34 = vld [vmem:[#allocation4 + $0x24] ss:$2 sm:$0xff] }
 0x697   : > { %8812 = vst.msk [vmem:[#allocation5 + $0x8] sm:$0xff] %vm6224_vm2, %v8811_v34  ;;  %v8439_v21 = vpop.f32.mrf.mxu0  ;;  %v10187_v34 = vld [vmem:[%s14948_s8] sm:$0xff] }
 0x698   : > { %8912 = vmatpush.bf16.msrb.mxu2 %v10187_v34 }
 0x69c   : > { %v8666_v11 = vpop.f32.mrf.mxu1 }
 0x69d   : > { %v7688_v33 = vpop.f32.mrf.mxu2 }
 0x69f   : > { %10030 = vmatmul.msk.bf16.gmra.mxu1 %vm6224_vm2, %v14087_v24  ;;  %v8441_v28 = vpop.f32.mrf.mxu0 }
 0x6a4   : > { %v8668_v27 = vpop.f32.mrf.mxu1 }
 0x6a5   : > { %v8745_v2 = vadd.f32 %v8668_v27, %v14735_v15  ;;  %v8061_v15 = vpop.f32.mrf.mxu3  ;;  %v7691_v17 = vpop.f32.mrf.mxu2 }
 0x6a6   : > { %v7754_v12 = vadd.f32 %v7691_v17, %v14670_v61 }
 0x6a7   : > { %8781 = vst.msk [vmem:[#allocation4 + $0x48] sm:$0xff] %vm6224_vm2, %v8745_v2  ;;  %v8444_v4 = vpop.f32.mrf.mxu0 }
 0x6ac   : > { %v8671_v49 = vpop.f32.mrf.mxu1 }
 0x6ad   : > { %v8746_v39 = vadd.f32 %v8671_v49, %v14738_v16  ;;  %v8122_v16 = vadd.f32 %v8051_v56, %v7749_v40  ;;  %v8064_v32 = vpop.f32.mrf.mxu3  ;;  %v7693_v46 = vpop.f32.mrf.mxu2 }
 0x6ae   : > { %v8127_v27 = vadd.f32 %v8064_v32, %v7754_v12 }
 0x6af   : > { %8782 = vst.msk [vmem:[#allocation4 + $0x50] sm:$0xff] %vm6224_vm2, %v8746_v39  ;;  %10031 = vmatmul.msk.bf16.gmra.mxu1 %vm6224_vm2, %v15885_v60  ;;  %v8502_v19 = vadd.f32 %v8431_v47, %v8122_v16  ;;  %v8446_v42 = vpop.f32.mrf.mxu0  ;;  %v8920_v47 = vld [vmem:[%s14949_s9] sm:$0x1]  ;;  %v7755_v39 = vadd.f32 %v7693_v46, %v14683_v29  ;;  %v15889_v60 = vld [vmem:[#allocation8_spill] sm:$0xff] }
 0x6b0   : > { %v8927_v36 = vsel %vm8925_vm4, %v8920_v47, 0  ;;  %v8507_v2 = vadd.f32 %v8444_v4, %v8127_v27 }
 0x6b1   : > { %8936 = vmatpush.bf16.msra.mxu3 %v8927_v36 }
 0x6b4   : > { %v8673_v24 = vpop.f32.mrf.mxu1 }
 0x6b5   : > { %v8066_v57 = vpop.f32.mrf.mxu3  ;;  %v7696_v20 = vpop.f32.mrf.mxu2 }
 0x6b6   : > { %v8814_v52 = vld [vmem:[#allocation4 + $0x48] ss:$2 sm:$0xff]  ;;  %v8128_v45 = vadd.f32 %v8066_v57, %v7755_v39 }
 0x6b7   : > { %8815 = vst.msk [vmem:[#allocation5 + $0x10] sm:$0xff] %vm6224_vm2, %v8814_v52  ;;  %v8449_v14 = vpop.f32.mrf.mxu0 }
 0x6b8   : > { %v8508_v24 = vadd.f32 %v8446_v42, %v8128_v45 }
 0x6bc   : > { %v8676_v59 = vpop.f32.mrf.mxu1 }
 0x6bd   : > { %v8069_v25 = vpop.f32.mrf.mxu3  ;;  %v7698_v56 = vpop.f32.mrf.mxu2 }
 0x6bf   : > { %10032 = vmatmul.msk.bf16.gmra.mxu1 %vm6224_vm2, %v15886_v53  ;;  %v8451_v31 = vpop.f32.mrf.mxu0 }
 0x6c4   : > { %v8678_v55 = vpop.f32.mrf.mxu1 }
 0x6c5   : > { %v8749_v54 = vadd.f32 %v8678_v55, %v8502_v19  ;;  %v8071_v10 = vpop.f32.mrf.mxu3  ;;  %v7701_v30 = vpop.f32.mrf.mxu2 }
 0x6c6   : > { %v7758_v17 = vadd.f32 %v7701_v30, %v14712_v0 }
 0x6c7   : > { %8785 = vst.msk [vmem:[#allocation4 + $0x68] sm:$0xff] %vm6224_vm2, %v8749_v54  ;;  %v8454_v41 = vpop.f32.mrf.mxu0 }
 0x6cc   : > { %v8681_v9 = vpop.f32.mrf.mxu1 }
 0x6cd   : > { %v8750_v44 = vadd.f32 %v8681_v9, %v8503_v51  ;;  %v8074_v48 = vpop.f32.mrf.mxu3  ;;  %v7703_v21 = vpop.f32.mrf.mxu2 }
 0x6ce   : > { %v8131_v32 = vadd.f32 %v8074_v48, %v7758_v17  ;;  %v7759_v46 = vadd.f32 %v7703_v21, %v14721_v26 }
 0x6cf   : > { %8786 = vst.msk [vmem:[#allocation4 + $0x70] sm:$0xff] %vm6224_vm2, %v8750_v44  ;;  %10033 = vmatmul.msk.bf16.gmra.mxu1 %vm6224_vm2, %v15887_v18  ;;  %v8456_v15 = vpop.f32.mrf.mxu0 }
 0x6d0   : > { %v8511_v54 = vadd.f32 %v8454_v41, %v8131_v32 }
 0x6d4   : > { %v8683_v62 = vpop.f32.mrf.mxu1 }
 0x6d5   : > { %v8751_v3 = vadd.f32 %v8683_v62, %v8504_v1  ;;  %v8076_v61 = vpop.f32.mrf.mxu3  ;;  %v7706_v59 = vpop.f32.mrf.mxu2 }
 0x6d6   : > { %v8132_v9 = vadd.f32 %v8076_v61, %v7759_v46  ;;  %v7760_v0 = vadd.f32 %v7706_v59, %v14726_v13 }
 0x6d7   : > { %8787 = vst.msk [vmem:[#allocation4 + $0x78] sm:$0xff] %vm6224_vm2, %v8751_v3  ;;  %v8459_v53 = vpop.f32.mrf.mxu0 }
 0x6d8   : > { %v8512_v44 = vadd.f32 %v8456_v15, %v8132_v9 }
 0x6dc   : > { %v8686_v22 = vpop.f32.mrf.mxu1 }
 0x6dd   : > { %v8079_v29 = vpop.f32.mrf.mxu3  ;;  %v7708_v19 = vpop.f32.mrf.mxu2 }
 0x6de   : > { %v8817_v6 = vld [vmem:[#allocation4 + $0x6c] ss:$2 sm:$0xff]  ;;  %v8133_v43 = vadd.f32 %v8079_v29, %v7760_v0 }
 0x6df   : > { %8818 = vst.msk [vmem:[#allocation5 + $0x18] sm:$0xff] %vm6224_vm2, %v8817_v6  ;;  %10034 = vmatmul.msk.bf16.gmra.mxu1 %vm6224_vm2, %v15888_v37  ;;  %v8461_v4 = vpop.f32.mrf.mxu0 }
 0x6e0   : > { %v8513_v62 = vadd.f32 %v8459_v53, %v8133_v43 }
 0x6e4   : > { %v8688_v11 = vpop.f32.mrf.mxu1 }
 0x6e5   : > { %v8081_v55 = vpop.f32.mrf.mxu3  ;;  %v7711_v51 = vpop.f32.mrf.mxu2 }
 0x6e6   : > { %v8832_v51 = vld [vmem:[#allocation5 + $0x8] sm:$0xff] }
 0x6e7   : > { %v8464_v42 = vpop.f32.mrf.mxu0 }
 0x6ec   : > { %v8691_v5 = vpop.f32.mrf.mxu1 }
 0x6ed   : > { %v8754_v49 = vadd.f32 %v8691_v5, %v8507_v2  ;;  %v8084_v57 = vpop.f32.mrf.mxu3  ;;  %v7713_v1 = vpop.f32.mrf.mxu2 }
 0x6ee   : > { %v7763_v13 = vadd.f32 %v7713_v1, %v14749_v38  ;;  %v8834_v1 = vld [vmem:[#allocation5 + $0x18] sm:$0xff] }
 0x6ef   : > { %8790 = vst.msk [vmem:[#allocation4 + $0x90] sm:$0xff] %vm6224_vm2, %v8754_v49  ;;  %10035 = vmatmul.msk.bf16.gmra.mxu1 %vm6224_vm2, %v15889_v60  ;;  %v8466_v26 = vpop.f32.mrf.mxu0 }
 0x6f4   : > { %v8693_v52 = vpop.f32.mrf.mxu1 }
 0x6f5   : > { %v8755_v33 = vadd.f32 %v8693_v52, %v8508_v24  ;;  %v8086_v25 = vpop.f32.mrf.mxu3  ;;  %v7716_v22 = vpop.f32.mrf.mxu2 }
 0x6f6   : > { %v8136_v34 = vadd.f32 %v8086_v25, %v7763_v13  ;;  %v7764_v27 = vadd.f32 %v7716_v22, %v14754_v50 }
 0x6f7   : > { %8791 = vst.msk [vmem:[#allocation4 + $0x98] sm:$0xff] %vm6224_vm2, %v8755_v33  ;;  %v8469_v37 = vpop.f32.mrf.mxu0 }
 0x6f8   : > { %v8516_v31 = vadd.f32 %v8466_v26, %v8136_v34 }
 0x6fc   : > { %v8696_v28 = vpop.f32.mrf.mxu1 }
 0x6fd   : > { %v8089_v56 = vpop.f32.mrf.mxu3  ;;  %v7718_v36 = vpop.f32.mrf.mxu2 }
 0x6fe   : > { %v8820_v40 = vld [vmem:[#allocation4 + $0x90] ss:$2 sm:$0xff]  ;;  %v8137_v48 = vadd.f32 %v8089_v56, %v7764_v27 }
 0x6ff   : > { %8821 = vst.msk [vmem:[#allocation5 + $0x20] sm:$0xff] %vm6224_vm2, %v8820_v40  ;;  %v8471_v11 = vpop.f32.mrf.mxu0 }
 0x700   : > { %v8517_v5 = vadd.f32 %v8469_v37, %v8137_v48 }
 0x704   : > { %v8698_v16 = vpop.f32.mrf.mxu1 }
 0x705   : > { %v8091_v10 = vpop.f32.mrf.mxu3  ;;  %v7721_v2 = vpop.f32.mrf.mxu2 }
 0x707   : > { %v8474_v60 = vpop.f32.mrf.mxu0 }
 0x70c   : > { %v8701_v63 = vpop.f32.mrf.mxu1 }
 0x70d   : > { %v8758_v8 = vadd.f32 %v8701_v63, %v8511_v54  ;;  %v8094_v49 = vpop.f32.mrf.mxu3  ;;  %v7723_v38 = vpop.f32.mrf.mxu2 }
 0x70e   : > { %v7767_v61 = vadd.f32 %v7723_v38, %v14763_v58 }
 0x70f   : > { %8794 = vst.msk [vmem:[#allocation4 + $0xb0] sm:$0xff] %vm6224_vm2, %v8758_v8  ;;  %v8476_v52 = vpop.f32.mrf.mxu0 }
 0x714   : > { %v8703_v35 = vpop.f32.mrf.mxu1 }
 0x715   : > { %v8759_v18 = vadd.f32 %v8703_v35, %v8512_v44  ;;  %v8096_v21 = vpop.f32.mrf.mxu3  ;;  %v7726_v50 = vpop.f32.mrf.mxu2  ;;  %v8831_v35 = vld [vmem:[#allocation5] sm:$0xff] }
 0x716   : > { %v8140_v28 = vadd.f32 %v8096_v21, %v7767_v61  ;;  %v7768_v16 = vadd.f32 %v7726_v50, %v14768_v23  ;;  %v10220_v23 = vld [vmem:[%s14946_s6] ss:$0 sm:$0xff] }
 0x717   : > { %8795 = vst.msk [vmem:[#allocation4 + $0xb8] sm:$0xff] %vm6224_vm2, %v8759_v18  ;;  %v8479_v59 = vpop.f32.mrf.mxu0  ;;  %v8833_v18 = vld [vmem:[#allocation5 + $0x10] sm:$0xff]  ;;  %v8844_v0 = vmul.f32 %v10220_v23, %v8832_v51  ;;  %v8846_v25 = vmul.f32 %v10220_v23, %v8834_v1  ;;  %v8972_v51 = vld [vmem:[%s482_s28 + $0x10] sm:$0xff] }
 0x718   : > { %v8520_v40 = vadd.f32 %v8476_v52, %v8140_v28 }
 0x71c   : > { %v8706_v20 = vpop.f32.mrf.mxu1 }
 0x71d   : > { %v8760_v3 = vadd.f32 %v8706_v20, %v8513_v62  ;;  %v8099_v15 = vpop.f32.mrf.mxu3  ;;  %v7728_v17 = vpop.f32.mrf.mxu2  ;;  %v8845_v62 = vmul.f32 %v10220_v23, %v8833_v18  ;;  %v10221_v20 = vld [vmem:[%s14947_s7] ss:$0 sm:$0xff]  ;;  %v8976_v18 = vld [vmem:[%s482_s28 + $0x30] sm:$0xff] }
 0x71e   : > { %v8141_v19 = vadd.f32 %v8099_v15, %v7768_v16  ;;  %v7769_v8 = vadd.f32 %v7728_v17, %v14775_v7  ;;  %v8843_v7 = vmul.f32 %v10220_v23, %v8831_v35  ;;  %v14863_v26 = vadd.f32 %v10221_v20, %v8844_v0 }
 0x71f   : > { %8796 = vst.msk [vmem:[#allocation4 + $0xc0] sm:$0xff] %vm6224_vm2, %v8760_v3  ;;  %v8481_v54 = vpop.f32.mrf.mxu0  ;;  %v8835_v3 = vld [vmem:[#allocation5 + $0x20] sm:$0xff]  ;;  %v14867_v37 = vadd.f32 %v10221_v20, %v8845_v62  ;;  %v14869_v34 = vadd.f32 %v10221_v20, %v8846_v25 }
 0x720   : > { %v8521_v55 = vadd.f32 %v8479_v59, %v8141_v19  ;;  %v14865_v56 = vadd.f32 %v10221_v20, %v8843_v7  ;;  %v8864_v10 = vsel %vm6224_vm2, %v14863_v26, 0.0 }
 0x721   : > { %v8866_v48 = vsel %vm6224_vm2, %v14867_v37, 0.0 }
 0x722   : > { %v8863_v2 = vsel %vm6224_vm2, %v14865_v56, 0.0 }
 0x723   : > { %v8865_v49 = vadd.f32 %v8864_v10, %v8863_v2 }
 0x724   : > { %v8708_v14 = vpop.f32.mrf.mxu1 }
 0x725   : > { %v8101_v32 = vpop.f32.mrf.mxu3  ;;  %v7731_v58 = vpop.f32.mrf.mxu2  ;;  %v8867_v60 = vadd.f32 %v8866_v48, %v8865_v49  ;;  %v10222_v48 = vld [vmem:[%s14952_s12] ss:$0 sm:$0xff] }
 0x726   : > { %v8823_v6 = vld [vmem:[#allocation4 + $0xb4] ss:$2 sm:$0xff]  ;;  %v8142_v46 = vadd.f32 %v8101_v32, %v7769_v8  ;;  %v8970_v8 = vld [vmem:[%s482_s28] sm:$0xff] }
 0x727   : > { %8824 = vst.msk [vmem:[#allocation5 + $0x28] sm:$0xff] %vm6224_vm2, %v8823_v6  ;;  %v8484_v43 = vpop.f32.mrf.mxu0  ;;  %v8847_v6 = vmul.f32 %v10220_v23, %v8835_v3  ;;  %v8971_v58 = vld [vmem:[%s482_s28 + $0x8] sm:$0xff] }
 0x728   : > { %v8522_v9 = vadd.f32 %v8481_v54, %v8142_v46  ;;  %v8978_v46 = vpack.c.bf16 %v8971_v58, %v8970_v8 }
 0x729   : > { %v14877_v27 = vadd.f32 %v10221_v20, %v8847_v6 }
 0x72c   : > { %v8711_v47 = vpop.f32.mrf.mxu1 }
 0x72d   : > { %v8104_v44 = vpop.f32.mrf.mxu3  ;;  %v7733_v22 = vpop.f32.mrf.mxu2 }
 0x72e   : > { %v8836_v14 = vld [vmem:[#allocation5 + $0x28] sm:$0xff] }
 0x72f   : > { %v8848_v36 = vmul.f32 %v10220_v23, %v8836_v14  ;;  %v8974_v44 = vld [vmem:[%s482_s28 + $0x20] sm:$0xff] }
 0x734   : > { %v8713_v12 = vpop.f32.mrf.mxu1 }
 0x735   : > { %v8763_v30 = vadd.f32 %v8713_v12, %v8516_v31  ;;  %v8106_v31 = vpop.f32.mrf.mxu3  ;;  %v10189_v12 = vld [vmem:[%s14951_s11] sm:$0xff] }
 0x736   : > { %9009 = vmatpush.bf16.msra.mxu2 %v10189_v12 }
 0x737   : > { %8799 = vst.msk [vmem:[#allocation4 + $0xd8] sm:$0xff] %vm6224_vm2, %v8763_v30 }
 0x73c   : > { %v8716_v41 = vpop.f32.mrf.mxu1 }
 0x73d   : > { %v8764_v39 = vadd.f32 %v8716_v41, %v8517_v5  ;;  %v8486_v5 = vpop.f32.mrf.mxu0  ;;  %v14883_v41 = vadd.f32 %v10221_v20, %v8848_v36 }
 0x73f   : > { %8800 = vst.msk [vmem:[#allocation4 + $0xe0] sm:$0xff] %vm6224_vm2, %v8764_v39  ;;  %v8868_v39 = vsel %vm6224_vm2, %v14869_v34, 0.0  ;;  %v8872_v52 = vsel %vm6224_vm2, %v14883_v41, 0.0 }
 0x744   : > { %v8718_v45 = vpop.f32.mrf.mxu1 }
 0x745   : > { %v8870_v45 = vsel %vm6224_vm2, %v14877_v27, 0.0 }
 0x746   : > { %v8826_v24 = vld [vmem:[#allocation4 + $0xd8] ss:$2 sm:$0xff] }
 0x747   : > { %8827 = vst.msk [vmem:[#allocation5 + $0x30] sm:$0xff] %vm6224_vm2, %v8826_v24  ;;  %v8869_v24 = vadd.f32 %v8868_v39, %v8867_v60 }
 0x749   : > { %v8871_v50 = vadd.f32 %v8870_v45, %v8869_v24 }
 0x74b   : > { %v8873_v28 = vadd.f32 %v8872_v52, %v8871_v50 }
 0x74c   : > { %v8721_v33 = vpop.f32.mrf.mxu1 }
 0x74e   : > { %v8837_v13 = vld [vmem:[#allocation5 + $0x30] sm:$0xff] }
 0x74f   : > { %v8849_v30 = vmul.f32 %v10220_v23, %v8837_v13 }
 0x751   : > { %v14887_v38 = vadd.f32 %v10221_v20, %v8849_v30 }
 0x753   : > { %v8874_v15 = vsel %vm6224_vm2, %v14887_v38, 0.0 }
 0x754   : > { %v8723_v29 = vpop.f32.mrf.mxu1 }
 0x755   : > { %v8767_v53 = vadd.f32 %v8723_v29, %v8520_v40  ;;  %v8875_v40 = vadd.f32 %v8874_v15, %v8873_v28 }
 0x757   : > { %8803 = vst.msk [vmem:[#allocation4 + $0xf8] sm:$0xff] %vm6224_vm2, %v8767_v53 }
 0x75c   : > { %v8726_v4 = vpop.f32.mrf.mxu1 }
 0x75d   : > { %v8768_v63 = vadd.f32 %v8726_v4, %v8521_v55 }
 0x75f   : > { %8804 = vst.msk [vmem:[#allocation4 + $0x100] sm:$0xff] %vm6224_vm2, %v8768_v63 }
 0x764   : > { %v8728_v57 = vpop.f32.mrf.mxu1 }
 0x765   : > { %v8769_v42 = vadd.f32 %v8728_v57, %v8522_v9  ;;  %v8973_v9 = vld [vmem:[%s482_s28 + $0x18] sm:$0xff]  ;;  %v8975_v57 = vld [vmem:[%s482_s28 + $0x28] sm:$0xff] }
 0x766   : > { %v8980_v35 = vpack.c.bf16 %v8975_v57, %v8974_v44 }
 0x767   : > { %8805 = vst.msk [vmem:[#allocation4 + $0x108] sm:$0xff] %vm6224_vm2, %v8769_v42  ;;  %v8977_v42 = vld [vmem:[%s482_s28 + $0x38] sm:$0xff] }
 0x768   : > { %v8981_v0 = vpack.c.bf16 %v8977_v42, %v8976_v18 }
 0x76c   : > { %v8731_v47 = vpop.f32.mrf.mxu1 }
 0x76e   : > { %v8829_v11 = vld [vmem:[#allocation4 + $0xfc] ss:$2 sm:$0xff] }
 0x76f   : > { %8830 = vst.msk [vmem:[#allocation5 + $0x38] sm:$0xff] %vm6224_vm2, %v8829_v11 }
 0x774   : > { %v8733_v21 = vpop.f32.mrf.mxu1 }
 0x775   : > { %v10223_v21 = vld [vmem:[%s14953_s13] ss:$0 sm:$0xff] }
 0x776   : > { %v8838_v33 = vld [vmem:[#allocation5 + $0x38] sm:$0xff] }
 0x777   : > { %v8850_v61 = vmul.f32 %v10220_v23, %v8838_v33  ;;  %v8979_v23 = vpack.c.bf16 %v8973_v9, %v8972_v51 }
 0x779   : > { %v14895_v59 = vadd.f32 %v10221_v20, %v8850_v61 }
 0x77b   : > { %v8876_v29 = vsel %vm6224_vm2, %v14895_v59, 0.0 }
 0x77c   : > { %v8877_v53 = vadd.f32 %v8876_v29, %v8875_v40 }
 0x77e   : > { %v8878_v16 = vrot.slane %v8877_v53, 4 }
 0x780   : > { %v8879_v17 = vadd.f32 %v8878_v16, %v8877_v53 }
 0x782   : > { %v8880_v19 = vrot.slane %v8879_v17, 2 }
 0x784   : > { %v8881_v32 = vadd.f32 %v8880_v19, %v8879_v17 }
 0x786   : > { %v8882_v55 = vrot.slane %v8881_v32, 1 }
 0x788   : > { %v8883_v54 = vadd.f32 %v8882_v55, %v8881_v32 }
 0x78a   : > { %v8884_v4 = vmul.f32 0.015625, %v8883_v54 }
 0x78c   : > { %v8885_v63 = vpack.c.bf16 %v8884_v4, %v8884_v4 }
 0x78e   : > { %10044 = vmatmul.msk.bf16.vlgmr.msrb.gmra.mxu2 %vm6224_vm2, %v8885_v63 }
 0x79e   : > { %10050 = vmatmul.msk.bf16.vlgmr.msra.gmra.mxu2 %vm15890_vm3, %v8978_v46 }
 0x7ae   : > { %10051 = vmatmul.msk.bf16.gmra.mxu2 %vm15891_vm1, %v8979_v23 }
 0x7be   : > { %10052 = vmatmul.msk.bf16.gmra.mxu2 %vm15892_vm14, %v8980_v35 }
 0x7ce   : > { %10053 = vmatmul.msk.bf16.gmra.mxu2 %vm15893_vm11, %v8981_v0 }
 0x811   : > { %v8914_v43 = vpop.f32.mrf.mxu2 }
 0x812   : > { %v8918_v1 = vmax.f32 %v8914_v43, 0.0 }
 0x814   : > { %v8919_v7 = vpack.c.bf16 %v8918_v1, %v8918_v1 }
 0x816   : > { %10045 = vmatmul.msk.bf16.vlgmr.msra.gmra.mxu3 %vm8921_vm9, %v8919_v7 }
 0x819   : > { %v8916_v62 = vpop.f32.mrf.mxu2 }
 0x821   : > { %v9011_v20 = vpop.f32.mrf.mxu2 }
 0x822   : > { %v9035_v45 = vmul.f32 %v10222_v48, %v9011_v20 }
 0x824   : > { %v9047_v29 = vadd.f32 %v10223_v21, %v9035_v45 }
 0x829   : > { %v9013_v3 = vpop.f32.mrf.mxu2 }
 0x82a   : > { %v9036_v24 = vmul.f32 %v10222_v48, %v9013_v3 }
 0x82c   : > { %v9048_v53 = vadd.f32 %v10223_v21, %v9036_v24 }
 0x831   : > { %v9016_v25 = vpop.f32.mrf.mxu2 }
 0x832   : > { %v9037_v33 = vmul.f32 %v10222_v48, %v9016_v25 }
 0x834   : > { %v9049_v19 = vadd.f32 %v10223_v21, %v9037_v33 }
 0x839   : > { %v9018_v14 = vpop.f32.mrf.mxu2 }
 0x83a   : > { %v9038_v50 = vmul.f32 %v10222_v48, %v9018_v14 }
 0x83c   : > { %v9050_v32 = vadd.f32 %v10223_v21, %v9038_v50 }
 0x841   : > { %v9021_v6 = vpop.f32.mrf.mxu2 }
 0x842   : > { %v9039_v28 = vmul.f32 %v10222_v48, %v9021_v6 }
 0x844   : > { %v9051_v46 = vadd.f32 %v10223_v21, %v9039_v28 }
 0x849   : > { %v9023_v31 = vpop.f32.mrf.mxu2 }
 0x84a   : > { %v9040_v55 = vmul.f32 %v10222_v48, %v9023_v31 }
 0x84c   : > { %v9052_v35 = vadd.f32 %v10223_v21, %v9040_v55 }
 0x851   : > { %v9026_v2 = vpop.f32.mrf.mxu2 }
 0x852   : > { %v9041_v54 = vmul.f32 %v10222_v48, %v9026_v2 }
 0x854   : > { %v9053_v42 = vadd.f32 %v10223_v21, %v9041_v54 }
 0x859   : > { %v9028_v17 = vpop.f32.mrf.mxu2 }
 0x85a   : > { %v9042_v23 = vmul.f32 %v10222_v48, %v9028_v17 }
 0x899   : > { %v8938_v22 = vpop.f32.mrf.mxu3 }
 0x89a   : > { %v8942_v47 = vsub.f32 0.0, %v8938_v22 }
 0x89c   : > { %v8943_v13 = vmul.f32 1.442695, %v8942_v47 }
 0x89e   : > { %10224 = vpow2.f32 %v8943_v13 }
 0x8a1   : > { %v8940_v36 = vpop.f32.mrf.mxu3 }
 0x8a4   : > { %v10225_v10 = vpop.eup %10224 }
 0x8a5   : > { %v8945_v11 = vadd.f32 1.0, %v10225_v10 }
 0x8a7   : > { %10226 = vrcp.f32 %v8945_v11  ;;  %v8957_v49 = vand.u32 2147483648, %v8945_v11  ;;  %v8955_v60 = vand.u32 2147483647, %v8945_v11  ;;  %vm8951_vm15 = vweird.f32 %v8945_v11 }
 0x8a9   : > { %v8958_v61 = vor.u32 1.1754944e-38, %v8957_v49  ;;  %vm8956_vm5 = vcmp.eq.f32.partialorder %v8955_v60, 8.507059e+37 }
 0x8ad   : > { %v10227_v12 = vpop.eup %10226 }
 0x8ae   : > { %v8947_v30 = vmul.f32 %v10227_v12, %v8945_v11  ;;  %vm8952_vm7 = vweird.f32 %v10227_v12 }
 0x8af   : > { %vm8953_vm13 = vmor %vm8951_vm15, %vm8952_vm7 }
 0x8b0   : > { %v8948_v5 = vsub.f32 1.0, %v8947_v30 }
 0x8b2   : > { %v8949_v39 = vmul.f32 %v10227_v12, %v8948_v5 }
 0x8b4   : > { %v8950_v52 = vadd.f32 %v10227_v12, %v8949_v39 }
 0x8b6   : > { %v8954_v15 = vsel %vm8953_vm13, %v10227_v12, %v8950_v52 }
 0x8b7   : > { %v8959_v40 = vsel %vm8956_vm5, %v8958_v61, %v8954_v15 }
 0x8b8   : > { %v8961_v16 = vperm.slane %v8959_v40, 0 }
 0x8ba   : > { %v8962_v4 = vmul.f32 %v8961_v16, %v14865_v56  ;;  %v8963_v63 = vmul.f32 %v8961_v16, %v14863_v26  ;;  %v8964_v8 = vmul.f32 %v8961_v16, %v14867_v37  ;;  %v8965_v58 = vmul.f32 %v8961_v16, %v14869_v34 }
 0x8bb   : > { %v8966_v51 = vmul.f32 %v8961_v16, %v14877_v27  ;;  %v8967_v9 = vmul.f32 %v8961_v16, %v14883_v41  ;;  %v8968_v26 = vmul.f32 %v8961_v16, %v14887_v38  ;;  %v8969_v34 = vmul.f32 %v8961_v16, %v14895_v59 }
 0x8bc   : > { %v9055_v44 = vadd.f32 %v9047_v29, %v8962_v4  ;;  %v9056_v57 = vadd.f32 %v9048_v53, %v8963_v63  ;;  %v9057_v56 = vadd.f32 %v9049_v19, %v8964_v8  ;;  %v9058_v37 = vadd.f32 %v9050_v32, %v8965_v58 }
 0x8bd   : > { %v9059_v18 = vadd.f32 %v9051_v46, %v8966_v51  ;;  %v9060_v0 = vadd.f32 %v9052_v35, %v8967_v9  ;;  %v9054_v27 = vadd.f32 %v10223_v21, %v9042_v23  ;;  %v9061_v41 = vadd.f32 %v9053_v42, %v8968_v26 }
 0x8be   : > { %9063 = vst.msk [vmem:[%s487_s20] sm:$0xff] %vm6224_vm2, %v9055_v44 }
 0x8bf   : > { %9064 = vst.msk [vmem:[%s487_s20 + $0x8] sm:$0xff] %vm6224_vm2, %v9056_v57  ;;  %v9062_v43 = vadd.f32 %v9054_v27, %v8969_v34 }
 0x8c0   : > { %9065 = vst.msk [vmem:[%s487_s20 + $0x10] sm:$0xff] %vm6224_vm2, %v9057_v56 }
 0x8c1   : > { %9066 = vst.msk [vmem:[%s487_s20 + $0x18] sm:$0xff] %vm6224_vm2, %v9058_v37 }
 0x8c2   : > { %9067 = vst.msk [vmem:[%s487_s20 + $0x20] sm:$0xff] %vm6224_vm2, %v9059_v18 }
 0x8c3   : > { %9068 = vst.msk [vmem:[%s487_s20 + $0x28] sm:$0xff] %vm6224_vm2, %v9060_v0 }
 0x8c4   : > { %9069 = vst.msk [vmem:[%s487_s20 + $0x30] sm:$0xff] %vm6224_vm2, %v9061_v41 }
 0x8c5   : > { %9070 = vst.msk [vmem:[%s487_s20 + $0x38] sm:$0xff] %vm6224_vm2, %v9062_v43 }
 0x8c6 PF: > { %s24_s29 = sadd.s32 1, %s10271_s29  }
 0x8c7   : > { %p21_p4 = scmp.ge.s32.totalorder %s24_s29, 4  }
 0x8c9   :  { %23 = sbr.rel (!%p21_p4) target bundleno = 1 (0x1), region = 132 }

</bundles_post_ra>
